<compile_context>
chip_gen: v5e
topology: v5e:2x2
jax: 0.10.0
libtpu: 0.0.40
codegen_flags: <defaults>
</compile_context>

<pallas_src>
import functools

import jax
import jax.numpy as jnp
from jax import lax
from jax.experimental import pallas as pl
from jax.experimental.pallas import tpu as pltpu

BN_EPS = 1e-5
_VMEM_LIMIT = 32 * 1024 * 1024  # safe on v7x (64 MiB physical VMEM per TC)


def _round_up(x, m):
    return ((x + m - 1) // m) * m


# ----------------------------- Pallas kernels ---------------------------------
def _matmul_bias_kernel(x_ref, w_ref, shift_ref, o_ref, *, relu):
    # (tm, Kp) @ (Kp, Np) on the MXU (bf16 in, f32 accumulate), then per-output-channel
    # shift (conv bias + BN folded), optional ReLU -- all fused in VMEM.
    acc = jnp.dot(x_ref[...], w_ref[...], preferred_element_type=jnp.float32)
    y = acc + shift_ref[...]
    if relu:
        y = jnp.maximum(y, 0.0)
    o_ref[...] = y.astype(o_ref.dtype)


def fused_matmul(x, w, shift, *, relu, tm):
    """relu?(x @ w + shift) via a Pallas TPU kernel.

    x: (M, K) f32, w: (K, N) f32 (BN scale already folded in), shift: (N,) f32.
    K and N are zero-padded to multiples of 128 (lane-dense loads / unmasked stores),
    M to a multiple of `tm`; MXU operands are bf16 with f32 accumulation.
    """
    M, K = x.shape
    Kw, N = w.shape
    assert K == Kw
    Kp = _round_up(K, 128)
    Np = _round_up(N, 128)
    Mp = _round_up(M, tm)

    x_p = jnp.pad(x, ((0, Mp - M), (0, Kp - K))).astype(jnp.bfloat16)
    w_p = jnp.pad(w, ((0, Kp - K), (0, Np - N))).astype(jnp.bfloat16)
    s_p = jnp.pad(shift.reshape(1, N), ((0, 0), (0, Np - N))).astype(jnp.float32)

    # TODO(synk): the grid-invariant w/shift specs could take pipeline_mode=pl.Buffered(1)
    # to drop their dead second pipeline buffer; left at the default for robustness.
    out = pl.pallas_call(
        functools.partial(_matmul_bias_kernel, relu=relu),
        out_shape=jax.ShapeDtypeStruct((Mp, Np), jnp.float32),
        grid_spec=pltpu.PrefetchScalarGridSpec(
            num_scalar_prefetch=0,
            grid=(Mp // tm,),
            in_specs=[
                pl.BlockSpec((tm, Kp), lambda i: (i, 0)),
                pl.BlockSpec((Kp, Np), lambda i: (0, 0)),
                pl.BlockSpec((1, Np), lambda i: (0, 0)),
            ],
            out_specs=pl.BlockSpec((tm, Np), lambda i: (i, 0)),
        ),
        compiler_params=pltpu.CompilerParams(
            dimension_semantics=("parallel",),
            vmem_limit_bytes=_VMEM_LIMIT,
        ),
    )(x_p, w_p, s_p)
    return out[:M, :N]


def _fc_head_kernel(x_ref, w1_ref, b1_ref, w2_ref, b2_ref, o_ref):
    # Both classifier Linears fused: the 256-wide hidden activation stays in VMEM/vregs.
    h = jnp.dot(x_ref[...], w1_ref[...], preferred_element_type=jnp.float32)
    h = jnp.maximum(h + b1_ref[...], 0.0)
    o = jnp.dot(h.astype(w2_ref.dtype), w2_ref[...],
                preferred_element_type=jnp.float32)
    o_ref[...] = (o + b2_ref[...]).astype(o_ref.dtype)


def fc_head(x, fc1_w, fc1_b, fc2_w, fc2_b):
    """Dropout(id) -> Linear(K,H) -> ReLU -> Dropout(id) -> Linear(H,C), one pallas_call.

    The tiny batch is padded only to 8 sublane rows (not 128); the final output dim C
    is padded to 128 lanes (unmasked stores) and sliced back.
    """
    M, K = x.shape
    H = fc1_b.shape[0]
    C = fc2_b.shape[0]
    Mp = _round_up(max(M, 8), 8)
    Cp = _round_up(C, 128)

    x_p = jnp.pad(x, ((0, Mp - M), (0, 0))).astype(jnp.bfloat16)
    w1 = fc1_w.T.astype(jnp.bfloat16)                                   # (K, H)
    b1 = fc1_b.reshape(1, H).astype(jnp.float32)
    w2 = jnp.pad(fc2_w.T, ((0, 0), (0, Cp - C))).astype(jnp.bfloat16)   # (H, Cp)
    b2 = jnp.pad(fc2_b, (0, Cp - C)).reshape(1, Cp).astype(jnp.float32)

    out = pl.pallas_call(
        _fc_head_kernel,
        out_shape=jax.ShapeDtypeStruct((Mp, Cp), jnp.float32),
        compiler_params=pltpu.CompilerParams(vmem_limit_bytes=_VMEM_LIMIT),
    )(x_p, w1, b1, w2, b2)
    return out[:M, :C]


# ------------------------------- JAX glue -------------------------------------
def extract_patches_nhwc(x, kh, kw, stride, pad):
    """x: (N,H,W,C) -> (N, Ho, Wo, C*kh*kw); patch channels ordered as (C, kh, kw)."""
    return lax.conv_general_dilated_patches(
        x, filter_shape=(kh, kw), window_strides=(stride, stride),
        padding=((pad, pad), (pad, pad)),
        dimension_numbers=("NHWC", "HWIO", "NHWC"))


def max_pool_nhwc(x, k, s):
    # TODO(synk): pooling window reductions (negligible FLOPs) stay in plain-JAX glue.
    return lax.reduce_window(x, -jnp.inf, lax.max, (1, k, k, 1), (1, s, s, 1), "VALID")


def adaptive_avg_pool_nhwc(x, oh, ow):
    n, h, w, c = x.shape
    if (h, w) == (oh, ow):           # identity for the 112x112 path -- no ops emitted
        return x
    if h % oh == 0 and w % ow == 0:  # even split: single reshape + mean
        return x.reshape(n, oh, h // oh, ow, w // ow, c).mean(axis=(2, 4))
    # General (uneven) fallback, matching torch AdaptiveAvgPool2d window bounds.
    rows = []
    for i in range(oh):
        h0, h1 = (i * h) // oh, -(-((i + 1) * h) // oh)
        cols = []
        for j in range(ow):
            w0, w1 = (j * w) // ow, -(-((j + 1) * w) // ow)
            cols.append(jnp.mean(x[:, h0:h1, w0:w1, :], axis=(1, 2)))
        rows.append(jnp.stack(cols, axis=1))
    return jnp.stack(rows, axis=1)


# ------------------------------ parameters ------------------------------------
def init_params(key, num_classes):
    ks = jax.random.split(key, 16)
    p = {}
    p["w1"] = jax.random.normal(ks[0], (64, 1, 11, 11), jnp.float32) * 0.05
    p["b1"] = jax.random.normal(ks[1], (64,), jnp.float32) * 0.05
    p["bn1_gamma"] = jax.random.uniform(ks[2], (64,), jnp.float32, 0.5, 1.5)
    p["bn1_beta"] = jax.random.normal(ks[3], (64,), jnp.float32) * 0.05
    p["bn1_mean"] = jax.random.normal(ks[4], (64,), jnp.float32) * 0.05
    p["bn1_var"] = jax.random.uniform(ks[5], (64,), jnp.float32, 0.5, 1.5)
    p["w2"] = jax.random.normal(ks[6], (128, 64, 5, 5), jnp.float32) * 0.02
    p["b2"] = jax.random.normal(ks[7], (128,), jnp.float32) * 0.05
    p["bn2_gamma"] = jax.random.uniform(ks[8], (128,), jnp.float32, 0.5, 1.5)
    p["bn2_beta"] = jax.random.normal(ks[9], (128,), jnp.float32) * 0.05
    p["bn2_mean"] = jax.random.normal(ks[10], (128,), jnp.float32) * 0.05
    p["bn2_var"] = jax.random.uniform(ks[11], (128,), jnp.float32, 0.5, 1.5)
    p["fc1_w"] = jax.random.normal(ks[12], (256, 128 * 6 * 6), jnp.float32) * 0.01
    p["fc1_b"] = jax.random.normal(ks[13], (256,), jnp.float32) * 0.01
    p["fc2_w"] = jax.random.normal(ks[14], (num_classes, 256), jnp.float32) * 0.01
    p["fc2_b"] = jax.random.normal(ks[15], (num_classes,), jnp.float32) * 0.01
    return p


# ------------------------------- forward --------------------------------------
def cnn2fc1_forward(params, x_nchw):
    n = x_nchw.shape[0]
    x = jnp.transpose(x_nchw, (0, 2, 3, 1))  # NCHW -> NHWC

    # features[0:3]: Conv2d(1, 64, k=11, s=4, p=2) + BatchNorm2d(64) + ReLU  (fused Pallas)
    p1 = extract_patches_nhwc(x, 11, 11, 4, 2)
    _, ho, wo, k1 = p1.shape
    w1 = jnp.transpose(params["w1"], (1, 2, 3, 0)).reshape(k1, 64)   # (Cin,kh,kw) order
    s1 = params["bn1_gamma"] * lax.rsqrt(params["bn1_var"] + BN_EPS)
    t1 = (params["b1"] - params["bn1_mean"]) * s1 + params["bn1_beta"]
    y = fused_matmul(p1.reshape(n * ho * wo, k1), w1 * s1[None, :], t1,
                     relu=True, tm=768)   # M=1458 -> 2 tiles (v7x megacore friendly)
    y = y.reshape(n, ho, wo, 64)

    # features[3]: MaxPool2d(3, 2)
    y = max_pool_nhwc(y, 3, 2)

    # features[4:7]: Conv2d(64, 128, k=5, p=2) + BatchNorm2d(128) + ReLU  (fused Pallas)
    p2 = extract_patches_nhwc(y, 5, 5, 1, 2)
    _, ho, wo, k2 = p2.shape
    w2 = jnp.transpose(params["w2"], (1, 2, 3, 0)).reshape(k2, 128)
    s2 = params["bn2_gamma"] * lax.rsqrt(params["bn2_var"] + BN_EPS)
    t2 = (params["b2"] - params["bn2_mean"]) * s2 + params["bn2_beta"]
    y = fused_matmul(p2.reshape(n * ho * wo, k2), w2 * s2[None, :], t2,
                     relu=True, tm=192)   # M=338 -> 2 tiles
    y = y.reshape(n, ho, wo, 128)

    # features[7]: MaxPool2d(3, 2); avgpool: AdaptiveAvgPool2d((6, 6)) (identity here)
    y = max_pool_nhwc(y, 3, 2)
    y = adaptive_avg_pool_nhwc(y, 6, 6)

    # torch.flatten(x, 1) on NCHW order
    y = jnp.transpose(y, (0, 3, 1, 2)).reshape(n, 128 * 6 * 6)

    # classifier: Dropout(id) -> Linear(4608,256) -> ReLU -> Dropout(id) -> Linear(256,C)
    # fused into a single Pallas kernel.
    return fc_head(y, params["fc1_w"], params["fc1_b"],
                   params["fc2_w"], params["fc2_b"])


if __name__ == "__main__":
    num_classes = 10
    key = jax.random.PRNGKey(0)
    k_param, k_x = jax.random.split(key)
    params = init_params(k_param, num_classes)
    # Input: batch=2, 1 channel, 112x112 -> conv1: 27x27 -> pool: 13x13 -> conv2: 13x13
    # -> pool: 6x6 -> adaptive avgpool (6,6)=identity -> flatten 4608 -> 256 -> num_classes
    x = jax.random.normal(k_x, (2, 1, 112, 112), jnp.float32)

    fwd = jax.jit(cnn2fc1_forward)
    out = fwd(params, x)
    out = jax.block_until_ready(out)
    assert out.shape == (2, num_classes), out.shape
    assert jnp.all(jnp.isfinite(out))
    print("KERNEL_OK")
</pallas_src>

<mosaic_0001>
module attributes {stable_mosaic.version = 11 : i64} {
  func.func @_matmul_bias_kernel(%arg0: i32, %arg1: memref<768x128xbf16, #tpu.memory_space<vmem>>, %arg2: memref<128x128xbf16, #tpu.memory_space<vmem>>, %arg3: memref<1x128xf32, #tpu.memory_space<vmem>>, %arg4: memref<768x128xf32, #tpu.memory_space<vmem>>) attributes {dimension_semantics = [#tpu.dimension_semantics<parallel>], iteration_bounds = array<i64: 2>, scalar_prefetch = 0 : i64, scratch_operands = 0 : i64, tpu.core_type = #tpu.core_type<tc>, window_params = [{transform_indices = @transform_0, window_bounds = array<i64: 768, 128>}, {pipeline_mode = #tpu.pipeline_mode<synchronous>, transform_indices = @transform_1, window_bounds = array<i64: 128, 128>}, {pipeline_mode = #tpu.pipeline_mode<synchronous>, transform_indices = @transform_2, window_bounds = array<i64: 1, 128>}, {transform_indices = @transform_3, window_bounds = array<i64: 768, 128>}]} {
    %c0 = arith.constant 0 : index
    %c0_0 = arith.constant 0 : index
    %0 = vector.load %arg1[%c0, %c0_0] : memref<768x128xbf16, #tpu.memory_space<vmem>>, vector<768x128xbf16>
    %c0_1 = arith.constant 0 : index
    %c0_2 = arith.constant 0 : index
    %1 = vector.load %arg2[%c0_1, %c0_2] : memref<128x128xbf16, #tpu.memory_space<vmem>>, vector<128x128xbf16>
    %cst = arith.constant dense<0.000000e+00> : vector<768x128xf32>
    %2 = tpu.matmul %0, %1, %cst {dimension_numbers = #tpu.dot_dimension_numbers<[1], [0], [0], [1], [0, 0, 1, 1], [], []>} : vector<768x128xbf16>, vector<128x128xbf16>, vector<768x128xf32> -> vector<768x128xf32>
    %c0_3 = arith.constant 0 : index
    %c0_4 = arith.constant 0 : index
    %3 = vector.load %arg3[%c0_3, %c0_4] : memref<1x128xf32, #tpu.memory_space<vmem>>, vector<1x128xf32>
    %4 = vector.broadcast %3 : vector<1x128xf32> to vector<768x128xf32>
    %5 = arith.addf %2, %4 : vector<768x128xf32>
    %cst_5 = arith.constant 0.000000e+00 : f32
    %6 = vector.broadcast %cst_5 : f32 to vector<768x128xf32>
    %7 = arith.maximumf %5, %6 : vector<768x128xf32>
    %c0_6 = arith.constant 0 : index
    %c0_7 = arith.constant 0 : index
    %8 = vector.load %arg4[%c0_6, %c0_7] : memref<768x128xf32, #tpu.memory_space<vmem>>, vector<768x128xf32>
    tpu.vector_store %arg4[%c0_6, %c0_7], %7 {strides = array<i32>} : memref<768x128xf32, #tpu.memory_space<vmem>>, vector<768x128xf32>,
    return
  }
  func.func @transform_0(%arg0: i32) -> (i32, i32) {
    %c0_i32 = arith.constant 0 : i32
    %c0_i32_0 = arith.constant 0 : i32
    return %arg0, %c0_i32 : i32, i32
  }
  func.func @transform_1(%arg0: i32) -> (i32, i32) {
    %c0_i32 = arith.constant 0 : i32
    %c0_i32_0 = arith.constant 0 : i32
    %c0_i32_1 = arith.constant 0 : i32
    return %c0_i32, %c0_i32_0 : i32, i32
  }
  func.func @transform_2(%arg0: i32) -> (i32, i32) {
    %c0_i32 = arith.constant 0 : i32
    %c0_i32_0 = arith.constant 0 : i32
    %c0_i32_1 = arith.constant 0 : i32
    return %c0_i32, %c0_i32_0 : i32, i32
  }
  func.func @transform_3(%arg0: i32) -> (i32, i32) {
    %c0_i32 = arith.constant 0 : i32
    %c0_i32_0 = arith.constant 0 : i32
    return %arg0, %c0_i32 : i32, i32
  }
}

module attributes {stable_mosaic.version = 11 : i64} {
  func.func @_matmul_bias_kernel(%arg0: i32, %arg1: memref<192x1664xbf16, #tpu.memory_space<vmem>>, %arg2: memref<1664x128xbf16, #tpu.memory_space<vmem>>, %arg3: memref<1x128xf32, #tpu.memory_space<vmem>>, %arg4: memref<192x128xf32, #tpu.memory_space<vmem>>) attributes {dimension_semantics = [#tpu.dimension_semantics<parallel>], iteration_bounds = array<i64: 2>, scalar_prefetch = 0 : i64, scratch_operands = 0 : i64, tpu.core_type = #tpu.core_type<tc>, window_params = [{transform_indices = @transform_0, window_bounds = array<i64: 192, 1664>}, {pipeline_mode = #tpu.pipeline_mode<synchronous>, transform_indices = @transform_1, window_bounds = array<i64: 1664, 128>}, {pipeline_mode = #tpu.pipeline_mode<synchronous>, transform_indices = @transform_2, window_bounds = array<i64: 1, 128>}, {transform_indices = @transform_3, window_bounds = array<i64: 192, 128>}]} {
    %c0 = arith.constant 0 : index
    %c0_0 = arith.constant 0 : index
    %0 = vector.load %arg1[%c0, %c0_0] : memref<192x1664xbf16, #tpu.memory_space<vmem>>, vector<192x1664xbf16>
    %c0_1 = arith.constant 0 : index
    %c0_2 = arith.constant 0 : index
    %1 = vector.load %arg2[%c0_1, %c0_2] : memref<1664x128xbf16, #tpu.memory_space<vmem>>, vector<1664x128xbf16>
    %cst = arith.constant dense<0.000000e+00> : vector<192x128xf32>
    %2 = tpu.matmul %0, %1, %cst {dimension_numbers = #tpu.dot_dimension_numbers<[1], [0], [0], [1], [0, 0, 1, 1], [], []>} : vector<192x1664xbf16>, vector<1664x128xbf16>, vector<192x128xf32> -> vector<192x128xf32>
    %c0_3 = arith.constant 0 : index
    %c0_4 = arith.constant 0 : index
    %3 = vector.load %arg3[%c0_3, %c0_4] : memref<1x128xf32, #tpu.memory_space<vmem>>, vector<1x128xf32>
    %4 = vector.broadcast %3 : vector<1x128xf32> to vector<192x128xf32>
    %5 = arith.addf %2, %4 : vector<192x128xf32>
    %cst_5 = arith.constant 0.000000e+00 : f32
    %6 = vector.broadcast %cst_5 : f32 to vector<192x128xf32>
    %7 = arith.maximumf %5, %6 : vector<192x128xf32>
    %c0_6 = arith.constant 0 : index
    %c0_7 = arith.constant 0 : index
    %8 = vector.load %arg4[%c0_6, %c0_7] : memref<192x128xf32, #tpu.memory_space<vmem>>, vector<192x128xf32>
    tpu.vector_store %arg4[%c0_6, %c0_7], %7 {strides = array<i32>} : memref<192x128xf32, #tpu.memory_space<vmem>>, vector<192x128xf32>,
    return
  }
  func.func @transform_0(%arg0: i32) -> (i32, i32) {
    %c0_i32 = arith.constant 0 : i32
    %c0_i32_0 = arith.constant 0 : i32
    return %arg0, %c0_i32 : i32, i32
  }
  func.func @transform_1(%arg0: i32) -> (i32, i32) {
    %c0_i32 = arith.constant 0 : i32
    %c0_i32_0 = arith.constant 0 : i32
    %c0_i32_1 = arith.constant 0 : i32
    return %c0_i32, %c0_i32_0 : i32, i32
  }
  func.func @transform_2(%arg0: i32) -> (i32, i32) {
    %c0_i32 = arith.constant 0 : i32
    %c0_i32_0 = arith.constant 0 : i32
    %c0_i32_1 = arith.constant 0 : i32
    return %c0_i32, %c0_i32_0 : i32, i32
  }
  func.func @transform_3(%arg0: i32) -> (i32, i32) {
    %c0_i32 = arith.constant 0 : i32
    %c0_i32_0 = arith.constant 0 : i32
    return %arg0, %c0_i32 : i32, i32
  }
}

module attributes {stable_mosaic.version = 11 : i64} {
  func.func @_fc_head_kernel(%arg0: memref<8x4608xbf16, #tpu.memory_space<vmem>>, %arg1: memref<4608x256xbf16, #tpu.memory_space<vmem>>, %arg2: memref<1x256xf32, #tpu.memory_space<vmem>>, %arg3: memref<256x128xbf16, #tpu.memory_space<vmem>>, %arg4: memref<1x128xf32, #tpu.memory_space<vmem>>, %arg5: memref<8x128xf32, #tpu.memory_space<vmem>>) attributes {dimension_semantics = [], scalar_prefetch = 0 : i64, scratch_operands = 0 : i64, tpu.core_type = #tpu.core_type<tc>} {
    %c0 = arith.constant 0 : index
    %c0_0 = arith.constant 0 : index
    %0 = vector.load %arg0[%c0, %c0_0] : memref<8x4608xbf16, #tpu.memory_space<vmem>>, vector<8x4608xbf16>
    %c0_1 = arith.constant 0 : index
    %c0_2 = arith.constant 0 : index
    %1 = vector.load %arg1[%c0_1, %c0_2] : memref<4608x256xbf16, #tpu.memory_space<vmem>>, vector<4608x256xbf16>
    %cst = arith.constant dense<0.000000e+00> : vector<8x256xf32>
    %2 = tpu.matmul %0, %1, %cst {dimension_numbers = #tpu.dot_dimension_numbers<[1], [0], [0], [1], [0, 0, 1, 1], [], []>} : vector<8x4608xbf16>, vector<4608x256xbf16>, vector<8x256xf32> -> vector<8x256xf32>
    %c0_3 = arith.constant 0 : index
    %c0_4 = arith.constant 0 : index
    %3 = vector.load %arg2[%c0_3, %c0_4] : memref<1x256xf32, #tpu.memory_space<vmem>>, vector<1x256xf32>
    %4 = vector.broadcast %3 : vector<1x256xf32> to vector<8x256xf32>
    %5 = arith.addf %2, %4 : vector<8x256xf32>
    %cst_5 = arith.constant 0.000000e+00 : f32
    %6 = vector.broadcast %cst_5 : f32 to vector<8x256xf32>
    %7 = arith.maximumf %5, %6 : vector<8x256xf32>
    %8 = arith.truncf %7 : vector<8x256xf32> to vector<8x256xbf16>
    %c0_6 = arith.constant 0 : index
    %c0_7 = arith.constant 0 : index
    %9 = vector.load %arg3[%c0_6, %c0_7] : memref<256x128xbf16, #tpu.memory_space<vmem>>, vector<256x128xbf16>
    %cst_8 = arith.constant dense<0.000000e+00> : vector<8x128xf32>
    %10 = tpu.matmul %8, %9, %cst_8 {dimension_numbers = #tpu.dot_dimension_numbers<[1], [0], [0], [1], [0, 0, 1, 1], [], []>} : vector<8x256xbf16>, vector<256x128xbf16>, vector<8x128xf32> -> vector<8x128xf32>
    %c0_9 = arith.constant 0 : index
    %c0_10 = arith.constant 0 : index
    %11 = vector.load %arg4[%c0_9, %c0_10] : memref<1x128xf32, #tpu.memory_space<vmem>>, vector<1x128xf32>
    %12 = vector.broadcast %11 : vector<1x128xf32> to vector<8x128xf32>
    %13 = arith.addf %10, %12 : vector<8x128xf32>
    %c0_11 = arith.constant 0 : index
    %c0_12 = arith.constant 0 : index
    %14 = vector.load %arg5[%c0_11, %c0_12] : memref<8x128xf32, #tpu.memory_space<vmem>>, vector<8x128xf32>
    tpu.vector_store %arg5[%c0_11, %c0_12], %13 {strides = array<i32>} : memref<8x128xf32, #tpu.memory_space<vmem>>, vector<8x128xf32>,
    return
  }
}

</mosaic_0001>

<bundles_post_ra>
// kernel: cnn2fc1_forward.3
= control target key start
LH: loop header
LB: loop body
LE: loop exit
PB: predicated region body
PF: predicated region fallthrough
CT: control target
= control target key end

     0   :  { %s1473_s12 = smov 0   ;;  %s1767_s0 = inlined_call_operand.vmem [shape: bf16[1536,128], index: 0, kind: input, shape index: {}]   ;;  %s1768_s1 = inlined_call_operand.vmem [shape: bf16[128,128], index: 1, kind: input, shape index: {}]   ;;  %s1769_s2 = inlined_call_operand.vmem [shape: f32[1,128], index: 2, kind: input, shape index: {}]   ;;  %s1770_s3 = inlined_call_operand.vmem [shape: f32[1536,128], index: 3, kind: output, shape index: {}]  }
   0x1 LB: > { %s1123_s13 = sadd.s32 4294967295, %s1451_s12   ;;  %p1127_p0 = scmp.ge.s32.totalorder %s1451_s12, 1  ;;  %s1451_s12 = sphi %s1473_s12, %s13_s12  }
   0x2   : > { %p138_p1 = scmp.lt.s32.totalorder %s1451_s12, 3 }
   0x4   : > { %p139_p2 = pnand %p1127_p0, %p138_p1 }
   0x5   : > { %s162_s22 = smul.u32 (!%p139_p2), 96, %s1123_s13 }
   0x6   : > { %142 = sbr.rel (%p139_p2) target bundleno = 366 (0x16e), region = 32 }
   0x7   : > { %p163_p3 = scmp.lt.s32.totalorder (!%p139_p2), %s162_s22, 191 }
   0xb   : > { %v1411_v0 = vld [vmem:[%s1768_s1 + $0x38] sm:$0xff]  ;;  %v1410_v1 = vld [vmem:[%s1768_s1 + $0x30] sm:$0xff]  ;;  %v1409_v2 = vld [vmem:[%s1768_s1 + $0x28] sm:$0xff]  ;;  %s1772_s22 = smov (!%p163_p3, %s162_s22), 191 }
   0xc   : > { %626 = vmatpush.bf16.msra.mxu0 %v1411_v0  ;;  %1412 = vmatpush.bf16.msra.mxu1 %v1411_v0  ;;  %v1408_v3 = vld [vmem:[%s1768_s1 + $0x20] sm:$0xff]  ;;  %v1407_v4 = vld [vmem:[%s1768_s1 + $0x18] sm:$0xff]  ;;  %v1406_v5 = vld [vmem:[%s1768_s1 + $0x10] sm:$0xff]  ;;  %s1128_s29 = sshll.u32 %s1772_s22, 2  ;;  %s1129_s10 = sshll.u32 %s1772_s22, 3 }
   0xd   : > { %1413 = vmatpush.bf16.msra.mxu2 %v1411_v0  ;;  %1414 = vmatpush.bf16.msra.mxu3 %v1411_v0  ;;  %v1405_v6 = vld [vmem:[%s1768_s1 + $0x8] sm:$0xff]  ;;  %v1404_v7 = vld [vmem:[%s1768_s1] sm:$0xff]  ;;  %s1511_s7 = scalar_lea.vmem %s1767_s0, %s1128_s29  ;;  %s1560_s14 = scalar_lea.vmem %s1770_s3, %s1129_s10 }
   0xe   : > { %v1356_v8 = vld [vmem:[%s1511_s7] sm:$0xff]  ;;  %v1357_v12 = vld [vmem:[%s1511_s7 + $0x8] sm:$0xff]  ;;  %v1358_v16 = vld [vmem:[%s1511_s7 + $0x10] sm:$0xff] }
   0xf   : > { %v1368_v9 = vld [vmem:[%s1511_s7 + $0x60] sm:$0xff]  ;;  %v1369_v13 = vld [vmem:[%s1511_s7 + $0x68] sm:$0xff]  ;;  %v1370_v17 = vld [vmem:[%s1511_s7 + $0x70] sm:$0xff] }
  0x10   : > { %627 = vmatpush.bf16.msra.mxu0 %v1410_v1  ;;  %1415 = vmatpush.bf16.msra.mxu1 %v1410_v1  ;;  %v1380_v10 = vld [vmem:[%s1511_s7 + $0xc0] sm:$0xff]  ;;  %v1381_v14 = vld [vmem:[%s1511_s7 + $0xc8] sm:$0xff]  ;;  %v1382_v18 = vld [vmem:[%s1511_s7 + $0xd0] sm:$0xff] }
  0x11   : > { %1416 = vmatpush.bf16.msra.mxu2 %v1410_v1  ;;  %1417 = vmatpush.bf16.msra.mxu3 %v1410_v1  ;;  %v1392_v11 = vld [vmem:[%s1511_s7 + $0x120] sm:$0xff]  ;;  %v1393_v15 = vld [vmem:[%s1511_s7 + $0x128] sm:$0xff]  ;;  %v1394_v19 = vld [vmem:[%s1511_s7 + $0x130] sm:$0xff] }
  0x12   : > { %v1359_v20 = vld [vmem:[%s1511_s7 + $0x18] sm:$0xff]  ;;  %v1360_v24 = vld [vmem:[%s1511_s7 + $0x20] sm:$0xff]  ;;  %v1361_v28 = vld [vmem:[%s1511_s7 + $0x28] sm:$0xff] }
  0x13   : > { %v1371_v21 = vld [vmem:[%s1511_s7 + $0x78] sm:$0xff]  ;;  %v1372_v25 = vld [vmem:[%s1511_s7 + $0x80] sm:$0xff]  ;;  %v1373_v29 = vld [vmem:[%s1511_s7 + $0x88] sm:$0xff] }
  0x14   : > { %628 = vmatpush.bf16.msra.mxu0 %v1409_v2  ;;  %1418 = vmatpush.bf16.msra.mxu1 %v1409_v2  ;;  %v1383_v22 = vld [vmem:[%s1511_s7 + $0xd8] sm:$0xff]  ;;  %v1384_v26 = vld [vmem:[%s1511_s7 + $0xe0] sm:$0xff]  ;;  %v1385_v30 = vld [vmem:[%s1511_s7 + $0xe8] sm:$0xff] }
  0x15   : > { %1419 = vmatpush.bf16.msra.mxu2 %v1409_v2  ;;  %1420 = vmatpush.bf16.msra.mxu3 %v1409_v2  ;;  %v1395_v23 = vld [vmem:[%s1511_s7 + $0x138] sm:$0xff]  ;;  %v1396_v27 = vld [vmem:[%s1511_s7 + $0x140] sm:$0xff]  ;;  %v1397_v31 = vld [vmem:[%s1511_s7 + $0x148] sm:$0xff] }
  0x16   : > { %v1362_v32 = vld [vmem:[%s1511_s7 + $0x30] sm:$0xff]  ;;  %v1363_v36 = vld [vmem:[%s1511_s7 + $0x38] sm:$0xff]  ;;  %v1548_v40 = vld [vmem:[%s1769_s2] ss:$0 sm:$0xff] }
  0x17   : > { %v1374_v33 = vld [vmem:[%s1511_s7 + $0x90] sm:$0xff]  ;;  %v1375_v37 = vld [vmem:[%s1511_s7 + $0x98] sm:$0xff]  ;;  %v1364_v41 = vld [vmem:[%s1511_s7 + $0x40] sm:$0xff] }
  0x18   : > { %629 = vmatpush.bf16.msra.mxu0 %v1408_v3  ;;  %1421 = vmatpush.bf16.msra.mxu1 %v1408_v3  ;;  %v1386_v34 = vld [vmem:[%s1511_s7 + $0xf0] sm:$0xff]  ;;  %v1387_v38 = vld [vmem:[%s1511_s7 + $0xf8] sm:$0xff]  ;;  %v1376_v42 = vld [vmem:[%s1511_s7 + $0xa0] sm:$0xff] }
  0x19   : > { %1422 = vmatpush.bf16.msra.mxu2 %v1408_v3  ;;  %1423 = vmatpush.bf16.msra.mxu3 %v1408_v3  ;;  %v1398_v35 = vld [vmem:[%s1511_s7 + $0x150] sm:$0xff]  ;;  %v1399_v39 = vld [vmem:[%s1511_s7 + $0x158] sm:$0xff]  ;;  %v1388_v45 = vld [vmem:[%s1511_s7 + $0x100] sm:$0xff] }
  0x1a   : > { %v1400_v46 = vld [vmem:[%s1511_s7 + $0x160] sm:$0xff]  ;;  %v1365_v1 = vld [vmem:[%s1511_s7 + $0x48] sm:$0xff] }
  0x1b   : > { %v1377_v2 = vld [vmem:[%s1511_s7 + $0xa8] sm:$0xff] }
  0x1c   : > { %630 = vmatpush.bf16.msra.mxu0 %v1407_v4  ;;  %1424 = vmatpush.bf16.msra.mxu1 %v1407_v4 }
  0x1d   : > { %1425 = vmatpush.bf16.msra.mxu2 %v1407_v4  ;;  %1426 = vmatpush.bf16.msra.mxu3 %v1407_v4 }
  0x20   : > { %631 = vmatpush.bf16.msra.mxu0 %v1406_v5  ;;  %1427 = vmatpush.bf16.msra.mxu1 %v1406_v5 }
  0x21   : > { %1428 = vmatpush.bf16.msra.mxu2 %v1406_v5  ;;  %1429 = vmatpush.bf16.msra.mxu3 %v1406_v5 }
  0x24   : > { %632 = vmatpush.bf16.msra.mxu0 %v1405_v6  ;;  %1430 = vmatpush.bf16.msra.mxu1 %v1405_v6 }
  0x25   : > { %1431 = vmatpush.bf16.msra.mxu2 %v1405_v6  ;;  %1432 = vmatpush.bf16.msra.mxu3 %v1405_v6 }
  0x28   : > { %633 = vmatpush.bf16.msra.mxu0 %v1404_v7  ;;  %1433 = vmatpush.bf16.msra.mxu1 %v1404_v7 }
  0x29   : > { %1434 = vmatpush.bf16.msra.mxu2 %v1404_v7  ;;  %1435 = vmatpush.bf16.msra.mxu3 %v1404_v7  ;;  %v1389_v7 = vld [vmem:[%s1511_s7 + $0x108] sm:$0xff] }
  0x2b   : > { %634 = vmatmul.bf16.vlgmr.msra.gmra.mxu0 %v1356_v8  ;;  %694 = vmatmul.bf16.vlgmr.msra.gmra.mxu1 %v1368_v9  ;;  %v1401_v8 = vld [vmem:[%s1511_s7 + $0x168] sm:$0xff] }
  0x2c   : > { %754 = vmatmul.bf16.vlgmr.msra.gmra.mxu2 %v1380_v10  ;;  %814 = vmatmul.bf16.vlgmr.msra.gmra.mxu3 %v1392_v11 }
  0x3b   : > { %639 = vmatmul.bf16.gmra.mxu0 %v1357_v12  ;;  %699 = vmatmul.bf16.gmra.mxu1 %v1369_v13 }
  0x3c   : > { %759 = vmatmul.bf16.gmra.mxu2 %v1381_v14  ;;  %819 = vmatmul.bf16.gmra.mxu3 %v1393_v15 }
  0x4b   : > { %644 = vmatmul.bf16.gmra.mxu0 %v1358_v16  ;;  %704 = vmatmul.bf16.gmra.mxu1 %v1370_v17 }
  0x4c   : > { %764 = vmatmul.bf16.gmra.mxu2 %v1382_v18  ;;  %824 = vmatmul.bf16.gmra.mxu3 %v1394_v19 }
  0x5b   : > { %649 = vmatmul.bf16.gmra.mxu0 %v1359_v20  ;;  %709 = vmatmul.bf16.gmra.mxu1 %v1371_v21 }
  0x5c   : > { %769 = vmatmul.bf16.gmra.mxu2 %v1383_v22  ;;  %829 = vmatmul.bf16.gmra.mxu3 %v1395_v23 }
  0x6b   : > { %654 = vmatmul.bf16.gmra.mxu0 %v1360_v24  ;;  %714 = vmatmul.bf16.gmra.mxu1 %v1372_v25 }
  0x6c   : > { %774 = vmatmul.bf16.gmra.mxu2 %v1384_v26  ;;  %834 = vmatmul.bf16.gmra.mxu3 %v1396_v27 }
  0x7b   : > { %659 = vmatmul.bf16.gmra.mxu0 %v1361_v28  ;;  %719 = vmatmul.bf16.gmra.mxu1 %v1373_v29  ;;  %v1366_v29 = vld [vmem:[%s1511_s7 + $0x50] sm:$0xff] }
  0x7c   : > { %779 = vmatmul.bf16.gmra.mxu2 %v1385_v30  ;;  %839 = vmatmul.bf16.gmra.mxu3 %v1397_v31  ;;  %v1378_v30 = vld [vmem:[%s1511_s7 + $0xb0] sm:$0xff] }
  0x8b   : > { %664 = vmatmul.bf16.gmra.mxu0 %v1362_v32  ;;  %724 = vmatmul.bf16.gmra.mxu1 %v1374_v33 }
  0x8c   : > { %784 = vmatmul.bf16.gmra.mxu2 %v1386_v34  ;;  %844 = vmatmul.bf16.gmra.mxu3 %v1398_v35  ;;  %v1390_v35 = vld [vmem:[%s1511_s7 + $0x110] sm:$0xff] }
  0x9b   : > { %669 = vmatmul.bf16.gmra.mxu0 %v1363_v36  ;;  %729 = vmatmul.bf16.gmra.mxu1 %v1375_v37  ;;  %v1402_v36 = vld [vmem:[%s1511_s7 + $0x170] sm:$0xff] }
  0x9c   : > { %789 = vmatmul.bf16.gmra.mxu2 %v1387_v38  ;;  %849 = vmatmul.bf16.gmra.mxu3 %v1399_v39 }
  0xa8   : > { %v635_v43 = vpop.f32.mrf.mxu0  ;;  %v695_v44 = vpop.f32.mrf.mxu1 }
  0xa9   : > { %v636_v47 = vadd.f32 %v1548_v40, %v635_v43  ;;  %v696_v48 = vadd.f32 %v1548_v40, %v695_v44 }
  0xab   : > { %v875_v49 = vmax.f32 %v636_v47, 0.0  ;;  %v899_v50 = vmax.f32 %v696_v48, 0.0  ;;  %674 = vmatmul.bf16.gmra.mxu0 %v1364_v41  ;;  %734 = vmatmul.bf16.gmra.mxu1 %v1376_v42 }
  0xac   : > { %794 = vmatmul.bf16.gmra.mxu2 %v1388_v45  ;;  %854 = vmatmul.bf16.gmra.mxu3 %v1400_v46 }
  0xad   : > { %971 = vst [vmem:[%s1560_s14] sm:$0xff] %v875_v49 }
  0xae   : > { %995 = vst [vmem:[%s1560_s14 + $0xc0] sm:$0xff] %v899_v50 }
  0xaf   : > { %v755_v51 = vpop.f32.mrf.mxu2  ;;  %v815_v52 = vpop.f32.mrf.mxu3 }
  0xb0   : > { %v756_v53 = vadd.f32 %v1548_v40, %v755_v51  ;;  %v816_v54 = vadd.f32 %v1548_v40, %v815_v52  ;;  %v637_v55 = vpop.f32.mrf.mxu0  ;;  %v697_v56 = vpop.f32.mrf.mxu1 }
  0xb1   : > { %v638_v57 = vadd.f32 %v1548_v40, %v637_v55  ;;  %v698_v58 = vadd.f32 %v1548_v40, %v697_v56 }
  0xb2   : > { %v923_v59 = vmax.f32 %v756_v53, 0.0  ;;  %v947_v60 = vmax.f32 %v816_v54, 0.0 }
  0xb3   : > { %v876_v61 = vmax.f32 %v638_v57, 0.0  ;;  %v900_v62 = vmax.f32 %v698_v58, 0.0  ;;  %v1367_v58 = vld [vmem:[%s1511_s7 + $0x58] sm:$0xff] }
  0xb4   : > { %1019 = vst [vmem:[%s1560_s14 + $0x180] sm:$0xff] %v923_v59  ;;  %v1379_v59 = vld [vmem:[%s1511_s7 + $0xb8] sm:$0xff] }
  0xb5   : > { %1043 = vst [vmem:[%s1560_s14 + $0x240] sm:$0xff] %v947_v60 }
  0xb6   : > { %972 = vst [vmem:[%s1560_s14 + $0x8] sm:$0xff] %v876_v61 }
  0xb7   : > { %996 = vst [vmem:[%s1560_s14 + $0xc8] sm:$0xff] %v900_v62  ;;  %v757_v63 = vpop.f32.mrf.mxu2  ;;  %v817_v0 = vpop.f32.mrf.mxu3 }
  0xb8   : > { %v758_v3 = vadd.f32 %v1548_v40, %v757_v63  ;;  %v818_v4 = vadd.f32 %v1548_v40, %v817_v0  ;;  %v640_v5 = vpop.f32.mrf.mxu0  ;;  %v700_v6 = vpop.f32.mrf.mxu1  ;;  %v1391_v0 = vld [vmem:[%s1511_s7 + $0x118] sm:$0xff] }
  0xb9   : > { %v641_v9 = vadd.f32 %v1548_v40, %v640_v5  ;;  %v701_v10 = vadd.f32 %v1548_v40, %v700_v6 }
  0xba   : > { %v924_v11 = vmax.f32 %v758_v3, 0.0  ;;  %v948_v12 = vmax.f32 %v818_v4, 0.0 }
  0xbb   : > { %v877_v13 = vmax.f32 %v641_v9, 0.0  ;;  %v901_v14 = vmax.f32 %v701_v10, 0.0  ;;  %679 = vmatmul.bf16.gmra.mxu0 %v1365_v1  ;;  %739 = vmatmul.bf16.gmra.mxu1 %v1377_v2  ;;  %v1403_v1 = vld [vmem:[%s1511_s7 + $0x178] sm:$0xff] }
  0xbc   : > { %1020 = vst [vmem:[%s1560_s14 + $0x188] sm:$0xff] %v924_v11  ;;  %799 = vmatmul.bf16.gmra.mxu2 %v1389_v7  ;;  %859 = vmatmul.bf16.gmra.mxu3 %v1401_v8 }
  0xbd   : > { %1044 = vst [vmem:[%s1560_s14 + $0x248] sm:$0xff] %v948_v12 }
  0xbe   : > { %973 = vst [vmem:[%s1560_s14 + $0x10] sm:$0xff] %v877_v13 }
  0xbf   : > { %997 = vst [vmem:[%s1560_s14 + $0xd0] sm:$0xff] %v901_v14  ;;  %v760_v15 = vpop.f32.mrf.mxu2  ;;  %v820_v16 = vpop.f32.mrf.mxu3 }
  0xc0   : > { %v761_v17 = vadd.f32 %v1548_v40, %v760_v15  ;;  %v821_v18 = vadd.f32 %v1548_v40, %v820_v16  ;;  %v642_v19 = vpop.f32.mrf.mxu0  ;;  %v702_v20 = vpop.f32.mrf.mxu1 }
  0xc1   : > { %v643_v21 = vadd.f32 %v1548_v40, %v642_v19  ;;  %v703_v22 = vadd.f32 %v1548_v40, %v702_v20 }
  0xc2   : > { %v925_v23 = vmax.f32 %v761_v17, 0.0  ;;  %v949_v24 = vmax.f32 %v821_v18, 0.0 }
  0xc3   : > { %v878_v25 = vmax.f32 %v643_v21, 0.0  ;;  %v902_v26 = vmax.f32 %v703_v22, 0.0 }
  0xc4   : > { %1021 = vst [vmem:[%s1560_s14 + $0x190] sm:$0xff] %v925_v23 }
  0xc5   : > { %1045 = vst [vmem:[%s1560_s14 + $0x250] sm:$0xff] %v949_v24 }
  0xc6   : > { %974 = vst [vmem:[%s1560_s14 + $0x18] sm:$0xff] %v878_v25 }
  0xc7   : > { %998 = vst [vmem:[%s1560_s14 + $0xd8] sm:$0xff] %v902_v26  ;;  %v762_v27 = vpop.f32.mrf.mxu2  ;;  %v822_v28 = vpop.f32.mrf.mxu3 }
  0xc8   : > { %v763_v31 = vadd.f32 %v1548_v40, %v762_v27  ;;  %v823_v32 = vadd.f32 %v1548_v40, %v822_v28  ;;  %v645_v33 = vpop.f32.mrf.mxu0  ;;  %v705_v34 = vpop.f32.mrf.mxu1 }
  0xc9   : > { %v646_v37 = vadd.f32 %v1548_v40, %v645_v33  ;;  %v706_v38 = vadd.f32 %v1548_v40, %v705_v34 }
  0xca   : > { %v926_v39 = vmax.f32 %v763_v31, 0.0  ;;  %v950_v41 = vmax.f32 %v823_v32, 0.0 }
  0xcb   : > { %v879_v42 = vmax.f32 %v646_v37, 0.0  ;;  %v903_v43 = vmax.f32 %v706_v38, 0.0  ;;  %684 = vmatmul.bf16.gmra.mxu0 %v1366_v29  ;;  %744 = vmatmul.bf16.gmra.mxu1 %v1378_v30 }
  0xcc   : > { %1022 = vst [vmem:[%s1560_s14 + $0x198] sm:$0xff] %v926_v39  ;;  %804 = vmatmul.bf16.gmra.mxu2 %v1390_v35  ;;  %864 = vmatmul.bf16.gmra.mxu3 %v1402_v36 }
  0xcd   : > { %1046 = vst [vmem:[%s1560_s14 + $0x258] sm:$0xff] %v950_v41 }
  0xce   : > { %975 = vst [vmem:[%s1560_s14 + $0x20] sm:$0xff] %v879_v42 }
  0xcf   : > { %999 = vst [vmem:[%s1560_s14 + $0xe0] sm:$0xff] %v903_v43  ;;  %v765_v44 = vpop.f32.mrf.mxu2  ;;  %v825_v45 = vpop.f32.mrf.mxu3 }
  0xd0   : > { %v766_v46 = vadd.f32 %v1548_v40, %v765_v44  ;;  %v826_v47 = vadd.f32 %v1548_v40, %v825_v45  ;;  %v647_v48 = vpop.f32.mrf.mxu0  ;;  %v707_v49 = vpop.f32.mrf.mxu1 }
  0xd1   : > { %v648_v50 = vadd.f32 %v1548_v40, %v647_v48  ;;  %v708_v51 = vadd.f32 %v1548_v40, %v707_v49 }
  0xd2   : > { %v927_v52 = vmax.f32 %v766_v46, 0.0  ;;  %v951_v53 = vmax.f32 %v826_v47, 0.0 }
  0xd3   : > { %v880_v54 = vmax.f32 %v648_v50, 0.0  ;;  %v904_v55 = vmax.f32 %v708_v51, 0.0 }
  0xd4   : > { %1023 = vst [vmem:[%s1560_s14 + $0x1a0] sm:$0xff] %v927_v52 }
  0xd5   : > { %1047 = vst [vmem:[%s1560_s14 + $0x260] sm:$0xff] %v951_v53 }
  0xd6   : > { %976 = vst [vmem:[%s1560_s14 + $0x28] sm:$0xff] %v880_v54 }
  0xd7   : > { %1000 = vst [vmem:[%s1560_s14 + $0xe8] sm:$0xff] %v904_v55  ;;  %v767_v56 = vpop.f32.mrf.mxu2  ;;  %v827_v57 = vpop.f32.mrf.mxu3 }
  0xd8   : > { %v768_v60 = vadd.f32 %v1548_v40, %v767_v56  ;;  %v828_v61 = vadd.f32 %v1548_v40, %v827_v57  ;;  %v650_v62 = vpop.f32.mrf.mxu0  ;;  %v710_v63 = vpop.f32.mrf.mxu1 }
  0xd9   : > { %v651_v2 = vadd.f32 %v1548_v40, %v650_v62  ;;  %v711_v3 = vadd.f32 %v1548_v40, %v710_v63 }
  0xda   : > { %v928_v4 = vmax.f32 %v768_v60, 0.0  ;;  %v952_v5 = vmax.f32 %v828_v61, 0.0 }
  0xdb   : > { %v881_v6 = vmax.f32 %v651_v2, 0.0  ;;  %v905_v7 = vmax.f32 %v711_v3, 0.0  ;;  %689 = vmatmul.bf16.gmra.mxu0 %v1367_v58  ;;  %749 = vmatmul.bf16.gmra.mxu1 %v1379_v59 }
  0xdc   : > { %1024 = vst [vmem:[%s1560_s14 + $0x1a8] sm:$0xff] %v928_v4  ;;  %809 = vmatmul.bf16.gmra.mxu2 %v1391_v0  ;;  %869 = vmatmul.bf16.gmra.mxu3 %v1403_v1 }
  0xdd   : > { %1048 = vst [vmem:[%s1560_s14 + $0x268] sm:$0xff] %v952_v5 }
  0xde   : > { %977 = vst [vmem:[%s1560_s14 + $0x30] sm:$0xff] %v881_v6 }
  0xdf   : > { %1001 = vst [vmem:[%s1560_s14 + $0xf0] sm:$0xff] %v905_v7  ;;  %v770_v8 = vpop.f32.mrf.mxu2  ;;  %v830_v9 = vpop.f32.mrf.mxu3 }
  0xe0   : > { %v771_v10 = vadd.f32 %v1548_v40, %v770_v8  ;;  %v831_v11 = vadd.f32 %v1548_v40, %v830_v9  ;;  %v652_v12 = vpop.f32.mrf.mxu0  ;;  %v712_v13 = vpop.f32.mrf.mxu1 }
  0xe1   : > { %v653_v14 = vadd.f32 %v1548_v40, %v652_v12  ;;  %v713_v15 = vadd.f32 %v1548_v40, %v712_v13 }
  0xe2   : > { %v929_v16 = vmax.f32 %v771_v10, 0.0  ;;  %v953_v17 = vmax.f32 %v831_v11, 0.0 }
  0xe3   : > { %v882_v18 = vmax.f32 %v653_v14, 0.0  ;;  %v906_v19 = vmax.f32 %v713_v15, 0.0 }
  0xe4   : > { %1025 = vst [vmem:[%s1560_s14 + $0x1b0] sm:$0xff] %v929_v16 }
  0xe5   : > { %1049 = vst [vmem:[%s1560_s14 + $0x270] sm:$0xff] %v953_v17 }
  0xe6   : > { %978 = vst [vmem:[%s1560_s14 + $0x38] sm:$0xff] %v882_v18 }
  0xe7   : > { %1002 = vst [vmem:[%s1560_s14 + $0xf8] sm:$0xff] %v906_v19  ;;  %v772_v20 = vpop.f32.mrf.mxu2  ;;  %v832_v21 = vpop.f32.mrf.mxu3 }
  0xe8   : > { %v773_v22 = vadd.f32 %v1548_v40, %v772_v20  ;;  %v833_v23 = vadd.f32 %v1548_v40, %v832_v21  ;;  %v655_v24 = vpop.f32.mrf.mxu0  ;;  %v715_v25 = vpop.f32.mrf.mxu1 }
  0xe9   : > { %v656_v26 = vadd.f32 %v1548_v40, %v655_v24  ;;  %v716_v27 = vadd.f32 %v1548_v40, %v715_v25 }
  0xea   : > { %v930_v28 = vmax.f32 %v773_v22, 0.0  ;;  %v954_v29 = vmax.f32 %v833_v23, 0.0 }
  0xeb   : > { %v883_v30 = vmax.f32 %v656_v26, 0.0  ;;  %v907_v31 = vmax.f32 %v716_v27, 0.0 }
  0xec   : > { %1026 = vst [vmem:[%s1560_s14 + $0x1b8] sm:$0xff] %v930_v28 }
  0xed   : > { %1050 = vst [vmem:[%s1560_s14 + $0x278] sm:$0xff] %v954_v29 }
  0xee   : > { %979 = vst [vmem:[%s1560_s14 + $0x40] sm:$0xff] %v883_v30 }
  0xef   : > { %1003 = vst [vmem:[%s1560_s14 + $0x100] sm:$0xff] %v907_v31  ;;  %v775_v32 = vpop.f32.mrf.mxu2  ;;  %v835_v33 = vpop.f32.mrf.mxu3 }
  0xf0   : > { %v776_v34 = vadd.f32 %v1548_v40, %v775_v32  ;;  %v836_v35 = vadd.f32 %v1548_v40, %v835_v33  ;;  %v657_v36 = vpop.f32.mrf.mxu0  ;;  %v717_v37 = vpop.f32.mrf.mxu1 }
  0xf1   : > { %v658_v38 = vadd.f32 %v1548_v40, %v657_v36  ;;  %v718_v39 = vadd.f32 %v1548_v40, %v717_v37 }
  0xf2   : > { %v931_v41 = vmax.f32 %v776_v34, 0.0  ;;  %v955_v42 = vmax.f32 %v836_v35, 0.0 }
  0xf3   : > { %v884_v43 = vmax.f32 %v658_v38, 0.0  ;;  %v908_v44 = vmax.f32 %v718_v39, 0.0 }
  0xf4   : > { %1027 = vst [vmem:[%s1560_s14 + $0x1c0] sm:$0xff] %v931_v41 }
  0xf5   : > { %1051 = vst [vmem:[%s1560_s14 + $0x280] sm:$0xff] %v955_v42 }
  0xf6   : > { %980 = vst [vmem:[%s1560_s14 + $0x48] sm:$0xff] %v884_v43 }
  0xf7   : > { %1004 = vst [vmem:[%s1560_s14 + $0x108] sm:$0xff] %v908_v44  ;;  %v777_v45 = vpop.f32.mrf.mxu2  ;;  %v837_v46 = vpop.f32.mrf.mxu3 }
  0xf8   : > { %v778_v47 = vadd.f32 %v1548_v40, %v777_v45  ;;  %v838_v48 = vadd.f32 %v1548_v40, %v837_v46  ;;  %v660_v49 = vpop.f32.mrf.mxu0  ;;  %v720_v50 = vpop.f32.mrf.mxu1 }
  0xf9   : > { %v661_v51 = vadd.f32 %v1548_v40, %v660_v49  ;;  %v721_v52 = vadd.f32 %v1548_v40, %v720_v50 }
  0xfa   : > { %v932_v53 = vmax.f32 %v778_v47, 0.0  ;;  %v956_v54 = vmax.f32 %v838_v48, 0.0 }
  0xfb   : > { %v885_v55 = vmax.f32 %v661_v51, 0.0  ;;  %v909_v56 = vmax.f32 %v721_v52, 0.0 }
  0xfc   : > { %1028 = vst [vmem:[%s1560_s14 + $0x1c8] sm:$0xff] %v932_v53 }
  0xfd   : > { %1052 = vst [vmem:[%s1560_s14 + $0x288] sm:$0xff] %v956_v54 }
  0xfe   : > { %981 = vst [vmem:[%s1560_s14 + $0x50] sm:$0xff] %v885_v55 }
  0xff   : > { %1005 = vst [vmem:[%s1560_s14 + $0x110] sm:$0xff] %v909_v56  ;;  %v780_v57 = vpop.f32.mrf.mxu2  ;;  %v840_v58 = vpop.f32.mrf.mxu3 }
 0x100   : > { %v781_v59 = vadd.f32 %v1548_v40, %v780_v57  ;;  %v841_v60 = vadd.f32 %v1548_v40, %v840_v58  ;;  %v662_v61 = vpop.f32.mrf.mxu0  ;;  %v722_v62 = vpop.f32.mrf.mxu1 }
 0x101   : > { %v663_v63 = vadd.f32 %v1548_v40, %v662_v61  ;;  %v723_v0 = vadd.f32 %v1548_v40, %v722_v62 }
 0x102   : > { %v933_v1 = vmax.f32 %v781_v59, 0.0  ;;  %v957_v2 = vmax.f32 %v841_v60, 0.0 }
 0x103   : > { %v886_v3 = vmax.f32 %v663_v63, 0.0  ;;  %v910_v4 = vmax.f32 %v723_v0, 0.0 }
 0x104   : > { %1029 = vst [vmem:[%s1560_s14 + $0x1d0] sm:$0xff] %v933_v1 }
 0x105   : > { %1053 = vst [vmem:[%s1560_s14 + $0x290] sm:$0xff] %v957_v2 }
 0x106   : > { %982 = vst [vmem:[%s1560_s14 + $0x58] sm:$0xff] %v886_v3 }
 0x107   : > { %1006 = vst [vmem:[%s1560_s14 + $0x118] sm:$0xff] %v910_v4  ;;  %v782_v5 = vpop.f32.mrf.mxu2  ;;  %v842_v6 = vpop.f32.mrf.mxu3 }
 0x108   : > { %v783_v7 = vadd.f32 %v1548_v40, %v782_v5  ;;  %v843_v8 = vadd.f32 %v1548_v40, %v842_v6  ;;  %v665_v9 = vpop.f32.mrf.mxu0  ;;  %v725_v10 = vpop.f32.mrf.mxu1 }
 0x109   : > { %v666_v11 = vadd.f32 %v1548_v40, %v665_v9  ;;  %v726_v12 = vadd.f32 %v1548_v40, %v725_v10 }
 0x10a   : > { %v934_v13 = vmax.f32 %v783_v7, 0.0  ;;  %v958_v14 = vmax.f32 %v843_v8, 0.0 }
 0x10b   : > { %v887_v15 = vmax.f32 %v666_v11, 0.0  ;;  %v911_v16 = vmax.f32 %v726_v12, 0.0 }
 0x10c   : > { %1030 = vst [vmem:[%s1560_s14 + $0x1d8] sm:$0xff] %v934_v13 }
 0x10d   : > { %1054 = vst [vmem:[%s1560_s14 + $0x298] sm:$0xff] %v958_v14 }
 0x10e   : > { %983 = vst [vmem:[%s1560_s14 + $0x60] sm:$0xff] %v887_v15 }
 0x10f   : > { %1007 = vst [vmem:[%s1560_s14 + $0x120] sm:$0xff] %v911_v16  ;;  %v785_v17 = vpop.f32.mrf.mxu2  ;;  %v845_v18 = vpop.f32.mrf.mxu3 }
 0x110   : > { %v786_v19 = vadd.f32 %v1548_v40, %v785_v17  ;;  %v846_v20 = vadd.f32 %v1548_v40, %v845_v18  ;;  %v667_v21 = vpop.f32.mrf.mxu0  ;;  %v727_v22 = vpop.f32.mrf.mxu1 }
 0x111   : > { %v668_v23 = vadd.f32 %v1548_v40, %v667_v21  ;;  %v728_v24 = vadd.f32 %v1548_v40, %v727_v22 }
 0x112   : > { %v935_v25 = vmax.f32 %v786_v19, 0.0  ;;  %v959_v26 = vmax.f32 %v846_v20, 0.0 }
 0x113   : > { %v888_v27 = vmax.f32 %v668_v23, 0.0  ;;  %v912_v28 = vmax.f32 %v728_v24, 0.0 }
 0x114   : > { %1031 = vst [vmem:[%s1560_s14 + $0x1e0] sm:$0xff] %v935_v25 }
 0x115   : > { %1055 = vst [vmem:[%s1560_s14 + $0x2a0] sm:$0xff] %v959_v26 }
 0x116   : > { %984 = vst [vmem:[%s1560_s14 + $0x68] sm:$0xff] %v888_v27 }
 0x117   : > { %1008 = vst [vmem:[%s1560_s14 + $0x128] sm:$0xff] %v912_v28  ;;  %v787_v29 = vpop.f32.mrf.mxu2  ;;  %v847_v30 = vpop.f32.mrf.mxu3 }
 0x118   : > { %v788_v31 = vadd.f32 %v1548_v40, %v787_v29  ;;  %v848_v32 = vadd.f32 %v1548_v40, %v847_v30  ;;  %v670_v33 = vpop.f32.mrf.mxu0  ;;  %v730_v34 = vpop.f32.mrf.mxu1 }
 0x119   : > { %v671_v35 = vadd.f32 %v1548_v40, %v670_v33  ;;  %v731_v36 = vadd.f32 %v1548_v40, %v730_v34 }
 0x11a   : > { %v936_v37 = vmax.f32 %v788_v31, 0.0  ;;  %v960_v38 = vmax.f32 %v848_v32, 0.0 }
 0x11b   : > { %v889_v39 = vmax.f32 %v671_v35, 0.0  ;;  %v913_v41 = vmax.f32 %v731_v36, 0.0 }
 0x11c   : > { %1032 = vst [vmem:[%s1560_s14 + $0x1e8] sm:$0xff] %v936_v37 }
 0x11d   : > { %1056 = vst [vmem:[%s1560_s14 + $0x2a8] sm:$0xff] %v960_v38 }
 0x11e   : > { %985 = vst [vmem:[%s1560_s14 + $0x70] sm:$0xff] %v889_v39 }
 0x11f   : > { %1009 = vst [vmem:[%s1560_s14 + $0x130] sm:$0xff] %v913_v41  ;;  %v790_v42 = vpop.f32.mrf.mxu2  ;;  %v850_v43 = vpop.f32.mrf.mxu3 }
 0x120   : > { %v791_v44 = vadd.f32 %v1548_v40, %v790_v42  ;;  %v851_v45 = vadd.f32 %v1548_v40, %v850_v43  ;;  %v672_v46 = vpop.f32.mrf.mxu0  ;;  %v732_v47 = vpop.f32.mrf.mxu1 }
 0x121   : > { %v673_v48 = vadd.f32 %v1548_v40, %v672_v46  ;;  %v733_v49 = vadd.f32 %v1548_v40, %v732_v47 }
 0x122   : > { %v937_v50 = vmax.f32 %v791_v44, 0.0  ;;  %v961_v51 = vmax.f32 %v851_v45, 0.0 }
 0x123   : > { %v890_v52 = vmax.f32 %v673_v48, 0.0  ;;  %v914_v53 = vmax.f32 %v733_v49, 0.0 }
 0x124   : > { %1033 = vst [vmem:[%s1560_s14 + $0x1f0] sm:$0xff] %v937_v50 }
 0x125   : > { %1057 = vst [vmem:[%s1560_s14 + $0x2b0] sm:$0xff] %v961_v51 }
 0x126   : > { %986 = vst [vmem:[%s1560_s14 + $0x78] sm:$0xff] %v890_v52 }
 0x127   : > { %1010 = vst [vmem:[%s1560_s14 + $0x138] sm:$0xff] %v914_v53  ;;  %v792_v54 = vpop.f32.mrf.mxu2  ;;  %v852_v55 = vpop.f32.mrf.mxu3 }
 0x128   : > { %v793_v56 = vadd.f32 %v1548_v40, %v792_v54  ;;  %v853_v57 = vadd.f32 %v1548_v40, %v852_v55  ;;  %v675_v58 = vpop.f32.mrf.mxu0  ;;  %v735_v59 = vpop.f32.mrf.mxu1 }
 0x129   : > { %v676_v60 = vadd.f32 %v1548_v40, %v675_v58  ;;  %v736_v61 = vadd.f32 %v1548_v40, %v735_v59 }
 0x12a   : > { %v938_v62 = vmax.f32 %v793_v56, 0.0  ;;  %v962_v63 = vmax.f32 %v853_v57, 0.0 }
 0x12b   : > { %v891_v0 = vmax.f32 %v676_v60, 0.0  ;;  %v915_v1 = vmax.f32 %v736_v61, 0.0 }
 0x12c   : > { %1034 = vst [vmem:[%s1560_s14 + $0x1f8] sm:$0xff] %v938_v62 }
 0x12d   : > { %1058 = vst [vmem:[%s1560_s14 + $0x2b8] sm:$0xff] %v962_v63 }
 0x12e   : > { %987 = vst [vmem:[%s1560_s14 + $0x80] sm:$0xff] %v891_v0 }
 0x12f   : > { %1011 = vst [vmem:[%s1560_s14 + $0x140] sm:$0xff] %v915_v1  ;;  %v795_v2 = vpop.f32.mrf.mxu2  ;;  %v855_v3 = vpop.f32.mrf.mxu3 }
 0x130   : > { %v796_v4 = vadd.f32 %v1548_v40, %v795_v2  ;;  %v856_v5 = vadd.f32 %v1548_v40, %v855_v3  ;;  %v677_v6 = vpop.f32.mrf.mxu0  ;;  %v737_v7 = vpop.f32.mrf.mxu1 }
 0x131   : > { %v678_v8 = vadd.f32 %v1548_v40, %v677_v6  ;;  %v738_v9 = vadd.f32 %v1548_v40, %v737_v7 }
 0x132   : > { %v939_v10 = vmax.f32 %v796_v4, 0.0  ;;  %v963_v11 = vmax.f32 %v856_v5, 0.0 }
 0x133   : > { %v892_v12 = vmax.f32 %v678_v8, 0.0  ;;  %v916_v13 = vmax.f32 %v738_v9, 0.0 }
 0x134   : > { %1035 = vst [vmem:[%s1560_s14 + $0x200] sm:$0xff] %v939_v10 }
 0x135   : > { %1059 = vst [vmem:[%s1560_s14 + $0x2c0] sm:$0xff] %v963_v11 }
 0x136   : > { %988 = vst [vmem:[%s1560_s14 + $0x88] sm:$0xff] %v892_v12 }
 0x137   : > { %1012 = vst [vmem:[%s1560_s14 + $0x148] sm:$0xff] %v916_v13  ;;  %v797_v14 = vpop.f32.mrf.mxu2  ;;  %v857_v15 = vpop.f32.mrf.mxu3 }
 0x138   : > { %v798_v16 = vadd.f32 %v1548_v40, %v797_v14  ;;  %v858_v17 = vadd.f32 %v1548_v40, %v857_v15  ;;  %v680_v18 = vpop.f32.mrf.mxu0  ;;  %v740_v19 = vpop.f32.mrf.mxu1 }
 0x139   : > { %v681_v20 = vadd.f32 %v1548_v40, %v680_v18  ;;  %v741_v21 = vadd.f32 %v1548_v40, %v740_v19 }
 0x13a   : > { %v940_v22 = vmax.f32 %v798_v16, 0.0  ;;  %v964_v23 = vmax.f32 %v858_v17, 0.0 }
 0x13b   : > { %v893_v24 = vmax.f32 %v681_v20, 0.0  ;;  %v917_v25 = vmax.f32 %v741_v21, 0.0 }
 0x13c   : > { %1036 = vst [vmem:[%s1560_s14 + $0x208] sm:$0xff] %v940_v22 }
 0x13d   : > { %1060 = vst [vmem:[%s1560_s14 + $0x2c8] sm:$0xff] %v964_v23 }
 0x13e   : > { %989 = vst [vmem:[%s1560_s14 + $0x90] sm:$0xff] %v893_v24 }
 0x13f   : > { %1013 = vst [vmem:[%s1560_s14 + $0x150] sm:$0xff] %v917_v25  ;;  %v800_v26 = vpop.f32.mrf.mxu2  ;;  %v860_v27 = vpop.f32.mrf.mxu3 }
 0x140   : > { %v801_v28 = vadd.f32 %v1548_v40, %v800_v26  ;;  %v861_v29 = vadd.f32 %v1548_v40, %v860_v27  ;;  %v682_v30 = vpop.f32.mrf.mxu0  ;;  %v742_v31 = vpop.f32.mrf.mxu1 }
 0x141   : > { %v683_v32 = vadd.f32 %v1548_v40, %v682_v30  ;;  %v743_v33 = vadd.f32 %v1548_v40, %v742_v31 }
 0x142   : > { %v941_v34 = vmax.f32 %v801_v28, 0.0  ;;  %v965_v35 = vmax.f32 %v861_v29, 0.0 }
 0x143   : > { %v894_v36 = vmax.f32 %v683_v32, 0.0  ;;  %v918_v37 = vmax.f32 %v743_v33, 0.0 }
 0x144   : > { %1037 = vst [vmem:[%s1560_s14 + $0x210] sm:$0xff] %v941_v34 }
 0x145   : > { %1061 = vst [vmem:[%s1560_s14 + $0x2d0] sm:$0xff] %v965_v35 }
 0x146   : > { %990 = vst [vmem:[%s1560_s14 + $0x98] sm:$0xff] %v894_v36 }
 0x147   : > { %1014 = vst [vmem:[%s1560_s14 + $0x158] sm:$0xff] %v918_v37  ;;  %v802_v38 = vpop.f32.mrf.mxu2  ;;  %v862_v39 = vpop.f32.mrf.mxu3 }
 0x148   : > { %v803_v41 = vadd.f32 %v1548_v40, %v802_v38  ;;  %v863_v42 = vadd.f32 %v1548_v40, %v862_v39  ;;  %v685_v43 = vpop.f32.mrf.mxu0  ;;  %v745_v44 = vpop.f32.mrf.mxu1 }
 0x149   : > { %v686_v45 = vadd.f32 %v1548_v40, %v685_v43  ;;  %v746_v46 = vadd.f32 %v1548_v40, %v745_v44 }
 0x14a   : > { %v942_v47 = vmax.f32 %v803_v41, 0.0  ;;  %v966_v48 = vmax.f32 %v863_v42, 0.0 }
 0x14b   : > { %v895_v49 = vmax.f32 %v686_v45, 0.0  ;;  %v919_v50 = vmax.f32 %v746_v46, 0.0 }
 0x14c   : > { %1038 = vst [vmem:[%s1560_s14 + $0x218] sm:$0xff] %v942_v47 }
 0x14d   : > { %1062 = vst [vmem:[%s1560_s14 + $0x2d8] sm:$0xff] %v966_v48 }
 0x14e   : > { %991 = vst [vmem:[%s1560_s14 + $0xa0] sm:$0xff] %v895_v49 }
 0x14f   : > { %1015 = vst [vmem:[%s1560_s14 + $0x160] sm:$0xff] %v919_v50  ;;  %v805_v51 = vpop.f32.mrf.mxu2  ;;  %v865_v52 = vpop.f32.mrf.mxu3 }
 0x150   : > { %v806_v53 = vadd.f32 %v1548_v40, %v805_v51  ;;  %v866_v54 = vadd.f32 %v1548_v40, %v865_v52  ;;  %v687_v55 = vpop.f32.mrf.mxu0  ;;  %v747_v56 = vpop.f32.mrf.mxu1 }
 0x151   : > { %v688_v57 = vadd.f32 %v1548_v40, %v687_v55  ;;  %v748_v58 = vadd.f32 %v1548_v40, %v747_v56 }
 0x152   : > { %v943_v59 = vmax.f32 %v806_v53, 0.0  ;;  %v967_v60 = vmax.f32 %v866_v54, 0.0 }
 0x153   : > { %v896_v61 = vmax.f32 %v688_v57, 0.0  ;;  %v920_v62 = vmax.f32 %v748_v58, 0.0 }
 0x154   : > { %1039 = vst [vmem:[%s1560_s14 + $0x220] sm:$0xff] %v943_v59 }
 0x155   : > { %1063 = vst [vmem:[%s1560_s14 + $0x2e0] sm:$0xff] %v967_v60 }
 0x156   : > { %992 = vst [vmem:[%s1560_s14 + $0xa8] sm:$0xff] %v896_v61 }
 0x157   : > { %1016 = vst [vmem:[%s1560_s14 + $0x168] sm:$0xff] %v920_v62  ;;  %v807_v63 = vpop.f32.mrf.mxu2  ;;  %v867_v0 = vpop.f32.mrf.mxu3 }
 0x158   : > { %v808_v1 = vadd.f32 %v1548_v40, %v807_v63  ;;  %v868_v2 = vadd.f32 %v1548_v40, %v867_v0  ;;  %v690_v3 = vpop.f32.mrf.mxu0  ;;  %v750_v4 = vpop.f32.mrf.mxu1 }
 0x159   : > { %v691_v5 = vadd.f32 %v1548_v40, %v690_v3  ;;  %v751_v6 = vadd.f32 %v1548_v40, %v750_v4 }
 0x15a   : > { %v944_v7 = vmax.f32 %v808_v1, 0.0  ;;  %v968_v8 = vmax.f32 %v868_v2, 0.0 }
 0x15b   : > { %v897_v9 = vmax.f32 %v691_v5, 0.0  ;;  %v921_v10 = vmax.f32 %v751_v6, 0.0 }
 0x15c   : > { %1040 = vst [vmem:[%s1560_s14 + $0x228] sm:$0xff] %v944_v7 }
 0x15d   : > { %1064 = vst [vmem:[%s1560_s14 + $0x2e8] sm:$0xff] %v968_v8 }
 0x15e   : > { %993 = vst [vmem:[%s1560_s14 + $0xb0] sm:$0xff] %v897_v9 }
 0x15f   : > { %1017 = vst [vmem:[%s1560_s14 + $0x170] sm:$0xff] %v921_v10  ;;  %v810_v11 = vpop.f32.mrf.mxu2  ;;  %v870_v12 = vpop.f32.mrf.mxu3 }
 0x160   : > { %v811_v13 = vadd.f32 %v1548_v40, %v810_v11  ;;  %v871_v14 = vadd.f32 %v1548_v40, %v870_v12  ;;  %v692_v15 = vpop.f32.mrf.mxu0  ;;  %v752_v16 = vpop.f32.mrf.mxu1 }
 0x161   : > { %v693_v17 = vadd.f32 %v1548_v40, %v692_v15  ;;  %v753_v18 = vadd.f32 %v1548_v40, %v752_v16 }
 0x162   : > { %v945_v19 = vmax.f32 %v811_v13, 0.0  ;;  %v969_v20 = vmax.f32 %v871_v14, 0.0 }
 0x163   : > { %v898_v21 = vmax.f32 %v693_v17, 0.0  ;;  %v922_v22 = vmax.f32 %v753_v18, 0.0 }
 0x164   : > { %1041 = vst [vmem:[%s1560_s14 + $0x230] sm:$0xff] %v945_v19 }
 0x165   : > { %1065 = vst [vmem:[%s1560_s14 + $0x2f0] sm:$0xff] %v969_v20 }
 0x166   : > { %994 = vst [vmem:[%s1560_s14 + $0xb8] sm:$0xff] %v898_v21 }
 0x167   : > { %1018 = vst [vmem:[%s1560_s14 + $0x178] sm:$0xff] %v922_v22  ;;  %v812_v23 = vpop.f32.mrf.mxu2  ;;  %v872_v24 = vpop.f32.mrf.mxu3 }
 0x168   : > { %v813_v25 = vadd.f32 %v1548_v40, %v812_v23  ;;  %v873_v26 = vadd.f32 %v1548_v40, %v872_v24 }
 0x16a   : > { %v946_v27 = vmax.f32 %v813_v25, 0.0  ;;  %v970_v28 = vmax.f32 %v873_v26, 0.0 }
 0x16c   : > { %1042 = vst [vmem:[%s1560_s14 + $0x238] sm:$0xff] %v946_v27 }
 0x16d   : > { %1066 = vst [vmem:[%s1560_s14 + $0x2f8] sm:$0xff] %v970_v28 }
 0x16e PF: > { %s13_s12 = sadd.s32 1, %s1451_s12  }
 0x16f   : > { %p10_p4 = scmp.ge.s32.totalorder %s13_s12, 4  }
 0x171   :  { %12 = sbr.rel (!%p10_p4) target bundleno = 1 (0x1), region = 62 }

// kernel: cnn2fc1_forward.4
= control target key start
LH: loop header
LB: loop body
LE: loop exit
PB: predicated region body
PF: predicated region fallthrough
CT: control target
= control target key end

     0   :  { %s4345_s12 = smov 0   ;;  %s5263_s0 = inlined_call_operand.vmem [shape: bf16[384,1664], index: 0, kind: input, shape index: {}]   ;;  %s5264_s1 = inlined_call_operand.vmem [shape: bf16[1664,128], index: 1, kind: input, shape index: {}]   ;;  %s5265_s2 = inlined_call_operand.vmem [shape: f32[1,128], index: 2, kind: input, shape index: {}]   ;;  %s5266_s3 = inlined_call_operand.vmem [shape: f32[384,128], index: 3, kind: output, shape index: {}]  }
   0x1 LB: > { %s2974_s13 = sadd.s32 4294967295, %s4323_s12   ;;  %p2978_p0 = scmp.ge.s32.totalorder %s4323_s12, 1  ;;  %s4323_s12 = sphi %s4345_s12, %s13_s12  }
   0x2   : > { %p139_p1 = scmp.lt.s32.totalorder %s4323_s12, 3 }
   0x4   : > { %p140_p2 = pnand %p2978_p0, %p139_p1 }
   0x5   : > { %s164_s20 = smul.u32 (!%p140_p2), 24, %s2974_s13 }
   0x6   : > { %143 = sbr.rel (%p140_p2) target bundleno = 800 (0x320), region = 32 }
   0x7   : > { %p165_p3 = scmp.lt.s32.totalorder (!%p140_p2), %s164_s20, 47 }
   0xb   : > { %v4186_v0 = vld [vmem:[%s5264_s1 + $0x38] sm:$0xff]  ;;  %v4185_v1 = vld [vmem:[%s5264_s1 + $0x30] sm:$0xff]  ;;  %v4184_v2 = vld [vmem:[%s5264_s1 + $0x28] sm:$0xff]  ;;  %s5268_s20 = smov (!%p165_p3, %s164_s20), 47 }
   0xc   : > { %4283 = vmatpush.bf16.msra.mxu1 %v4186_v0  ;;  %4284 = vmatpush.bf16.msra.mxu2 %v4186_v0  ;;  %v4183_v3 = vld [vmem:[%s5264_s1 + $0x20] sm:$0xff]  ;;  %v4182_v4 = vld [vmem:[%s5264_s1 + $0x18] sm:$0xff]  ;;  %v4181_v5 = vld [vmem:[%s5264_s1 + $0x10] sm:$0xff]  ;;  %s4307_s27 = smul.u32 52, %s5268_s20  ;;  %s2980_s10 = sshll.u32 %s5268_s20, 3 }
   0xd   : > { %4285 = vmatpush.bf16.msra.mxu3 %v4186_v0  ;;  %1973 = vmatpush.bf16.msra.mxu0 %v4186_v0  ;;  %v4180_v6 = vld [vmem:[%s5264_s1 + $0x8] sm:$0xff]  ;;  %v4179_v7 = vld [vmem:[%s5264_s1] sm:$0xff]  ;;  %v4202_v16 = vld [vmem:[%s5264_s1 + $0xb8] sm:$0xff]  ;;  %s5190_s14 = scalar_lea.vmem %s5266_s3, %s2980_s10 }
   0xe   : > { %s4380_s5 = scalar_lea.vmem %s5263_s0, %s4307_s27  ;;  %v4210_v17 = vld [vmem:[%s5264_s1 + $0xf8] sm:$0xff]  ;;  %v4201_v24 = vld [vmem:[%s5264_s1 + $0xb0] sm:$0xff]  ;;  %v4200_v28 = vld [vmem:[%s5264_s1 + $0xa8] sm:$0xff] }
   0xf   : > { %v3139_v8 = vld [vmem:[%s4380_s5 + $0x138] sm:$0xf]  ;;  %v4068_v9 = vld [vmem:[%s4380_s5 + $0x168] sm:$0xf0]  ;;  %v3295_v10 = vld [vmem:[%s4380_s5 + $0x270] sm:$0xf] }
  0x10   : > { %4286 = vmatpush.bf16.msra.mxu1 %v4185_v1  ;;  %4287 = vmatpush.bf16.msra.mxu2 %v4185_v1  ;;  %v4107_v11 = vld [vmem:[%s4380_s5 + $0x2a0] sm:$0xf0]  ;;  %v3451_v12 = vld [vmem:[%s4380_s5 + $0x3a8] sm:$0xf]  ;;  %v4146_v13 = vld [vmem:[%s4380_s5 + $0x3d8] sm:$0xf0]  ;;  %v3140_v18 = vor.u32 %v4068_v9, %v3139_v8 }
  0x11   : > { %4288 = vmatpush.bf16.msra.mxu3 %v4185_v1  ;;  %1974 = vmatpush.bf16.msra.mxu0 %v4185_v1  ;;  %v2983_v14 = vld [vmem:[%s4380_s5] sm:$0xf]  ;;  %v4029_v15 = vld [vmem:[%s4380_s5 + $0x30] sm:$0xf0]  ;;  %v3296_v19 = vor.u32 %v4107_v11, %v3295_v10  ;;  %v3452_v20 = vor.u32 %v4146_v13, %v3451_v12  ;;  %v4194_v22 = vld [vmem:[%s5264_s1 + $0x78] sm:$0xff] }
  0x12   : > { %v2984_v21 = vor.u32 %v4029_v15, %v2983_v14  ;;  %v4218_v23 = vld [vmem:[%s5264_s1 + $0x138] sm:$0xff]  ;;  %v4209_v25 = vld [vmem:[%s5264_s1 + $0xf0] sm:$0xff]  ;;  %v4208_v29 = vld [vmem:[%s5264_s1 + $0xe8] sm:$0xff] }
  0x13   : > { %v4193_v26 = vld [vmem:[%s5264_s1 + $0x70] sm:$0xff]  ;;  %v4192_v30 = vld [vmem:[%s5264_s1 + $0x68] sm:$0xff]  ;;  %v3191_v32 = vld [vmem:[%s4380_s5 + $0x1a0] sm:$0xf] }
  0x14   : > { %4289 = vmatpush.bf16.msra.mxu1 %v4184_v2  ;;  %4290 = vmatpush.bf16.msra.mxu2 %v4184_v2  ;;  %v4217_v27 = vld [vmem:[%s5264_s1 + $0x130] sm:$0xff]  ;;  %v4216_v31 = vld [vmem:[%s5264_s1 + $0x128] sm:$0xff]  ;;  %v4199_v33 = vld [vmem:[%s5264_s1 + $0xa0] sm:$0xff] }
  0x15   : > { %4291 = vmatpush.bf16.msra.mxu3 %v4184_v2  ;;  %1975 = vmatpush.bf16.msra.mxu0 %v4184_v2  ;;  %v4207_v34 = vld [vmem:[%s5264_s1 + $0xe0] sm:$0xff]  ;;  %v4081_v35 = vld [vmem:[%s4380_s5 + $0x1d0] sm:$0xf0]  ;;  %v3347_v36 = vld [vmem:[%s4380_s5 + $0x2d8] sm:$0xf] }
  0x16   : > { %v4120_v37 = vld [vmem:[%s4380_s5 + $0x308] sm:$0xf0]  ;;  %v3503_v38 = vld [vmem:[%s4380_s5 + $0x410] sm:$0xf]  ;;  %v4159_v39 = vld [vmem:[%s4380_s5 + $0x440] sm:$0xf0]  ;;  %v3192_v46 = vor.u32 %v4081_v35, %v3191_v32 }
  0x17   : > { %v3035_v40 = vld [vmem:[%s4380_s5 + $0x68] sm:$0xf]  ;;  %v4042_v41 = vld [vmem:[%s4380_s5 + $0x98] sm:$0xf0]  ;;  %v4191_v42 = vld [vmem:[%s5264_s1 + $0x60] sm:$0xff]  ;;  %v3348_v47 = vor.u32 %v4120_v37, %v3347_v36  ;;  %v3504_v48 = vor.u32 %v4159_v39, %v3503_v38 }
  0x18   : > { %4292 = vmatpush.bf16.msra.mxu1 %v4183_v3  ;;  %4293 = vmatpush.bf16.msra.mxu2 %v4183_v3  ;;  %v4215_v43 = vld [vmem:[%s5264_s1 + $0x120] sm:$0xff]  ;;  %v4198_v44 = vld [vmem:[%s5264_s1 + $0x98] sm:$0xff]  ;;  %v3036_v49 = vor.u32 %v4042_v41, %v3035_v40  ;;  %v4197_v52 = vld [vmem:[%s5264_s1 + $0x90] sm:$0xff] }
  0x19   : > { %4294 = vmatpush.bf16.msra.mxu3 %v4183_v3  ;;  %1976 = vmatpush.bf16.msra.mxu0 %v4183_v3  ;;  %v4206_v45 = vld [vmem:[%s5264_s1 + $0xd8] sm:$0xff]  ;;  %v4205_v53 = vld [vmem:[%s5264_s1 + $0xd0] sm:$0xff]  ;;  %v4196_v56 = vld [vmem:[%s5264_s1 + $0x88] sm:$0xff] }
  0x1a   : > { %v4190_v50 = vld [vmem:[%s5264_s1 + $0x58] sm:$0xff]  ;;  %v4189_v54 = vld [vmem:[%s5264_s1 + $0x50] sm:$0xff]  ;;  %v4204_v57 = vld [vmem:[%s5264_s1 + $0xc8] sm:$0xff] }
  0x1b   : > { %v4214_v51 = vld [vmem:[%s5264_s1 + $0x118] sm:$0xff]  ;;  %v4213_v55 = vld [vmem:[%s5264_s1 + $0x110] sm:$0xff]  ;;  %v4188_v58 = vld [vmem:[%s5264_s1 + $0x48] sm:$0xff] }
  0x1c   : > { %4295 = vmatpush.bf16.msra.mxu1 %v4182_v4  ;;  %4296 = vmatpush.bf16.msra.mxu2 %v4182_v4  ;;  %v4212_v59 = vld [vmem:[%s5264_s1 + $0x108] sm:$0xff]  ;;  %v4094_v61 = vld [vmem:[%s4380_s5 + $0x238] sm:$0xf0]  ;;  %v3399_v62 = vld [vmem:[%s4380_s5 + $0x340] sm:$0xf] }
  0x1d   : > { %4297 = vmatpush.bf16.msra.mxu3 %v4182_v4  ;;  %1977 = vmatpush.bf16.msra.mxu0 %v4182_v4  ;;  %v3243_v60 = vld [vmem:[%s4380_s5 + $0x208] sm:$0xf]  ;;  %v4195_v63 = vld [vmem:[%s5264_s1 + $0x80] sm:$0xff]  ;;  %v4133_v1 = vld [vmem:[%s4380_s5 + $0x370] sm:$0xf0] }
  0x1e   : > { %v4203_v0 = vld [vmem:[%s5264_s1 + $0xc0] sm:$0xff]  ;;  %v4234_v2 = vld [vmem:[%s5264_s1 + $0x1b8] sm:$0xff]  ;;  %v3244_v12 = vor.u32 %v4094_v61, %v3243_v60  ;;  %v3400_v13 = vor.u32 %v4133_v1, %v3399_v62  ;;  %v4036_v32 = vld [vmem:[%s4380_s5 + $0x6c] sm:$0xf] }
  0x1f   : > { %v4242_v3 = vld [vmem:[%s5264_s1 + $0x1f8] sm:$0xff]  ;;  %v4187_v8 = vld [vmem:[%s5264_s1 + $0x40] sm:$0xff]  ;;  %v4037_v36 = vld [vmem:[%s4380_s5 + $0x74] sm:$0xf] }
  0x20   : > { %4298 = vmatpush.bf16.msra.mxu1 %v4181_v5  ;;  %4299 = vmatpush.bf16.msra.mxu2 %v4181_v5  ;;  %v3555_v4 = vld [vmem:[%s4380_s5 + $0x478] sm:$0xf]  ;;  %v4211_v9 = vld [vmem:[%s5264_s1 + $0x100] sm:$0xff]  ;;  %v3045_v37 = vld [vmem:[%s4380_s5 + $0xa4] sm:$0xf0] }
  0x21   : > { %4300 = vmatpush.bf16.msra.mxu3 %v4181_v5  ;;  %1978 = vmatpush.bf16.msra.mxu0 %v4181_v5  ;;  %v4172_v5 = vld [vmem:[%s4380_s5 + $0x4a8] sm:$0xf0]  ;;  %v4226_v10 = vld [vmem:[%s5264_s1 + $0x178] sm:$0xff]  ;;  %v4043_v35 = vld [vmem:[%s4380_s5 + $0xa0] sm:$0xf0] }
  0x22   : > { %v4250_v11 = vld [vmem:[%s5264_s1 + $0x238] sm:$0xff]  ;;  %v3556_v14 = vor.u32 %v4172_v5, %v3555_v4  ;;  %v4044_v39 = vld [vmem:[%s4380_s5 + $0xa8] sm:$0xf0]  ;;  %v4231_v60 = vld [vmem:[%s5264_s1 + $0x1a0] sm:$0xff] }
  0x23   : > { %v3051_v38 = vld [vmem:[%s4380_s5 + $0x78] sm:$0xf]  ;;  %v4239_v61 = vld [vmem:[%s5264_s1 + $0x1e0] sm:$0xff]  ;;  %v3155_v5 = vld [vmem:[%s4380_s5 + $0x148] sm:$0xf] }
  0x24   : > { %4301 = vmatpush.bf16.msra.mxu1 %v4180_v6  ;;  %4302 = vmatpush.bf16.msra.mxu2 %v4180_v6  ;;  %v4223_v62 = vld [vmem:[%s5264_s1 + $0x160] sm:$0xff]  ;;  %v3149_v4 = vld [vmem:[%s4380_s5 + $0x174] sm:$0xf0] }
  0x25   : > { %4303 = vmatpush.bf16.msra.mxu3 %v4180_v6  ;;  %1979 = vmatpush.bf16.msra.mxu0 %v4180_v6  ;;  %v3087_v6 = vld [vmem:[%s4380_s5 + $0xd0] sm:$0xf]  ;;  %v3147_v1 = vld [vmem:[%s4380_s5 + $0x140] sm:$0xf] }
  0x28   : > { %4304 = vmatpush.bf16.msra.mxu1 %v4179_v7  ;;  %4305 = vmatpush.bf16.msra.mxu2 %v4179_v7 }
  0x29   : > { %4306 = vmatpush.bf16.msra.mxu3 %v4179_v7  ;;  %1980 = vmatpush.bf16.msra.mxu0 %v4179_v7  ;;  %v4055_v7 = vld [vmem:[%s4380_s5 + $0x100] sm:$0xf0] }
  0x2a   : > { %v3088_v15 = vor.u32 %v4055_v7, %v3087_v6  ;;  %v4070_v6 = vld [vmem:[%s4380_s5 + $0x178] sm:$0xf0] }
  0x2b   : > { %1996 = vmatmul.bf16.vlgmr.msra.gmra.mxu1 %v3140_v18  ;;  %2011 = vmatmul.bf16.vlgmr.msra.gmra.mxu2 %v3296_v19  ;;  %v4225_v18 = vld [vmem:[%s5264_s1 + $0x170] sm:$0xff]  ;;  %v4023_v19 = vld [vmem:[%s4380_s5 + $0x4] sm:$0xf] }
  0x2c   : > { %2111 = vmatpush.bf16.msrb.mxu2 %v4202_v16  ;;  %2026 = vmatmul.bf16.vlgmr.msra.gmra.mxu3 %v3452_v20  ;;  %v4233_v16 = vld [vmem:[%s5264_s1 + $0x1b0] sm:$0xff]  ;;  %v2985_v20 = vld [vmem:[%s4380_s5 + $0x34] sm:$0xf0] }
  0x2d   : > { %2180 = vmatpush.bf16.msrb.mxu3 %v4210_v17  ;;  %1981 = vmatmul.bf16.vlgmr.msra.gmra.mxu0 %v2984_v21  ;;  %v4241_v17 = vld [vmem:[%s5264_s1 + $0x1f0] sm:$0xff]  ;;  %v2991_v21 = vld [vmem:[%s4380_s5 + $0x8] sm:$0xf] }
  0x2e   : > { %2042 = vmatpush.bf16.msrb.mxu1 %v4194_v22  ;;  %2249 = vmatpush.bf16.msrb.mxu0 %v4218_v23  ;;  %v4030_v22 = vld [vmem:[%s4380_s5 + $0x38] sm:$0xf0]  ;;  %v4024_v23 = vld [vmem:[%s4380_s5 + $0xc] sm:$0xf] }
  0x30   : > { %2112 = vmatpush.bf16.msrb.mxu2 %v4201_v24  ;;  %v2993_v24 = vld [vmem:[%s4380_s5 + $0x3c] sm:$0xf0] }
  0x31   : > { %2181 = vmatpush.bf16.msrb.mxu3 %v4209_v25  ;;  %v2999_v25 = vld [vmem:[%s4380_s5 + $0x10] sm:$0xf] }
  0x32   : > { %2043 = vmatpush.bf16.msrb.mxu1 %v4193_v26  ;;  %2250 = vmatpush.bf16.msrb.mxu0 %v4217_v27  ;;  %v4031_v26 = vld [vmem:[%s4380_s5 + $0x40] sm:$0xf0]  ;;  %v2988_v27 = vor.u32 %v4023_v19, %v2985_v20 }
  0x33   : > { %v4083_v19 = vld [vmem:[%s4380_s5 + $0x1e0] sm:$0xf0] }
  0x34   : > { %2113 = vmatpush.bf16.msrb.mxu2 %v4200_v28  ;;  %v2992_v28 = vor.u32 %v4030_v22, %v2991_v21 }
  0x35   : > { %2182 = vmatpush.bf16.msrb.mxu3 %v4208_v29  ;;  %v2996_v29 = vor.u32 %v4024_v23, %v2993_v24  ;;  %v4230_v24 = vld [vmem:[%s5264_s1 + $0x198] sm:$0xff] }
  0x36   : > { %2044 = vmatpush.bf16.msrb.mxu1 %v4192_v30  ;;  %2251 = vmatpush.bf16.msrb.mxu0 %v4216_v31  ;;  %v3000_v30 = vor.u32 %v4031_v26, %v2999_v25  ;;  %v4249_v31 = vld [vmem:[%s5264_s1 + $0x230] sm:$0xff]  ;;  %v4238_v25 = vld [vmem:[%s5264_s1 + $0x1d8] sm:$0xff] }
  0x37   : > { %v4222_v26 = vld [vmem:[%s5264_s1 + $0x158] sm:$0xff] }
  0x38   : > { %2114 = vmatpush.bf16.msrb.mxu2 %v4199_v33  ;;  %v3037_v33 = vld [vmem:[%s4380_s5 + $0x9c] sm:$0xf0] }
  0x39   : > { %2183 = vmatpush.bf16.msrb.mxu3 %v4207_v34  ;;  %v3043_v34 = vld [vmem:[%s4380_s5 + $0x70] sm:$0xf]  ;;  %v3040_v40 = vor.u32 %v4036_v32, %v3037_v33  ;;  %v4089_v32 = vld [vmem:[%s4380_s5 + $0x214] sm:$0xf]  ;;  %v3253_v33 = vld [vmem:[%s4380_s5 + $0x244] sm:$0xf0] }
  0x3a   : > { %2045 = vmatpush.bf16.msrb.mxu1 %v4191_v42  ;;  %2252 = vmatpush.bf16.msrb.mxu0 %v4215_v43  ;;  %v3044_v41 = vor.u32 %v4043_v35, %v3043_v34  ;;  %v3048_v42 = vor.u32 %v4037_v36, %v3045_v37  ;;  %v3052_v43 = vor.u32 %v4044_v39, %v3051_v38  ;;  %v3259_v34 = vld [vmem:[%s4380_s5 + $0x218] sm:$0xf]  ;;  %v4096_v35 = vld [vmem:[%s4380_s5 + $0x248] sm:$0xf0] }
  0x3b   : > { %2001 = vmatmul.bf16.gmra.mxu1 %v3192_v46  ;;  %2016 = vmatmul.bf16.gmra.mxu2 %v3348_v47  ;;  %v4224_v46 = vld [vmem:[%s5264_s1 + $0x168] sm:$0xff]  ;;  %v3256_v39 = vor.u32 %v4089_v32, %v3253_v33 }
  0x3c   : > { %2115 = vmatpush.bf16.msrb.mxu2 %v4198_v44  ;;  %2031 = vmatmul.bf16.gmra.mxu3 %v3504_v48  ;;  %v4232_v44 = vld [vmem:[%s5264_s1 + $0x1a8] sm:$0xff]  ;;  %v4049_v48 = vld [vmem:[%s4380_s5 + $0xd4] sm:$0xf] }
  0x3d   : > { %2184 = vmatpush.bf16.msrb.mxu3 %v4206_v45  ;;  %1986 = vmatmul.bf16.gmra.mxu0 %v3036_v49  ;;  %v4240_v45 = vld [vmem:[%s5264_s1 + $0x1e8] sm:$0xff] }
  0x3e   : > { %2046 = vmatpush.bf16.msrb.mxu1 %v4190_v50  ;;  %2253 = vmatpush.bf16.msrb.mxu0 %v4214_v51  ;;  %v4248_v47 = vld [vmem:[%s5264_s1 + $0x228] sm:$0xff]  ;;  %v3095_v50 = vld [vmem:[%s4380_s5 + $0xd8] sm:$0xf] }
  0x3f   : > { %v3089_v49 = vld [vmem:[%s4380_s5 + $0x104] sm:$0xf0]  ;;  %v4056_v51 = vld [vmem:[%s4380_s5 + $0x108] sm:$0xf0] }
  0x40   : > { %2116 = vmatpush.bf16.msrb.mxu2 %v4197_v52  ;;  %v4050_v52 = vld [vmem:[%s4380_s5 + $0xdc] sm:$0xf] }
  0x41   : > { %2185 = vmatpush.bf16.msrb.mxu3 %v4205_v53  ;;  %v3097_v53 = vld [vmem:[%s4380_s5 + $0x10c] sm:$0xf0] }
  0x42   : > { %2047 = vmatpush.bf16.msrb.mxu1 %v4189_v54  ;;  %2254 = vmatpush.bf16.msrb.mxu0 %v4213_v55  ;;  %v3103_v54 = vld [vmem:[%s4380_s5 + $0xe0] sm:$0xf]  ;;  %v4057_v55 = vld [vmem:[%s4380_s5 + $0x110] sm:$0xf0] }
  0x44   : > { %2117 = vmatpush.bf16.msrb.mxu2 %v4196_v56  ;;  %v3092_v56 = vor.u32 %v4049_v48, %v3089_v49  ;;  %v4229_v49 = vld [vmem:[%s5264_s1 + $0x190] sm:$0xff] }
  0x45   : > { %2186 = vmatpush.bf16.msrb.mxu3 %v4204_v57  ;;  %v3096_v57 = vor.u32 %v4056_v51, %v3095_v50  ;;  %v4237_v50 = vld [vmem:[%s5264_s1 + $0x1d0] sm:$0xff] }
  0x46   : > { %2048 = vmatpush.bf16.msrb.mxu1 %v4188_v58  ;;  %2255 = vmatpush.bf16.msrb.mxu0 %v4212_v59  ;;  %v3100_v58 = vor.u32 %v4050_v52, %v3097_v53  ;;  %v3104_v59 = vor.u32 %v4057_v55, %v3103_v54  ;;  %v4101_v51 = vld [vmem:[%s4380_s5 + $0x274] sm:$0xf]  ;;  %v3297_v52 = vld [vmem:[%s4380_s5 + $0x2a4] sm:$0xf0]  ;;  %v3303_v53 = vld [vmem:[%s4380_s5 + $0x278] sm:$0xf] }
  0x47   : > { %v4108_v54 = vld [vmem:[%s4380_s5 + $0x2a8] sm:$0xf0]  ;;  %v4102_v55 = vld [vmem:[%s4380_s5 + $0x27c] sm:$0xf] }
  0x48   : > { %2118 = vmatpush.bf16.msrb.mxu2 %v4195_v63  ;;  %v4062_v63 = vld [vmem:[%s4380_s5 + $0x13c] sm:$0xf] }
  0x49   : > { %2187 = vmatpush.bf16.msrb.mxu3 %v4203_v0  ;;  %v3141_v0 = vld [vmem:[%s4380_s5 + $0x16c] sm:$0xf0] }
  0x4a   : > { %2049 = vmatpush.bf16.msrb.mxu1 %v4187_v8  ;;  %2256 = vmatpush.bf16.msrb.mxu0 %v4211_v9  ;;  %v3144_v7 = vor.u32 %v4062_v63, %v3141_v0  ;;  %v3304_v63 = vor.u32 %v4108_v54, %v3303_v53  ;;  %v3401_v53 = vld [vmem:[%s4380_s5 + $0x374] sm:$0xf0]  ;;  %v3407_v54 = vld [vmem:[%s4380_s5 + $0x348] sm:$0xf] }
  0x4b   : > { %2006 = vmatmul.bf16.gmra.mxu1 %v3244_v12  ;;  %2021 = vmatmul.bf16.gmra.mxu2 %v3400_v13  ;;  %v4075_v12 = vld [vmem:[%s4380_s5 + $0x1a4] sm:$0xf]  ;;  %v3193_v13 = vld [vmem:[%s4380_s5 + $0x1d4] sm:$0xf0] }
  0x4c   : > { %2387 = vmatpush.bf16.msra.mxu2 %v4234_v2  ;;  %2036 = vmatmul.bf16.gmra.mxu3 %v3556_v14  ;;  %v4069_v2 = vld [vmem:[%s4380_s5 + $0x170] sm:$0xf0]  ;;  %v3199_v14 = vld [vmem:[%s4380_s5 + $0x1a8] sm:$0xf]  ;;  %v3196_v20 = vor.u32 %v4075_v12, %v3193_v13 }
  0x4d   : > { %2456 = vmatpush.bf16.msra.mxu3 %v4242_v3  ;;  %1991 = vmatmul.bf16.gmra.mxu0 %v3088_v15  ;;  %v4063_v3 = vld [vmem:[%s4380_s5 + $0x144] sm:$0xf]  ;;  %v3148_v8 = vor.u32 %v4069_v2, %v3147_v1  ;;  %v4082_v15 = vld [vmem:[%s4380_s5 + $0x1d8] sm:$0xf0] }
  0x4e   : > { %2318 = vmatpush.bf16.msra.mxu1 %v4226_v10  ;;  %2525 = vmatpush.bf16.msra.mxu0 %v4250_v11  ;;  %v3152_v9 = vor.u32 %v4063_v3, %v3149_v4  ;;  %v3156_v10 = vor.u32 %v4070_v6, %v3155_v5  ;;  %v4247_v11 = vld [vmem:[%s5264_s1 + $0x220] sm:$0xff]  ;;  %v3200_v21 = vor.u32 %v4082_v15, %v3199_v14  ;;  %v4221_v4 = vld [vmem:[%s5264_s1 + $0x150] sm:$0xff]  ;;  %v4114_v15 = vld [vmem:[%s4380_s5 + $0x2dc] sm:$0xf] }
  0x50   : > { %2388 = vmatpush.bf16.msra.mxu2 %v4233_v16  ;;  %v4076_v16 = vld [vmem:[%s4380_s5 + $0x1ac] sm:$0xf] }
  0x51   : > { %2457 = vmatpush.bf16.msra.mxu3 %v4241_v17  ;;  %v3201_v17 = vld [vmem:[%s4380_s5 + $0x1dc] sm:$0xf0] }
  0x52   : > { %2319 = vmatpush.bf16.msra.mxu1 %v4225_v18  ;;  %2526 = vmatpush.bf16.msra.mxu0 %v4249_v31  ;;  %v3207_v18 = vld [vmem:[%s4380_s5 + $0x1b0] sm:$0xf]  ;;  %v3204_v22 = vor.u32 %v4076_v16, %v3201_v17  ;;  %v4095_v31 = vld [vmem:[%s4380_s5 + $0x240] sm:$0xf0]  ;;  %v3355_v17 = vld [vmem:[%s4380_s5 + $0x2e0] sm:$0xf] }
  0x53   : > { %v3208_v23 = vor.u32 %v4083_v19, %v3207_v18  ;;  %v3349_v16 = vld [vmem:[%s4380_s5 + $0x30c] sm:$0xf0]  ;;  %v4121_v18 = vld [vmem:[%s4380_s5 + $0x310] sm:$0xf0]  ;;  %v4115_v19 = vld [vmem:[%s4380_s5 + $0x2e4] sm:$0xf] }
  0x54   : > { %2389 = vmatpush.bf16.msra.mxu2 %v4232_v44 }
  0x55   : > { %2458 = vmatpush.bf16.msra.mxu3 %v4240_v45 }
  0x56   : > { %2320 = vmatpush.bf16.msra.mxu1 %v4224_v46  ;;  %2527 = vmatpush.bf16.msra.mxu0 %v4248_v47 }
  0x58   : > { %2390 = vmatpush.bf16.msra.mxu2 %v4231_v60 }
  0x59   : > { %2459 = vmatpush.bf16.msra.mxu3 %v4239_v61 }
  0x5a   : > { %2321 = vmatpush.bf16.msra.mxu1 %v4223_v62  ;;  %2528 = vmatpush.bf16.msra.mxu0 %v4247_v11  ;;  %v3300_v62 = vor.u32 %v4101_v51, %v3297_v52  ;;  %v4244_v51 = vld [vmem:[%s5264_s1 + $0x208] sm:$0xff]  ;;  %v4127_v52 = vld [vmem:[%s4380_s5 + $0x344] sm:$0xf] }
  0x5b   : > { %2050 = vmatmul.bf16.vlgmr.msrb.gmra.mxu1 %v2988_v27  ;;  %2119 = vmatmul.bf16.vlgmr.msrb.gmra.mxu2 %v2992_v28  ;;  %v4246_v27 = vld [vmem:[%s5264_s1 + $0x218] sm:$0xff]  ;;  %v4088_v28 = vld [vmem:[%s4380_s5 + $0x20c] sm:$0xf] }
  0x5c   : > { %2188 = vmatmul.bf16.vlgmr.msrb.gmra.mxu3 %v2996_v29  ;;  %2391 = vmatpush.bf16.msra.mxu2 %v4230_v24  ;;  %v3245_v29 = vld [vmem:[%s4380_s5 + $0x23c] sm:$0xf0] }
  0x5d   : > { %2257 = vmatmul.bf16.vlgmr.msrb.gmra.mxu0 %v3000_v30  ;;  %2460 = vmatpush.bf16.msra.mxu3 %v4238_v25  ;;  %v3251_v30 = vld [vmem:[%s4380_s5 + $0x210] sm:$0xf]  ;;  %v3248_v36 = vor.u32 %v4088_v28, %v3245_v29 }
  0x5e   : > { %2322 = vmatpush.bf16.msra.mxu1 %v4222_v26  ;;  %2529 = vmatpush.bf16.msra.mxu0 %v4246_v27  ;;  %v3252_v37 = vor.u32 %v4095_v31, %v3251_v30  ;;  %v3352_v26 = vor.u32 %v4114_v15, %v3349_v16  ;;  %v3356_v27 = vor.u32 %v4121_v18, %v3355_v17 }
  0x60   : > { %2392 = vmatpush.bf16.msra.mxu2 %v4229_v49 }
  0x61   : > { %2461 = vmatpush.bf16.msra.mxu3 %v4237_v50  ;;  %v4220_v50 = vld [vmem:[%s5264_s1 + $0x148] sm:$0xff] }
  0x62   : > { %2323 = vmatpush.bf16.msra.mxu1 %v4221_v4 }
  0x66   : > { %2324 = vmatpush.bf16.msra.mxu1 %v4220_v50 }
  0x6b   : > { %2055 = vmatmul.bf16.gmra.mxu1 %v3040_v40  ;;  %2124 = vmatmul.bf16.gmra.mxu2 %v3044_v41  ;;  %v3260_v40 = vor.u32 %v4096_v35, %v3259_v34  ;;  %v4228_v34 = vld [vmem:[%s5264_s1 + $0x188] sm:$0xff] }
  0x6c   : > { %2193 = vmatmul.bf16.gmra.mxu3 %v3048_v42  ;;  %v4620_v42 = vld [vmem:[%s5265_s2] ss:$0 sm:$0xff]  ;;  %v4236_v35 = vld [vmem:[%s5264_s1 + $0x1c8] sm:$0xff]  ;;  %2393 = vmatpush.bf16.msra.mxu2 %v4228_v34 }
  0x6d   : > { %2262 = vmatmul.bf16.gmra.mxu0 %v3052_v43  ;;  %2462 = vmatpush.bf16.msra.mxu3 %v4236_v35  ;;  %v3461_v34 = vld [vmem:[%s4380_s5 + $0x3e4] sm:$0xf0]  ;;  %v3467_v35 = vld [vmem:[%s4380_s5 + $0x3b8] sm:$0xf] }
  0x7b   : > { %2060 = vmatmul.bf16.gmra.mxu1 %v3092_v56  ;;  %2129 = vmatmul.bf16.gmra.mxu2 %v3096_v57  ;;  %v3305_v56 = vld [vmem:[%s4380_s5 + $0x2ac] sm:$0xf0]  ;;  %v3311_v57 = vld [vmem:[%s4380_s5 + $0x280] sm:$0xf] }
  0x7c   : > { %2198 = vmatmul.bf16.gmra.mxu3 %v3100_v58  ;;  %v4109_v58 = vld [vmem:[%s4380_s5 + $0x2b0] sm:$0xf0]  ;;  %v3308_v2 = vor.u32 %v4102_v55, %v3305_v56  ;;  %v4134_v55 = vld [vmem:[%s4380_s5 + $0x378] sm:$0xf0]  ;;  %v4128_v56 = vld [vmem:[%s4380_s5 + $0x34c] sm:$0xf] }
  0x7d   : > { %2267 = vmatmul.bf16.gmra.mxu0 %v3104_v59  ;;  %v3312_v3 = vor.u32 %v4109_v58, %v3311_v57  ;;  %v3409_v57 = vld [vmem:[%s4380_s5 + $0x37c] sm:$0xf0]  ;;  %v3415_v58 = vld [vmem:[%s4380_s5 + $0x350] sm:$0xf] }
  0x8b   : > { %2065 = vmatmul.bf16.gmra.mxu1 %v3144_v7  ;;  %2134 = vmatmul.bf16.gmra.mxu2 %v3148_v8  ;;  %v4245_v7 = vld [vmem:[%s5264_s1 + $0x210] sm:$0xff] }
  0x8c   : > { %2203 = vmatmul.bf16.gmra.mxu3 %v3152_v9  ;;  %2530 = vmatpush.bf16.msra.mxu0 %v4245_v7 }
  0x8d   : > { %2272 = vmatmul.bf16.gmra.mxu0 %v3156_v10 }
  0x90   : > { %2531 = vmatpush.bf16.msra.mxu0 %v4244_v51 }
  0x9b   : > { %2070 = vmatmul.bf16.gmra.mxu1 %v3196_v20  ;;  %2139 = vmatmul.bf16.gmra.mxu2 %v3200_v21  ;;  %v3357_v20 = vld [vmem:[%s4380_s5 + $0x314] sm:$0xf0]  ;;  %v3363_v21 = vld [vmem:[%s4380_s5 + $0x2e8] sm:$0xf] }
  0x9c   : > { %2208 = vmatmul.bf16.gmra.mxu3 %v3204_v22  ;;  %v4122_v22 = vld [vmem:[%s4380_s5 + $0x318] sm:$0xf0]  ;;  %v3360_v30 = vor.u32 %v4115_v19, %v3357_v20 }
  0x9d   : > { %2277 = vmatmul.bf16.gmra.mxu0 %v3208_v23  ;;  %v3364_v31 = vor.u32 %v4122_v22, %v3363_v21 }
  0xa8   : > { %v4613_v38 = vpop.f32.mrf.mxu1 }
  0xaa   : > { %v4615_v41 = vpop.f32.mrf.mxu0 }
  0xab   : > { %2075 = vmatmul.bf16.gmra.mxu1 %v3248_v36  ;;  %2144 = vmatmul.bf16.gmra.mxu2 %v3252_v37 }
  0xac   : > { %2213 = vmatmul.bf16.gmra.mxu3 %v3256_v39 }
  0xad   : > { %2282 = vmatmul.bf16.gmra.mxu0 %v3260_v40 }
  0xae   : > { %v2012_v43 = vpop.f32.mrf.mxu2 }
  0xaf   : > { %v4623_v44 = vadd.f32 %v4620_v42, %v2012_v43  ;;  %v2027_v45 = vpop.f32.mrf.mxu3 }
  0xb0   : > { %v4626_v46 = vadd.f32 %v4620_v42, %v2027_v45  ;;  %v4628_v47 = vpop.f32.mrf.mxu1 }
  0xb2   : > { %v4630_v48 = vpop.f32.mrf.mxu0 }
  0xb3   : > { %v1985_v16 = vadd.f32 %v4620_v42, %v4630_v48  ;;  %v3453_v48 = vld [vmem:[%s4380_s5 + $0x3dc] sm:$0xf0] }
  0xb6   : > { %v2014_v59 = vpop.f32.mrf.mxu2 }
  0xb7   : > { %v4647_v60 = vadd.f32 %v4620_v42, %v2014_v59  ;;  %v2029_v61 = vpop.f32.mrf.mxu3  ;;  %v4135_v59 = vld [vmem:[%s4380_s5 + $0x380] sm:$0xf0] }
  0xb8   : > { %v4650_v0 = vadd.f32 %v4620_v42, %v2029_v61  ;;  %v2002_v1 = vpop.f32.mrf.mxu1 }
  0xb9   : > { %v4656_v5 = vadd.f32 %v4620_v42, %v2002_v1 }
  0xba   : > { %v4658_v6 = vpop.f32.mrf.mxu0 }
  0xbb   : > { %2080 = vmatmul.bf16.gmra.mxu1 %v3300_v62  ;;  %2149 = vmatmul.bf16.gmra.mxu2 %v3304_v63  ;;  %v1983_v62 = vadd.f32 %v4620_v42, %v4615_v41 }
  0xbc   : > { %2218 = vmatmul.bf16.gmra.mxu3 %v3308_v2  ;;  %v3404_v2 = vor.u32 %v4127_v52, %v3401_v53 }
  0xbd   : > { %2287 = vmatmul.bf16.gmra.mxu0 %v3312_v3  ;;  %v3408_v3 = vor.u32 %v4134_v55, %v3407_v54 }
  0xbe   : > { %v2017_v8 = vpop.f32.mrf.mxu2 }
  0xbf   : > { %v4664_v9 = vadd.f32 %v4620_v42, %v2017_v8  ;;  %v2032_v10 = vpop.f32.mrf.mxu3  ;;  %v3412_v8 = vor.u32 %v4128_v56, %v3409_v57 }
  0xc0   : > { %v4667_v11 = vadd.f32 %v4620_v42, %v2032_v10  ;;  %v2004_v12 = vpop.f32.mrf.mxu1  ;;  %v3416_v10 = vor.u32 %v4135_v59, %v3415_v58 }
  0xc1   : > { %v4670_v13 = vadd.f32 %v4620_v42, %v2004_v12 }
  0xc2   : > { %v4672_v14 = vpop.f32.mrf.mxu0 }
  0xc6   : > { %v2019_v23 = vpop.f32.mrf.mxu2 }
  0xc7   : > { %v4683_v24 = vadd.f32 %v4620_v42, %v2019_v23  ;;  %v2034_v25 = vpop.f32.mrf.mxu3  ;;  %v4227_v23 = vld [vmem:[%s5264_s1 + $0x180] sm:$0xff] }
  0xc8   : > { %v4686_v28 = vadd.f32 %v4620_v42, %v2034_v25  ;;  %v2007_v29 = vpop.f32.mrf.mxu1  ;;  %v4235_v25 = vld [vmem:[%s5264_s1 + $0x1c0] sm:$0xff]  ;;  %2394 = vmatpush.bf16.msra.mxu2 %v4227_v23  ;;  %v4161_v23 = vld [vmem:[%s4380_s5 + $0x450] sm:$0xf0] }
  0xc9   : > { %v4689_v32 = vadd.f32 %v4620_v42, %v2007_v29  ;;  %2463 = vmatpush.bf16.msra.mxu3 %v4235_v25  ;;  %v3459_v29 = vld [vmem:[%s4380_s5 + $0x3b0] sm:$0xf] }
  0xca   : > { %v4691_v33 = vpop.f32.mrf.mxu0 }
  0xcb   : > { %2085 = vmatmul.bf16.gmra.mxu1 %v3352_v26  ;;  %2154 = vmatmul.bf16.gmra.mxu2 %v3356_v27  ;;  %v4140_v26 = vld [vmem:[%s4380_s5 + $0x3ac] sm:$0xf] }
  0xcc   : > { %2223 = vmatmul.bf16.gmra.mxu3 %v3360_v30  ;;  %v4147_v30 = vld [vmem:[%s4380_s5 + $0x3e0] sm:$0xf0]  ;;  %v3456_v52 = vor.u32 %v4140_v26, %v3453_v48 }
  0xcd   : > { %2292 = vmatmul.bf16.gmra.mxu0 %v3364_v31  ;;  %v4141_v31 = vld [vmem:[%s4380_s5 + $0x3b4] sm:$0xf]  ;;  %v3460_v53 = vor.u32 %v4147_v30, %v3459_v29 }
  0xce   : > { %v2022_v36 = vpop.f32.mrf.mxu2  ;;  %v3464_v55 = vor.u32 %v4141_v31, %v3461_v34 }
  0xcf   : > { %v4700_v37 = vadd.f32 %v4620_v42, %v2022_v36  ;;  %v2037_v39 = vpop.f32.mrf.mxu3  ;;  %v4148_v36 = vld [vmem:[%s4380_s5 + $0x3e8] sm:$0xf0] }
  0xd0   : > { %v4703_v40 = vadd.f32 %v4620_v42, %v2037_v39  ;;  %v2009_v43 = vpop.f32.mrf.mxu1  ;;  %v3468_v56 = vor.u32 %v4148_v36, %v3467_v35 }
  0xd1   : > { %v4706_v45 = vadd.f32 %v4620_v42, %v2009_v43  ;;  %v1988_v43 = vadd.f32 %v4620_v42, %v4658_v6  ;;  %v4243_v6 = vld [vmem:[%s5264_s1 + $0x200] sm:$0xff] }
  0xd2   : > { %v4708_v49 = vpop.f32.mrf.mxu0  ;;  %2532 = vmatpush.bf16.msra.mxu0 %v4243_v6  ;;  %v4282_v6 = vld [vmem:[%s5264_s1 + $0x338] sm:$0xff] }
  0xd6   : > { %v2024_v61 = vpop.f32.mrf.mxu2  ;;  %2801 = vmatpush.bf16.msrb.mxu0 %v4282_v6 }
  0xd7   : > { %v4727_v63 = vadd.f32 %v4620_v42, %v2024_v61  ;;  %v2039_v1 = vpop.f32.mrf.mxu3  ;;  %v4219_v61 = vld [vmem:[%s5264_s1 + $0x140] sm:$0xff] }
  0xd8   : > { %v4730_v4 = vadd.f32 %v4620_v42, %v2039_v1  ;;  %v2051_v7 = vpop.f32.mrf.mxu1  ;;  %2325 = vmatpush.bf16.msra.mxu1 %v4219_v61  ;;  %v4258_v61 = vld [vmem:[%s5264_s1 + $0x278] sm:$0xff] }
  0xd9   : > { %v2052_v12 = vadd.f32 %v2051_v7, %v1983_v62 }
  0xda   : > { %v2258_v15 = vpop.f32.mrf.mxu0 }
  0xdb   : > { %2090 = vmatmul.bf16.gmra.mxu1 %v3404_v2  ;;  %2159 = vmatmul.bf16.gmra.mxu2 %v3408_v3  ;;  %v1990_v2 = vadd.f32 %v4620_v42, %v4672_v14  ;;  %v1993_v14 = vadd.f32 %v4620_v42, %v4691_v33  ;;  %v4266_v33 = vld [vmem:[%s5264_s1 + $0x2b8] sm:$0xff] }
  0xdc   : > { %2228 = vmatmul.bf16.gmra.mxu3 %v3412_v8  ;;  %2663 = vmatpush.bf16.msrb.mxu2 %v4266_v33  ;;  %v4265_v33 = vld [vmem:[%s5264_s1 + $0x2b0] sm:$0xff] }
  0xdd   : > { %2297 = vmatmul.bf16.gmra.mxu0 %v3416_v10  ;;  %2594 = vmatpush.bf16.msrb.mxu1 %v4258_v61 }
  0xde   : > { %v2120_v41 = vpop.f32.mrf.mxu2 }
  0xdf   : > { %v2121_v17 = vadd.f32 %v2120_v41, %v2052_v12  ;;  %v2189_v18 = vpop.f32.mrf.mxu3  ;;  %v4153_v41 = vld [vmem:[%s4380_s5 + $0x414] sm:$0xf] }
  0xe0   : > { %v2053_v19 = vpop.f32.mrf.mxu1  ;;  %2664 = vmatpush.bf16.msrb.mxu2 %v4265_v33 }
  0xe1   : > { %v2190_v20 = vadd.f32 %v2189_v18, %v2121_v17  ;;  %v2054_v21 = vadd.f32 %v2053_v19, %v1985_v16  ;;  %v3505_v16 = vld [vmem:[%s4380_s5 + $0x444] sm:$0xf0]  ;;  %v3511_v18 = vld [vmem:[%s4380_s5 + $0x418] sm:$0xf]  ;;  %v4160_v19 = vld [vmem:[%s4380_s5 + $0x448] sm:$0xf0] }
  0xe2   : > { %v2260_v22 = vpop.f32.mrf.mxu0  ;;  %v3508_v29 = vor.u32 %v4153_v41, %v3505_v16  ;;  %v3512_v30 = vor.u32 %v4160_v19, %v3511_v18  ;;  %v1998_v16 = vadd.f32 %v4620_v42, %v4613_v38 }
  0xe3   : > { %v4742_v27 = vadd.f32 %v2258_v15, %v2190_v20  ;;  %v4154_v20 = vld [vmem:[%s4380_s5 + $0x41c] sm:$0xf] }
  0xe6   : > { %v2122_v39 = vpop.f32.mrf.mxu2 }
  0xe7   : > { %v2123_v50 = vadd.f32 %v2122_v39, %v2054_v21  ;;  %v2191_v51 = vpop.f32.mrf.mxu3  ;;  %v3513_v21 = vld [vmem:[%s4380_s5 + $0x44c] sm:$0xf0] }
  0xe8   : > { %v2056_v54 = vpop.f32.mrf.mxu1  ;;  %v3516_v34 = vor.u32 %v4154_v20, %v3513_v21 }
  0xe9   : > { %v2192_v57 = vadd.f32 %v2191_v51, %v2123_v50  ;;  %v2057_v58 = vadd.f32 %v2056_v54, %v1988_v43  ;;  %v4274_v51 = vld [vmem:[%s5264_s1 + $0x2f8] sm:$0xff] }
  0xea   : > { %v2263_v59 = vpop.f32.mrf.mxu0  ;;  %2732 = vmatpush.bf16.msrb.mxu3 %v4274_v51  ;;  %v4273_v51 = vld [vmem:[%s5264_s1 + $0x2f0] sm:$0xff] }
  0xeb   : > { %2095 = vmatmul.bf16.gmra.mxu1 %v3456_v52  ;;  %2164 = vmatmul.bf16.gmra.mxu2 %v3460_v53  ;;  %v4755_v62 = vadd.f32 %v2260_v22, %v2192_v57  ;;  %v3519_v22 = vld [vmem:[%s4380_s5 + $0x420] sm:$0xf]  ;;  %v1995_v53 = vadd.f32 %v4620_v42, %v4708_v49  ;;  %v3557_v49 = vld [vmem:[%s4380_s5 + $0x4ac] sm:$0xf0] }
  0xec   : > { %2233 = vmatmul.bf16.gmra.mxu3 %v3464_v55  ;;  %v3520_v35 = vor.u32 %v4161_v23, %v3519_v22 }
  0xed   : > { %2302 = vmatmul.bf16.gmra.mxu0 %v3468_v56 }
  0xee   : > { %v2125_v1 = vpop.f32.mrf.mxu2  ;;  %2733 = vmatpush.bf16.msrb.mxu3 %v4273_v51 }
  0xef   : > { %v2126_v3 = vadd.f32 %v2125_v1, %v2057_v58  ;;  %v2194_v7 = vpop.f32.mrf.mxu3  ;;  %v4166_v1 = vld [vmem:[%s4380_s5 + $0x47c] sm:$0xf] }
  0xf0   : > { %v2058_v8 = vpop.f32.mrf.mxu1  ;;  %v3560_v20 = vor.u32 %v4166_v1, %v3557_v49 }
  0xf1   : > { %v2195_v10 = vadd.f32 %v2194_v7, %v2126_v3  ;;  %v2059_v12 = vadd.f32 %v2058_v8, %v1990_v2  ;;  %v3563_v3 = vld [vmem:[%s4380_s5 + $0x480] sm:$0xf]  ;;  %v4173_v7 = vld [vmem:[%s4380_s5 + $0x4b0] sm:$0xf0]  ;;  %v4167_v8 = vld [vmem:[%s4380_s5 + $0x484] sm:$0xf] }
  0xf2   : > { %v2265_v15 = vpop.f32.mrf.mxu0  ;;  %v3564_v21 = vor.u32 %v4173_v7, %v3563_v3 }
  0xf3   : > { %v4764_v17 = vadd.f32 %v2263_v59, %v2195_v10  ;;  %v3565_v10 = vld [vmem:[%s4380_s5 + $0x4b4] sm:$0xf0] }
  0xf4   : > { %v3568_v23 = vor.u32 %v4167_v8, %v3565_v10 }
  0xf6   : > { %v2127_v25 = vpop.f32.mrf.mxu2 }
  0xf7   : > { %v2128_v26 = vadd.f32 %v2127_v25, %v2059_v12  ;;  %v2196_v48 = vpop.f32.mrf.mxu3  ;;  %v3571_v12 = vld [vmem:[%s4380_s5 + $0x488] sm:$0xf] }
  0xf8   : > { %v2061_v31 = vpop.f32.mrf.mxu1 }
  0xf9   : > { %v2197_v36 = vadd.f32 %v2196_v48, %v2128_v26  ;;  %v2062_v39 = vadd.f32 %v2061_v31, %v1993_v14 }
  0xfa   : > { %v2268_v43 = vpop.f32.mrf.mxu0 }
  0xfb   : > { %2100 = vmatmul.bf16.gmra.mxu1 %v3508_v29  ;;  %2169 = vmatmul.bf16.gmra.mxu2 %v3512_v30  ;;  %v4774_v50 = vadd.f32 %v2265_v15, %v2197_v36  ;;  %v4174_v15 = vld [vmem:[%s4380_s5 + $0x4b8] sm:$0xf0]  ;;  %v2000_v30 = vadd.f32 %v4620_v42, %v4628_v47  ;;  %v3001_v42 = vld [vmem:[%s4380_s5 + $0x44] sm:$0xf0] }
  0xfc   : > { %2238 = vmatmul.bf16.gmra.mxu3 %v3516_v34  ;;  %v3572_v25 = vor.u32 %v4174_v15, %v3571_v12 }
  0xfd   : > { %2307 = vmatmul.bf16.gmra.mxu0 %v3520_v35 }
  0xfe   : > { %v2130_v52 = vpop.f32.mrf.mxu2 }
  0xff   : > { %v2131_v54 = vadd.f32 %v2130_v52, %v2062_v39  ;;  %v2199_v55 = vpop.f32.mrf.mxu3  ;;  %v4025_v52 = vld [vmem:[%s4380_s5 + $0x14] sm:$0xf] }
 0x100   : > { %v2063_v56 = vpop.f32.mrf.mxu1  ;;  %v3004_v1 = vor.u32 %v4025_v52, %v3001_v42 }
 0x101   : > { %v2200_v57 = vadd.f32 %v2199_v55, %v2131_v54  ;;  %v2064_v58 = vadd.f32 %v2063_v56, %v1995_v53  ;;  %v3007_v53 = vld [vmem:[%s4380_s5 + $0x18] sm:$0xf]  ;;  %v4032_v54 = vld [vmem:[%s4380_s5 + $0x48] sm:$0xf0]  ;;  %v4026_v55 = vld [vmem:[%s4380_s5 + $0x1c] sm:$0xf] }
 0x102   : > { %v2270_v59 = vpop.f32.mrf.mxu0  ;;  %v3009_v56 = vld [vmem:[%s4380_s5 + $0x4c] sm:$0xf0]  ;;  %v3008_v49 = vor.u32 %v4032_v54, %v3007_v53 }
 0x103   : > { %v4792_v2 = vadd.f32 %v2268_v43, %v2200_v57  ;;  %v3015_v57 = vld [vmem:[%s4380_s5 + $0x20] sm:$0xf]  ;;  %v3012_v7 = vor.u32 %v4026_v55, %v3009_v56 }
 0x106   : > { %v2132_v41 = vpop.f32.mrf.mxu2 }
 0x107   : > { %v2133_v18 = vadd.f32 %v2132_v41, %v2064_v58  ;;  %v2201_v19 = vpop.f32.mrf.mxu3  ;;  %v4033_v58 = vld [vmem:[%s4380_s5 + $0x50] sm:$0xf0] }
 0x108   : > { %v2066_v22 = vpop.f32.mrf.mxu1  ;;  %v3016_v8 = vor.u32 %v4033_v58, %v3015_v57  ;;  %v4257_v41 = vld [vmem:[%s5264_s1 + $0x270] sm:$0xff]  ;;  %v4264_v58 = vld [vmem:[%s5264_s1 + $0x2a8] sm:$0xff] }
 0x109   : > { %v2202_v14 = vadd.f32 %v2201_v19, %v2133_v18  ;;  %v2067_v26 = vadd.f32 %v2066_v22, %v1998_v16  ;;  %2595 = vmatpush.bf16.msrb.mxu1 %v4257_v41  ;;  %2665 = vmatpush.bf16.msrb.mxu2 %v4264_v58 }
 0x10a   : > { %v2273_v48 = vpop.f32.mrf.mxu0 }
 0x10b   : > { %2105 = vmatmul.bf16.gmra.mxu1 %v3560_v20  ;;  %2174 = vmatmul.bf16.gmra.mxu2 %v3564_v21  ;;  %v4802_v29 = vadd.f32 %v2270_v59, %v2202_v14  ;;  %v4038_v14 = vld [vmem:[%s4380_s5 + $0x7c] sm:$0xf] }
 0x10c   : > { %2243 = vmatmul.bf16.gmra.mxu3 %v3568_v23 }
 0x10d   : > { %2312 = vmatmul.bf16.gmra.mxu0 %v3572_v25 }
 0x10e   : > { %v2135_v38 = vpop.f32.mrf.mxu2 }
 0x10f   : > { %v2136_v31 = vadd.f32 %v2135_v38, %v2067_v26  ;;  %v2204_v34 = vpop.f32.mrf.mxu3  ;;  %v3053_v26 = vld [vmem:[%s4380_s5 + $0xac] sm:$0xf0]  ;;  %v3059_v38 = vld [vmem:[%s4380_s5 + $0x80] sm:$0xf] }
 0x110   : > { %v2068_v35 = vpop.f32.mrf.mxu1  ;;  %v3056_v51 = vor.u32 %v4038_v14, %v3053_v26 }
 0x111   : > { %v2205_v36 = vadd.f32 %v2204_v34, %v2136_v31  ;;  %v2069_v39 = vadd.f32 %v2068_v35, %v2000_v30  ;;  %v4045_v30 = vld [vmem:[%s4380_s5 + $0xb0] sm:$0xf0]  ;;  %v4039_v31 = vld [vmem:[%s4380_s5 + $0x84] sm:$0xf]  ;;  %v3061_v34 = vld [vmem:[%s4380_s5 + $0xb4] sm:$0xf0] }
 0x112   : > { %v2275_v43 = vpop.f32.mrf.mxu0  ;;  %v3067_v35 = vld [vmem:[%s4380_s5 + $0x88] sm:$0xf]  ;;  %v3060_v52 = vor.u32 %v4045_v30, %v3059_v38  ;;  %v3064_v53 = vor.u32 %v4039_v31, %v3061_v34 }
 0x113   : > { %v4814_v47 = vadd.f32 %v2273_v48, %v2205_v36  ;;  %v4046_v36 = vld [vmem:[%s4380_s5 + $0xb8] sm:$0xf0] }
 0x114   : > { %v3068_v54 = vor.u32 %v4046_v36, %v3067_v35 }
 0x116   : > { %v2137_v59 = vpop.f32.mrf.mxu2 }
 0x117   : > { %v2138_v61 = vadd.f32 %v2137_v59, %v2069_v39  ;;  %v2206_v6 = vpop.f32.mrf.mxu3  ;;  %v4272_v59 = vld [vmem:[%s5264_s1 + $0x2e8] sm:$0xff] }
 0x118   : > { %v2071_v3 = vpop.f32.mrf.mxu1  ;;  %2734 = vmatpush.bf16.msrb.mxu3 %v4272_v59  ;;  %v3163_v59 = vld [vmem:[%s4380_s5 + $0x150] sm:$0xf] }
 0x119   : > { %v2207_v10 = vadd.f32 %v2206_v6, %v2138_v61  ;;  %v2072_v12 = vadd.f32 %v2071_v3, %v4656_v5  ;;  %v4281_v5 = vld [vmem:[%s5264_s1 + $0x330] sm:$0xff] }
 0x11a   : > { %v2278_v15 = vpop.f32.mrf.mxu0  ;;  %2802 = vmatpush.bf16.msrb.mxu0 %v4281_v5  ;;  %v3111_v5 = vld [vmem:[%s4380_s5 + $0xe8] sm:$0xf] }
 0x11b   : > { %2326 = vmatmul.bf16.vlgmr.msra.gmra.mxu1 %v3004_v1  ;;  %2395 = vmatmul.bf16.vlgmr.msra.gmra.mxu2 %v3008_v49  ;;  %v4826_v16 = vadd.f32 %v2275_v43, %v2207_v10  ;;  %v4280_v10 = vld [vmem:[%s5264_s1 + $0x328] sm:$0xff] }
 0x11c   : > { %2464 = vmatmul.bf16.vlgmr.msra.gmra.mxu3 %v3012_v7 }
 0x11d   : > { %2533 = vmatmul.bf16.vlgmr.msra.gmra.mxu0 %v3016_v8  ;;  %v4256_v8 = vld [vmem:[%s5264_s1 + $0x268] sm:$0xff] }
 0x11e   : > { %v2140_v18 = vpop.f32.mrf.mxu2  ;;  %2596 = vmatpush.bf16.msrb.mxu1 %v4256_v8  ;;  %2803 = vmatpush.bf16.msrb.mxu0 %v4280_v10 }
 0x11f   : > { %v2141_v19 = vadd.f32 %v2140_v18, %v2072_v12  ;;  %v2209_v20 = vpop.f32.mrf.mxu3  ;;  %v4051_v12 = vld [vmem:[%s4380_s5 + $0xe4] sm:$0xf]  ;;  %v4058_v18 = vld [vmem:[%s4380_s5 + $0x118] sm:$0xf0] }
 0x120   : > { %v2073_v21 = vpop.f32.mrf.mxu1  ;;  %v3112_v26 = vor.u32 %v4058_v18, %v3111_v5 }
 0x121   : > { %v2210_v22 = vadd.f32 %v2209_v20, %v2141_v19  ;;  %v2074_v23 = vadd.f32 %v2073_v21, %v4670_v13  ;;  %v4052_v19 = vld [vmem:[%s4380_s5 + $0xec] sm:$0xf]  ;;  %v3113_v20 = vld [vmem:[%s4380_s5 + $0x11c] sm:$0xf0]  ;;  %v4059_v21 = vld [vmem:[%s4380_s5 + $0x120] sm:$0xf0] }
 0x122   : > { %v2280_v25 = vpop.f32.mrf.mxu0  ;;  %v3116_v30 = vor.u32 %v4052_v19, %v3113_v20 }
 0x123   : > { %v4834_v48 = vadd.f32 %v2278_v15, %v2210_v22  ;;  %v3105_v15 = vld [vmem:[%s4380_s5 + $0x114] sm:$0xf0] }
 0x124   : > { %v3108_v14 = vor.u32 %v4051_v12, %v3105_v15 }
 0x126   : > { %v2142_v39 = vpop.f32.mrf.mxu2 }
 0x127   : > { %v2143_v43 = vadd.f32 %v2142_v39, %v2074_v23  ;;  %v2211_v33 = vpop.f32.mrf.mxu3 }
 0x128   : > { %v2076_v42 = vpop.f32.mrf.mxu1 }
 0x129   : > { %v2212_v13 = vadd.f32 %v2211_v33, %v2143_v43  ;;  %v2077_v55 = vadd.f32 %v2076_v42, %v4689_v32 }
 0x12a   : > { %v2283_v56 = vpop.f32.mrf.mxu0 }
 0x12b   : > { %2331 = vmatmul.bf16.gmra.mxu1 %v3056_v51  ;;  %2400 = vmatmul.bf16.gmra.mxu2 %v3060_v52  ;;  %v4843_v57 = vadd.f32 %v2280_v25, %v2212_v13  ;;  %v4271_v13 = vld [vmem:[%s5264_s1 + $0x2e0] sm:$0xff] }
 0x12c   : > { %2469 = vmatmul.bf16.gmra.mxu3 %v3064_v53 }
 0x12d   : > { %2538 = vmatmul.bf16.gmra.mxu0 %v3068_v54  ;;  %v4263_v54 = vld [vmem:[%s5264_s1 + $0x2a0] sm:$0xff]  ;;  %2735 = vmatpush.bf16.msrb.mxu3 %v4271_v13 }
 0x12e   : > { %v2145_v61 = vpop.f32.mrf.mxu2  ;;  %2666 = vmatpush.bf16.msrb.mxu2 %v4263_v54 }
 0x12f   : > { %v2146_v32 = vadd.f32 %v2145_v61, %v2077_v55  ;;  %v2214_v6 = vpop.f32.mrf.mxu3  ;;  %v4064_v55 = vld [vmem:[%s4380_s5 + $0x14c] sm:$0xf]  ;;  %v4071_v61 = vld [vmem:[%s4380_s5 + $0x180] sm:$0xf0] }
 0x130   : > { %v2078_v1 = vpop.f32.mrf.mxu1  ;;  %v3164_v10 = vor.u32 %v4071_v61, %v3163_v59 }
 0x131   : > { %v2215_v49 = vadd.f32 %v2214_v6, %v2146_v32  ;;  %v2079_v3 = vadd.f32 %v2078_v1, %v4706_v45  ;;  %v3119_v45 = vld [vmem:[%s4380_s5 + $0xf0] sm:$0xf]  ;;  %v4065_v32 = vld [vmem:[%s4380_s5 + $0x154] sm:$0xf]  ;;  %v3165_v6 = vld [vmem:[%s4380_s5 + $0x184] sm:$0xf0] }
 0x132   : > { %v2285_v7 = vpop.f32.mrf.mxu0  ;;  %v3120_v31 = vor.u32 %v4059_v21, %v3119_v45  ;;  %v4072_v1 = vld [vmem:[%s4380_s5 + $0x188] sm:$0xf0]  ;;  %v3168_v15 = vor.u32 %v4065_v32, %v3165_v6  ;;  %v4255_v45 = vld [vmem:[%s5264_s1 + $0x260] sm:$0xff] }
 0x133   : > { %v4860_v41 = vadd.f32 %v2283_v56, %v2215_v49  ;;  %v3157_v56 = vld [vmem:[%s4380_s5 + $0x17c] sm:$0xf0]  ;;  %2597 = vmatpush.bf16.msrb.mxu1 %v4255_v45 }
 0x134   : > { %v3160_v8 = vor.u32 %v4064_v55, %v3157_v56 }
 0x136   : > { %v2147_v22 = vpop.f32.mrf.mxu2 }
 0x137   : > { %v2148_v23 = vadd.f32 %v2147_v22, %v2079_v3  ;;  %v2216_v25 = vpop.f32.mrf.mxu3 }
 0x138   : > { %v2081_v38 = vpop.f32.mrf.mxu1 }
 0x139   : > { %v2217_v34 = vadd.f32 %v2216_v25, %v2148_v23  ;;  %v2082_v35 = vadd.f32 %v2081_v38, %v4623_v44 }
 0x13a   : > { %v2288_v36 = vpop.f32.mrf.mxu0 }
 0x13b   : > { %2336 = vmatmul.bf16.gmra.mxu1 %v3108_v14  ;;  %2405 = vmatmul.bf16.gmra.mxu2 %v3112_v26  ;;  %v4869_v39 = vadd.f32 %v2285_v7, %v2217_v34  ;;  %v3209_v34 = vld [vmem:[%s4380_s5 + $0x1e4] sm:$0xf0] }
 0x13c   : > { %2474 = vmatmul.bf16.gmra.mxu3 %v3116_v30 }
 0x13d   : > { %2543 = vmatmul.bf16.gmra.mxu0 %v3120_v31  ;;  %v4077_v31 = vld [vmem:[%s4380_s5 + $0x1b4] sm:$0xf] }
 0x13e   : > { %v2150_v43 = vpop.f32.mrf.mxu2  ;;  %v3212_v13 = vor.u32 %v4077_v31, %v3209_v34 }
 0x13f   : > { %v2151_v33 = vadd.f32 %v2150_v43, %v2082_v35  ;;  %v2219_v51 = vpop.f32.mrf.mxu3  ;;  %v4084_v43 = vld [vmem:[%s4380_s5 + $0x1e8] sm:$0xf0] }
 0x140   : > { %v2083_v52 = vpop.f32.mrf.mxu1 }
 0x141   : > { %v2220_v44 = vadd.f32 %v2219_v51, %v2151_v33  ;;  %v2084_v42 = vadd.f32 %v2083_v52, %v4647_v60  ;;  %v3171_v60 = vld [vmem:[%s4380_s5 + $0x158] sm:$0xf]  ;;  %v4078_v33 = vld [vmem:[%s4380_s5 + $0x1bc] sm:$0xf]  ;;  %v3217_v51 = vld [vmem:[%s4380_s5 + $0x1ec] sm:$0xf0] }
 0x142   : > { %v2290_v53 = vpop.f32.mrf.mxu0  ;;  %v3172_v5 = vor.u32 %v4072_v1, %v3171_v60  ;;  %v3223_v52 = vld [vmem:[%s4380_s5 + $0x1c0] sm:$0xf]  ;;  %v3220_v59 = vor.u32 %v4078_v33, %v3217_v51  ;;  %v4262_v1 = vld [vmem:[%s5264_s1 + $0x298] sm:$0xff] }
 0x143   : > { %v4880_v58 = vadd.f32 %v2288_v36, %v2220_v44  ;;  %v3215_v36 = vld [vmem:[%s4380_s5 + $0x1b8] sm:$0xf]  ;;  %v4085_v44 = vld [vmem:[%s4380_s5 + $0x1f0] sm:$0xf0]  ;;  %2667 = vmatpush.bf16.msrb.mxu2 %v4262_v1 }
 0x144   : > { %v3216_v55 = vor.u32 %v4084_v43, %v3215_v36  ;;  %v3224_v61 = vor.u32 %v4085_v44, %v3223_v52 }
 0x146   : > { %v2152_v49 = vpop.f32.mrf.mxu2 }
 0x147   : > { %v2153_v3 = vadd.f32 %v2152_v49, %v2084_v42  ;;  %v2221_v7 = vpop.f32.mrf.mxu3  ;;  %v4270_v49 = vld [vmem:[%s5264_s1 + $0x2d8] sm:$0xff] }
 0x148   : > { %v2086_v12 = vpop.f32.mrf.mxu1  ;;  %2736 = vmatpush.bf16.msrb.mxu3 %v4270_v49  ;;  %v3319_v49 = vld [vmem:[%s4380_s5 + $0x288] sm:$0xf] }
 0x149   : > { %v2222_v18 = vadd.f32 %v2221_v7, %v2153_v3  ;;  %v2087_v19 = vadd.f32 %v2086_v12, %v4664_v9  ;;  %v4279_v9 = vld [vmem:[%s5264_s1 + $0x320] sm:$0xff] }
 0x14a   : > { %v2293_v20 = vpop.f32.mrf.mxu0  ;;  %2804 = vmatpush.bf16.msrb.mxu0 %v4279_v9  ;;  %v3267_v9 = vld [vmem:[%s4380_s5 + $0x220] sm:$0xf] }
 0x14b   : > { %2341 = vmatmul.bf16.gmra.mxu1 %v3160_v8  ;;  %2410 = vmatmul.bf16.gmra.mxu2 %v3164_v10  ;;  %v4892_v21 = vadd.f32 %v2290_v53, %v2222_v18  ;;  %v4278_v18 = vld [vmem:[%s5264_s1 + $0x318] sm:$0xff] }
 0x14c   : > { %2479 = vmatmul.bf16.gmra.mxu3 %v3168_v15 }
 0x14d   : > { %2548 = vmatmul.bf16.gmra.mxu0 %v3172_v5  ;;  %v4254_v5 = vld [vmem:[%s5264_s1 + $0x258] sm:$0xff] }
 0x14e   : > { %v2155_v22 = vpop.f32.mrf.mxu2  ;;  %2598 = vmatpush.bf16.msrb.mxu1 %v4254_v5  ;;  %2805 = vmatpush.bf16.msrb.mxu0 %v4278_v18 }
 0x14f   : > { %v2156_v23 = vadd.f32 %v2155_v22, %v2087_v19  ;;  %v2224_v25 = vpop.f32.mrf.mxu3  ;;  %v4090_v19 = vld [vmem:[%s4380_s5 + $0x21c] sm:$0xf]  ;;  %v4097_v22 = vld [vmem:[%s4380_s5 + $0x250] sm:$0xf0] }
 0x150   : > { %v2088_v14 = vpop.f32.mrf.mxu1  ;;  %v3268_v34 = vor.u32 %v4097_v22, %v3267_v9 }
 0x151   : > { %v2225_v26 = vadd.f32 %v2224_v25, %v2156_v23  ;;  %v2089_v38 = vadd.f32 %v2088_v14, %v4683_v24  ;;  %v4091_v23 = vld [vmem:[%s4380_s5 + $0x224] sm:$0xf]  ;;  %v3269_v25 = vld [vmem:[%s4380_s5 + $0x254] sm:$0xf0]  ;;  %v4098_v14 = vld [vmem:[%s4380_s5 + $0x258] sm:$0xf0] }
 0x152   : > { %v2295_v30 = vpop.f32.mrf.mxu0  ;;  %v3272_v43 = vor.u32 %v4091_v23, %v3269_v25 }
 0x153   : > { %v4900_v35 = vadd.f32 %v2293_v20, %v2225_v26  ;;  %v3261_v20 = vld [vmem:[%s4380_s5 + $0x24c] sm:$0xf0] }
 0x154   : > { %v3264_v31 = vor.u32 %v4090_v19, %v3261_v20 }
 0x156   : > { %v2157_v42 = vpop.f32.mrf.mxu2 }
 0x157   : > { %v2158_v53 = vadd.f32 %v2157_v42, %v2089_v38  ;;  %v2226_v54 = vpop.f32.mrf.mxu3 }
 0x158   : > { %v2091_v56 = vpop.f32.mrf.mxu1 }
 0x159   : > { %v2227_v24 = vadd.f32 %v2226_v54, %v2158_v53  ;;  %v2092_v32 = vadd.f32 %v2091_v56, %v4700_v37 }
 0x15a   : > { %v2298_v6 = vpop.f32.mrf.mxu0 }
 0x15b   : > { %2346 = vmatmul.bf16.gmra.mxu1 %v3212_v13  ;;  %2415 = vmatmul.bf16.gmra.mxu2 %v3216_v55  ;;  %v4909_v60 = vadd.f32 %v2295_v30, %v2227_v24  ;;  %v4269_v24 = vld [vmem:[%s5264_s1 + $0x2d0] sm:$0xff] }
 0x15c   : > { %2484 = vmatmul.bf16.gmra.mxu3 %v3220_v59 }
 0x15d   : > { %2553 = vmatmul.bf16.gmra.mxu0 %v3224_v61  ;;  %v4261_v61 = vld [vmem:[%s5264_s1 + $0x290] sm:$0xff]  ;;  %2737 = vmatpush.bf16.msrb.mxu3 %v4269_v24 }
 0x15e   : > { %v2160_v3 = vpop.f32.mrf.mxu2  ;;  %2668 = vmatpush.bf16.msrb.mxu2 %v4261_v61 }
 0x15f   : > { %v2161_v37 = vadd.f32 %v2160_v3, %v2092_v32  ;;  %v2229_v7 = vpop.f32.mrf.mxu3  ;;  %v4103_v32 = vld [vmem:[%s4380_s5 + $0x284] sm:$0xf]  ;;  %v4110_v3 = vld [vmem:[%s4380_s5 + $0x2b8] sm:$0xf0] }
 0x160   : > { %v2093_v8 = vpop.f32.mrf.mxu1  ;;  %v3320_v18 = vor.u32 %v4110_v3, %v3319_v49 }
 0x161   : > { %v2230_v10 = vadd.f32 %v2229_v7, %v2161_v37  ;;  %v2094_v12 = vadd.f32 %v2093_v8, %v4727_v63  ;;  %v3275_v63 = vld [vmem:[%s4380_s5 + $0x228] sm:$0xf]  ;;  %v4104_v37 = vld [vmem:[%s4380_s5 + $0x28c] sm:$0xf]  ;;  %v3321_v7 = vld [vmem:[%s4380_s5 + $0x2bc] sm:$0xf0] }
 0x162   : > { %v2300_v15 = vpop.f32.mrf.mxu0  ;;  %v3276_v33 = vor.u32 %v4098_v14, %v3275_v63  ;;  %v4111_v8 = vld [vmem:[%s4380_s5 + $0x2c0] sm:$0xf0]  ;;  %v3324_v20 = vor.u32 %v4104_v37, %v3321_v7  ;;  %v4253_v63 = vld [vmem:[%s5264_s1 + $0x250] sm:$0xff] }
 0x163   : > { %v4926_v45 = vadd.f32 %v2298_v6, %v2230_v10  ;;  %v3313_v6 = vld [vmem:[%s4380_s5 + $0x2b4] sm:$0xf0]  ;;  %2599 = vmatpush.bf16.msrb.mxu1 %v4253_v63 }
 0x164   : > { %v3316_v5 = vor.u32 %v4103_v32, %v3313_v6 }
 0x166   : > { %v2162_v26 = vpop.f32.mrf.mxu2 }
 0x167   : > { %v2163_v38 = vadd.f32 %v2162_v26, %v2094_v12  ;;  %v2231_v30 = vpop.f32.mrf.mxu3 }
 0x168   : > { %v2096_v36 = vpop.f32.mrf.mxu1 }
 0x169   : > { %v2232_v51 = vadd.f32 %v2231_v30, %v2163_v38  ;;  %v2097_v52 = vadd.f32 %v2096_v36, %v4626_v46 }
 0x16a   : > { %v2303_v44 = vpop.f32.mrf.mxu0 }
 0x16b   : > { %2351 = vmatmul.bf16.gmra.mxu1 %v3264_v31  ;;  %2420 = vmatmul.bf16.gmra.mxu2 %v3268_v34  ;;  %v4935_v42 = vadd.f32 %v2300_v15, %v2232_v51  ;;  %v3365_v51 = vld [vmem:[%s4380_s5 + $0x31c] sm:$0xf0] }
 0x16c   : > { %2489 = vmatmul.bf16.gmra.mxu3 %v3272_v43 }
 0x16d   : > { %2558 = vmatmul.bf16.gmra.mxu0 %v3276_v33  ;;  %v4116_v33 = vld [vmem:[%s4380_s5 + $0x2ec] sm:$0xf] }
 0x16e   : > { %v2165_v53 = vpop.f32.mrf.mxu2  ;;  %v3368_v24 = vor.u32 %v4116_v33, %v3365_v51 }
 0x16f   : > { %v2166_v54 = vadd.f32 %v2165_v53, %v2097_v52  ;;  %v2234_v13 = vpop.f32.mrf.mxu3  ;;  %v4123_v53 = vld [vmem:[%s4380_s5 + $0x320] sm:$0xf0] }
 0x170   : > { %v2098_v55 = vpop.f32.mrf.mxu1 }
 0x171   : > { %v2235_v46 = vadd.f32 %v2234_v13, %v2166_v54  ;;  %v2099_v56 = vadd.f32 %v2098_v55, %v4650_v0  ;;  %v3327_v0 = vld [vmem:[%s4380_s5 + $0x290] sm:$0xf]  ;;  %v4117_v54 = vld [vmem:[%s4380_s5 + $0x2f4] sm:$0xf]  ;;  %v3373_v13 = vld [vmem:[%s4380_s5 + $0x324] sm:$0xf0] }
 0x172   : > { %v2305_v59 = vpop.f32.mrf.mxu0  ;;  %v3328_v9 = vor.u32 %v4111_v8, %v3327_v0  ;;  %v3379_v55 = vld [vmem:[%s4380_s5 + $0x2f8] sm:$0xf]  ;;  %v3376_v49 = vor.u32 %v4117_v54, %v3373_v13  ;;  %v4260_v8 = vld [vmem:[%s5264_s1 + $0x288] sm:$0xff] }
 0x173   : > { %v4946_v1 = vadd.f32 %v2303_v44, %v2235_v46  ;;  %v3371_v44 = vld [vmem:[%s4380_s5 + $0x2f0] sm:$0xf]  ;;  %v4124_v46 = vld [vmem:[%s4380_s5 + $0x328] sm:$0xf0]  ;;  %2669 = vmatpush.bf16.msrb.mxu2 %v4260_v8 }
 0x174   : > { %v3372_v32 = vor.u32 %v4123_v53, %v3371_v44  ;;  %v3380_v3 = vor.u32 %v4124_v46, %v3379_v55 }
 0x176   : > { %v2167_v10 = vpop.f32.mrf.mxu2 }
 0x177   : > { %v2168_v12 = vadd.f32 %v2167_v10, %v2099_v56  ;;  %v2236_v15 = vpop.f32.mrf.mxu3  ;;  %v4268_v10 = vld [vmem:[%s5264_s1 + $0x2c8] sm:$0xff] }
 0x178   : > { %v2101_v19 = vpop.f32.mrf.mxu1  ;;  %2738 = vmatpush.bf16.msrb.mxu3 %v4268_v10  ;;  %v3475_v10 = vld [vmem:[%s4380_s5 + $0x3c0] sm:$0xf] }
 0x179   : > { %v2237_v22 = vadd.f32 %v2236_v15, %v2168_v12  ;;  %v2102_v23 = vadd.f32 %v2101_v19, %v4667_v11  ;;  %v4277_v11 = vld [vmem:[%s5264_s1 + $0x310] sm:$0xff] }
 0x17a   : > { %v2308_v25 = vpop.f32.mrf.mxu0  ;;  %2806 = vmatpush.bf16.msrb.mxu0 %v4277_v11  ;;  %v3423_v11 = vld [vmem:[%s4380_s5 + $0x358] sm:$0xf] }
 0x17b   : > { %2356 = vmatmul.bf16.gmra.mxu1 %v3316_v5  ;;  %2425 = vmatmul.bf16.gmra.mxu2 %v3320_v18  ;;  %v4958_v14 = vadd.f32 %v2305_v59, %v2237_v22  ;;  %v4276_v22 = vld [vmem:[%s5264_s1 + $0x308] sm:$0xff] }
 0x17c   : > { %2494 = vmatmul.bf16.gmra.mxu3 %v3324_v20 }
 0x17d   : > { %2563 = vmatmul.bf16.gmra.mxu0 %v3328_v9  ;;  %v4252_v9 = vld [vmem:[%s5264_s1 + $0x248] sm:$0xff] }
 0x17e   : > { %v2170_v26 = vpop.f32.mrf.mxu2  ;;  %2600 = vmatpush.bf16.msrb.mxu1 %v4252_v9  ;;  %2807 = vmatpush.bf16.msrb.mxu0 %v4276_v22 }
 0x17f   : > { %v2171_v38 = vadd.f32 %v2170_v26, %v2102_v23  ;;  %v2239_v30 = vpop.f32.mrf.mxu3  ;;  %v4129_v23 = vld [vmem:[%s4380_s5 + $0x354] sm:$0xf]  ;;  %v4136_v26 = vld [vmem:[%s4380_s5 + $0x388] sm:$0xf0] }
 0x180   : > { %v2103_v31 = vpop.f32.mrf.mxu1  ;;  %v3424_v51 = vor.u32 %v4136_v26, %v3423_v11 }
 0x181   : > { %v2240_v34 = vadd.f32 %v2239_v30, %v2171_v38  ;;  %v2104_v36 = vadd.f32 %v2103_v31, %v4686_v28  ;;  %v4130_v38 = vld [vmem:[%s4380_s5 + $0x35c] sm:$0xf]  ;;  %v3425_v30 = vld [vmem:[%s4380_s5 + $0x38c] sm:$0xf0]  ;;  %v4137_v31 = vld [vmem:[%s4380_s5 + $0x390] sm:$0xf0] }
 0x182   : > { %v2310_v43 = vpop.f32.mrf.mxu0  ;;  %v3428_v53 = vor.u32 %v4130_v38, %v3425_v30 }
 0x183   : > { %v4966_v52 = vadd.f32 %v2308_v25, %v2240_v34  ;;  %v3417_v25 = vld [vmem:[%s4380_s5 + $0x384] sm:$0xf0] }
 0x184   : > { %v3420_v33 = vor.u32 %v4129_v23, %v3417_v25 }
 0x186   : > { %v2172_v56 = vpop.f32.mrf.mxu2 }
 0x187   : > { %v2173_v59 = vadd.f32 %v2172_v56, %v2104_v36  ;;  %v2241_v61 = vpop.f32.mrf.mxu3 }
 0x188   : > { %v2106_v6 = vpop.f32.mrf.mxu1 }
 0x189   : > { %v2242_v28 = vadd.f32 %v2241_v61, %v2173_v59  ;;  %v2107_v37 = vadd.f32 %v2106_v6, %v4703_v40 }
 0x18a   : > { %v2313_v7 = vpop.f32.mrf.mxu0 }
 0x18b   : > { %2361 = vmatmul.bf16.gmra.mxu1 %v3368_v24  ;;  %2430 = vmatmul.bf16.gmra.mxu2 %v3372_v32  ;;  %v4975_v0 = vadd.f32 %v2310_v43, %v2242_v28  ;;  %v4267_v28 = vld [vmem:[%s5264_s1 + $0x2c0] sm:$0xff] }
 0x18c   : > { %2499 = vmatmul.bf16.gmra.mxu3 %v3376_v49 }
 0x18d   : > { %2568 = vmatmul.bf16.gmra.mxu0 %v3380_v3  ;;  %v4259_v3 = vld [vmem:[%s5264_s1 + $0x280] sm:$0xff]  ;;  %2739 = vmatpush.bf16.msrb.mxu3 %v4267_v28 }
 0x18e   : > { %v2175_v12 = vpop.f32.mrf.mxu2  ;;  %2670 = vmatpush.bf16.msrb.mxu2 %v4259_v3 }
 0x18f   : > { %v2176_v40 = vadd.f32 %v2175_v12, %v2107_v37  ;;  %v2244_v15 = vpop.f32.mrf.mxu3  ;;  %v4142_v37 = vld [vmem:[%s4380_s5 + $0x3bc] sm:$0xf]  ;;  %v4149_v12 = vld [vmem:[%s4380_s5 + $0x3f0] sm:$0xf0] }
 0x190   : > { %v2108_v5 = vpop.f32.mrf.mxu1  ;;  %v3476_v22 = vor.u32 %v4149_v12, %v3475_v10 }
 0x191   : > { %v2245_v18 = vadd.f32 %v2244_v15, %v2176_v40  ;;  %v2109_v19 = vadd.f32 %v2108_v5, %v4730_v4  ;;  %v3431_v4 = vld [vmem:[%s4380_s5 + $0x360] sm:$0xf]  ;;  %v4143_v40 = vld [vmem:[%s4380_s5 + $0x3c4] sm:$0xf]  ;;  %v3477_v15 = vld [vmem:[%s4380_s5 + $0x3f4] sm:$0xf0] }
 0x192   : > { %v2315_v20 = vpop.f32.mrf.mxu0  ;;  %v3432_v54 = vor.u32 %v4137_v31, %v3431_v4  ;;  %v4150_v5 = vld [vmem:[%s4380_s5 + $0x3f8] sm:$0xf0]  ;;  %v3480_v25 = vor.u32 %v4143_v40, %v3477_v15  ;;  %v4251_v4 = vld [vmem:[%s5264_s1 + $0x240] sm:$0xff] }
 0x193   : > { %v4992_v63 = vadd.f32 %v2313_v7, %v2245_v18  ;;  %v3469_v7 = vld [vmem:[%s4380_s5 + $0x3ec] sm:$0xf0]  ;;  %2601 = vmatpush.bf16.msrb.mxu1 %v4251_v4  ;;  %v3581_v4 = vld [vmem:[%s4380_s5 + $0x4c4] sm:$0xf0] }
 0x194   : > { %v3472_v9 = vor.u32 %v4142_v37, %v3469_v7 }
 0x196   : > { %v2177_v34 = vpop.f32.mrf.mxu2 }
 0x197   : > { %v2178_v36 = vadd.f32 %v2177_v34, %v2109_v19  ;;  %v2246_v43 = vpop.f32.mrf.mxu3 }
 0x198   : > { %v2327_v44 = vpop.f32.mrf.mxu1 }
 0x199   : > { %v2247_v13 = vadd.f32 %v2246_v43, %v2178_v36  ;;  %v2328_v55 = vadd.f32 %v2327_v44, %v4742_v27 }
 0x19a   : > { %v2534_v46 = vpop.f32.mrf.mxu0 }
 0x19b   : > { %2366 = vmatmul.bf16.gmra.mxu1 %v3420_v33  ;;  %2435 = vmatmul.bf16.gmra.mxu2 %v3424_v51  ;;  %v5001_v56 = vadd.f32 %v2315_v20, %v2247_v13  ;;  %v3521_v13 = vld [vmem:[%s4380_s5 + $0x454] sm:$0xf0] }
 0x19c   : > { %2504 = vmatmul.bf16.gmra.mxu3 %v3428_v53 }
 0x19d   : > { %2573 = vmatmul.bf16.gmra.mxu0 %v3432_v54  ;;  %v4155_v54 = vld [vmem:[%s4380_s5 + $0x424] sm:$0xf] }
 0x19e   : > { %v2396_v59 = vpop.f32.mrf.mxu2  ;;  %v3524_v28 = vor.u32 %v4155_v54, %v3521_v13 }
 0x19f   : > { %v2397_v61 = vadd.f32 %v2396_v59, %v2328_v55  ;;  %v2465_v24 = vpop.f32.mrf.mxu3  ;;  %v4162_v59 = vld [vmem:[%s4380_s5 + $0x458] sm:$0xf0] }
 0x1a0   : > { %v2329_v32 = vpop.f32.mrf.mxu1 }
 0x1a1   : > { %v2466_v27 = vadd.f32 %v2465_v24, %v2397_v61  ;;  %v2330_v6 = vadd.f32 %v2329_v32, %v4755_v62  ;;  %v3483_v62 = vld [vmem:[%s4380_s5 + $0x3c8] sm:$0xf]  ;;  %v4156_v61 = vld [vmem:[%s4380_s5 + $0x42c] sm:$0xf]  ;;  %v3529_v24 = vld [vmem:[%s4380_s5 + $0x45c] sm:$0xf0] }
 0x1a2   : > { %v2536_v49 = vpop.f32.mrf.mxu0  ;;  %v3484_v11 = vor.u32 %v4150_v5, %v3483_v62  ;;  %v3535_v32 = vld [vmem:[%s4380_s5 + $0x430] sm:$0xf]  ;;  %v3532_v10 = vor.u32 %v4156_v61, %v3529_v24 }
 0x1a3   : > { %v5012_v8 = vadd.f32 %v2534_v46, %v2466_v27  ;;  %v3527_v46 = vld [vmem:[%s4380_s5 + $0x428] sm:$0xf]  ;;  %v4163_v27 = vld [vmem:[%s4380_s5 + $0x460] sm:$0xf0] }
 0x1a4   : > { %v3528_v37 = vor.u32 %v4162_v59, %v3527_v46  ;;  %v3536_v12 = vor.u32 %v4163_v27, %v3535_v32 }
 0x1a6   : > { %v2398_v18 = vpop.f32.mrf.mxu2 }
 0x1a7   : > { %v2399_v19 = vadd.f32 %v2398_v18, %v2330_v6  ;;  %v2467_v20 = vpop.f32.mrf.mxu3 }
 0x1a8   : > { %v2332_v23 = vpop.f32.mrf.mxu1 }
 0x1a9   : > { %v2468_v26 = vadd.f32 %v2467_v20, %v2399_v19  ;;  %v2333_v38 = vadd.f32 %v2332_v23, %v4764_v17  ;;  %v4275_v17 = vld [vmem:[%s5264_s1 + $0x300] sm:$0xff]  ;;  %v4168_v23 = vld [vmem:[%s4380_s5 + $0x48c] sm:$0xf] }
 0x1aa   : > { %v2539_v30 = vpop.f32.mrf.mxu0  ;;  %2808 = vmatpush.bf16.msrb.mxu0 %v4275_v17  ;;  %v3587_v17 = vld [vmem:[%s4380_s5 + $0x498] sm:$0xf] }
 0x1ab   : > { %2371 = vmatmul.bf16.gmra.mxu1 %v3472_v9  ;;  %2440 = vmatmul.bf16.gmra.mxu2 %v3476_v22  ;;  %v5024_v31 = vadd.f32 %v2536_v49, %v2468_v26  ;;  %v3579_v26 = vld [vmem:[%s4380_s5 + $0x490] sm:$0xf] }
 0x1ac   : > { %2509 = vmatmul.bf16.gmra.mxu3 %v3480_v25  ;;  %v3573_v25 = vld [vmem:[%s4380_s5 + $0x4bc] sm:$0xf0] }
 0x1ad   : > { %2578 = vmatmul.bf16.gmra.mxu0 %v3484_v11 }
 0x1ae   : > { %v2401_v34 = vpop.f32.mrf.mxu2 }
 0x1af   : > { %v2402_v36 = vadd.f32 %v2401_v34, %v2333_v38  ;;  %v2470_v43 = vpop.f32.mrf.mxu3  ;;  %v4175_v38 = vld [vmem:[%s4380_s5 + $0x4c0] sm:$0xf0]  ;;  %v4176_v34 = vld [vmem:[%s4380_s5 + $0x4c8] sm:$0xf0] }
 0x1b0   : > { %v2334_v33 = vpop.f32.mrf.mxu1  ;;  %v3588_v13 = vor.u32 %v4176_v34, %v3587_v17 }
 0x1b1   : > { %v2471_v51 = vadd.f32 %v2470_v43, %v2402_v36  ;;  %v2335_v44 = vadd.f32 %v2334_v33, %v4774_v50 }
 0x1b2   : > { %v2541_v53 = vpop.f32.mrf.mxu0 }
 0x1b3   : > { %v5032_v55 = vadd.f32 %v2539_v30, %v2471_v51  ;;  %v4169_v30 = vld [vmem:[%s4380_s5 + $0x494] sm:$0xf]  ;;  %v3576_v51 = vor.u32 %v4168_v23, %v3573_v25 }
 0x1b4   : > { %v3584_v54 = vor.u32 %v4169_v30, %v3581_v4 }
 0x1b6   : > { %v2403_v6 = vpop.f32.mrf.mxu2 }
 0x1b7   : > { %v2404_v49 = vadd.f32 %v2403_v6, %v2335_v44  ;;  %v2472_v3 = vpop.f32.mrf.mxu3  ;;  %v3580_v44 = vor.u32 %v4175_v38, %v3579_v26 }
 0x1b8   : > { %v2337_v7 = vpop.f32.mrf.mxu1 }
 0x1b9   : > { %v2473_v50 = vadd.f32 %v2472_v3, %v2404_v49  ;;  %v2338_v40 = vadd.f32 %v2337_v7, %v4792_v2 }
 0x1ba   : > { %v2544_v15 = vpop.f32.mrf.mxu0 }
 0x1bb   : > { %2376 = vmatmul.bf16.gmra.mxu1 %v3524_v28  ;;  %2445 = vmatmul.bf16.gmra.mxu2 %v3528_v37  ;;  %v5041_v62 = vadd.f32 %v2541_v53, %v2473_v50  ;;  %v4027_v28 = vld [vmem:[%s4380_s5 + $0x24] sm:$0xf]  ;;  %v3017_v37 = vld [vmem:[%s4380_s5 + $0x54] sm:$0xf0]  ;;  %v4028_v50 = vld [vmem:[%s4380_s5 + $0x2c] sm:$0xf] }
 0x1bc   : > { %2514 = vmatmul.bf16.gmra.mxu3 %v3532_v10  ;;  %v3023_v10 = vld [vmem:[%s4380_s5 + $0x28] sm:$0xf] }
 0x1bd   : > { %2583 = vmatmul.bf16.gmra.mxu0 %v3536_v12  ;;  %v4034_v12 = vld [vmem:[%s4380_s5 + $0x58] sm:$0xf0] }
 0x1be   : > { %v2406_v5 = vpop.f32.mrf.mxu2 }
 0x1bf   : > { %v2407_v18 = vadd.f32 %v2406_v5, %v2338_v40  ;;  %v2475_v19 = vpop.f32.mrf.mxu3  ;;  %v3025_v40 = vld [vmem:[%s4380_s5 + $0x5c] sm:$0xf0]  ;;  %v4035_v5 = vld [vmem:[%s4380_s5 + $0x60] sm:$0xf0] }
 0x1c0   : > { %v2339_v20 = vpop.f32.mrf.mxu1  ;;  %v3028_v23 = vor.u32 %v4028_v50, %v3025_v40 }
 0x1c1   : > { %v2476_v9 = vadd.f32 %v2475_v19, %v2407_v18  ;;  %v2340_v2 = vadd.f32 %v2339_v20, %v4802_v29 }
 0x1c2   : > { %v2546_v22 = vpop.f32.mrf.mxu0 }
 0x1c3   : > { %v5046_v11 = vadd.f32 %v2544_v15, %v2476_v9  ;;  %v3031_v15 = vld [vmem:[%s4380_s5 + $0x30] sm:$0xf]  ;;  %v3020_v9 = vor.u32 %v4027_v28, %v3017_v37 }
 0x1c4   : > { %v3032_v25 = vor.u32 %v4035_v5, %v3031_v15 }
 0x1c6   : > { %v2408_v36 = vpop.f32.mrf.mxu2 }
 0x1c7   : > { %v2409_v43 = vadd.f32 %v2408_v36, %v2340_v2  ;;  %v2477_v33 = vpop.f32.mrf.mxu3  ;;  %v3024_v2 = vor.u32 %v4034_v12, %v3023_v10 }
 0x1c8   : > { %v2342_v53 = vpop.f32.mrf.mxu1 }
 0x1c9   : > { %v2478_v29 = vadd.f32 %v2477_v33, %v2409_v43  ;;  %v2343_v46 = vadd.f32 %v2342_v53, %v4814_v47 }
 0x1ca   : > { %v2549_v59 = vpop.f32.mrf.mxu0 }
 0x1cb   : > { %2381 = vmatmul.bf16.gmra.mxu1 %v3576_v51  ;;  %2450 = vmatmul.bf16.gmra.mxu2 %v3580_v44  ;;  %v5055_v61 = vadd.f32 %v2546_v22, %v2478_v29  ;;  %v4040_v51 = vld [vmem:[%s4380_s5 + $0x8c] sm:$0xf]  ;;  %v3069_v44 = vld [vmem:[%s4380_s5 + $0xbc] sm:$0xf0]  ;;  %v4041_v29 = vld [vmem:[%s4380_s5 + $0x94] sm:$0xf] }
 0x1cc   : > { %2519 = vmatmul.bf16.gmra.mxu3 %v3584_v54  ;;  %v3075_v54 = vld [vmem:[%s4380_s5 + $0x90] sm:$0xf] }
 0x1cd   : > { %2588 = vmatmul.bf16.gmra.mxu0 %v3588_v13  ;;  %v4047_v13 = vld [vmem:[%s4380_s5 + $0xc0] sm:$0xf0] }
 0x1ce   : > { %v2411_v24 = vpop.f32.mrf.mxu2 }
 0x1cf   : > { %v2412_v32 = vadd.f32 %v2411_v24, %v2343_v46  ;;  %v2480_v27 = vpop.f32.mrf.mxu3  ;;  %v3077_v46 = vld [vmem:[%s4380_s5 + $0xc4] sm:$0xf0]  ;;  %v4048_v24 = vld [vmem:[%s4380_s5 + $0xc8] sm:$0xf0] }
 0x1d0   : > { %v2344_v6 = vpop.f32.mrf.mxu1  ;;  %v3080_v28 = vor.u32 %v4041_v29, %v3077_v46 }
 0x1d1   : > { %v2481_v49 = vadd.f32 %v2480_v27, %v2412_v32  ;;  %v2345_v47 = vadd.f32 %v2344_v6, %v4826_v16 }
 0x1d2   : > { %v2551_v3 = vpop.f32.mrf.mxu0 }
 0x1d3   : > { %v5060_v7 = vadd.f32 %v2549_v59, %v2481_v49  ;;  %v3083_v59 = vld [vmem:[%s4380_s5 + $0x98] sm:$0xf]  ;;  %v3072_v49 = vor.u32 %v4040_v51, %v3069_v44 }
 0x1d4   : > { %v3084_v37 = vor.u32 %v4048_v24, %v3083_v59 }
 0x1d6   : > { %v2413_v18 = vpop.f32.mrf.mxu2 }
 0x1d7   : > { %v2414_v19 = vadd.f32 %v2413_v18, %v2345_v47  ;;  %v2482_v20 = vpop.f32.mrf.mxu3  ;;  %v3076_v47 = vor.u32 %v4047_v13, %v3075_v54 }
 0x1d8   : > { %v2347_v22 = vpop.f32.mrf.mxu1 }
 0x1d9   : > { %v2483_v16 = vadd.f32 %v2482_v20, %v2414_v19  ;;  %v2348_v26 = vadd.f32 %v2347_v22, %v4834_v48 }
 0x1da   : > { %v2554_v38 = vpop.f32.mrf.mxu0 }
 0x1db   : > { %2602 = vmatmul.bf16.vlgmr.msrb.gmra.mxu1 %v3020_v9  ;;  %2671 = vmatmul.bf16.vlgmr.msrb.gmra.mxu2 %v3024_v2  ;;  %v5069_v30 = vadd.f32 %v2551_v3, %v2483_v16  ;;  %v4053_v9 = vld [vmem:[%s4380_s5 + $0xf4] sm:$0xf]  ;;  %v3121_v2 = vld [vmem:[%s4380_s5 + $0x124] sm:$0xf0]  ;;  %v4054_v16 = vld [vmem:[%s4380_s5 + $0xfc] sm:$0xf] }
 0x1dc   : > { %2740 = vmatmul.bf16.vlgmr.msrb.gmra.mxu3 %v3028_v23  ;;  %v3127_v23 = vld [vmem:[%s4380_s5 + $0xf8] sm:$0xf] }
 0x1dd   : > { %2809 = vmatmul.bf16.vlgmr.msrb.gmra.mxu0 %v3032_v25  ;;  %v4060_v25 = vld [vmem:[%s4380_s5 + $0x128] sm:$0xf0] }
 0x1de   : > { %v2416_v4 = vpop.f32.mrf.mxu2 }
 0x1df   : > { %v2417_v17 = vadd.f32 %v2416_v4, %v2348_v26  ;;  %v2485_v34 = vpop.f32.mrf.mxu3  ;;  %v3129_v26 = vld [vmem:[%s4380_s5 + $0x12c] sm:$0xf0]  ;;  %v4061_v4 = vld [vmem:[%s4380_s5 + $0x130] sm:$0xf0] }
 0x1e0   : > { %v2349_v36 = vpop.f32.mrf.mxu1  ;;  %v3132_v51 = vor.u32 %v4054_v16, %v3129_v26 }
 0x1e1   : > { %v2486_v43 = vadd.f32 %v2485_v34, %v2417_v17  ;;  %v2350_v48 = vadd.f32 %v2349_v36, %v4843_v57 }
 0x1e2   : > { %v2556_v33 = vpop.f32.mrf.mxu0 }
 0x1e3   : > { %v5074_v53 = vadd.f32 %v2554_v38, %v2486_v43  ;;  %v3135_v38 = vld [vmem:[%s4380_s5 + $0x100] sm:$0xf]  ;;  %v3124_v43 = vor.u32 %v4053_v9, %v3121_v2 }
 0x1e4   : > { %v3136_v44 = vor.u32 %v4061_v4, %v3135_v38 }
 0x1e6   : > { %v2418_v32 = vpop.f32.mrf.mxu2 }
 0x1e7   : > { %v2419_v27 = vadd.f32 %v2418_v32, %v2350_v48  ;;  %v2487_v6 = vpop.f32.mrf.mxu3  ;;  %v3128_v48 = vor.u32 %v4060_v25, %v3127_v23 }
 0x1e8   : > { %v2352_v3 = vpop.f32.mrf.mxu1 }
 0x1e9   : > { %v2488_v57 = vadd.f32 %v2487_v6, %v2419_v27  ;;  %v2353_v10 = vadd.f32 %v2352_v3, %v4860_v41 }
 0x1ea   : > { %v2559_v12 = vpop.f32.mrf.mxu0 }
 0x1eb   : > { %2607 = vmatmul.bf16.gmra.mxu1 %v3072_v49  ;;  %2676 = vmatmul.bf16.gmra.mxu2 %v3076_v47  ;;  %v5083_v50 = vadd.f32 %v2556_v33, %v2488_v57  ;;  %v4066_v49 = vld [vmem:[%s4380_s5 + $0x15c] sm:$0xf]  ;;  %v3173_v47 = vld [vmem:[%s4380_s5 + $0x18c] sm:$0xf0]  ;;  %v4067_v57 = vld [vmem:[%s4380_s5 + $0x164] sm:$0xf] }
 0x1ec   : > { %2745 = vmatmul.bf16.gmra.mxu3 %v3080_v28  ;;  %v3179_v28 = vld [vmem:[%s4380_s5 + $0x160] sm:$0xf] }
 0x1ed   : > { %2814 = vmatmul.bf16.gmra.mxu0 %v3084_v37  ;;  %v4073_v37 = vld [vmem:[%s4380_s5 + $0x190] sm:$0xf0] }
 0x1ee   : > { %v2421_v40 = vpop.f32.mrf.mxu2 }
 0x1ef   : > { %v2422_v15 = vadd.f32 %v2421_v40, %v2353_v10  ;;  %v2490_v5 = vpop.f32.mrf.mxu3  ;;  %v3181_v10 = vld [vmem:[%s4380_s5 + $0x194] sm:$0xf0]  ;;  %v4074_v40 = vld [vmem:[%s4380_s5 + $0x198] sm:$0xf0] }
 0x1f0   : > { %v2354_v18 = vpop.f32.mrf.mxu1  ;;  %v3184_v9 = vor.u32 %v4067_v57, %v3181_v10 }
 0x1f1   : > { %v2491_v19 = vadd.f32 %v2490_v5, %v2422_v15  ;;  %v2355_v41 = vadd.f32 %v2354_v18, %v4869_v39 }
 0x1f2   : > { %v2561_v20 = vpop.f32.mrf.mxu0 }
 0x1f3   : > { %v5088_v22 = vadd.f32 %v2559_v12, %v2491_v19  ;;  %v3187_v12 = vld [vmem:[%s4380_s5 + $0x168] sm:$0xf]  ;;  %v3176_v19 = vor.u32 %v4066_v49, %v3173_v47 }
 0x1f4   : > { %v3188_v2 = vor.u32 %v4074_v40, %v3187_v12 }
 0x1f6   : > { %v2423_v17 = vpop.f32.mrf.mxu2 }
 0x1f7   : > { %v2424_v34 = vadd.f32 %v2423_v17, %v2355_v41  ;;  %v2492_v36 = vpop.f32.mrf.mxu3  ;;  %v3180_v41 = vor.u32 %v4073_v37, %v3179_v28 }
 0x1f8   : > { %v2357_v33 = vpop.f32.mrf.mxu1 }
 0x1f9   : > { %v2493_v39 = vadd.f32 %v2492_v36, %v2424_v34  ;;  %v2358_v54 = vadd.f32 %v2357_v33, %v4880_v58 }
 0x1fa   : > { %v2564_v13 = vpop.f32.mrf.mxu0 }
 0x1fb   : > { %2612 = vmatmul.bf16.gmra.mxu1 %v3124_v43  ;;  %2681 = vmatmul.bf16.gmra.mxu2 %v3128_v48  ;;  %v5097_v29 = vadd.f32 %v2561_v20, %v2493_v39  ;;  %v4079_v43 = vld [vmem:[%s4380_s5 + $0x1c4] sm:$0xf]  ;;  %v3225_v48 = vld [vmem:[%s4380_s5 + $0x1f4] sm:$0xf0]  ;;  %v4080_v39 = vld [vmem:[%s4380_s5 + $0x1cc] sm:$0xf] }
 0x1fc   : > { %2750 = vmatmul.bf16.gmra.mxu3 %v3132_v51  ;;  %v3231_v51 = vld [vmem:[%s4380_s5 + $0x1c8] sm:$0xf] }
 0x1fd   : > { %2819 = vmatmul.bf16.gmra.mxu0 %v3136_v44  ;;  %v4086_v44 = vld [vmem:[%s4380_s5 + $0x1f8] sm:$0xf0] }
 0x1fe   : > { %v2426_v46 = vpop.f32.mrf.mxu2 }
 0x1ff   : > { %v2427_v59 = vadd.f32 %v2426_v46, %v2358_v54  ;;  %v2495_v24 = vpop.f32.mrf.mxu3  ;;  %v3233_v54 = vld [vmem:[%s4380_s5 + $0x1fc] sm:$0xf0]  ;;  %v4087_v46 = vld [vmem:[%s4380_s5 + $0x200] sm:$0xf0] }
 0x200   : > { %v2359_v32 = vpop.f32.mrf.mxu1  ;;  %v3236_v49 = vor.u32 %v4080_v39, %v3233_v54 }
 0x201   : > { %v2496_v27 = vadd.f32 %v2495_v24, %v2427_v59  ;;  %v2360_v58 = vadd.f32 %v2359_v32, %v4892_v21 }
 0x202   : > { %v2566_v6 = vpop.f32.mrf.mxu0 }
 0x203   : > { %v5102_v3 = vadd.f32 %v2564_v13, %v2496_v27  ;;  %v3239_v13 = vld [vmem:[%s4380_s5 + $0x1d0] sm:$0xf]  ;;  %v3228_v27 = vor.u32 %v4079_v43, %v3225_v48 }
 0x204   : > { %v3240_v47 = vor.u32 %v4087_v46, %v3239_v13 }
 0x206   : > { %v2428_v15 = vpop.f32.mrf.mxu2 }
 0x207   : > { %v2429_v5 = vadd.f32 %v2428_v15, %v2360_v58  ;;  %v2497_v18 = vpop.f32.mrf.mxu3  ;;  %v3232_v58 = vor.u32 %v4086_v44, %v3231_v51 }
 0x208   : > { %v2362_v20 = vpop.f32.mrf.mxu1 }
 0x209   : > { %v2498_v21 = vadd.f32 %v2497_v18, %v2429_v5  ;;  %v2363_v23 = vadd.f32 %v2362_v20, %v4900_v35 }
 0x20a   : > { %v2569_v25 = vpop.f32.mrf.mxu0 }
 0x20b   : > { %2617 = vmatmul.bf16.gmra.mxu1 %v3176_v19  ;;  %2686 = vmatmul.bf16.gmra.mxu2 %v3180_v41  ;;  %v5111_v16 = vadd.f32 %v2566_v6, %v2498_v21  ;;  %v4092_v19 = vld [vmem:[%s4380_s5 + $0x22c] sm:$0xf]  ;;  %v3277_v41 = vld [vmem:[%s4380_s5 + $0x25c] sm:$0xf0]  ;;  %v4093_v21 = vld [vmem:[%s4380_s5 + $0x234] sm:$0xf] }
 0x20c   : > { %2755 = vmatmul.bf16.gmra.mxu3 %v3184_v9  ;;  %v3283_v9 = vld [vmem:[%s4380_s5 + $0x230] sm:$0xf] }
 0x20d   : > { %2824 = vmatmul.bf16.gmra.mxu0 %v3188_v2  ;;  %v4099_v2 = vld [vmem:[%s4380_s5 + $0x260] sm:$0xf0] }
 0x20e   : > { %v2431_v26 = vpop.f32.mrf.mxu2 }
 0x20f   : > { %v2432_v38 = vadd.f32 %v2431_v26, %v2363_v23  ;;  %v2500_v4 = vpop.f32.mrf.mxu3  ;;  %v3285_v23 = vld [vmem:[%s4380_s5 + $0x264] sm:$0xf0]  ;;  %v4100_v26 = vld [vmem:[%s4380_s5 + $0x268] sm:$0xf0] }
 0x210   : > { %v2364_v17 = vpop.f32.mrf.mxu1  ;;  %v3288_v43 = vor.u32 %v4093_v21, %v3285_v23 }
 0x211   : > { %v2501_v34 = vadd.f32 %v2500_v4, %v2432_v38  ;;  %v2365_v35 = vadd.f32 %v2364_v17, %v4909_v60 }
 0x212   : > { %v2571_v36 = vpop.f32.mrf.mxu0 }
 0x213   : > { %v5116_v33 = vadd.f32 %v2569_v25, %v2501_v34  ;;  %v3291_v25 = vld [vmem:[%s4380_s5 + $0x238] sm:$0xf]  ;;  %v3280_v34 = vor.u32 %v4092_v19, %v3277_v41 }
 0x214   : > { %v3292_v48 = vor.u32 %v4100_v26, %v3291_v25 }
 0x216   : > { %v2433_v59 = vpop.f32.mrf.mxu2 }
 0x217   : > { %v2434_v24 = vadd.f32 %v2433_v59, %v2365_v35  ;;  %v2502_v32 = vpop.f32.mrf.mxu3  ;;  %v3284_v35 = vor.u32 %v4099_v2, %v3283_v9 }
 0x218   : > { %v2367_v6 = vpop.f32.mrf.mxu1 }
 0x219   : > { %v2503_v60 = vadd.f32 %v2502_v32, %v2434_v24  ;;  %v2368_v28 = vadd.f32 %v2367_v6, %v4926_v45 }
 0x21a   : > { %v2574_v37 = vpop.f32.mrf.mxu0 }
 0x21b   : > { %2622 = vmatmul.bf16.gmra.mxu1 %v3228_v27  ;;  %2691 = vmatmul.bf16.gmra.mxu2 %v3232_v58  ;;  %v5125_v57 = vadd.f32 %v2571_v36, %v2503_v60  ;;  %v4105_v27 = vld [vmem:[%s4380_s5 + $0x294] sm:$0xf]  ;;  %v3329_v58 = vld [vmem:[%s4380_s5 + $0x2c4] sm:$0xf0]  ;;  %v4106_v60 = vld [vmem:[%s4380_s5 + $0x29c] sm:$0xf] }
 0x21c   : > { %2760 = vmatmul.bf16.gmra.mxu3 %v3236_v49  ;;  %v3335_v49 = vld [vmem:[%s4380_s5 + $0x298] sm:$0xf] }
 0x21d   : > { %2829 = vmatmul.bf16.gmra.mxu0 %v3240_v47  ;;  %v4112_v47 = vld [vmem:[%s4380_s5 + $0x2c8] sm:$0xf0] }
 0x21e   : > { %v2436_v10 = vpop.f32.mrf.mxu2 }
 0x21f   : > { %v2437_v12 = vadd.f32 %v2436_v10, %v2368_v28  ;;  %v2505_v40 = vpop.f32.mrf.mxu3  ;;  %v3337_v28 = vld [vmem:[%s4380_s5 + $0x2cc] sm:$0xf0]  ;;  %v4113_v10 = vld [vmem:[%s4380_s5 + $0x2d0] sm:$0xf0] }
 0x220   : > { %v2369_v15 = vpop.f32.mrf.mxu1  ;;  %v3340_v19 = vor.u32 %v4106_v60, %v3337_v28 }
 0x221   : > { %v2506_v5 = vadd.f32 %v2505_v40, %v2437_v12  ;;  %v2370_v45 = vadd.f32 %v2369_v15, %v4935_v42 }
 0x222   : > { %v2576_v18 = vpop.f32.mrf.mxu0 }
 0x223   : > { %v5130_v20 = vadd.f32 %v2574_v37, %v2506_v5  ;;  %v3343_v37 = vld [vmem:[%s4380_s5 + $0x2a0] sm:$0xf]  ;;  %v3332_v5 = vor.u32 %v4105_v27, %v3329_v58 }
 0x224   : > { %v3344_v41 = vor.u32 %v4113_v10, %v3343_v37 }
 0x226   : > { %v2438_v38 = vpop.f32.mrf.mxu2 }
 0x227   : > { %v2439_v4 = vadd.f32 %v2438_v38, %v2370_v45  ;;  %v2507_v17 = vpop.f32.mrf.mxu3  ;;  %v3336_v45 = vor.u32 %v4112_v47, %v3335_v49 }
 0x228   : > { %v2372_v36 = vpop.f32.mrf.mxu1 }
 0x229   : > { %v2508_v42 = vadd.f32 %v2507_v17, %v2439_v4  ;;  %v2373_v51 = vadd.f32 %v2372_v36, %v4946_v1 }
 0x22a   : > { %v2579_v44 = vpop.f32.mrf.mxu0 }
 0x22b   : > { %2627 = vmatmul.bf16.gmra.mxu1 %v3280_v34  ;;  %2696 = vmatmul.bf16.gmra.mxu2 %v3284_v35  ;;  %v5139_v39 = vadd.f32 %v2576_v18, %v2508_v42  ;;  %v4118_v34 = vld [vmem:[%s4380_s5 + $0x2fc] sm:$0xf]  ;;  %v3381_v35 = vld [vmem:[%s4380_s5 + $0x32c] sm:$0xf0]  ;;  %v4119_v42 = vld [vmem:[%s4380_s5 + $0x304] sm:$0xf] }
 0x22c   : > { %2765 = vmatmul.bf16.gmra.mxu3 %v3288_v43  ;;  %v3387_v43 = vld [vmem:[%s4380_s5 + $0x300] sm:$0xf] }
 0x22d   : > { %2834 = vmatmul.bf16.gmra.mxu0 %v3292_v48  ;;  %v4125_v48 = vld [vmem:[%s4380_s5 + $0x330] sm:$0xf0] }
 0x22e   : > { %v2441_v54 = vpop.f32.mrf.mxu2 }
 0x22f   : > { %v2442_v13 = vadd.f32 %v2441_v54, %v2373_v51  ;;  %v2510_v46 = vpop.f32.mrf.mxu3  ;;  %v3389_v51 = vld [vmem:[%s4380_s5 + $0x334] sm:$0xf0]  ;;  %v4126_v54 = vld [vmem:[%s4380_s5 + $0x338] sm:$0xf0] }
 0x230   : > { %v2374_v59 = vpop.f32.mrf.mxu1  ;;  %v3392_v27 = vor.u32 %v4119_v42, %v3389_v51 }
 0x231   : > { %v2511_v24 = vadd.f32 %v2510_v46, %v2442_v13  ;;  %v2375_v1 = vadd.f32 %v2374_v59, %v4958_v14 }
 0x232   : > { %v2581_v32 = vpop.f32.mrf.mxu0 }
 0x233   : > { %v5144_v6 = vadd.f32 %v2579_v44, %v2511_v24  ;;  %v3395_v44 = vld [vmem:[%s4380_s5 + $0x308] sm:$0xf]  ;;  %v3384_v24 = vor.u32 %v4118_v34, %v3381_v35 }
 0x234   : > { %v3396_v58 = vor.u32 %v4126_v54, %v3395_v44 }
 0x236   : > { %v2443_v12 = vpop.f32.mrf.mxu2 }
 0x237   : > { %v2444_v40 = vadd.f32 %v2443_v12, %v2375_v1  ;;  %v2512_v15 = vpop.f32.mrf.mxu3  ;;  %v3388_v1 = vor.u32 %v4125_v48, %v3387_v43 }
 0x238   : > { %v2377_v18 = vpop.f32.mrf.mxu1 }
 0x239   : > { %v2513_v14 = vadd.f32 %v2512_v15, %v2444_v40  ;;  %v2378_v9 = vadd.f32 %v2377_v18, %v4966_v52 }
 0x23a   : > { %v2584_v2 = vpop.f32.mrf.mxu0 }
 0x23b   : > { %2632 = vmatmul.bf16.gmra.mxu1 %v3332_v5  ;;  %2701 = vmatmul.bf16.gmra.mxu2 %v3336_v45  ;;  %v5153_v21 = vadd.f32 %v2581_v32, %v2513_v14  ;;  %v4131_v5 = vld [vmem:[%s4380_s5 + $0x364] sm:$0xf]  ;;  %v3433_v45 = vld [vmem:[%s4380_s5 + $0x394] sm:$0xf0]  ;;  %v4132_v14 = vld [vmem:[%s4380_s5 + $0x36c] sm:$0xf] }
 0x23c   : > { %2770 = vmatmul.bf16.gmra.mxu3 %v3340_v19  ;;  %v3439_v19 = vld [vmem:[%s4380_s5 + $0x368] sm:$0xf] }
 0x23d   : > { %2839 = vmatmul.bf16.gmra.mxu0 %v3344_v41  ;;  %v4138_v41 = vld [vmem:[%s4380_s5 + $0x398] sm:$0xf0] }
 0x23e   : > { %v2446_v23 = vpop.f32.mrf.mxu2 }
 0x23f   : > { %v2447_v25 = vadd.f32 %v2446_v23, %v2378_v9  ;;  %v2515_v26 = vpop.f32.mrf.mxu3  ;;  %v3441_v9 = vld [vmem:[%s4380_s5 + $0x39c] sm:$0xf0]  ;;  %v4139_v23 = vld [vmem:[%s4380_s5 + $0x3a0] sm:$0xf0] }
 0x240   : > { %v2379_v38 = vpop.f32.mrf.mxu1  ;;  %v3444_v34 = vor.u32 %v4132_v14, %v3441_v9 }
 0x241   : > { %v2516_v4 = vadd.f32 %v2515_v26, %v2447_v25  ;;  %v2380_v52 = vadd.f32 %v2379_v38, %v4975_v0 }
 0x242   : > { %v2586_v17 = vpop.f32.mrf.mxu0 }
 0x243   : > { %v5158_v36 = vadd.f32 %v2584_v2, %v2516_v4  ;;  %v3447_v2 = vld [vmem:[%s4380_s5 + $0x370] sm:$0xf]  ;;  %v3436_v4 = vor.u32 %v4131_v5, %v3433_v45 }
 0x246   : > { %v2448_v13 = vpop.f32.mrf.mxu2 }
 0x247   : > { %v2449_v46 = vadd.f32 %v2448_v13, %v2380_v52  ;;  %v2517_v59 = vpop.f32.mrf.mxu3  ;;  %v3440_v52 = vor.u32 %v4138_v41, %v3439_v19 }
 0x248   : > { %v2382_v32 = vpop.f32.mrf.mxu1 }
 0x249   : > { %v2518_v0 = vadd.f32 %v2517_v59, %v2449_v46  ;;  %v2383_v49 = vadd.f32 %v2382_v32, %v4992_v63  ;;  %v3485_v32 = vld [vmem:[%s4380_s5 + $0x3fc] sm:$0xf0] }
 0x24a   : > { %v2589_v47 = vpop.f32.mrf.mxu0 }
 0x24b   : > { %2637 = vmatmul.bf16.gmra.mxu1 %v3384_v24  ;;  %2706 = vmatmul.bf16.gmra.mxu2 %v3388_v1  ;;  %v5167_v60 = vadd.f32 %v2586_v17, %v2518_v0  ;;  %v4144_v1 = vld [vmem:[%s4380_s5 + $0x3cc] sm:$0xf]  ;;  %v3493_v0 = vld [vmem:[%s4380_s5 + $0x404] sm:$0xf0] }
 0x24c   : > { %2775 = vmatmul.bf16.gmra.mxu3 %v3392_v27  ;;  %v3491_v27 = vld [vmem:[%s4380_s5 + $0x3d0] sm:$0xf] }
 0x24d   : > { %2844 = vmatmul.bf16.gmra.mxu0 %v3396_v58  ;;  %v4145_v58 = vld [vmem:[%s4380_s5 + $0x3d4] sm:$0xf] }
 0x24e   : > { %v2451_v28 = vpop.f32.mrf.mxu2  ;;  %v3496_v45 = vor.u32 %v4145_v58, %v3493_v0 }
 0x24f   : > { %v2452_v37 = vadd.f32 %v2451_v28, %v2383_v49  ;;  %v2520_v10 = vpop.f32.mrf.mxu3  ;;  %v3499_v28 = vld [vmem:[%s4380_s5 + $0x3d8] sm:$0xf] }
 0x250   : > { %v2384_v12 = vpop.f32.mrf.mxu1 }
 0x251   : > { %v2521_v40 = vadd.f32 %v2520_v10, %v2452_v37  ;;  %v2385_v63 = vadd.f32 %v2384_v12, %v5001_v56  ;;  %v3448_v56 = vor.u32 %v4139_v23, %v3447_v2  ;;  %v4152_v37 = vld [vmem:[%s4380_s5 + $0x408] sm:$0xf0] }
 0x252   : > { %v2591_v15 = vpop.f32.mrf.mxu0  ;;  %v3500_v19 = vor.u32 %v4152_v37, %v3499_v28 }
 0x253   : > { %v5172_v18 = vadd.f32 %v2589_v47, %v2521_v40 }
 0x256   : > { %v2453_v25 = vpop.f32.mrf.mxu2 }
 0x257   : > { %v2454_v26 = vadd.f32 %v2453_v25, %v2385_v63  ;;  %v2522_v38 = vpop.f32.mrf.mxu3  ;;  %v3488_v63 = vor.u32 %v4144_v1, %v3485_v32 }
 0x258   : > { %v2603_v17 = vpop.f32.mrf.mxu1 }
 0x259   : > { %v2523_v35 = vadd.f32 %v2522_v38, %v2454_v26  ;;  %v2604_v42 = vadd.f32 %v2603_v17, %v5012_v8  ;;  %v4151_v8 = vld [vmem:[%s4380_s5 + $0x400] sm:$0xf0] }
 0x25a   : > { %v2810_v43 = vpop.f32.mrf.mxu0 }
 0x25b   : > { %2642 = vmatmul.bf16.gmra.mxu1 %v3436_v4  ;;  %2711 = vmatmul.bf16.gmra.mxu2 %v3440_v52  ;;  %v5180_v48 = vadd.f32 %v2591_v15, %v2523_v35  ;;  %v3492_v15 = vor.u32 %v4151_v8, %v3491_v27  ;;  %v3543_v35 = vld [vmem:[%s4380_s5 + $0x438] sm:$0xf] }
 0x25c   : > { %2780 = vmatmul.bf16.gmra.mxu3 %v3444_v34  ;;  %v4157_v34 = vld [vmem:[%s4380_s5 + $0x434] sm:$0xf] }
 0x25d   : > { %2849 = vmatmul.bf16.gmra.mxu0 %v3448_v56  ;;  %v3537_v56 = vld [vmem:[%s4380_s5 + $0x464] sm:$0xf0] }
 0x25e   : > { %v2672_v51 = vpop.f32.mrf.mxu2  ;;  %v3540_v1 = vor.u32 %v4157_v34, %v3537_v56 }
 0x25f   : > { %v2673_v44 = vadd.f32 %v2672_v51, %v2604_v42  ;;  %v2741_v54 = vpop.f32.mrf.mxu3  ;;  %v4158_v42 = vld [vmem:[%s4380_s5 + $0x43c] sm:$0xf]  ;;  %v3545_v51 = vld [vmem:[%s4380_s5 + $0x46c] sm:$0xf0] }
 0x260   : > { %v2605_v13 = vpop.f32.mrf.mxu1  ;;  %v3548_v8 = vor.u32 %v4158_v42, %v3545_v51 }
 0x261   : > { %v2742_v46 = vadd.f32 %v2741_v54, %v2673_v44  ;;  %v2606_v47 = vadd.f32 %v2605_v13, %v5024_v31  ;;  %v3551_v54 = vld [vmem:[%s4380_s5 + $0x440] sm:$0xf]  ;;  %v4165_v13 = vld [vmem:[%s4380_s5 + $0x470] sm:$0xf0] }
 0x262   : > { %v2812_v59 = vpop.f32.mrf.mxu0  ;;  %v3552_v58 = vor.u32 %v4165_v13, %v3551_v54 }
 0x263   : > { %v2811_v24 = vadd.f32 %v2810_v43, %v2742_v46  ;;  %v4164_v43 = vld [vmem:[%s4380_s5 + $0x468] sm:$0xf0] }
 0x264   : > { %v3544_v32 = vor.u32 %v4164_v43, %v3543_v35 }
 0x265   : > { %v2870_v49 = vmax.f32 %v2811_v24, 0.0 }
 0x266   : > { %v2674_v10 = vpop.f32.mrf.mxu2 }
 0x267   : > { %2894 = vst [vmem:[%s5190_s14] sm:$0xff] %v2870_v49  ;;  %v2675_v12 = vadd.f32 %v2674_v10, %v2606_v47  ;;  %v2743_v40 = vpop.f32.mrf.mxu3 }
 0x268   : > { %v2608_v5 = vpop.f32.mrf.mxu1 }
 0x269   : > { %v2744_v41 = vadd.f32 %v2743_v40, %v2675_v12  ;;  %v2609_v2 = vadd.f32 %v2608_v5, %v5032_v55 }
 0x26a   : > { %v2815_v14 = vpop.f32.mrf.mxu0 }
 0x26b   : > { %v2813_v9 = vadd.f32 %v2812_v59, %v2744_v41  ;;  %2647 = vmatmul.bf16.gmra.mxu1 %v3488_v63  ;;  %2716 = vmatmul.bf16.gmra.mxu2 %v3492_v15  ;;  %v3595_v41 = vld [vmem:[%s4380_s5 + $0x4a0] sm:$0xf] }
 0x26c   : > { %2785 = vmatmul.bf16.gmra.mxu3 %v3496_v45  ;;  %v4170_v45 = vld [vmem:[%s4380_s5 + $0x49c] sm:$0xf] }
 0x26d   : > { %2854 = vmatmul.bf16.gmra.mxu0 %v3500_v19  ;;  %v2871_v31 = vmax.f32 %v2813_v9, 0.0  ;;  %v3589_v19 = vld [vmem:[%s4380_s5 + $0x4cc] sm:$0xf0]  ;;  %v4171_v9 = vld [vmem:[%s4380_s5 + $0x4a4] sm:$0xf] }
 0x26e   : > { %v2677_v23 = vpop.f32.mrf.mxu2 }
 0x26f   : > { %2895 = vst [vmem:[%s5190_s14 + $0x8] sm:$0xff] %v2871_v31  ;;  %v2678_v25 = vadd.f32 %v2677_v23, %v2609_v2  ;;  %v2746_v26 = vpop.f32.mrf.mxu3  ;;  %v3597_v31 = vld [vmem:[%s4380_s5 + $0x4d4] sm:$0xf0]  ;;  %v3603_v23 = vld [vmem:[%s4380_s5 + $0x4a8] sm:$0xf] }
 0x270   : > { %v2610_v38 = vpop.f32.mrf.mxu1  ;;  %v3600_v56 = vor.u32 %v4171_v9, %v3597_v31 }
 0x271   : > { %v2747_v4 = vadd.f32 %v2746_v26, %v2678_v25  ;;  %v2611_v55 = vadd.f32 %v2610_v38, %v5041_v62  ;;  %v4178_v25 = vld [vmem:[%s4380_s5 + $0x4d8] sm:$0xf0] }
 0x272   : > { %v2817_v52 = vpop.f32.mrf.mxu0  ;;  %v3604_v35 = vor.u32 %v4178_v25, %v3603_v23 }
 0x273   : > { %v2816_v17 = vadd.f32 %v2815_v14, %v2747_v4  ;;  %v4177_v14 = vld [vmem:[%s4380_s5 + $0x4d0] sm:$0xf0] }
 0x275   : > { %v2872_v44 = vmax.f32 %v2816_v17, 0.0  ;;  %v3596_v17 = vor.u32 %v4177_v14, %v3595_v41 }
 0x276   : > { %v2679_v46 = vpop.f32.mrf.mxu2 }
 0x277   : > { %2896 = vst [vmem:[%s5190_s14 + $0x10] sm:$0xff] %v2872_v44  ;;  %v2680_v59 = vadd.f32 %v2679_v46, %v2611_v55  ;;  %v2748_v24 = vpop.f32.mrf.mxu3 }
 0x278   : > { %v2613_v27 = vpop.f32.mrf.mxu1 }
 0x279   : > { %v2749_v0 = vadd.f32 %v2748_v24, %v2680_v59  ;;  %v2614_v28 = vadd.f32 %v2613_v27, %v5046_v11 }
 0x27a   : > { %v2820_v49 = vpop.f32.mrf.mxu0 }
 0x27b   : > { %v2818_v47 = vadd.f32 %v2817_v52, %v2749_v0  ;;  %2652 = vmatmul.bf16.gmra.mxu1 %v3540_v1  ;;  %2721 = vmatmul.bf16.gmra.mxu2 %v3544_v32  ;;  %v3592_v52 = vor.u32 %v4170_v45, %v3589_v19 }
 0x27c   : > { %2790 = vmatmul.bf16.gmra.mxu3 %v3548_v8 }
 0x27d   : > { %2859 = vmatmul.bf16.gmra.mxu0 %v3552_v58  ;;  %v2873_v62 = vmax.f32 %v2818_v47, 0.0 }
 0x27e   : > { %v2682_v37 = vpop.f32.mrf.mxu2 }
 0x27f   : > { %2897 = vst [vmem:[%s5190_s14 + $0x18] sm:$0xff] %v2873_v62  ;;  %v2683_v10 = vadd.f32 %v2682_v37, %v2614_v28  ;;  %v2751_v12 = vpop.f32.mrf.mxu3 }
 0x280   : > { %v2615_v40 = vpop.f32.mrf.mxu1 }
 0x281   : > { %v2752_v63 = vadd.f32 %v2751_v12, %v2683_v10  ;;  %v2616_v11 = vadd.f32 %v2615_v40, %v5055_v61 }
 0x282   : > { %v2822_v15 = vpop.f32.mrf.mxu0 }
 0x283   : > { %v2821_v5 = vadd.f32 %v2820_v49, %v2752_v63 }
 0x285   : > { %v2874_v2 = vmax.f32 %v2821_v5, 0.0 }
 0x286   : > { %v2684_v26 = vpop.f32.mrf.mxu2 }
 0x287   : > { %2898 = vst [vmem:[%s5190_s14 + $0x20] sm:$0xff] %v2874_v2  ;;  %v2685_v38 = vadd.f32 %v2684_v26, %v2616_v11  ;;  %v2753_v4 = vpop.f32.mrf.mxu3 }
 0x288   : > { %v2618_v34 = vpop.f32.mrf.mxu1 }
 0x289   : > { %v2754_v43 = vadd.f32 %v2753_v4, %v2685_v38  ;;  %v2619_v44 = vadd.f32 %v2618_v34, %v5060_v7 }
 0x28a   : > { %v2825_v42 = vpop.f32.mrf.mxu0 }
 0x28b   : > { %v2823_v51 = vadd.f32 %v2822_v15, %v2754_v43  ;;  %2657 = vmatmul.bf16.gmra.mxu1 %v3592_v52  ;;  %2726 = vmatmul.bf16.gmra.mxu2 %v3596_v17 }
 0x28c   : > { %2795 = vmatmul.bf16.gmra.mxu3 %v3600_v56 }
 0x28d   : > { %2864 = vmatmul.bf16.gmra.mxu0 %v3604_v35  ;;  %v2875_v61 = vmax.f32 %v2823_v51, 0.0 }
 0x28e   : > { %v2687_v55 = vpop.f32.mrf.mxu2 }
 0x28f   : > { %2899 = vst [vmem:[%s5190_s14 + $0x28] sm:$0xff] %v2875_v61  ;;  %v2688_v54 = vadd.f32 %v2687_v55, %v2619_v44  ;;  %v2756_v13 = vpop.f32.mrf.mxu3 }
 0x290   : > { %v2620_v46 = vpop.f32.mrf.mxu1 }
 0x291   : > { %v2757_v59 = vadd.f32 %v2756_v13, %v2688_v54  ;;  %v2621_v27 = vadd.f32 %v2620_v46, %v5069_v30 }
 0x292   : > { %v2827_v24 = vpop.f32.mrf.mxu0 }
 0x293   : > { %v2826_v1 = vadd.f32 %v2825_v42, %v2757_v59 }
 0x295   : > { %v2876_v32 = vmax.f32 %v2826_v1, 0.0 }
 0x296   : > { %v2689_v8 = vpop.f32.mrf.mxu2 }
 0x297   : > { %2900 = vst [vmem:[%s5190_s14 + $0x30] sm:$0xff] %v2876_v32  ;;  %v2690_v58 = vadd.f32 %v2689_v8, %v2621_v27  ;;  %v2758_v0 = vpop.f32.mrf.mxu3 }
 0x298   : > { %v2623_v49 = vpop.f32.mrf.mxu1 }
 0x299   : > { %v2759_v47 = vadd.f32 %v2758_v0, %v2690_v58  ;;  %v2624_v37 = vadd.f32 %v2623_v49, %v5074_v53 }
 0x29a   : > { %v2830_v7 = vpop.f32.mrf.mxu0 }
 0x29b   : > { %v2828_v62 = vadd.f32 %v2827_v24, %v2759_v47 }
 0x29d   : > { %v2877_v28 = vmax.f32 %v2828_v62, 0.0 }
 0x29e   : > { %v2692_v10 = vpop.f32.mrf.mxu2 }
 0x29f   : > { %2901 = vst [vmem:[%s5190_s14 + $0x38] sm:$0xff] %v2877_v28  ;;  %v2693_v12 = vadd.f32 %v2692_v10, %v2624_v37  ;;  %v2761_v40 = vpop.f32.mrf.mxu3 }
 0x2a0   : > { %v2625_v63 = vpop.f32.mrf.mxu1 }
 0x2a1   : > { %v2762_v15 = vadd.f32 %v2761_v40, %v2693_v12  ;;  %v2626_v19 = vadd.f32 %v2625_v63, %v5083_v50 }
 0x2a2   : > { %v2832_v30 = vpop.f32.mrf.mxu0 }
 0x2a3   : > { %v2831_v5 = vadd.f32 %v2830_v7, %v2762_v15 }
 0x2a5   : > { %v2878_v45 = vmax.f32 %v2831_v5, 0.0 }
 0x2a6   : > { %v2694_v41 = vpop.f32.mrf.mxu2 }
 0x2a7   : > { %2902 = vst [vmem:[%s5190_s14 + $0x40] sm:$0xff] %v2878_v45  ;;  %v2695_v14 = vadd.f32 %v2694_v41, %v2626_v19  ;;  %v2763_v9 = vpop.f32.mrf.mxu3 }
 0x2a8   : > { %v2628_v31 = vpop.f32.mrf.mxu1 }
 0x2a9   : > { %v2764_v2 = vadd.f32 %v2763_v9, %v2695_v14  ;;  %v2629_v25 = vadd.f32 %v2628_v31, %v5088_v22 }
 0x2aa   : > { %v2835_v53 = vpop.f32.mrf.mxu0 }
 0x2ab   : > { %v2833_v11 = vadd.f32 %v2832_v30, %v2764_v2 }
 0x2ad   : > { %v2879_v23 = vmax.f32 %v2833_v11, 0.0 }
 0x2ae   : > { %v2697_v26 = vpop.f32.mrf.mxu2 }
 0x2af   : > { %2903 = vst [vmem:[%s5190_s14 + $0x48] sm:$0xff] %v2879_v23  ;;  %v2698_v38 = vadd.f32 %v2697_v26, %v2629_v25  ;;  %v2766_v4 = vpop.f32.mrf.mxu3 }
 0x2b0   : > { %v2630_v52 = vpop.f32.mrf.mxu1 }
 0x2b1   : > { %v2767_v17 = vadd.f32 %v2766_v4, %v2698_v38  ;;  %v2631_v35 = vadd.f32 %v2630_v52, %v5097_v29 }
 0x2b2   : > { %v2837_v50 = vpop.f32.mrf.mxu0 }
 0x2b3   : > { %v2836_v34 = vadd.f32 %v2835_v53, %v2767_v17 }
 0x2b5   : > { %v2880_v56 = vmax.f32 %v2836_v34, 0.0 }
 0x2b6   : > { %v2699_v43 = vpop.f32.mrf.mxu2 }
 0x2b7   : > { %2904 = vst [vmem:[%s5190_s14 + $0x50] sm:$0xff] %v2880_v56  ;;  %v2700_v42 = vadd.f32 %v2699_v43, %v2631_v35  ;;  %v2768_v51 = vpop.f32.mrf.mxu3 }
 0x2b8   : > { %v2633_v61 = vpop.f32.mrf.mxu1 }
 0x2b9   : > { %v2769_v44 = vadd.f32 %v2768_v51, %v2700_v42  ;;  %v2634_v13 = vadd.f32 %v2633_v61, %v5102_v3 }
 0x2ba   : > { %v2840_v22 = vpop.f32.mrf.mxu0 }
 0x2bb   : > { %v2838_v55 = vadd.f32 %v2837_v50, %v2769_v44 }
 0x2bd   : > { %v2881_v54 = vmax.f32 %v2838_v55, 0.0 }
 0x2be   : > { %v2702_v46 = vpop.f32.mrf.mxu2 }
 0x2bf   : > { %2905 = vst [vmem:[%s5190_s14 + $0x58] sm:$0xff] %v2881_v54  ;;  %v2703_v59 = vadd.f32 %v2702_v46, %v2634_v13  ;;  %v2771_v24 = vpop.f32.mrf.mxu3 }
 0x2c0   : > { %v2635_v1 = vpop.f32.mrf.mxu1 }
 0x2c1   : > { %v2772_v32 = vadd.f32 %v2771_v24, %v2703_v59  ;;  %v2636_v58 = vadd.f32 %v2635_v1, %v5111_v16 }
 0x2c2   : > { %v2842_v29 = vpop.f32.mrf.mxu0 }
 0x2c3   : > { %v2841_v27 = vadd.f32 %v2840_v22, %v2772_v32 }
 0x2c5   : > { %v2882_v8 = vmax.f32 %v2841_v27, 0.0 }
 0x2c6   : > { %v2704_v0 = vpop.f32.mrf.mxu2 }
 0x2c7   : > { %2906 = vst [vmem:[%s5190_s14 + $0x60] sm:$0xff] %v2882_v8  ;;  %v2705_v49 = vadd.f32 %v2704_v0, %v2636_v58  ;;  %v2773_v47 = vpop.f32.mrf.mxu3 }
 0x2c8   : > { %v2638_v7 = vpop.f32.mrf.mxu1 }
 0x2c9   : > { %v2774_v62 = vadd.f32 %v2773_v47, %v2705_v49  ;;  %v2639_v10 = vadd.f32 %v2638_v7, %v5116_v33 }
 0x2ca   : > { %v2845_v3 = vpop.f32.mrf.mxu0 }
 0x2cb   : > { %v2843_v28 = vadd.f32 %v2842_v29, %v2774_v62 }
 0x2cd   : > { %v2883_v37 = vmax.f32 %v2843_v28, 0.0 }
 0x2ce   : > { %v2707_v12 = vpop.f32.mrf.mxu2 }
 0x2cf   : > { %2907 = vst [vmem:[%s5190_s14 + $0x68] sm:$0xff] %v2883_v37  ;;  %v2708_v40 = vadd.f32 %v2707_v12, %v2639_v10  ;;  %v2776_v63 = vpop.f32.mrf.mxu3 }
 0x2d0   : > { %v2640_v15 = vpop.f32.mrf.mxu1 }
 0x2d1   : > { %v2777_v30 = vadd.f32 %v2776_v63, %v2708_v40  ;;  %v2641_v19 = vadd.f32 %v2640_v15, %v5125_v57 }
 0x2d2   : > { %v2847_v16 = vpop.f32.mrf.mxu0 }
 0x2d3   : > { %v2846_v5 = vadd.f32 %v2845_v3, %v2777_v30 }
 0x2d5   : > { %v2884_v45 = vmax.f32 %v2846_v5, 0.0 }
 0x2d6   : > { %v2709_v41 = vpop.f32.mrf.mxu2 }
 0x2d7   : > { %2908 = vst [vmem:[%s5190_s14 + $0x70] sm:$0xff] %v2884_v45  ;;  %v2710_v14 = vadd.f32 %v2709_v41, %v2641_v19  ;;  %v2778_v9 = vpop.f32.mrf.mxu3 }
 0x2d8   : > { %v2643_v31 = vpop.f32.mrf.mxu1 }
 0x2d9   : > { %v2779_v2 = vadd.f32 %v2778_v9, %v2710_v14  ;;  %v2644_v23 = vadd.f32 %v2643_v31, %v5130_v20 }
 0x2da   : > { %v2850_v33 = vpop.f32.mrf.mxu0 }
 0x2db   : > { %v2848_v53 = vadd.f32 %v2847_v16, %v2779_v2 }
 0x2dd   : > { %v2885_v11 = vmax.f32 %v2848_v53, 0.0 }
 0x2de   : > { %v2712_v25 = vpop.f32.mrf.mxu2 }
 0x2df   : > { %2909 = vst [vmem:[%s5190_s14 + $0x78] sm:$0xff] %v2885_v11  ;;  %v2713_v26 = vadd.f32 %v2712_v25, %v2644_v23  ;;  %v2781_v38 = vpop.f32.mrf.mxu3 }
 0x2e0   : > { %v2645_v4 = vpop.f32.mrf.mxu1 }
 0x2e1   : > { %v2782_v52 = vadd.f32 %v2781_v38, %v2713_v26  ;;  %v2646_v34 = vadd.f32 %v2645_v4, %v5139_v39 }
 0x2e2   : > { %v2852_v57 = vpop.f32.mrf.mxu0 }
 0x2e3   : > { %v2851_v17 = vadd.f32 %v2850_v33, %v2782_v52 }
 0x2e5   : > { %v2886_v50 = vmax.f32 %v2851_v17, 0.0 }
 0x2e6   : > { %v2714_v56 = vpop.f32.mrf.mxu2 }
 0x2e7   : > { %2910 = vst [vmem:[%s5190_s14 + $0x80] sm:$0xff] %v2886_v50  ;;  %v2715_v35 = vadd.f32 %v2714_v56, %v2646_v34  ;;  %v2783_v43 = vpop.f32.mrf.mxu3 }
 0x2e8   : > { %v2648_v42 = vpop.f32.mrf.mxu1 }
 0x2e9   : > { %v2784_v51 = vadd.f32 %v2783_v43, %v2715_v35  ;;  %v2649_v22 = vadd.f32 %v2648_v42, %v5144_v6 }
 0x2ea   : > { %v2855_v20 = vpop.f32.mrf.mxu0 }
 0x2eb   : > { %v2853_v61 = vadd.f32 %v2852_v57, %v2784_v51 }
 0x2ed   : > { %v2887_v44 = vmax.f32 %v2853_v61, 0.0 }
 0x2ee   : > { %v2717_v55 = vpop.f32.mrf.mxu2 }
 0x2ef   : > { %2911 = vst [vmem:[%s5190_s14 + $0x88] sm:$0xff] %v2887_v44  ;;  %v2718_v54 = vadd.f32 %v2717_v55, %v2649_v22  ;;  %v2786_v13 = vpop.f32.mrf.mxu3 }
 0x2f0   : > { %v2650_v46 = vpop.f32.mrf.mxu1 }
 0x2f1   : > { %v2787_v59 = vadd.f32 %v2786_v13, %v2718_v54  ;;  %v2651_v32 = vadd.f32 %v2650_v46, %v5153_v21 }
 0x2f2   : > { %v2857_v39 = vpop.f32.mrf.mxu0 }
 0x2f3   : > { %v2856_v24 = vadd.f32 %v2855_v20, %v2787_v59 }
 0x2f5   : > { %v2888_v1 = vmax.f32 %v2856_v24, 0.0 }
 0x2f6   : > { %v2719_v29 = vpop.f32.mrf.mxu2 }
 0x2f7   : > { %2912 = vst [vmem:[%s5190_s14 + $0x90] sm:$0xff] %v2888_v1  ;;  %v2720_v27 = vadd.f32 %v2719_v29, %v2651_v32  ;;  %v2788_v8 = vpop.f32.mrf.mxu3 }
 0x2f8   : > { %v2653_v58 = vpop.f32.mrf.mxu1 }
 0x2f9   : > { %v2789_v0 = vadd.f32 %v2788_v8, %v2720_v27  ;;  %v2654_v7 = vadd.f32 %v2653_v58, %v5158_v36 }
 0x2fa   : > { %v2860_v49 = vpop.f32.mrf.mxu0 }
 0x2fb   : > { %v2858_v6 = vadd.f32 %v2857_v39, %v2789_v0 }
 0x2fd   : > { %v2889_v47 = vmax.f32 %v2858_v6, 0.0 }
 0x2fe   : > { %v2722_v62 = vpop.f32.mrf.mxu2 }
 0x2ff   : > { %2913 = vst [vmem:[%s5190_s14 + $0x98] sm:$0xff] %v2889_v47  ;;  %v2723_v3 = vadd.f32 %v2722_v62, %v2654_v7  ;;  %v2791_v28 = vpop.f32.mrf.mxu3 }
 0x300   : > { %v2655_v37 = vpop.f32.mrf.mxu1 }
 0x301   : > { %v2792_v10 = vadd.f32 %v2791_v28, %v2723_v3  ;;  %v2656_v40 = vadd.f32 %v2655_v37, %v5167_v60 }
 0x302   : > { %v2862_v63 = vpop.f32.mrf.mxu0 }
 0x303   : > { %v2861_v21 = vadd.f32 %v2860_v49, %v2792_v10 }
 0x305   : > { %v2890_v12 = vmax.f32 %v2861_v21, 0.0 }
 0x306   : > { %v2724_v15 = vpop.f32.mrf.mxu2 }
 0x307   : > { %2914 = vst [vmem:[%s5190_s14 + $0xa0] sm:$0xff] %v2890_v12  ;;  %v2725_v30 = vadd.f32 %v2724_v15, %v2656_v40  ;;  %v2793_v16 = vpop.f32.mrf.mxu3 }
 0x308   : > { %v2658_v5 = vpop.f32.mrf.mxu1 }
 0x309   : > { %v2794_v45 = vadd.f32 %v2793_v16, %v2725_v30  ;;  %v2659_v41 = vadd.f32 %v2658_v5, %v5172_v18 }
 0x30a   : > { %v2865_v2 = vpop.f32.mrf.mxu0 }
 0x30b   : > { %v2863_v36 = vadd.f32 %v2862_v63, %v2794_v45 }
 0x30d   : > { %v2891_v19 = vmax.f32 %v2863_v36, 0.0 }
 0x30e   : > { %v2727_v14 = vpop.f32.mrf.mxu2 }
 0x30f   : > { %2915 = vst [vmem:[%s5190_s14 + $0xa8] sm:$0xff] %v2891_v19  ;;  %v2728_v9 = vadd.f32 %v2727_v14, %v2659_v41  ;;  %v2796_v31 = vpop.f32.mrf.mxu3 }
 0x310   : > { %v2660_v60 = vpop.f32.mrf.mxu1 }
 0x311   : > { %v2797_v33 = vadd.f32 %v2796_v31, %v2728_v9  ;;  %v2661_v23 = vadd.f32 %v2660_v60, %v5180_v48 }
 0x312   : > { %v2867_v52 = vpop.f32.mrf.mxu0 }
 0x313   : > { %v2866_v53 = vadd.f32 %v2865_v2, %v2797_v33 }
 0x315   : > { %v2892_v11 = vmax.f32 %v2866_v53, 0.0 }
 0x316   : > { %v2729_v25 = vpop.f32.mrf.mxu2 }
 0x317   : > { %2916 = vst [vmem:[%s5190_s14 + $0xb0] sm:$0xff] %v2892_v11  ;;  %v2730_v26 = vadd.f32 %v2729_v25, %v2661_v23  ;;  %v2798_v38 = vpop.f32.mrf.mxu3 }
 0x319   : > { %v2799_v4 = vadd.f32 %v2798_v38, %v2730_v26 }
 0x31b   : > { %v2868_v57 = vadd.f32 %v2867_v52, %v2799_v4 }
 0x31d   : > { %v2893_v18 = vmax.f32 %v2868_v57, 0.0 }
 0x31f   : > { %2917 = vst [vmem:[%s5190_s14 + $0xb8] sm:$0xff] %v2893_v18 }
 0x320 PF: > { %s13_s12 = sadd.s32 1, %s4323_s12  }
 0x321   : > { %p10_p4 = scmp.ge.s32.totalorder %s13_s12, 4  }
 0x323   :  { %12 = sbr.rel (!%p10_p4) target bundleno = 1 (0x1), region = 62 }

// kernel: cnn2fc1_forward.5
= control target key start
LH: loop header
LB: loop body
LE: loop exit
PB: predicated region body
PF: predicated region fallthrough
CT: control target
= control target key end

     0   :  { %s11471_s1 = inlined_call_operand.vmem [shape: bf16[4608,256], index: 1, kind: input, shape index: {}]   ;;  %s11472_s0 = inlined_call_operand.vmem [shape: bf16[8,4608], index: 0, kind: input, shape index: {}]   ;;  %s11473_s2 = inlined_call_operand.vmem [shape: f32[1,256], index: 2, kind: input, shape index: {}]   ;;  %s11474_s3 = inlined_call_operand.vmem [shape: bf16[256,128], index: 3, kind: input, shape index: {}]   ;;  %s11475_s4 = inlined_call_operand.vmem [shape: f32[1,128], index: 4, kind: input, shape index: {}]   ;;  %s11476_s5 = inlined_call_operand.vmem [shape: f32[8,128], index: 5, kind: output, shape index: {}]  }
   0x1   :  { %v4787_v0 = vld [vmem:[%s11471_s1 + $0x70] sm:$0xf]  ;;  %v7112_v1 = vld [vmem:[%s11471_s1 + $0x74] sm:$0xf0]  ;;  %v4779_v11 = vld [vmem:[%s11471_s1 + $0x60] sm:$0xf] }
   0x2   :  { %v4851_v2 = vld [vmem:[%s11471_s1 + $0xf0] sm:$0xf]  ;;  %v4788_v3 = vor.u32 %v7112_v1, %v4787_v0  ;;  %v7128_v4 = vld [vmem:[%s11471_s1 + $0xf4] sm:$0xf0]  ;;  %v7110_v13 = vld [vmem:[%s11471_s1 + $0x64] sm:$0xf0] }
   0x3   :  { %v4915_v5 = vld [vmem:[%s11471_s1 + $0x170] sm:$0xf]  ;;  %v7144_v6 = vld [vmem:[%s11471_s1 + $0x174] sm:$0xf0]  ;;  %v4852_v7 = vor.u32 %v7128_v4, %v4851_v2  ;;  %v4843_v14 = vld [vmem:[%s11471_s1 + $0xe0] sm:$0xf]  ;;  %v4780_v16 = vor.u32 %v7110_v13, %v4779_v11 }
   0x4   :  { %v4916_v8 = vor.u32 %v7144_v6, %v4915_v5  ;;  %v4979_v9 = vld [vmem:[%s11471_s1 + $0x1f0] sm:$0xf]  ;;  %v7160_v10 = vld [vmem:[%s11471_s1 + $0x1f4] sm:$0xf0]  ;;  %3626 = vmatpush.bf16.msra.mxu0 %v4788_v3  ;;  %v7126_v15 = vld [vmem:[%s11471_s1 + $0xe4] sm:$0xf0] }
   0x5   :  { %v4980_v12 = vor.u32 %v7160_v10, %v4979_v9  ;;  %3639 = vmatpush.bf16.msra.mxu1 %v4852_v7  ;;  %v4844_v17 = vor.u32 %v7126_v15, %v4843_v14  ;;  %v4907_v18 = vld [vmem:[%s11471_s1 + $0x160] sm:$0xf]  ;;  %v7142_v19 = vld [vmem:[%s11471_s1 + $0x164] sm:$0xf0]  ;;  %v4771_v23 = vld [vmem:[%s11471_s1 + $0x50] sm:$0xf] }
   0x6   :  { %3652 = vmatpush.bf16.msra.mxu2 %v4916_v8  ;;  %v4971_v20 = vld [vmem:[%s11471_s1 + $0x1e0] sm:$0xf]  ;;  %v4908_v21 = vor.u32 %v7142_v19, %v4907_v18  ;;  %v7158_v22 = vld [vmem:[%s11471_s1 + $0x1e4] sm:$0xf0]  ;;  %v7108_v24 = vld [vmem:[%s11471_s1 + $0x54] sm:$0xf0] }
   0x7   :  { %3665 = vmatpush.bf16.msra.mxu3 %v4980_v12  ;;  %v4972_v25 = vor.u32 %v7158_v22, %v4971_v20  ;;  %v4835_v26 = vld [vmem:[%s11471_s1 + $0xd0] sm:$0xf]  ;;  %v7124_v27 = vld [vmem:[%s11471_s1 + $0xd4] sm:$0xf0]  ;;  %v4772_v29 = vor.u32 %v7108_v24, %v4771_v23  ;;  %v4763_v35 = vld [vmem:[%s11471_s1 + $0x40] sm:$0xf] }
   0x8   :  { %v4899_v28 = vld [vmem:[%s11471_s1 + $0x150] sm:$0xf]  ;;  %3627 = vmatpush.bf16.msra.mxu0 %v4780_v16  ;;  %v7140_v30 = vld [vmem:[%s11471_s1 + $0x154] sm:$0xf0]  ;;  %v4836_v33 = vor.u32 %v7124_v27, %v4835_v26  ;;  %v7106_v36 = vld [vmem:[%s11471_s1 + $0x44] sm:$0xf0] }
   0x9   :  { %v4963_v31 = vld [vmem:[%s11471_s1 + $0x1d0] sm:$0xf]  ;;  %v7156_v32 = vld [vmem:[%s11471_s1 + $0x1d4] sm:$0xf0]  ;;  %3640 = vmatpush.bf16.msra.mxu1 %v4844_v17  ;;  %v4900_v34 = vor.u32 %v7140_v30, %v4899_v28  ;;  %v4827_v37 = vld [vmem:[%s11471_s1 + $0xc0] sm:$0xf]  ;;  %v4764_v44 = vor.u32 %v7106_v36, %v4763_v35 }
   0xa   :  { %3653 = vmatpush.bf16.msra.mxu2 %v4908_v21  ;;  %v4964_v38 = vor.u32 %v7156_v32, %v4963_v31  ;;  %v7122_v39 = vld [vmem:[%s11471_s1 + $0xc4] sm:$0xf0]  ;;  %v4891_v40 = vld [vmem:[%s11471_s1 + $0x140] sm:$0xf]  ;;  %v4755_v47 = vld [vmem:[%s11471_s1 + $0x30] sm:$0xf] }
   0xb   :  { %3666 = vmatpush.bf16.msra.mxu3 %v4972_v25  ;;  %v7138_v41 = vld [vmem:[%s11471_s1 + $0x144] sm:$0xf0]  ;;  %v4955_v42 = vld [vmem:[%s11471_s1 + $0x1c0] sm:$0xf]  ;;  %v4828_v45 = vor.u32 %v7122_v39, %v4827_v37  ;;  %v7104_v48 = vld [vmem:[%s11471_s1 + $0x34] sm:$0xf0] }
   0xc   :  { %v7154_v43 = vld [vmem:[%s11471_s1 + $0x1c4] sm:$0xf0]  ;;  %3628 = vmatpush.bf16.msra.mxu0 %v4772_v29  ;;  %v4892_v46 = vor.u32 %v7138_v41, %v4891_v40  ;;  %v4819_v49 = vld [vmem:[%s11471_s1 + $0xb0] sm:$0xf]  ;;  %v7120_v51 = vld [vmem:[%s11471_s1 + $0xb4] sm:$0xf0]  ;;  %v4756_v56 = vor.u32 %v7104_v48, %v4755_v47 }
   0xd   :  { %3641 = vmatpush.bf16.msra.mxu1 %v4836_v33  ;;  %v4956_v50 = vor.u32 %v7154_v43, %v4955_v42  ;;  %v4883_v52 = vld [vmem:[%s11471_s1 + $0x130] sm:$0xf]  ;;  %v7136_v53 = vld [vmem:[%s11471_s1 + $0x134] sm:$0xf0]  ;;  %v4820_v57 = vor.u32 %v7120_v51, %v4819_v49  ;;  %v4747_v59 = vld [vmem:[%s11471_s1 + $0x20] sm:$0xf] }
   0xe   :  { %3654 = vmatpush.bf16.msra.mxu2 %v4900_v34  ;;  %v4947_v54 = vld [vmem:[%s11471_s1 + $0x1b0] sm:$0xf]  ;;  %v7152_v55 = vld [vmem:[%s11471_s1 + $0x1b4] sm:$0xf0]  ;;  %v4884_v58 = vor.u32 %v7136_v53, %v4883_v52  ;;  %v7102_v60 = vld [vmem:[%s11471_s1 + $0x24] sm:$0xf0] }
   0xf   :  { %3667 = vmatpush.bf16.msra.mxu3 %v4964_v38  ;;  %v4811_v61 = vld [vmem:[%s11471_s1 + $0xa0] sm:$0xf]  ;;  %v4948_v62 = vor.u32 %v7152_v55, %v4947_v54  ;;  %v7118_v63 = vld [vmem:[%s11471_s1 + $0xa4] sm:$0xf0]  ;;  %v4748_v4 = vor.u32 %v7102_v60, %v4747_v59  ;;  %v4739_v7 = vld [vmem:[%s11471_s1 + $0x10] sm:$0xf] }
  0x10   :  { %3629 = vmatpush.bf16.msra.mxu0 %v4764_v44  ;;  %v4875_v0 = vld [vmem:[%s11471_s1 + $0x120] sm:$0xf]  ;;  %v7134_v1 = vld [vmem:[%s11471_s1 + $0x124] sm:$0xf0]  ;;  %v4812_v5 = vor.u32 %v7118_v63, %v4811_v61  ;;  %v7100_v8 = vld [vmem:[%s11471_s1 + $0x14] sm:$0xf0] }
  0x11   :  { %3642 = vmatpush.bf16.msra.mxu1 %v4828_v45  ;;  %v4939_v2 = vld [vmem:[%s11471_s1 + $0x1a0] sm:$0xf]  ;;  %v7150_v3 = vld [vmem:[%s11471_s1 + $0x1a4] sm:$0xf0]  ;;  %v4876_v6 = vor.u32 %v7134_v1, %v4875_v0  ;;  %v4803_v9 = vld [vmem:[%s11471_s1 + $0x90] sm:$0xf]  ;;  %v4740_v16 = vor.u32 %v7100_v8, %v4739_v7 }
  0x12   :  { %3655 = vmatpush.bf16.msra.mxu2 %v4892_v46  ;;  %v4940_v10 = vor.u32 %v7150_v3, %v4939_v2  ;;  %v7116_v11 = vld [vmem:[%s11471_s1 + $0x94] sm:$0xf0]  ;;  %v4867_v12 = vld [vmem:[%s11471_s1 + $0x110] sm:$0xf]  ;;  %v4731_v17 = vld [vmem:[%s11471_s1] sm:$0xf] }
  0x13   :  { %3668 = vmatpush.bf16.msra.mxu3 %v4956_v50  ;;  %v7132_v13 = vld [vmem:[%s11471_s1 + $0x114] sm:$0xf0]  ;;  %v4931_v14 = vld [vmem:[%s11471_s1 + $0x190] sm:$0xf]  ;;  %v7098_v18 = vld [vmem:[%s11471_s1 + $0x4] sm:$0xf0]  ;;  %v4804_v19 = vor.u32 %v7116_v11, %v4803_v9 }
  0x14   :  { %3630 = vmatpush.bf16.msra.mxu0 %v4756_v56  ;;  %v7148_v15 = vld [vmem:[%s11471_s1 + $0x194] sm:$0xf0]  ;;  %v4868_v20 = vor.u32 %v7132_v13, %v4867_v12  ;;  %v4795_v21 = vld [vmem:[%s11471_s1 + $0x80] sm:$0xf]  ;;  %v7114_v22 = vld [vmem:[%s11471_s1 + $0x84] sm:$0xf0]  ;;  %v4732_v31 = vor.u32 %v7098_v18, %v4731_v17 }
  0x15   :  { %3643 = vmatpush.bf16.msra.mxu1 %v4820_v57  ;;  %v4859_v23 = vld [vmem:[%s11471_s1 + $0x100] sm:$0xf]  ;;  %v4932_v24 = vor.u32 %v7148_v15, %v4931_v14  ;;  %v7130_v25 = vld [vmem:[%s11471_s1 + $0x104] sm:$0xf0]  ;;  %v5043_v28 = vld [vmem:[%s11471_s1 + $0x270] sm:$0xf]  ;;  %v4796_v35 = vor.u32 %v7114_v22, %v4795_v21 }
  0x16   :  { %3656 = vmatpush.bf16.msra.mxu2 %v4884_v58  ;;  %v4923_v26 = vld [vmem:[%s11471_s1 + $0x180] sm:$0xf]  ;;  %v7146_v27 = vld [vmem:[%s11471_s1 + $0x184] sm:$0xf0]  ;;  %v7176_v29 = vld [vmem:[%s11471_s1 + $0x274] sm:$0xf0]  ;;  %v4860_v36 = vor.u32 %v7130_v25, %v4859_v23 }
  0x17   :  { %3669 = vmatpush.bf16.msra.mxu3 %v4948_v62  ;;  %v5107_v30 = vld [vmem:[%s11471_s1 + $0x2f0] sm:$0xf]  ;;  %v7192_v32 = vld [vmem:[%s11471_s1 + $0x2f4] sm:$0xf0]  ;;  %v4924_v39 = vor.u32 %v7146_v27, %v4923_v26  ;;  %v5044_v40 = vor.u32 %v7176_v29, %v5043_v28  ;;  %v5035_v43 = vld [vmem:[%s11471_s1 + $0x260] sm:$0xf] }
  0x18   :  { %3631 = vmatpush.bf16.msra.mxu0 %v4748_v4  ;;  %v5171_v33 = vld [vmem:[%s11471_s1 + $0x370] sm:$0xf]  ;;  %v7208_v34 = vld [vmem:[%s11471_s1 + $0x374] sm:$0xf0]  ;;  %v5108_v41 = vor.u32 %v7192_v32, %v5107_v30  ;;  %v7174_v44 = vld [vmem:[%s11471_s1 + $0x264] sm:$0xf0] }
  0x19   :  { %3644 = vmatpush.bf16.msra.mxu1 %v4812_v5  ;;  %v5235_v37 = vld [vmem:[%s11471_s1 + $0x3f0] sm:$0xf]  ;;  %v7224_v38 = vld [vmem:[%s11471_s1 + $0x3f4] sm:$0xf0]  ;;  %v5172_v42 = vor.u32 %v7208_v34, %v5171_v33  ;;  %v5099_v45 = vld [vmem:[%s11471_s1 + $0x2e0] sm:$0xf]  ;;  %v5036_v52 = vor.u32 %v7174_v44, %v5035_v43 }
  0x1a   :  { %3657 = vmatpush.bf16.msra.mxu2 %v4876_v6  ;;  %v5236_v46 = vor.u32 %v7224_v38, %v5235_v37  ;;  %v7190_v47 = vld [vmem:[%s11471_s1 + $0x2e4] sm:$0xf0]  ;;  %v5163_v48 = vld [vmem:[%s11471_s1 + $0x360] sm:$0xf]  ;;  %v5027_v53 = vld [vmem:[%s11471_s1 + $0x250] sm:$0xf] }
  0x1b   :  { %3670 = vmatpush.bf16.msra.mxu3 %v4940_v10  ;;  %v7206_v49 = vld [vmem:[%s11471_s1 + $0x364] sm:$0xf0]  ;;  %v5227_v50 = vld [vmem:[%s11471_s1 + $0x3e0] sm:$0xf]  ;;  %v5100_v54 = vor.u32 %v7190_v47, %v5099_v45  ;;  %v7172_v56 = vld [vmem:[%s11471_s1 + $0x254] sm:$0xf0] }
  0x1c   :  { %3632 = vmatpush.bf16.msra.mxu0 %v4740_v16  ;;  %v7222_v51 = vld [vmem:[%s11471_s1 + $0x3e4] sm:$0xf0]  ;;  %v5164_v55 = vor.u32 %v7206_v49, %v5163_v48  ;;  %v5091_v57 = vld [vmem:[%s11471_s1 + $0x2d0] sm:$0xf]  ;;  %v7188_v58 = vld [vmem:[%s11471_s1 + $0x2d4] sm:$0xf0]  ;;  %v5028_v0 = vor.u32 %v7172_v56, %v5027_v53 }
  0x1d   :  { %3645 = vmatpush.bf16.msra.mxu1 %v4804_v19  ;;  %v5228_v59 = vor.u32 %v7222_v51, %v5227_v50  ;;  %v5155_v60 = vld [vmem:[%s11471_s1 + $0x350] sm:$0xf]  ;;  %v7204_v61 = vld [vmem:[%s11471_s1 + $0x354] sm:$0xf0]  ;;  %v5092_v1 = vor.u32 %v7188_v58, %v5091_v57  ;;  %v21_v2 = vld [vmem:[%s11472_s0 + $0x8] sm:$0xff] }
  0x1e   :  { %3658 = vmatpush.bf16.msra.mxu2 %v4868_v20  ;;  %v5219_v62 = vld [vmem:[%s11471_s1 + $0x3d0] sm:$0xf]  ;;  %v7220_v63 = vld [vmem:[%s11471_s1 + $0x3d4] sm:$0xf0]  ;;  %v20_v3 = vld [vmem:[%s11472_s0] sm:$0xff]  ;;  %v5156_v4 = vor.u32 %v7204_v61, %v5155_v60  ;;  %v640_v8 = vunpack.c.l.b16 %v21_v2  ;;  %v641_v10 = vunpack.c.h.b16 %v21_v2 }
  0x1f   :  { %3671 = vmatpush.bf16.msra.mxu3 %v4932_v24  ;;  %v5019_v5 = vld [vmem:[%s11471_s1 + $0x240] sm:$0xf]  ;;  %v7170_v6 = vld [vmem:[%s11471_s1 + $0x244] sm:$0xf0]  ;;  %v638_v9 = vunpack.c.l.b16 %v20_v3  ;;  %v5220_v11 = vor.u32 %v7220_v63, %v5219_v62  ;;  %v639_v15 = vunpack.c.h.b16 %v20_v3  ;;  %v5011_v25 = vld [vmem:[%s11471_s1 + $0x230] sm:$0xf] }
  0x20   :  { %3633 = vmatpush.bf16.msra.mxu0 %v4732_v31  ;;  %v5083_v7 = vld [vmem:[%s11471_s1 + $0x2c0] sm:$0xf]  ;;  %v7186_v12 = vld [vmem:[%s11471_s1 + $0x2c4] sm:$0xf0]  ;;  %v8015_v18 = vpack.c.b16 %v640_v8, %v640_v8  ;;  %v8019_v20 = vpack.c.b16 %v641_v10, %v641_v10  ;;  %v5020_v21 = vor.u32 %v7170_v6, %v5019_v5  ;;  %v7168_v26 = vld [vmem:[%s11471_s1 + $0x234] sm:$0xf0] }
  0x21   :  { %3646 = vmatpush.bf16.msra.mxu1 %v4796_v35  ;;  %v5147_v13 = vld [vmem:[%s11471_s1 + $0x340] sm:$0xf]  ;;  %v7202_v14 = vld [vmem:[%s11471_s1 + $0x344] sm:$0xf0]  ;;  %v8017_v19 = vpack.c.b16 %v638_v9, %v638_v9  ;;  %v8021_v22 = vpack.c.b16 %v639_v15, %v639_v15  ;;  %v5084_v23 = vor.u32 %v7186_v12, %v5083_v7  ;;  %v5075_v27 = vld [vmem:[%s11471_s1 + $0x2b0] sm:$0xf]  ;;  %v5012_v34 = vor.u32 %v7168_v26, %v5011_v25 }
  0x22   :  { %3659 = vmatpush.bf16.msra.mxu2 %v4860_v36  ;;  %v5211_v16 = vld [vmem:[%s11471_s1 + $0x3c0] sm:$0xf]  ;;  %v7218_v17 = vld [vmem:[%s11471_s1 + $0x3c4] sm:$0xf0]  ;;  %v5148_v24 = vor.u32 %v7202_v14, %v5147_v13  ;;  %v7184_v29 = vld [vmem:[%s11471_s1 + $0x2b4] sm:$0xf0] }
  0x23   :  { %3672 = vmatpush.bf16.msra.mxu3 %v4924_v39  ;;  %v5212_v28 = vor.u32 %v7218_v17, %v5211_v16  ;;  %v5139_v30 = vld [vmem:[%s11471_s1 + $0x330] sm:$0xf]  ;;  %v7200_v31 = vld [vmem:[%s11471_s1 + $0x334] sm:$0xf0]  ;;  %3634 = vmatmul.bf16.vlgmr.msra.gmra.mxu0 %v8017_v19  ;;  %v5076_v35 = vor.u32 %v7184_v29, %v5075_v27  ;;  %v5003_v37 = vld [vmem:[%s11471_s1 + $0x220] sm:$0xf] }
  0x24   :  { %3678 = vmatpush.bf16.msrb.mxu0 %v5044_v40  ;;  %v5203_v32 = vld [vmem:[%s11471_s1 + $0x3b0] sm:$0xf]  ;;  %v7216_v33 = vld [vmem:[%s11471_s1 + $0x3b4] sm:$0xf0]  ;;  %3647 = vmatmul.bf16.vlgmr.msra.gmra.mxu1 %v8021_v22  ;;  %v5140_v36 = vor.u32 %v7200_v31, %v5139_v30  ;;  %v7166_v38 = vld [vmem:[%s11471_s1 + $0x224] sm:$0xf0] }
  0x25   :  { %3691 = vmatpush.bf16.msrb.mxu1 %v5108_v41  ;;  %3660 = vmatmul.bf16.vlgmr.msra.gmra.mxu2 %v8015_v18  ;;  %v5067_v39 = vld [vmem:[%s11471_s1 + $0x2a0] sm:$0xf]  ;;  %v5204_v40 = vor.u32 %v7216_v33, %v5203_v32  ;;  %v7182_v41 = vld [vmem:[%s11471_s1 + $0x2a4] sm:$0xf0]  ;;  %v4995_v49 = vld [vmem:[%s11471_s1 + $0x210] sm:$0xf] }
  0x26   :  { %3704 = vmatpush.bf16.msrb.mxu2 %v5172_v42  ;;  %3673 = vmatmul.bf16.vlgmr.msra.gmra.mxu3 %v8019_v20  ;;  %v5131_v42 = vld [vmem:[%s11471_s1 + $0x320] sm:$0xf]  ;;  %v7198_v43 = vld [vmem:[%s11471_s1 + $0x324] sm:$0xf0]  ;;  %v5068_v47 = vor.u32 %v7182_v41, %v5067_v39  ;;  %v7164_v50 = vld [vmem:[%s11471_s1 + $0x214] sm:$0xf0] }
  0x27   :  { %3717 = vmatpush.bf16.msrb.mxu3 %v5236_v46  ;;  %v5195_v44 = vld [vmem:[%s11471_s1 + $0x3a0] sm:$0xf]  ;;  %v7214_v45 = vld [vmem:[%s11471_s1 + $0x3a4] sm:$0xf0]  ;;  %v5004_v46 = vor.u32 %v7166_v38, %v5003_v37  ;;  %v5132_v48 = vor.u32 %v7198_v43, %v5131_v42  ;;  %v5059_v51 = vld [vmem:[%s11471_s1 + $0x290] sm:$0xf] }
  0x28   :  { %3679 = vmatpush.bf16.msrb.mxu0 %v5036_v52  ;;  %v5196_v52 = vor.u32 %v7214_v45, %v5195_v44  ;;  %v7180_v53 = vld [vmem:[%s11471_s1 + $0x294] sm:$0xf0]  ;;  %v5187_v56 = vld [vmem:[%s11471_s1 + $0x390] sm:$0xf]  ;;  %v4987_v58 = vld [vmem:[%s11471_s1 + $0x200] sm:$0xf] }
  0x29   :  { %3692 = vmatpush.bf16.msrb.mxu1 %v5100_v54  ;;  %v5123_v54 = vld [vmem:[%s11471_s1 + $0x310] sm:$0xf]  ;;  %v7212_v57 = vld [vmem:[%s11471_s1 + $0x394] sm:$0xf0]  ;;  %v7162_v60 = vld [vmem:[%s11471_s1 + $0x204] sm:$0xf0]  ;;  %v5060_v63 = vor.u32 %v7180_v53, %v5059_v51 }
  0x2a   :  { %3705 = vmatpush.bf16.msrb.mxu2 %v5164_v55  ;;  %v7196_v55 = vld [vmem:[%s11471_s1 + $0x314] sm:$0xf0]  ;;  %v5051_v61 = vld [vmem:[%s11471_s1 + $0x280] sm:$0xf]  ;;  %v7178_v62 = vld [vmem:[%s11471_s1 + $0x284] sm:$0xf0] }
  0x2b   :  { %3718 = vmatpush.bf16.msrb.mxu3 %v5228_v59  ;;  %v4996_v59 = vor.u32 %v7164_v50, %v4995_v49  ;;  %v7194_v2 = vld [vmem:[%s11471_s1 + $0x304] sm:$0xf0]  ;;  %v23_v3 = vld [vmem:[%s11472_s0 + $0x18] sm:$0xff]  ;;  %v5179_v5 = vld [vmem:[%s11471_s1 + $0x380] sm:$0xf]  ;;  %v5052_v16 = vor.u32 %v7178_v62, %v5051_v61 }
  0x2c   :  { %3680 = vmatpush.bf16.msrb.mxu0 %v5028_v0  ;;  %v5124_v0 = vor.u32 %v7196_v55, %v5123_v54  ;;  %v7210_v6 = vld [vmem:[%s11471_s1 + $0x384] sm:$0xf0]  ;;  %v22_v7 = vld [vmem:[%s11472_s0 + $0x10] sm:$0xff]  ;;  %v7240_v9 = vld [vmem:[%s11471_s1 + $0x474] sm:$0xf0]  ;;  %v644_v15 = vunpack.c.l.b16 %v23_v3  ;;  %v645_v25 = vunpack.c.h.b16 %v23_v3 }
  0x2d   :  { %3693 = vmatpush.bf16.msrb.mxu1 %v5092_v1  ;;  %v5115_v1 = vld [vmem:[%s11471_s1 + $0x300] sm:$0xf]  ;;  %v5299_v8 = vld [vmem:[%s11471_s1 + $0x470] sm:$0xf]  ;;  %v7256_v12 = vld [vmem:[%s11471_s1 + $0x4f4] sm:$0xf0]  ;;  %v5180_v26 = vor.u32 %v7210_v6, %v5179_v5 }
  0x2e   :  { %3706 = vmatpush.bf16.msrb.mxu2 %v5156_v4  ;;  %v5188_v4 = vor.u32 %v7212_v57, %v5187_v56  ;;  %v5363_v10 = vld [vmem:[%s11471_s1 + $0x4f0] sm:$0xf]  ;;  %v7272_v14 = vld [vmem:[%s11471_s1 + $0x574] sm:$0xf0]  ;;  %v5116_v17 = vor.u32 %v7194_v2, %v5115_v1  ;;  %v5300_v27 = vor.u32 %v7240_v9, %v5299_v8  ;;  %v5291_v31 = vld [vmem:[%s11471_s1 + $0x460] sm:$0xf]  ;;  %v8171_v38 = vpack.c.b16 %v644_v15, %v644_v15 }
  0x2f   :  { %3719 = vmatpush.bf16.msrb.mxu3 %v5220_v11  ;;  %v4988_v11 = vor.u32 %v7162_v60, %v4987_v58  ;;  %v5427_v13 = vld [vmem:[%s11471_s1 + $0x570] sm:$0xf]  ;;  %v5364_v29 = vor.u32 %v7256_v12, %v5363_v10  ;;  %v7238_v32 = vld [vmem:[%s11471_s1 + $0x464] sm:$0xf0]  ;;  %v5355_v33 = vld [vmem:[%s11471_s1 + $0x4e0] sm:$0xf]  ;;  %v8181_v42 = vpack.c.b16 %v645_v25, %v645_v25 }
  0x30   :  { %3681 = vmatpush.bf16.msrb.mxu0 %v5020_v21  ;;  %v5491_v21 = vld [vmem:[%s11471_s1 + $0x5f0] sm:$0xf]  ;;  %v5428_v30 = vor.u32 %v7272_v14, %v5427_v13  ;;  %v7270_v37 = vld [vmem:[%s11471_s1 + $0x564] sm:$0xf0]  ;;  %v5483_v39 = vld [vmem:[%s11471_s1 + $0x5e0] sm:$0xf]  ;;  %v5292_v43 = vor.u32 %v7238_v32, %v5291_v31 }
  0x31   :  { %3694 = vmatpush.bf16.msrb.mxu1 %v5084_v23  ;;  %v7288_v23 = vld [vmem:[%s11471_s1 + $0x5f4] sm:$0xf0]  ;;  %v5347_v49 = vld [vmem:[%s11471_s1 + $0x4d0] sm:$0xf]  ;;  %v7234_v60 = vld [vmem:[%s11471_s1 + $0x444] sm:$0xf0] }
  0x32   :  { %3707 = vmatpush.bf16.msrb.mxu2 %v5148_v24  ;;  %v642_v24 = vunpack.c.l.b16 %v22_v7  ;;  %v7252_v51 = vld [vmem:[%s11471_s1 + $0x4d4] sm:$0xf0]  ;;  %v5475_v54 = vld [vmem:[%s11471_s1 + $0x5d0] sm:$0xf]  ;;  %v5339_v61 = vld [vmem:[%s11471_s1 + $0x4c0] sm:$0xf] }
  0x33   :  { %3720 = vmatpush.bf16.msrb.mxu3 %v5212_v28  ;;  %v643_v28 = vunpack.c.h.b16 %v22_v7  ;;  %v7268_v53 = vld [vmem:[%s11471_s1 + $0x554] sm:$0xf0]  ;;  %v5348_v57 = vor.u32 %v7252_v51, %v5347_v49  ;;  %v7266_v1 = vld [vmem:[%s11471_s1 + $0x544] sm:$0xf0]  ;;  %v5467_v2 = vld [vmem:[%s11471_s1 + $0x5c0] sm:$0xf] }
  0x34   :  { %3682 = vmatpush.bf16.msrb.mxu0 %v5012_v34  ;;  %v5492_v34 = vor.u32 %v7288_v23, %v5491_v21  ;;  %v8179_v41 = vpack.c.b16 %v642_v24, %v642_v24  ;;  %v7284_v55 = vld [vmem:[%s11471_s1 + $0x5d4] sm:$0xf0]  ;;  %v7282_v3 = vld [vmem:[%s11471_s1 + $0x5c4] sm:$0xf0]  ;;  %v5267_v7 = vld [vmem:[%s11471_s1 + $0x430] sm:$0xf] }
  0x35   :  { %3695 = vmatpush.bf16.msrb.mxu1 %v5076_v35  ;;  %v7254_v35 = vld [vmem:[%s11471_s1 + $0x4e4] sm:$0xf0]  ;;  %v8183_v44 = vpack.c.b16 %v643_v28, %v643_v28  ;;  %v5476_v62 = vor.u32 %v7284_v55, %v5475_v54  ;;  %v7232_v8 = vld [vmem:[%s11471_s1 + $0x434] sm:$0xf0]  ;;  %v5331_v9 = vld [vmem:[%s11471_s1 + $0x4b0] sm:$0xf]  ;;  %v5468_v10 = vor.u32 %v7282_v3, %v5467_v2 }
  0x36   :  { %3708 = vmatpush.bf16.msrb.mxu2 %v5140_v36  ;;  %v5419_v36 = vld [vmem:[%s11471_s1 + $0x560] sm:$0xf]  ;;  %v5356_v45 = vor.u32 %v7254_v35, %v5355_v33  ;;  %v5395_v12 = vld [vmem:[%s11471_s1 + $0x530] sm:$0xf]  ;;  %v7264_v13 = vld [vmem:[%s11471_s1 + $0x534] sm:$0xf0] }
  0x37   :  { %3721 = vmatpush.bf16.msrb.mxu3 %v5204_v40  ;;  %v7286_v40 = vld [vmem:[%s11471_s1 + $0x5e4] sm:$0xf0]  ;;  %v5459_v14 = vld [vmem:[%s11471_s1 + $0x5b0] sm:$0xf]  ;;  %v7280_v15 = vld [vmem:[%s11471_s1 + $0x5b4] sm:$0xf0]  ;;  %v5396_v21 = vor.u32 %v7264_v13, %v5395_v12 }
  0x38   :  { %3683 = vmatpush.bf16.msrb.mxu0 %v5004_v46  ;;  %v5420_v46 = vor.u32 %v7270_v37, %v5419_v36  ;;  %v5484_v50 = vor.u32 %v7286_v40, %v5483_v39  ;;  %v5259_v23 = vld [vmem:[%s11471_s1 + $0x420] sm:$0xf]  ;;  %v7230_v24 = vld [vmem:[%s11471_s1 + $0x424] sm:$0xf0]  ;;  %v5251_v35 = vld [vmem:[%s11471_s1 + $0x410] sm:$0xf] }
  0x39   :  { %3696 = vmatpush.bf16.msrb.mxu1 %v5068_v47  ;;  %v5283_v47 = vld [vmem:[%s11471_s1 + $0x450] sm:$0xf]  ;;  %v5323_v25 = vld [vmem:[%s11471_s1 + $0x4a0] sm:$0xf]  ;;  %v7278_v31 = vld [vmem:[%s11471_s1 + $0x5a4] sm:$0xf0]  ;;  %v5260_v32 = vor.u32 %v7230_v24, %v5259_v23 }
  0x3a   :  { %3709 = vmatpush.bf16.msrb.mxu2 %v5132_v48  ;;  %v7236_v48 = vld [vmem:[%s11471_s1 + $0x454] sm:$0xf0]  ;;  %v5387_v28 = vld [vmem:[%s11471_s1 + $0x520] sm:$0xf]  ;;  %v5315_v37 = vld [vmem:[%s11471_s1 + $0x490] sm:$0xf] }
  0x3b   :  { %3722 = vmatpush.bf16.msrb.mxu3 %v5196_v52  ;;  %v5411_v52 = vld [vmem:[%s11471_s1 + $0x550] sm:$0xf]  ;;  %v5284_v56 = vor.u32 %v7236_v48, %v5283_v47  ;;  %v7228_v36 = vld [vmem:[%s11471_s1 + $0x414] sm:$0xf0]  ;;  %v5243_v48 = vld [vmem:[%s11471_s1 + $0x400] sm:$0xf] }
  0x3c   :  { %3684 = vmatpush.bf16.msrb.mxu0 %v4996_v59  ;;  %v5412_v58 = vor.u32 %v7268_v53, %v5411_v52  ;;  %v5275_v59 = vld [vmem:[%s11471_s1 + $0x440] sm:$0xf]  ;;  %v7244_v40 = vld [vmem:[%s11471_s1 + $0x494] sm:$0xf0]  ;;  %v5252_v49 = vor.u32 %v7228_v36, %v5251_v35  ;;  %v7242_v52 = vld [vmem:[%s11471_s1 + $0x484] sm:$0xf0] }
  0x3d   :  { %3697 = vmatpush.bf16.msrb.mxu1 %v5060_v63  ;;  %v7250_v63 = vld [vmem:[%s11471_s1 + $0x4c4] sm:$0xf0]  ;;  %v7276_v47 = vld [vmem:[%s11471_s1 + $0x594] sm:$0xf0]  ;;  %v5307_v51 = vld [vmem:[%s11471_s1 + $0x480] sm:$0xf]  ;;  %v5316_v53 = vor.u32 %v7244_v40, %v5315_v37 }
  0x3e   :  { %3710 = vmatpush.bf16.msrb.mxu2 %v5124_v0  ;;  %v5403_v0 = vld [vmem:[%s11471_s1 + $0x540] sm:$0xf]  ;;  %v5340_v5 = vor.u32 %v7250_v63, %v5339_v61  ;;  %v25_v61 = vld [vmem:[%s11472_s0 + $0x28] sm:$0xff]  ;;  %v7304_v63 = vld [vmem:[%s11471_s1 + $0x674] sm:$0xf0] }
  0x3f   :  { %3723 = vmatpush.bf16.msrb.mxu3 %v5188_v4  ;;  %v5276_v4 = vor.u32 %v7234_v60, %v5275_v59  ;;  %v5404_v6 = vor.u32 %v7266_v1, %v5403_v0  ;;  %v5371_v55 = vld [vmem:[%s11471_s1 + $0x500] sm:$0xf]  ;;  %v7274_v60 = vld [vmem:[%s11471_s1 + $0x584] sm:$0xf0]  ;;  %v5619_v0 = vld [vmem:[%s11471_s1 + $0x6f0] sm:$0xf] }
  0x40   :  { %3685 = vmatpush.bf16.msrb.mxu0 %v4988_v11  ;;  %v7248_v11 = vld [vmem:[%s11471_s1 + $0x4b4] sm:$0xf0]  ;;  %v5435_v59 = vld [vmem:[%s11471_s1 + $0x580] sm:$0xf]  ;;  %v5683_v3 = vld [vmem:[%s11471_s1 + $0x770] sm:$0xf] }
  0x41   :  { %3698 = vmatpush.bf16.msrb.mxu1 %v5052_v16  ;;  %v5268_v16 = vor.u32 %v7232_v8, %v5267_v7  ;;  %v7320_v2 = vld [vmem:[%s11471_s1 + $0x6f4] sm:$0xf0]  ;;  %v5747_v8 = vld [vmem:[%s11471_s1 + $0x7f0] sm:$0xf]  ;;  %v5436_v12 = vor.u32 %v7274_v60, %v5435_v59  ;;  %v5611_v23 = vld [vmem:[%s11471_s1 + $0x6e0] sm:$0xf] }
  0x42   :  { %3711 = vmatpush.bf16.msrb.mxu2 %v5116_v17  ;;  %v5332_v17 = vor.u32 %v7248_v11, %v5331_v9  ;;  %v7352_v9 = vld [vmem:[%s11471_s1 + $0x7f4] sm:$0xf0]  ;;  %v5539_v37 = vld [vmem:[%s11471_s1 + $0x650] sm:$0xf]  ;;  %v7330_v59 = vld [vmem:[%s11471_s1 + $0x744] sm:$0xf0] }
  0x43   :  { %3724 = vmatpush.bf16.msrb.mxu3 %v5180_v26  ;;  %3686 = vmatmul.bf16.vlgmr.msrb.gmra.mxu0 %v8179_v41  ;;  %v5460_v26 = vor.u32 %v7280_v15, %v5459_v14  ;;  %v649_v14 = vunpack.c.h.b16 %v25_v61  ;;  %v5620_v15 = vor.u32 %v7320_v2, %v5619_v0  ;;  %v5748_v24 = vor.u32 %v7352_v9, %v5747_v8  ;;  %v5603_v40 = vld [vmem:[%s11471_s1 + $0x6d0] sm:$0xf]  ;;  %v5723_v60 = vld [vmem:[%s11471_s1 + $0x7c0] sm:$0xf]  ;;  %v7296_v2 = vld [vmem:[%s11471_s1 + $0x634] sm:$0xf0] }
  0x44   :  { %3730 = vmatpush.bf16.msra.mxu0 %v5300_v27  ;;  %3699 = vmatmul.bf16.vlgmr.msrb.gmra.mxu1 %v8183_v44  ;;  %v7246_v27 = vld [vmem:[%s11471_s1 + $0x4a4] sm:$0xf0]  ;;  %v5715_v8 = vld [vmem:[%s11471_s1 + $0x7b0] sm:$0xf]  ;;  %v7344_v9 = vld [vmem:[%s11471_s1 + $0x7b4] sm:$0xf0] }
  0x45   :  { %3743 = vmatpush.bf16.msra.mxu1 %v5364_v29  ;;  %3712 = vmatmul.bf16.vlgmr.msrb.gmra.mxu2 %v8171_v38  ;;  %v7262_v29 = vld [vmem:[%s11471_s1 + $0x524] sm:$0xf0]  ;;  %v5324_v33 = vor.u32 %v7246_v27, %v5323_v25  ;;  %v5675_v27 = vld [vmem:[%s11471_s1 + $0x760] sm:$0xf] }
  0x46   :  { %3756 = vmatpush.bf16.msra.mxu2 %v5428_v30  ;;  %3725 = vmatmul.bf16.vlgmr.msrb.gmra.mxu3 %v8181_v42  ;;  %v5451_v30 = vld [vmem:[%s11471_s1 + $0x5a0] sm:$0xf] }
  0x47   :  { %3769 = vmatpush.bf16.msra.mxu3 %v5492_v34  ;;  %v5388_v34 = vor.u32 %v7262_v29, %v5387_v28  ;;  %v5452_v39 = vor.u32 %v7278_v31, %v5451_v30  ;;  %v7334_v28 = vld [vmem:[%s11471_s1 + $0x764] sm:$0xf0]  ;;  %v5739_v31 = vld [vmem:[%s11471_s1 + $0x7e0] sm:$0xf] }
  0x48   :  { %3731 = vmatpush.bf16.msra.mxu0 %v5292_v43  ;;  %v5379_v43 = vld [vmem:[%s11471_s1 + $0x510] sm:$0xf]  ;;  %v5676_v36 = vor.u32 %v7334_v28, %v5675_v27 }
  0x49   :  { %3744 = vmatpush.bf16.msra.mxu1 %v5356_v45  ;;  %v7260_v45 = vld [vmem:[%s11471_s1 + $0x514] sm:$0xf0] }
  0x4a   :  { %3757 = vmatpush.bf16.msra.mxu2 %v5420_v46  ;;  %v5443_v46 = vld [vmem:[%s11471_s1 + $0x590] sm:$0xf]  ;;  %v5380_v54 = vor.u32 %v7260_v45, %v5379_v43  ;;  %v7316_v45 = vld [vmem:[%s11471_s1 + $0x6d4] sm:$0xf0] }
  0x4b   :  { %3770 = vmatpush.bf16.msra.mxu3 %v5484_v50  ;;  %v7226_v50 = vld [vmem:[%s11471_s1 + $0x404] sm:$0xf0] }
  0x4c   :  { %3732 = vmatpush.bf16.msra.mxu0 %v5284_v56  ;;  %v7258_v56 = vld [vmem:[%s11471_s1 + $0x504] sm:$0xf0]  ;;  %v5244_v1 = vor.u32 %v7226_v50, %v5243_v48  ;;  %v5731_v48 = vld [vmem:[%s11471_s1 + $0x7d0] sm:$0xf] }
  0x4d   :  { %3745 = vmatpush.bf16.msra.mxu1 %v5348_v57  ;;  %v24_v57 = vld [vmem:[%s11472_s0 + $0x20] sm:$0xff]  ;;  %v5372_v7 = vor.u32 %v7258_v56, %v5371_v55 }
  0x4e   :  { %3758 = vmatpush.bf16.msra.mxu2 %v5412_v58  ;;  %v5444_v58 = vor.u32 %v7276_v47, %v5443_v46  ;;  %v647_v11 = vunpack.c.h.b16 %v24_v57  ;;  %v5667_v46 = vld [vmem:[%s11471_s1 + $0x750] sm:$0xf]  ;;  %v7332_v47 = vld [vmem:[%s11471_s1 + $0x754] sm:$0xf0]  ;;  %v5595_v55 = vld [vmem:[%s11471_s1 + $0x6c0] sm:$0xf] }
  0x4f   :  { %3771 = vmatpush.bf16.msra.mxu3 %v5476_v62  ;;  %v5555_v62 = vld [vmem:[%s11471_s1 + $0x670] sm:$0xf] }
  0x50   :  { %3733 = vmatpush.bf16.msra.mxu0 %v5276_v4  ;;  %v7336_v4 = vld [vmem:[%s11471_s1 + $0x774] sm:$0xf0]  ;;  %v5556_v13 = vor.u32 %v7304_v63, %v5555_v62  ;;  %v8385_v30 = vpack.c.b16 %v647_v11, %v647_v11 }
  0x51   :  { %3746 = vmatpush.bf16.msra.mxu1 %v5340_v5  ;;  %v646_v5 = vunpack.c.l.b16 %v24_v57  ;;  %v7314_v57 = vld [vmem:[%s11471_s1 + $0x6c4] sm:$0xf0] }
  0x52   :  { %3759 = vmatpush.bf16.msra.mxu2 %v5404_v6  ;;  %v5308_v6 = vor.u32 %v7242_v52, %v5307_v51  ;;  %v5604_v51 = vor.u32 %v7316_v45, %v5603_v40  ;;  %v5668_v52 = vor.u32 %v7332_v47, %v5667_v46  ;;  %v5596_v63 = vor.u32 %v7314_v57, %v5595_v55  ;;  %v7324_v40 = vld [vmem:[%s11471_s1 + $0x714] sm:$0xf0]  ;;  %v5499_v46 = vld [vmem:[%s11471_s1 + $0x600] sm:$0xf]  ;;  %v26_v55 = vld [vmem:[%s11472_s0 + $0x30] sm:$0xff] }
  0x53   :  { %3772 = vmatpush.bf16.msra.mxu3 %v5468_v10  ;;  %v648_v10 = vunpack.c.l.b16 %v25_v61  ;;  %v8372_v25 = vpack.c.b16 %v646_v5, %v646_v5  ;;  %v7346_v61 = vld [vmem:[%s11471_s1 + $0x7c4] sm:$0xf0]  ;;  %v7312_v5 = vld [vmem:[%s11471_s1 + $0x6b4] sm:$0xf0]  ;;  %v5691_v57 = vld [vmem:[%s11471_s1 + $0x780] sm:$0xf] }
  0x54   :  { %3734 = vmatpush.bf16.msra.mxu0 %v5268_v16  ;;  %v5684_v16 = vor.u32 %v7336_v4, %v5683_v3  ;;  %v5587_v3 = vld [vmem:[%s11471_s1 + $0x6b0] sm:$0xf]  ;;  %v5724_v4 = vor.u32 %v7346_v61, %v5723_v60  ;;  %v7340_v45 = vld [vmem:[%s11471_s1 + $0x794] sm:$0xf0] }
  0x55   :  { %3747 = vmatpush.bf16.msra.mxu1 %v5332_v17  ;;  %v5547_v17 = vld [vmem:[%s11471_s1 + $0x660] sm:$0xf]  ;;  %v8383_v29 = vpack.c.b16 %v648_v10, %v648_v10  ;;  %v5588_v11 = vor.u32 %v7312_v5, %v5587_v3  ;;  %v5811_v60 = vld [vmem:[%s11471_s1 + $0x870] sm:$0xf]  ;;  %v7368_v61 = vld [vmem:[%s11471_s1 + $0x874] sm:$0xf0]  ;;  %v650_v3 = vunpack.c.l.b16 %v26_v55 }
  0x56   :  { %3760 = vmatpush.bf16.msra.mxu2 %v5396_v21  ;;  %v7302_v21 = vld [vmem:[%s11471_s1 + $0x664] sm:$0xf0] }
  0x57   :  { %3773 = vmatpush.bf16.msra.mxu3 %v5460_v26  ;;  %v7318_v26 = vld [vmem:[%s11471_s1 + $0x6e4] sm:$0xf0] }
  0x58   :  { %3735 = vmatpush.bf16.msra.mxu0 %v5260_v32  ;;  %v7350_v32 = vld [vmem:[%s11471_s1 + $0x7e4] sm:$0xf0]  ;;  %v5612_v35 = vor.u32 %v7318_v26, %v5611_v23 }
  0x59   :  { %3748 = vmatpush.bf16.msra.mxu1 %v5324_v33  ;;  %v8393_v33 = vpack.c.b16 %v649_v14, %v649_v14  ;;  %v5740_v43 = vor.u32 %v7350_v32, %v5739_v31  ;;  %v7294_v14 = vld [vmem:[%s11471_s1 + $0x624] sm:$0xf0]  ;;  %v5507_v32 = vld [vmem:[%s11471_s1 + $0x610] sm:$0xf] }
  0x5a   :  { %3761 = vmatpush.bf16.msra.mxu2 %v5388_v34  ;;  %v5548_v34 = vor.u32 %v7302_v21, %v5547_v17  ;;  %v7310_v17 = vld [vmem:[%s11471_s1 + $0x6a4] sm:$0xf0]  ;;  %v5643_v21 = vld [vmem:[%s11471_s1 + $0x720] sm:$0xf] }
  0x5b   :  { %3774 = vmatpush.bf16.msra.mxu3 %v5452_v39  ;;  %v7300_v39 = vld [vmem:[%s11471_s1 + $0x654] sm:$0xf0]  ;;  %v7326_v23 = vld [vmem:[%s11471_s1 + $0x724] sm:$0xf0] }
  0x5c   :  { %3736 = vmatpush.bf16.msra.mxu0 %v5252_v49  ;;  %v7348_v49 = vld [vmem:[%s11471_s1 + $0x7d4] sm:$0xf0]  ;;  %v5540_v50 = vor.u32 %v7300_v39, %v5539_v37  ;;  %v7342_v26 = vld [vmem:[%s11471_s1 + $0x7a4] sm:$0xf0]  ;;  %v5644_v31 = vor.u32 %v7326_v23, %v5643_v21  ;;  %v5635_v39 = vld [vmem:[%s11471_s1 + $0x710] sm:$0xf]  ;;  %v8582_v23 = vpack.c.b16 %v650_v3, %v650_v3 }
  0x5d   :  { %3749 = vmatpush.bf16.msra.mxu1 %v5316_v53  ;;  %v5531_v53 = vld [vmem:[%s11471_s1 + $0x640] sm:$0xf]  ;;  %v5732_v56 = vor.u32 %v7348_v49, %v5731_v48  ;;  %v7308_v37 = vld [vmem:[%s11471_s1 + $0x694] sm:$0xf0]  ;;  %v7290_v48 = vld [vmem:[%s11471_s1 + $0x604] sm:$0xf0] }
  0x5e   :  { %3762 = vmatpush.bf16.msra.mxu2 %v5380_v54  ;;  %v7298_v54 = vld [vmem:[%s11471_s1 + $0x644] sm:$0xf0]  ;;  %v5563_v49 = vld [vmem:[%s11471_s1 + $0x680] sm:$0xf]  ;;  %v5779_v3 = vld [vmem:[%s11471_s1 + $0x830] sm:$0xf] }
  0x5f   :  { %3775 = vmatpush.bf16.msra.mxu3 %v5444_v58  ;;  %v5659_v58 = vld [vmem:[%s11471_s1 + $0x740] sm:$0xf]  ;;  %v5532_v62 = vor.u32 %v7298_v54, %v5531_v53  ;;  %v7322_v54 = vld [vmem:[%s11471_s1 + $0x704] sm:$0xf0] }
  0x60   :  { %3737 = vmatpush.bf16.msra.mxu0 %v5244_v1  ;;  %v5660_v0 = vor.u32 %v7330_v59, %v5659_v58  ;;  %v5523_v1 = vld [vmem:[%s11471_s1 + $0x630] sm:$0xf]  ;;  %v5627_v53 = vld [vmem:[%s11471_s1 + $0x700] sm:$0xf]  ;;  %v7338_v58 = vld [vmem:[%s11471_s1 + $0x784] sm:$0xf0] }
  0x61   :  { %3750 = vmatpush.bf16.msra.mxu1 %v5308_v6  ;;  %v5651_v6 = vld [vmem:[%s11471_s1 + $0x730] sm:$0xf]  ;;  %v5524_v10 = vor.u32 %v7296_v2, %v5523_v1  ;;  %v27_v59 = vld [vmem:[%s11472_s0 + $0x38] sm:$0xff]  ;;  %v5628_v5 = vor.u32 %v7322_v54, %v5627_v53 }
  0x62   :  { %3763 = vmatpush.bf16.msra.mxu2 %v5372_v7  ;;  %v7328_v7 = vld [vmem:[%s11471_s1 + $0x734] sm:$0xf0]  ;;  %v5939_v1 = vld [vmem:[%s11471_s1 + $0x970] sm:$0xf] }
  0x63   :  { %3776 = vmatpush.bf16.msra.mxu3 %v5436_v12  ;;  %3738 = vmatmul.bf16.vlgmr.msra.gmra.mxu0 %v8372_v25  ;;  %v5652_v12 = vor.u32 %v7328_v7, %v5651_v6  ;;  %v7400_v2 = vld [vmem:[%s11471_s1 + $0x974] sm:$0xf0]  ;;  %v6003_v6 = vld [vmem:[%s11471_s1 + $0x9f0] sm:$0xf] }
  0x64   :  { %3782 = vmatpush.bf16.msrb.mxu0 %v5556_v13  ;;  %3751 = vmatmul.bf16.vlgmr.msra.gmra.mxu1 %v8385_v30  ;;  %v5515_v13 = vld [vmem:[%s11471_s1 + $0x620] sm:$0xf]  ;;  %v7416_v7 = vld [vmem:[%s11471_s1 + $0x9f4] sm:$0xf0] }
  0x65   :  { %3795 = vmatpush.bf16.msrb.mxu1 %v5620_v15  ;;  %3764 = vmatmul.bf16.vlgmr.msra.gmra.mxu2 %v8383_v29  ;;  %v5579_v15 = vld [vmem:[%s11471_s1 + $0x6a0] sm:$0xf]  ;;  %v5516_v27 = vor.u32 %v7294_v14, %v5515_v13  ;;  %v5940_v14 = vor.u32 %v7400_v2, %v5939_v1  ;;  %v6004_v21 = vor.u32 %v7416_v7, %v6003_v6  ;;  %v7376_v7 = vld [vmem:[%s11471_s1 + $0x8b4] sm:$0xf0] }
  0x66   :  { %3808 = vmatpush.bf16.msrb.mxu2 %v5684_v16  ;;  %3777 = vmatmul.bf16.vlgmr.msra.gmra.mxu3 %v8393_v33  ;;  %v5716_v16 = vor.u32 %v7344_v9, %v5715_v8  ;;  %v5580_v28 = vor.u32 %v7310_v17, %v5579_v15  ;;  %v652_v8 = vunpack.c.l.b16 %v27_v59  ;;  %v651_v9 = vunpack.c.h.b16 %v26_v55  ;;  %v5803_v15 = vld [vmem:[%s11471_s1 + $0x860] sm:$0xf] }
  0x67   :  { %3821 = vmatpush.bf16.msrb.mxu3 %v5748_v24  ;;  %v5707_v24 = vld [vmem:[%s11471_s1 + $0x7a0] sm:$0xf] }
  0x68   :  { %3783 = vmatpush.bf16.msrb.mxu0 %v5548_v34  ;;  %v7292_v34 = vld [vmem:[%s11471_s1 + $0x614] sm:$0xf0]  ;;  %v5867_v17 = vld [vmem:[%s11471_s1 + $0x8e0] sm:$0xf] }
  0x69   :  { %3796 = vmatpush.bf16.msrb.mxu1 %v5612_v35  ;;  %v5571_v35 = vld [vmem:[%s11471_s1 + $0x690] sm:$0xf]  ;;  %v5508_v47 = vor.u32 %v7292_v34, %v5507_v32  ;;  %v5995_v32 = vld [vmem:[%s11471_s1 + $0x9e0] sm:$0xf]  ;;  %v7414_v34 = vld [vmem:[%s11471_s1 + $0x9e4] sm:$0xf0] }
  0x6a   :  { %3809 = vmatpush.bf16.msrb.mxu2 %v5676_v36  ;;  %v5708_v36 = vor.u32 %v7342_v26, %v5707_v24  ;;  %v7382_v24 = vld [vmem:[%s11471_s1 + $0x8e4] sm:$0xf0]  ;;  %v5931_v26 = vld [vmem:[%s11471_s1 + $0x960] sm:$0xf] }
  0x6b   :  { %3822 = vmatpush.bf16.msrb.mxu3 %v5740_v43  ;;  %v5699_v43 = vld [vmem:[%s11471_s1 + $0x790] sm:$0xf]  ;;  %v5787_v55 = vld [vmem:[%s11471_s1 + $0x840] sm:$0xf] }
  0x6c   :  { %3784 = vmatpush.bf16.msrb.mxu0 %v5540_v50  ;;  %v7306_v50 = vld [vmem:[%s11471_s1 + $0x684] sm:$0xf0] }
  0x6d   :  { %3797 = vmatpush.bf16.msrb.mxu1 %v5604_v51  ;;  %v5572_v51 = vor.u32 %v7308_v37, %v5571_v35  ;;  %v5868_v37 = vor.u32 %v7382_v24, %v5867_v17  ;;  %v5835_v17 = vld [vmem:[%s11471_s1 + $0x8a0] sm:$0xf]  ;;  %v7374_v24 = vld [vmem:[%s11471_s1 + $0x8a4] sm:$0xf0] }
  0x6e   :  { %3810 = vmatpush.bf16.msrb.mxu2 %v5668_v52  ;;  %v5636_v52 = vor.u32 %v7324_v40, %v5635_v39  ;;  %v5795_v40 = vld [vmem:[%s11471_s1 + $0x850] sm:$0xf] }
  0x6f   :  { %3823 = vmatpush.bf16.msrb.mxu3 %v5732_v56  ;;  %v5700_v56 = vor.u32 %v7340_v45, %v5699_v43  ;;  %v7364_v43 = vld [vmem:[%s11471_s1 + $0x854] sm:$0xf0]  ;;  %v5859_v45 = vld [vmem:[%s11471_s1 + $0x8d0] sm:$0xf] }
  0x70   :  { %3785 = vmatpush.bf16.msrb.mxu0 %v5532_v62  ;;  %v5875_v62 = vld [vmem:[%s11471_s1 + $0x8f0] sm:$0xf] }
  0x71   :  { %3798 = vmatpush.bf16.msrb.mxu1 %v5596_v63  ;;  %v5500_v63 = vor.u32 %v7290_v48, %v5499_v46  ;;  %v5996_v46 = vor.u32 %v7414_v34, %v5995_v32  ;;  %v5923_v48 = vld [vmem:[%s11471_s1 + $0x950] sm:$0xf]  ;;  %v5963_v32 = vld [vmem:[%s11471_s1 + $0x9a0] sm:$0xf]  ;;  %v7406_v34 = vld [vmem:[%s11471_s1 + $0x9a4] sm:$0xf0] }
  0x72   :  { %3811 = vmatpush.bf16.msrb.mxu2 %v5660_v0  ;;  %v7384_v0 = vld [vmem:[%s11471_s1 + $0x8f4] sm:$0xf0] }
  0x73   :  { %3824 = vmatpush.bf16.msrb.mxu3 %v5724_v4  ;;  %v5564_v4 = vor.u32 %v7306_v50, %v5563_v49  ;;  %v5876_v13 = vor.u32 %v7384_v0, %v5875_v62  ;;  %v7396_v49 = vld [vmem:[%s11471_s1 + $0x954] sm:$0xf0]  ;;  %v5987_v50 = vld [vmem:[%s11471_s1 + $0x9d0] sm:$0xf]  ;;  %v5979_v62 = vld [vmem:[%s11471_s1 + $0x9c0] sm:$0xf] }
  0x74   :  { %3786 = vmatpush.bf16.msrb.mxu0 %v5524_v10  ;;  %v5692_v10 = vor.u32 %v7338_v58, %v5691_v57  ;;  %v5924_v54 = vor.u32 %v7396_v49, %v5923_v48  ;;  %v5851_v57 = vld [vmem:[%s11471_s1 + $0x8c0] sm:$0xf]  ;;  %v5891_v48 = vld [vmem:[%s11471_s1 + $0x910] sm:$0xf]  ;;  %v7388_v49 = vld [vmem:[%s11471_s1 + $0x914] sm:$0xf0] }
  0x75   :  { %3799 = vmatpush.bf16.msrb.mxu1 %v5588_v11  ;;  %v5812_v11 = vor.u32 %v7368_v61, %v5811_v60  ;;  %v5915_v60 = vld [vmem:[%s11471_s1 + $0x940] sm:$0xf]  ;;  %v7394_v61 = vld [vmem:[%s11471_s1 + $0x944] sm:$0xf0] }
  0x76   :  { %3812 = vmatpush.bf16.msrb.mxu2 %v5652_v12  ;;  %v653_v12 = vunpack.c.h.b16 %v27_v59  ;;  %v7378_v59 = vld [vmem:[%s11471_s1 + $0x8c4] sm:$0xf0]  ;;  %v5916_v2 = vor.u32 %v7394_v61, %v5915_v60  ;;  %v28_v61 = vld [vmem:[%s11472_s0 + $0x40] sm:$0xff] }
  0x77   :  { %3825 = vmatpush.bf16.msrb.mxu3 %v5716_v16  ;;  %v7366_v16 = vld [vmem:[%s11471_s1 + $0x864] sm:$0xf0]  ;;  %v5852_v1 = vor.u32 %v7378_v59, %v5851_v57  ;;  %v5883_v59 = vld [vmem:[%s11471_s1 + $0x900] sm:$0xf] }
  0x78   :  { %3787 = vmatpush.bf16.msrb.mxu0 %v5516_v27  ;;  %v7398_v27 = vld [vmem:[%s11471_s1 + $0x964] sm:$0xf0]  ;;  %v8603_v35 = vpack.c.b16 %v653_v12, %v653_v12 }
  0x79   :  { %3800 = vmatpush.bf16.msrb.mxu1 %v5580_v28  ;;  %v8593_v28 = vpack.c.b16 %v652_v8, %v652_v8  ;;  %v5932_v39 = vor.u32 %v7398_v27, %v5931_v26  ;;  %v5907_v8 = vld [vmem:[%s11471_s1 + $0x930] sm:$0xf]  ;;  %v5899_v26 = vld [vmem:[%s11471_s1 + $0x920] sm:$0xf]  ;;  %v7390_v27 = vld [vmem:[%s11471_s1 + $0x924] sm:$0xf0] }
  0x7a   :  { %3813 = vmatpush.bf16.msrb.mxu2 %v5644_v31  ;;  %v8595_v31 = vpack.c.b16 %v651_v9, %v651_v9  ;;  %v7392_v9 = vld [vmem:[%s11471_s1 + $0x934] sm:$0xf0]  ;;  %v7386_v60 = vld [vmem:[%s11471_s1 + $0x904] sm:$0xf0] }
  0x7b   :  { %3826 = vmatpush.bf16.msrb.mxu3 %v5708_v36  ;;  %v5804_v36 = vor.u32 %v7366_v16, %v5803_v15  ;;  %v5771_v15 = vld [vmem:[%s11471_s1 + $0x820] sm:$0xf]  ;;  %v7358_v16 = vld [vmem:[%s11471_s1 + $0x824] sm:$0xf0] }
  0x7c   :  { %3788 = vmatpush.bf16.msrb.mxu0 %v5508_v47  ;;  %v7380_v47 = vld [vmem:[%s11471_s1 + $0x8d4] sm:$0xf0] }
  0x7d   :  { %3801 = vmatpush.bf16.msrb.mxu1 %v5572_v51  ;;  %v7412_v51 = vld [vmem:[%s11471_s1 + $0x9d4] sm:$0xf0]  ;;  %v5860_v53 = vor.u32 %v7380_v47, %v5859_v45  ;;  %v5827_v45 = vld [vmem:[%s11471_s1 + $0x890] sm:$0xf] }
  0x7e   :  { %3814 = vmatpush.bf16.msrb.mxu2 %v5636_v52  ;;  %v5796_v52 = vor.u32 %v7364_v43, %v5795_v40  ;;  %v5988_v58 = vor.u32 %v7412_v51, %v5987_v50  ;;  %v5763_v40 = vld [vmem:[%s11471_s1 + $0x810] sm:$0xf]  ;;  %v7356_v43 = vld [vmem:[%s11471_s1 + $0x814] sm:$0xf0] }
  0x7f   :  { %3827 = vmatpush.bf16.msrb.mxu3 %v5700_v56  ;;  %v7362_v56 = vld [vmem:[%s11471_s1 + $0x844] sm:$0xf0]  ;;  %v7372_v47 = vld [vmem:[%s11471_s1 + $0x894] sm:$0xf0]  ;;  %v5955_v50 = vld [vmem:[%s11471_s1 + $0x990] sm:$0xf] }
  0x80   :  { %3789 = vmatpush.bf16.msrb.mxu0 %v5500_v63  ;;  %v7410_v63 = vld [vmem:[%s11471_s1 + $0x9c4] sm:$0xf0]  ;;  %v5788_v0 = vor.u32 %v7362_v56, %v5787_v55  ;;  %v7404_v51 = vld [vmem:[%s11471_s1 + $0x994] sm:$0xf0]  ;;  %v5819_v55 = vld [vmem:[%s11471_s1 + $0x880] sm:$0xf]  ;;  %v5828_v57 = vor.u32 %v7372_v47, %v5827_v45 }
  0x81   :  { %3802 = vmatpush.bf16.msrb.mxu1 %v5564_v4  ;;  %v7360_v4 = vld [vmem:[%s11471_s1 + $0x834] sm:$0xf0]  ;;  %v5980_v6 = vor.u32 %v7410_v63, %v5979_v62  ;;  %v7370_v56 = vld [vmem:[%s11471_s1 + $0x884] sm:$0xf0]  ;;  %v5956_v62 = vor.u32 %v7404_v51, %v5955_v50  ;;  %v5947_v63 = vld [vmem:[%s11471_s1 + $0x980] sm:$0xf] }
  0x82   :  { %3815 = vmatpush.bf16.msrb.mxu2 %v5628_v5  ;;  %v5843_v5 = vld [vmem:[%s11471_s1 + $0x8b0] sm:$0xf]  ;;  %v5780_v12 = vor.u32 %v7360_v4, %v5779_v3  ;;  %v7432_v3 = vld [vmem:[%s11471_s1 + $0xa74] sm:$0xf0]  ;;  %v6251_v47 = vld [vmem:[%s11471_s1 + $0xbe0] sm:$0xf] }
  0x83   :  { %3828 = vmatpush.bf16.msrb.mxu3 %v5692_v10  ;;  %3790 = vmatmul.bf16.vlgmr.msrb.gmra.mxu0 %v8582_v23  ;;  %v5971_v10 = vld [vmem:[%s11471_s1 + $0x9b0] sm:$0xf] }
  0x84   :  { %3834 = vmatpush.bf16.msra.mxu0 %v5812_v11  ;;  %3803 = vmatmul.bf16.vlgmr.msrb.gmra.mxu1 %v8595_v31  ;;  %v7408_v11 = vld [vmem:[%s11471_s1 + $0x9b4] sm:$0xf0]  ;;  %v6131_v4 = vld [vmem:[%s11471_s1 + $0xaf0] sm:$0xf] }
  0x85   :  { %3847 = vmatpush.bf16.msra.mxu1 %v5876_v13  ;;  %3816 = vmatmul.bf16.vlgmr.msrb.gmra.mxu2 %v8593_v28  ;;  %v5844_v13 = vor.u32 %v7376_v7, %v5843_v5  ;;  %v6195_v7 = vld [vmem:[%s11471_s1 + $0xb70] sm:$0xf] }
  0x86   :  { %3860 = vmatpush.bf16.msra.mxu2 %v5940_v14  ;;  %3829 = vmatmul.bf16.vlgmr.msrb.gmra.mxu3 %v8603_v35  ;;  %v5908_v14 = vor.u32 %v7392_v9, %v5907_v8  ;;  %v7464_v8 = vld [vmem:[%s11471_s1 + $0xb74] sm:$0xf0]  ;;  %v654_v9 = vunpack.c.l.b16 %v28_v61 }
  0x87   :  { %3873 = vmatpush.bf16.msra.mxu3 %v6004_v21  ;;  %v5972_v21 = vor.u32 %v7408_v11, %v5971_v10  ;;  %v5820_v10 = vor.u32 %v7370_v56, %v5819_v55  ;;  %v5884_v11 = vor.u32 %v7386_v60, %v5883_v59  ;;  %v6115_v55 = vld [vmem:[%s11471_s1 + $0xad0] sm:$0xf]  ;;  %v7460_v59 = vld [vmem:[%s11471_s1 + $0xb54] sm:$0xf0] }
  0x88   :  { %3835 = vmatpush.bf16.msra.mxu0 %v5804_v36  ;;  %v5772_v36 = vor.u32 %v7358_v16, %v5771_v15  ;;  %v655_v15 = vunpack.c.h.b16 %v28_v61  ;;  %v6243_v60 = vld [vmem:[%s11471_s1 + $0xbd0] sm:$0xf]  ;;  %v7476_v61 = vld [vmem:[%s11471_s1 + $0xbd4] sm:$0xf0] }
  0x89   :  { %3848 = vmatpush.bf16.msra.mxu1 %v5868_v37  ;;  %v5836_v37 = vor.u32 %v7374_v24, %v5835_v17 }
  0x8a   :  { %3861 = vmatpush.bf16.msra.mxu2 %v5932_v39  ;;  %v5900_v39 = vor.u32 %v7390_v27, %v5899_v26  ;;  %v6196_v26 = vor.u32 %v7464_v8, %v6195_v7  ;;  %v6059_v27 = vld [vmem:[%s11471_s1 + $0xa60] sm:$0xf]  ;;  %v7458_v7 = vld [vmem:[%s11471_s1 + $0xb44] sm:$0xf0] }
  0x8b   :  { %3874 = vmatpush.bf16.msra.mxu3 %v5996_v46  ;;  %v5964_v46 = vor.u32 %v7406_v34, %v5963_v32  ;;  %v7430_v32 = vld [vmem:[%s11471_s1 + $0xa64] sm:$0xf0]  ;;  %v6123_v34 = vld [vmem:[%s11471_s1 + $0xae0] sm:$0xf] }
  0x8c   :  { %3836 = vmatpush.bf16.msra.mxu0 %v5796_v52  ;;  %v5755_v52 = vld [vmem:[%s11471_s1 + $0x800] sm:$0xf]  ;;  %v6060_v50 = vor.u32 %v7430_v32, %v6059_v27  ;;  %v6227_v27 = vld [vmem:[%s11471_s1 + $0xbb0] sm:$0xf]  ;;  %v7472_v32 = vld [vmem:[%s11471_s1 + $0xbb4] sm:$0xf0] }
  0x8d   :  { %3849 = vmatpush.bf16.msra.mxu1 %v5860_v53  ;;  %v5764_v53 = vor.u32 %v7356_v43, %v5763_v40  ;;  %v6187_v40 = vld [vmem:[%s11471_s1 + $0xb60] sm:$0xf]  ;;  %v7462_v43 = vld [vmem:[%s11471_s1 + $0xb64] sm:$0xf0] }
  0x8e   :  { %3862 = vmatpush.bf16.msra.mxu2 %v5924_v54  ;;  %v7354_v54 = vld [vmem:[%s11471_s1 + $0x804] sm:$0xf0]  ;;  %v6235_v8 = vld [vmem:[%s11471_s1 + $0xbc0] sm:$0xf] }
  0x8f   :  { %3875 = vmatpush.bf16.msra.mxu3 %v5988_v58  ;;  %v5892_v58 = vor.u32 %v7388_v49, %v5891_v48  ;;  %v5756_v5 = vor.u32 %v7354_v54, %v5755_v52  ;;  %v7478_v48 = vld [vmem:[%s11471_s1 + $0xbe4] sm:$0xf0]  ;;  %v6188_v52 = vor.u32 %v7462_v43, %v6187_v40  ;;  %v7428_v54 = vld [vmem:[%s11471_s1 + $0xa54] sm:$0xf0] }
  0x90   :  { %3837 = vmatpush.bf16.msra.mxu0 %v5788_v0  ;;  %v7402_v0 = vld [vmem:[%s11471_s1 + $0x984] sm:$0xf0]  ;;  %v6252_v56 = vor.u32 %v7478_v48, %v6251_v47  ;;  %v6091_v47 = vld [vmem:[%s11471_s1 + $0xaa0] sm:$0xf] }
  0x91   :  { %3850 = vmatpush.bf16.msra.mxu1 %v5852_v1  ;;  %v29_v1 = vld [vmem:[%s11472_s0 + $0x48] sm:$0xff]  ;;  %v5948_v16 = vor.u32 %v7402_v0, %v5947_v63 }
  0x92   :  { %3863 = vmatpush.bf16.msra.mxu2 %v5916_v2  ;;  %v6067_v2 = vld [vmem:[%s11471_s1 + $0xa70] sm:$0xf]  ;;  %v7422_v43 = vld [vmem:[%s11471_s1 + $0xa24] sm:$0xf0] }
  0x93   :  { %3876 = vmatpush.bf16.msra.mxu3 %v5980_v6  ;;  %v7448_v6 = vld [vmem:[%s11471_s1 + $0xaf4] sm:$0xf0]  ;;  %v6068_v17 = vor.u32 %v7432_v3, %v6067_v2  ;;  %v7426_v2 = vld [vmem:[%s11471_s1 + $0xa44] sm:$0xf0]  ;;  %v6107_v3 = vld [vmem:[%s11471_s1 + $0xac0] sm:$0xf] }
  0x94   :  { %3838 = vmatpush.bf16.msra.mxu0 %v5780_v12  ;;  %v6259_v12 = vld [vmem:[%s11471_s1 + $0xbf0] sm:$0xf]  ;;  %v6132_v24 = vor.u32 %v7448_v6, %v6131_v4  ;;  %v6244_v4 = vor.u32 %v7476_v61, %v6243_v60  ;;  %v6171_v6 = vld [vmem:[%s11471_s1 + $0xb40] sm:$0xf]  ;;  %v7420_v61 = vld [vmem:[%s11471_s1 + $0xa14] sm:$0xf0] }
  0x95   :  { %3851 = vmatpush.bf16.msra.mxu1 %v5844_v13  ;;  %v7480_v13 = vld [vmem:[%s11471_s1 + $0xbf4] sm:$0xf0]  ;;  %v6019_v60 = vld [vmem:[%s11471_s1 + $0xa10] sm:$0xf] }
  0x96   :  { %3864 = vmatpush.bf16.msra.mxu2 %v5908_v14  ;;  %v656_v14 = vunpack.c.l.b16 %v29_v1 }
  0x97   :  { %3877 = vmatpush.bf16.msra.mxu3 %v5972_v21  ;;  %v657_v21 = vunpack.c.h.b16 %v29_v1  ;;  %v6043_v1 = vld [vmem:[%s11471_s1 + $0xa40] sm:$0xf] }
  0x98   :  { %3839 = vmatpush.bf16.msra.mxu0 %v5772_v36  ;;  %v6260_v36 = vor.u32 %v7480_v13, %v6259_v12  ;;  %v8803_v45 = vpack.c.b16 %v656_v14, %v656_v14  ;;  %v6172_v13 = vor.u32 %v7458_v7, %v6171_v6  ;;  %v7424_v14 = vld [vmem:[%s11471_s1 + $0xa34] sm:$0xf0]  ;;  %v6011_v7 = vld [vmem:[%s11471_s1 + $0xa00] sm:$0xf] }
  0x99   :  { %3852 = vmatpush.bf16.msra.mxu1 %v5836_v37  ;;  %v8792_v37 = vpack.c.b16 %v654_v9, %v654_v9  ;;  %v8813_v49 = vpack.c.b16 %v657_v21, %v657_v21  ;;  %v7474_v9 = vld [vmem:[%s11471_s1 + $0xbc4] sm:$0xf0]  ;;  %v6163_v21 = vld [vmem:[%s11471_s1 + $0xb30] sm:$0xf]  ;;  %v7468_v6 = vld [vmem:[%s11471_s1 + $0xb94] sm:$0xf0] }
  0x9a   :  { %3865 = vmatpush.bf16.msra.mxu2 %v5900_v39  ;;  %v7446_v39 = vld [vmem:[%s11471_s1 + $0xae4] sm:$0xf0] }
  0x9b   :  { %3878 = vmatpush.bf16.msra.mxu3 %v5964_v46  ;;  %v8805_v46 = vpack.c.b16 %v655_v15, %v655_v15  ;;  %v6124_v51 = vor.u32 %v7446_v39, %v6123_v34  ;;  %v6099_v15 = vld [vmem:[%s11471_s1 + $0xab0] sm:$0xf] }
  0x9c   :  { %3840 = vmatpush.bf16.msra.mxu0 %v5764_v53  ;;  %v6051_v53 = vld [vmem:[%s11471_s1 + $0xa50] sm:$0xf] }
  0x9d   :  { %3853 = vmatpush.bf16.msra.mxu1 %v5828_v57  ;;  %v7444_v57 = vld [vmem:[%s11471_s1 + $0xad4] sm:$0xf0] }
  0x9e   :  { %3866 = vmatpush.bf16.msra.mxu2 %v5892_v58  ;;  %v6179_v58 = vld [vmem:[%s11471_s1 + $0xb50] sm:$0xf]  ;;  %v6116_v63 = vor.u32 %v7444_v57, %v6115_v55  ;;  %v7470_v55 = vld [vmem:[%s11471_s1 + $0xba4] sm:$0xf0] }
  0x9f   :  { %3879 = vmatpush.bf16.msra.mxu3 %v5956_v62  ;;  %v6052_v62 = vor.u32 %v7428_v54, %v6051_v53  ;;  %v6180_v0 = vor.u32 %v7460_v59, %v6179_v58  ;;  %v7454_v53 = vld [vmem:[%s11471_s1 + $0xb24] sm:$0xf0]  ;;  %v6219_v54 = vld [vmem:[%s11471_s1 + $0xba0] sm:$0xf] }
  0xa0   :  { %3841 = vmatpush.bf16.msra.mxu0 %v5756_v5  ;;  %v7442_v5 = vld [vmem:[%s11471_s1 + $0xac4] sm:$0xf0]  ;;  %v3635_v57 = vpop.f32.mrf.mxu0 }
  0xa1   :  { %3854 = vmatpush.bf16.msra.mxu1 %v5820_v10  ;;  %v6044_v10 = vor.u32 %v7426_v2, %v6043_v1  ;;  %v6108_v12 = vor.u32 %v7442_v5, %v6107_v3  ;;  %v6220_v1 = vor.u32 %v7470_v55, %v6219_v54  ;;  %v7436_v2 = vld [vmem:[%s11471_s1 + $0xa94] sm:$0xf0]  ;;  %v6147_v3 = vld [vmem:[%s11471_s1 + $0xb10] sm:$0xf] }
  0xa2   :  { %3867 = vmatpush.bf16.msra.mxu2 %v5884_v11  ;;  %v6035_v11 = vld [vmem:[%s11471_s1 + $0xa30] sm:$0xf] }
  0xa3   :  { %3880 = vmatpush.bf16.msra.mxu3 %v5948_v16  ;;  %3842 = vmatmul.bf16.vlgmr.msra.gmra.mxu0 %v8792_v37  ;;  %v7440_v16 = vld [vmem:[%s11471_s1 + $0xab4] sm:$0xf0]  ;;  %v6036_v34 = vor.u32 %v7424_v14, %v6035_v11  ;;  %v6211_v5 = vld [vmem:[%s11471_s1 + $0xb90] sm:$0xf]  ;;  %v6075_v11 = vld [vmem:[%s11471_s1 + $0xa80] sm:$0xf] }
  0xa4   :  { %3886 = vmatpush.bf16.msrb.mxu0 %v6068_v17  ;;  %3855 = vmatmul.bf16.vlgmr.msra.gmra.mxu1 %v8805_v46  ;;  %v6236_v17 = vor.u32 %v7474_v9, %v6235_v8  ;;  %v6100_v39 = vor.u32 %v7440_v16, %v6099_v15  ;;  %v6020_v9 = vor.u32 %v7420_v61, %v6019_v60  ;;  %v6139_v15 = vld [vmem:[%s11471_s1 + $0xb00] sm:$0xf]  ;;  %v7450_v16 = vld [vmem:[%s11471_s1 + $0xb04] sm:$0xf0] }
  0xa5   :  { %3899 = vmatpush.bf16.msrb.mxu1 %v6132_v24  ;;  %3868 = vmatmul.bf16.vlgmr.msra.gmra.mxu2 %v8803_v45  ;;  %v7456_v24 = vld [vmem:[%s11471_s1 + $0xb34] sm:$0xf0] }
  0xa6   :  { %3912 = vmatpush.bf16.msrb.mxu2 %v6196_v26  ;;  %3881 = vmatmul.bf16.vlgmr.msra.gmra.mxu3 %v8813_v49  ;;  %v614_v26 = vld [vmem:[%s11473_s2] sm:$0x3]  ;;  %v6164_v40 = vor.u32 %v7456_v24, %v6163_v21  ;;  %v6212_v24 = vor.u32 %v7468_v6, %v6211_v5 }
  0xa7   :  { %3925 = vmatpush.bf16.msrb.mxu3 %v6260_v36  ;;  %v6027_v36 = vld [vmem:[%s11471_s1 + $0xa20] sm:$0xf]  ;;  %v616_v48 = vperm.slane %v614_v26, 0 }
  0xa8   :  { %3887 = vmatpush.bf16.msrb.mxu0 %v6060_v50  ;;  %v6228_v50 = vor.u32 %v7472_v32, %v6227_v27  ;;  %v3661_v21 = vpop.f32.mrf.mxu2  ;;  %v6203_v26 = vld [vmem:[%s11471_s1 + $0xb80] sm:$0xf]  ;;  %v7466_v27 = vld [vmem:[%s11471_s1 + $0xb84] sm:$0xf0]  ;;  %v31_v32 = vld [vmem:[%s11472_s0 + $0x58] sm:$0xff]  ;;  %v3637_v54 = vpop.f32.mrf.mxu0 }
  0xa9   :  { %3900 = vmatpush.bf16.msrb.mxu1 %v6124_v51  ;;  %v7438_v51 = vld [vmem:[%s11471_s1 + $0xaa4] sm:$0xf0]  ;;  %v6379_v5 = vld [vmem:[%s11471_s1 + $0xce0] sm:$0xf] }
  0xaa   :  { %3913 = vmatpush.bf16.msrb.mxu2 %v6188_v52  ;;  %v6155_v52 = vld [vmem:[%s11471_s1 + $0xb20] sm:$0xf]  ;;  %v6092_v58 = vor.u32 %v7438_v51, %v6091_v47  ;;  %v7528_v51 = vld [vmem:[%s11471_s1 + $0xd74] sm:$0xf0] }
  0xab   :  { %3926 = vmatpush.bf16.msrb.mxu3 %v6252_v56  ;;  %v6028_v56 = vor.u32 %v7422_v43, %v6027_v36  ;;  %v6156_v59 = vor.u32 %v7454_v53, %v6155_v52  ;;  %v3674_v36 = vpop.f32.mrf.mxu3  ;;  %v6387_v43 = vld [vmem:[%s11471_s1 + $0xcf0] sm:$0xf]  ;;  %v6299_v54 = vld [vmem:[%s11471_s1 + $0xc40] sm:$0xf] }
  0xac   :  { %3888 = vmatpush.bf16.msrb.mxu0 %v6052_v62  ;;  %v6083_v62 = vld [vmem:[%s11471_s1 + $0xa90] sm:$0xf] }
  0xad   :  { %3901 = vmatpush.bf16.msrb.mxu1 %v6116_v63  ;;  %v3636_v63 = vadd.f32 %v3635_v57, %v616_v48  ;;  %v7512_v48 = vld [vmem:[%s11471_s1 + $0xcf4] sm:$0xf0]  ;;  %v6515_v57 = vld [vmem:[%s11471_s1 + $0xdf0] sm:$0xf] }
  0xae   :  { %3914 = vmatpush.bf16.msrb.mxu2 %v6180_v0  ;;  %v3648_v0 = vpop.f32.mrf.mxu1 }
  0xaf   :  { %3927 = vmatpush.bf16.msrb.mxu3 %v6244_v4  ;;  %v7452_v4 = vld [vmem:[%s11471_s1 + $0xb14] sm:$0xf0]  ;;  %v3649_v8 = vadd.f32 %v3648_v0, %v3636_v63  ;;  %v661_v0 = vunpack.c.h.b16 %v31_v32 }
  0xb0   :  { %3889 = vmatpush.bf16.msrb.mxu0 %v6044_v10  ;;  %v7418_v10 = vld [vmem:[%s11471_s1 + $0xa04] sm:$0xf0]  ;;  %v6148_v14 = vor.u32 %v7452_v4, %v6147_v3  ;;  %v6315_v3 = vld [vmem:[%s11471_s1 + $0xc60] sm:$0xf] }
  0xb1   :  { %3902 = vmatpush.bf16.msrb.mxu1 %v6108_v12  ;;  %v7434_v12 = vld [vmem:[%s11471_s1 + $0xa84] sm:$0xf0]  ;;  %v6012_v47 = vor.u32 %v7418_v10, %v6011_v7 }
  0xb2   :  { %3915 = vmatpush.bf16.msrb.mxu2 %v6172_v13  ;;  %v6084_v13 = vor.u32 %v7436_v2, %v6083_v62  ;;  %v6076_v55 = vor.u32 %v7434_v12, %v6075_v11  ;;  %v6204_v62 = vor.u32 %v7466_v27, %v6203_v26  ;;  %v7494_v4 = vld [vmem:[%s11471_s1 + $0xc64] sm:$0xf0]  ;;  %v6307_v27 = vld [vmem:[%s11471_s1 + $0xc50] sm:$0xf] }
  0xb3   :  { %3928 = vmatpush.bf16.msrb.mxu3 %v6236_v17  ;;  %v30_v17 = vld [vmem:[%s11472_s0 + $0x50] sm:$0xff]  ;;  %v7526_v10 = vld [vmem:[%s11471_s1 + $0xd64] sm:$0xf0] }
  0xb4   :  { %3890 = vmatpush.bf16.msrb.mxu0 %v6036_v34  ;;  %v3662_v34 = vadd.f32 %v3661_v21, %v3649_v8  ;;  %v658_v52 = vunpack.c.l.b16 %v30_v17  ;;  %v659_v60 = vunpack.c.h.b16 %v30_v17  ;;  %v7510_v8 = vld [vmem:[%s11471_s1 + $0xce4] sm:$0xf0]  ;;  %v6316_v17 = vor.u32 %v7494_v4, %v6315_v3  ;;  %v3676_v21 = vpop.f32.mrf.mxu3  ;;  %v6291_v3 = vld [vmem:[%s11471_s1 + $0xc30] sm:$0xf]  ;;  %v7488_v4 = vld [vmem:[%s11471_s1 + $0xc34] sm:$0xf0] }
  0xb5   :  { %3903 = vmatpush.bf16.msrb.mxu1 %v6100_v39  ;;  %v6323_v39 = vld [vmem:[%s11471_s1 + $0xc70] sm:$0xf]  ;;  %v6292_v21 = vor.u32 %v7488_v4, %v6291_v3  ;;  %v7532_v4 = vld [vmem:[%s11471_s1 + $0xd94] sm:$0xf0] }
  0xb6   :  { %3916 = vmatpush.bf16.msrb.mxu2 %v6164_v40  ;;  %v7496_v40 = vld [vmem:[%s11471_s1 + $0xc74] sm:$0xf0]  ;;  %v8990_v53 = vadd.f32 %v3674_v36, %v3662_v34  ;;  %v3650_v61 = vpop.f32.mrf.mxu1  ;;  %v9007_v7 = vpack.c.b16 %v658_v52, %v658_v52  ;;  %v9020_v12 = vpack.c.b16 %v659_v60, %v659_v60  ;;  %v6371_v34 = vld [vmem:[%s11471_s1 + $0xcd0] sm:$0xf]  ;;  %v7522_v60 = vld [vmem:[%s11471_s1 + $0xd44] sm:$0xf0] }
  0xb7   :  { %3929 = vmatpush.bf16.msrb.mxu3 %v6228_v50  ;;  %v6451_v50 = vld [vmem:[%s11471_s1 + $0xd70] sm:$0xf]  ;;  %v6324_v63 = vor.u32 %v7496_v40, %v6323_v39  ;;  %v7508_v39 = vld [vmem:[%s11471_s1 + $0xcd4] sm:$0xf0]  ;;  %v6491_v61 = vld [vmem:[%s11471_s1 + $0xdc0] sm:$0xf] }
  0xb8   :  { %3891 = vmatpush.bf16.msrb.mxu0 %v6028_v56  ;;  %v6140_v56 = vor.u32 %v7450_v16, %v6139_v15  ;;  %v6452_v2 = vor.u32 %v7528_v51, %v6451_v50  ;;  %v3663_v15 = vpop.f32.mrf.mxu2  ;;  %v9028_v16 = vpack.c.b16 %v661_v0, %v661_v0  ;;  %v6435_v40 = vld [vmem:[%s11471_s1 + $0xd50] sm:$0xf]  ;;  %v6372_v51 = vor.u32 %v7508_v39, %v6371_v34  ;;  %v6347_v34 = vld [vmem:[%s11471_s1 + $0xca0] sm:$0xf] }
  0xb9   :  { %3904 = vmatpush.bf16.msrb.mxu1 %v6092_v58  ;;  %v7544_v58 = vld [vmem:[%s11471_s1 + $0xdf4] sm:$0xf0]  ;;  %v6483_v15 = vld [vmem:[%s11471_s1 + $0xdb0] sm:$0xf] }
  0xba   :  { %3917 = vmatpush.bf16.msrb.mxu2 %v6156_v59  ;;  %v660_v59 = vunpack.c.l.b16 %v31_v32  ;;  %v6516_v6 = vor.u32 %v7544_v58, %v6515_v57  ;;  %v7492_v32 = vld [vmem:[%s11471_s1 + $0xc54] sm:$0xf0]  ;;  %v7506_v58 = vld [vmem:[%s11471_s1 + $0xcc4] sm:$0xf0]  ;;  %v6467_v3 = vld [vmem:[%s11471_s1 + $0xd90] sm:$0xf] }
  0xbb   :  { %3930 = vmatpush.bf16.msrb.mxu3 %v6220_v1  ;;  %v6388_v1 = vor.u32 %v7512_v48, %v6387_v43  ;;  %v7524_v43 = vld [vmem:[%s11471_s1 + $0xd54] sm:$0xf0]  ;;  %v6308_v50 = vor.u32 %v7492_v32, %v6307_v27  ;;  %v6283_v27 = vld [vmem:[%s11471_s1 + $0xc20] sm:$0xf]  ;;  %v7486_v32 = vld [vmem:[%s11471_s1 + $0xc24] sm:$0xf0] }
  0xbc   :  { %3892 = vmatpush.bf16.msrb.mxu0 %v6020_v9  ;;  %v6443_v9 = vld [vmem:[%s11471_s1 + $0xd60] sm:$0xf]  ;;  %v9018_v11 = vpack.c.b16 %v660_v59, %v660_v59  ;;  %v7540_v48 = vld [vmem:[%s11471_s1 + $0xdd4] sm:$0xf0]  ;;  %v6436_v52 = vor.u32 %v7524_v43, %v6435_v40  ;;  %v7502_v40 = vld [vmem:[%s11471_s1 + $0xca4] sm:$0xf0] }
  0xbd   :  { %3905 = vmatpush.bf16.msrb.mxu1 %v6084_v13  ;;  %v6507_v13 = vld [vmem:[%s11471_s1 + $0xde0] sm:$0xf]  ;;  %v6444_v26 = vor.u32 %v7526_v10, %v6443_v9  ;;  %v7504_v10 = vld [vmem:[%s11471_s1 + $0xcb4] sm:$0xf0] }
  0xbe   :  { %3918 = vmatpush.bf16.msrb.mxu2 %v6148_v14  ;;  %v7542_v14 = vld [vmem:[%s11471_s1 + $0xde4] sm:$0xf0]  ;;  %v6427_v59 = vld [vmem:[%s11471_s1 + $0xd40] sm:$0xf] }
  0xbf   :  { %3931 = vmatpush.bf16.msrb.mxu3 %v6212_v24  ;;  %v6380_v24 = vor.u32 %v7510_v8, %v6379_v5  ;;  %v6508_v36 = vor.u32 %v7542_v14, %v6507_v13  ;;  %v6355_v5 = vld [vmem:[%s11471_s1 + $0xcb0] sm:$0xf]  ;;  %v7520_v14 = vld [vmem:[%s11471_s1 + $0xd34] sm:$0xf0]  ;;  %v6411_v43 = vld [vmem:[%s11471_s1 + $0xd20] sm:$0xf] }
  0xc0   :  { %3893 = vmatpush.bf16.msrb.mxu0 %v6012_v47  ;;  %v6499_v47 = vld [vmem:[%s11471_s1 + $0xdd0] sm:$0xf]  ;;  %v3687_v0 = vpop.f32.mrf.mxu0 }
  0xc1   :  { %3906 = vmatpush.bf16.msrb.mxu1 %v6076_v55  ;;  %v7490_v55 = vld [vmem:[%s11471_s1 + $0xc44] sm:$0xf0]  ;;  %v6500_v57 = vor.u32 %v7540_v48, %v6499_v47  ;;  %v3700_v8 = vpop.f32.mrf.mxu1  ;;  %v6419_v13 = vld [vmem:[%s11471_s1 + $0xd30] sm:$0xf] }
  0xc2   :  { %3919 = vmatpush.bf16.msrb.mxu2 %v6140_v56  ;;  %v6363_v56 = vld [vmem:[%s11471_s1 + $0xcc0] sm:$0xf]  ;;  %v7518_v47 = vld [vmem:[%s11471_s1 + $0xd24] sm:$0xf0] }
  0xc3   :  { %3932 = vmatpush.bf16.msrb.mxu3 %v6204_v62  ;;  %3894 = vmatmul.bf16.vlgmr.msrb.gmra.mxu0 %v9007_v7  ;;  %v7538_v62 = vld [vmem:[%s11471_s1 + $0xdc4] sm:$0xf0] }
  0xc4   :  { %3938 = vmatpush.bf16.msra.mxu0 %v6324_v63  ;;  %3907 = vmatmul.bf16.vlgmr.msrb.gmra.mxu1 %v9020_v12  ;;  %v6300_v63 = vor.u32 %v7490_v55, %v6299_v54  ;;  %v6492_v9 = vor.u32 %v7538_v62, %v6491_v61  ;;  %v6284_v54 = vor.u32 %v7486_v32, %v6283_v27  ;;  %v6339_v61 = vld [vmem:[%s11471_s1 + $0xc90] sm:$0xf]  ;;  %v7530_v27 = vld [vmem:[%s11471_s1 + $0xd84] sm:$0xf0] }
  0xc5   :  { %3951 = vmatpush.bf16.msra.mxu1 %v6388_v1  ;;  %3920 = vmatmul.bf16.vlgmr.msrb.gmra.mxu2 %v9018_v11  ;;  %v6364_v1 = vor.u32 %v7506_v58, %v6363_v56  ;;  %v6412_v58 = vor.u32 %v7518_v47, %v6411_v43  ;;  %v33_v32 = vld [vmem:[%s11472_s0 + $0x68] sm:$0xff]  ;;  %v7576_v47 = vld [vmem:[%s11471_s1 + $0xef4] sm:$0xf0] }
  0xc6   :  { %3964 = vmatpush.bf16.msra.mxu2 %v6452_v2  ;;  %3933 = vmatmul.bf16.vlgmr.msrb.gmra.mxu3 %v9028_v16  ;;  %v6428_v2 = vor.u32 %v7522_v60, %v6427_v59  ;;  %v6275_v59 = vld [vmem:[%s11471_s1 + $0xc10] sm:$0xf]  ;;  %v7484_v60 = vld [vmem:[%s11471_s1 + $0xc14] sm:$0xf0] }
  0xc7   :  { %3977 = vmatpush.bf16.msra.mxu3 %v6516_v6  ;;  %v3688_v6 = vadd.f32 %v3687_v0, %v8990_v53  ;;  %v7536_v53 = vld [vmem:[%s11471_s1 + $0xdb4] sm:$0xf0] }
  0xc8   :  { %3939 = vmatpush.bf16.msra.mxu0 %v6316_v17  ;;  %v6484_v39 = vor.u32 %v7536_v53, %v6483_v15  ;;  %v3689_v56 = vpop.f32.mrf.mxu0  ;;  %v7500_v0 = vld [vmem:[%s11471_s1 + $0xc94] sm:$0xf0]  ;;  %v6395_v15 = vld [vmem:[%s11471_s1 + $0xd00] sm:$0xf]  ;;  %v7514_v53 = vld [vmem:[%s11471_s1 + $0xd04] sm:$0xf0] }
  0xc9   :  { %3952 = vmatpush.bf16.msra.mxu1 %v6380_v24  ;;  %v3701_v17 = vadd.f32 %v3700_v8, %v3688_v6  ;;  %v6356_v24 = vor.u32 %v7504_v10, %v6355_v5  ;;  %v3702_v62 = vpop.f32.mrf.mxu1  ;;  %v6267_v5 = vld [vmem:[%s11471_s1 + $0xc00] sm:$0xf]  ;;  %v6276_v6 = vor.u32 %v7484_v60, %v6275_v59  ;;  %v7482_v8 = vld [vmem:[%s11471_s1 + $0xc04] sm:$0xf0]  ;;  %v6771_v56 = vld [vmem:[%s11471_s1 + $0xff0] sm:$0xf] }
  0xca   :  { %3965 = vmatpush.bf16.msra.mxu2 %v6444_v26  ;;  %v6420_v26 = vor.u32 %v7520_v14, %v6419_v13  ;;  %v7498_v10 = vld [vmem:[%s11471_s1 + $0xc84] sm:$0xf0]  ;;  %v6340_v13 = vor.u32 %v7500_v0, %v6339_v61  ;;  %v6268_v43 = vor.u32 %v7482_v8, %v6267_v5  ;;  %v665_v62 = vunpack.c.h.b16 %v33_v32  ;;  %v6699_v8 = vld [vmem:[%s11471_s1 + $0xf60] sm:$0xf] }
  0xcb   :  { %3978 = vmatpush.bf16.msra.mxu3 %v6508_v36  ;;  %v3713_v36 = vpop.f32.mrf.mxu2 }
  0xcc   :  { %3940 = vmatpush.bf16.msra.mxu0 %v6308_v50  ;;  %v3714_v48 = vadd.f32 %v3713_v36, %v3701_v17  ;;  %v3726_v50 = vpop.f32.mrf.mxu3  ;;  %v32_v17 = vld [vmem:[%s11472_s0 + $0x60] sm:$0xff]  ;;  %v6579_v36 = vld [vmem:[%s11471_s1 + $0xe70] sm:$0xf] }
  0xcd   :  { %3953 = vmatpush.bf16.msra.mxu1 %v6372_v51  ;;  %v6475_v51 = vld [vmem:[%s11471_s1 + $0xda0] sm:$0xf]  ;;  %v663_v59 = vunpack.c.h.b16 %v32_v17 }
  0xce   :  { %3966 = vmatpush.bf16.msra.mxu2 %v6436_v52  ;;  %v7534_v52 = vld [vmem:[%s11471_s1 + $0xda4] sm:$0xf0]  ;;  %v9131_v55 = vadd.f32 %v3726_v50, %v3714_v48  ;;  %v6707_v48 = vld [vmem:[%s11471_s1 + $0xf70] sm:$0xf]  ;;  %v7592_v50 = vld [vmem:[%s11471_s1 + $0xf74] sm:$0xf0] }
  0xcf   :  { %3979 = vmatpush.bf16.msra.mxu3 %v6500_v57  ;;  %v6348_v57 = vor.u32 %v7502_v40, %v6347_v34  ;;  %v6643_v40 = vld [vmem:[%s11471_s1 + $0xef0] sm:$0xf]  ;;  %v6708_v0 = vor.u32 %v7592_v50, %v6707_v48 }
  0xd0   :  { %3941 = vmatpush.bf16.msra.mxu0 %v6300_v63  ;;  %v6476_v63 = vor.u32 %v7534_v52, %v6475_v51  ;;  %v662_v51 = vunpack.c.l.b16 %v32_v17 }
  0xd1   :  { %3954 = vmatpush.bf16.msra.mxu1 %v6364_v1  ;;  %v6403_v1 = vld [vmem:[%s11471_s1 + $0xd10] sm:$0xf] }
  0xd2   :  { %3967 = vmatpush.bf16.msra.mxu2 %v6428_v2  ;;  %v7516_v2 = vld [vmem:[%s11471_s1 + $0xd14] sm:$0xf0]  ;;  %v9220_v5 = vpack.c.b16 %v662_v51, %v662_v51 }
  0xd3   :  { %3980 = vmatpush.bf16.msra.mxu3 %v6492_v9  ;;  %v6331_v9 = vld [vmem:[%s11471_s1 + $0xc80] sm:$0xf]  ;;  %v6404_v14 = vor.u32 %v7516_v2, %v6403_v1  ;;  %v7558_v2 = vld [vmem:[%s11471_s1 + $0xe64] sm:$0xf0] }
  0xd4   :  { %3942 = vmatpush.bf16.msra.mxu0 %v6292_v21  ;;  %v3715_v21 = vpop.f32.mrf.mxu2  ;;  %v3728_v34 = vpop.f32.mrf.mxu3  ;;  %v6332_v52 = vor.u32 %v7498_v10, %v6331_v9  ;;  %v6571_v1 = vld [vmem:[%s11471_s1 + $0xe60] sm:$0xf]  ;;  %v7590_v9 = vld [vmem:[%s11471_s1 + $0xf64] sm:$0xf0] }
  0xd5   :  { %3955 = vmatpush.bf16.msra.mxu1 %v6356_v24  ;;  %v6468_v24 = vor.u32 %v7532_v4, %v6467_v3  ;;  %v6635_v3 = vld [vmem:[%s11471_s1 + $0xee0] sm:$0xf]  ;;  %v6572_v17 = vor.u32 %v7558_v2, %v6571_v1 }
  0xd6   :  { %3968 = vmatpush.bf16.msra.mxu2 %v6420_v26  ;;  %v6459_v26 = vld [vmem:[%s11471_s1 + $0xd80] sm:$0xf] }
  0xd7   :  { %3981 = vmatpush.bf16.msra.mxu3 %v6484_v39  ;;  %v7560_v39 = vld [vmem:[%s11471_s1 + $0xe74] sm:$0xf0]  ;;  %v6460_v60 = vor.u32 %v7530_v27, %v6459_v26  ;;  %v6563_v26 = vld [vmem:[%s11471_s1 + $0xe50] sm:$0xf] }
  0xd8   :  { %3943 = vmatpush.bf16.msra.mxu0 %v6284_v54  ;;  %v6396_v54 = vor.u32 %v7514_v53, %v6395_v15  ;;  %v6580_v61 = vor.u32 %v7560_v39, %v6579_v36  ;;  %v7606_v15 = vld [vmem:[%s11471_s1 + $0xfe4] sm:$0xf0]  ;;  %v9241_v53 = vpack.c.b16 %v665_v62, %v665_v62  ;;  %v7556_v27 = vld [vmem:[%s11471_s1 + $0xe54] sm:$0xf0]  ;;  %v6691_v39 = vld [vmem:[%s11471_s1 + $0xf50] sm:$0xf] }
  0xd9   :  { %3956 = vmatpush.bf16.msra.mxu1 %v6348_v57  ;;  %v7608_v57 = vld [vmem:[%s11471_s1 + $0xff4] sm:$0xf0]  ;;  %v6564_v48 = vor.u32 %v7556_v27, %v6563_v26  ;;  %v6747_v62 = vld [vmem:[%s11471_s1 + $0xfc0] sm:$0xf] }
  0xda   :  { %3969 = vmatpush.bf16.msra.mxu2 %v6412_v58  ;;  %v664_v58 = vunpack.c.l.b16 %v33_v32  ;;  %v6772_v4 = vor.u32 %v7608_v57, %v6771_v56  ;;  %v6627_v32 = vld [vmem:[%s11471_s1 + $0xed0] sm:$0xf]  ;;  %v7572_v36 = vld [vmem:[%s11471_s1 + $0xed4] sm:$0xf0]  ;;  %v6619_v56 = vld [vmem:[%s11471_s1 + $0xec0] sm:$0xf] }
  0xdb   :  { %3982 = vmatpush.bf16.msra.mxu3 %v6476_v63  ;;  %v6644_v63 = vor.u32 %v7576_v47, %v6643_v40  ;;  %v7588_v40 = vld [vmem:[%s11471_s1 + $0xf54] sm:$0xf0]  ;;  %v6628_v50 = vor.u32 %v7572_v36, %v6627_v32  ;;  %v6539_v36 = vld [vmem:[%s11471_s1 + $0xe20] sm:$0xf] }
  0xdc   :  { %3944 = vmatpush.bf16.msra.mxu0 %v6276_v6  ;;  %v7574_v6 = vld [vmem:[%s11471_s1 + $0xee4] sm:$0xf0]  ;;  %v9231_v10 = vpack.c.b16 %v664_v58, %v664_v58  ;;  %v7604_v47 = vld [vmem:[%s11471_s1 + $0xfd4] sm:$0xf0]  ;;  %v6692_v51 = vor.u32 %v7588_v40, %v6691_v39  ;;  %v6603_v40 = vld [vmem:[%s11471_s1 + $0xea0] sm:$0xf] }
  0xdd   :  { %3957 = vmatpush.bf16.msra.mxu1 %v6340_v13  ;;  %v9233_v13 = vpack.c.b16 %v663_v59, %v663_v59  ;;  %v6636_v21 = vor.u32 %v7574_v6, %v6635_v3  ;;  %v7570_v58 = vld [vmem:[%s11471_s1 + $0xec4] sm:$0xf0]  ;;  %v6683_v59 = vld [vmem:[%s11471_s1 + $0xf40] sm:$0xf]  ;;  %v6547_v6 = vld [vmem:[%s11471_s1 + $0xe30] sm:$0xf] }
  0xde   :  { %3970 = vmatpush.bf16.msra.mxu2 %v6404_v14  ;;  %v6763_v14 = vld [vmem:[%s11471_s1 + $0xfe0] sm:$0xf]  ;;  %v6620_v3 = vor.u32 %v7570_v58, %v6619_v56  ;;  %v7600_v26 = vld [vmem:[%s11471_s1 + $0xfb4] sm:$0xf0]  ;;  %v7550_v39 = vld [vmem:[%s11471_s1 + $0xe24] sm:$0xf0] }
  0xdf   :  { %3983 = vmatpush.bf16.msra.mxu3 %v6468_v24  ;;  %v6700_v24 = vor.u32 %v7590_v9, %v6699_v8  ;;  %v6764_v34 = vor.u32 %v7606_v15, %v6763_v14  ;;  %v7552_v8 = vld [vmem:[%s11471_s1 + $0xe34] sm:$0xf0]  ;;  %v6611_v9 = vld [vmem:[%s11471_s1 + $0xeb0] sm:$0xf]  ;;  %v6731_v56 = vld [vmem:[%s11471_s1 + $0xfa0] sm:$0xf] }
  0xe0   :  { %3945 = vmatpush.bf16.msra.mxu0 %v6268_v43  ;;  %v6755_v43 = vld [vmem:[%s11471_s1 + $0xfd0] sm:$0xf]  ;;  %v7568_v15 = vld [vmem:[%s11471_s1 + $0xeb4] sm:$0xf0]  ;;  %v6548_v27 = vor.u32 %v7552_v8, %v6547_v6 }
  0xe1   :  { %3958 = vmatpush.bf16.msra.mxu1 %v6332_v52  ;;  %v6555_v52 = vld [vmem:[%s11471_s1 + $0xe40] sm:$0xf]  ;;  %v6756_v57 = vor.u32 %v7604_v47, %v6755_v43  ;;  %v3752_v2 = vpop.f32.mrf.mxu1  ;;  %v6612_v32 = vor.u32 %v7568_v15, %v6611_v9  ;;  %v6659_v6 = vld [vmem:[%s11471_s1 + $0xf10] sm:$0xf]  ;;  %v7580_v8 = vld [vmem:[%s11471_s1 + $0xf14] sm:$0xf0] }
  0xe2   :  { %3971 = vmatpush.bf16.msra.mxu2 %v6396_v54  ;;  %v7554_v54 = vld [vmem:[%s11471_s1 + $0xe44] sm:$0xf0]  ;;  %v6723_v9 = vld [vmem:[%s11471_s1 + $0xf90] sm:$0xf] }
  0xe3   :  { %3984 = vmatpush.bf16.msra.mxu3 %v6460_v60  ;;  %3946 = vmatmul.bf16.vlgmr.msra.gmra.mxu0 %v9220_v5  ;;  %v7586_v60 = vld [vmem:[%s11471_s1 + $0xf44] sm:$0xf0]  ;;  %v6556_v1 = vor.u32 %v7554_v54, %v6555_v52 }
  0xe4   :  { %3990 = vmatpush.bf16.msrb.mxu0 %v6580_v61  ;;  %3959 = vmatmul.bf16.vlgmr.msra.gmra.mxu1 %v9233_v13  ;;  %v3739_v61 = vpop.f32.mrf.mxu0 }
  0xe5   :  { %4003 = vmatpush.bf16.msrb.mxu1 %v6644_v63  ;;  %3972 = vmatmul.bf16.vlgmr.msra.gmra.mxu2 %v9231_v10  ;;  %v7602_v63 = vld [vmem:[%s11471_s1 + $0xfc4] sm:$0xf0] }
  0xe6   :  { %4016 = vmatpush.bf16.msrb.mxu2 %v6708_v0  ;;  %3985 = vmatmul.bf16.vlgmr.msra.gmra.mxu3 %v9241_v53  ;;  %v3740_v0 = vadd.f32 %v3739_v61, %v9131_v55  ;;  %v6748_v55 = vor.u32 %v7602_v63, %v6747_v62 }
  0xe7   :  { %4029 = vmatpush.bf16.msrb.mxu3 %v6772_v4  ;;  %v6684_v4 = vor.u32 %v7586_v60, %v6683_v59  ;;  %v6540_v59 = vor.u32 %v7550_v39, %v6539_v36  ;;  %v34_v36 = vld [vmem:[%s11472_s0 + $0x70] sm:$0xff] }
  0xe8   :  { %3991 = vmatpush.bf16.msrb.mxu0 %v6572_v17  ;;  %v3753_v14 = vadd.f32 %v3752_v2, %v3740_v0  ;;  %v6675_v17 = vld [vmem:[%s11471_s1 + $0xf30] sm:$0xf]  ;;  %v3765_v47 = vpop.f32.mrf.mxu2 }
  0xe9   :  { %4004 = vmatpush.bf16.msrb.mxu1 %v6636_v21  ;;  %v7584_v21 = vld [vmem:[%s11471_s1 + $0xf34] sm:$0xf0]  ;;  %v3778_v54 = vpop.f32.mrf.mxu3  ;;  %v3754_v60 = vpop.f32.mrf.mxu1  ;;  %v6531_v0 = vld [vmem:[%s11471_s1 + $0xe10] sm:$0xf] }
  0xea   :  { %4017 = vmatpush.bf16.msrb.mxu2 %v6700_v24  ;;  %v6739_v24 = vld [vmem:[%s11471_s1 + $0xfb0] sm:$0xf]  ;;  %v3766_v52 = vadd.f32 %v3765_v47, %v3753_v14  ;;  %v6523_v14 = vld [vmem:[%s11471_s1 + $0xe00] sm:$0xf]  ;;  %v35_v47 = vld [vmem:[%s11472_s0 + $0x78] sm:$0xff]  ;;  %v666_v60 = vunpack.c.l.b16 %v34_v36 }
  0xeb   :  { %4030 = vmatpush.bf16.msrb.mxu3 %v6764_v34  ;;  %v6676_v34 = vor.u32 %v7584_v21, %v6675_v17  ;;  %v6740_v43 = vor.u32 %v7600_v26, %v6739_v24  ;;  %v6595_v2 = vld [vmem:[%s11471_s1 + $0xe90] sm:$0xf]  ;;  %v7546_v17 = vld [vmem:[%s11471_s1 + $0xe04] sm:$0xf0]  ;;  %v6587_v21 = vld [vmem:[%s11471_s1 + $0xe80] sm:$0xf] }
  0xec   :  { %3992 = vmatpush.bf16.msrb.mxu0 %v6564_v48  ;;  %v7566_v48 = vld [vmem:[%s11471_s1 + $0xea4] sm:$0xf0]  ;;  %v3741_v58 = vpop.f32.mrf.mxu0  ;;  %v9344_v61 = vadd.f32 %v3778_v54, %v3766_v52  ;;  %v6899_v52 = vld [vmem:[%s11471_s1 + $0x10f0] sm:$0xf] }
  0xed   :  { %4005 = vmatpush.bf16.msrb.mxu1 %v6628_v50  ;;  %v6667_v50 = vld [vmem:[%s11471_s1 + $0xf20] sm:$0xf]  ;;  %v6604_v62 = vor.u32 %v7566_v48, %v6603_v40  ;;  %v7562_v24 = vld [vmem:[%s11471_s1 + $0xe84] sm:$0xf0]  ;;  %v6963_v58 = vld [vmem:[%s11471_s1 + $0x1170] sm:$0xf] }
  0xee   :  { %4018 = vmatpush.bf16.msrb.mxu2 %v6692_v51  ;;  %v7582_v51 = vld [vmem:[%s11471_s1 + $0xf24] sm:$0xf0]  ;;  %v6715_v40 = vld [vmem:[%s11471_s1 + $0xf80] sm:$0xf] }
  0xef   :  { %4031 = vmatpush.bf16.msrb.mxu3 %v6756_v57  ;;  %v7598_v57 = vld [vmem:[%s11471_s1 + $0xfa4] sm:$0xf0]  ;;  %v6668_v63 = vor.u32 %v7582_v51, %v6667_v50  ;;  %v6835_v50 = vld [vmem:[%s11471_s1 + $0x1070] sm:$0xf]  ;;  %v7624_v51 = vld [vmem:[%s11471_s1 + $0x1074] sm:$0xf0] }
  0xf0   :  { %3993 = vmatpush.bf16.msrb.mxu0 %v6556_v1  ;;  %v7548_v1 = vld [vmem:[%s11471_s1 + $0xe14] sm:$0xf0]  ;;  %v3767_v48 = vpop.f32.mrf.mxu2 }
  0xf1   :  { %4006 = vmatpush.bf16.msrb.mxu1 %v6620_v3  ;;  %v6732_v3 = vor.u32 %v7598_v57, %v6731_v56  ;;  %v6532_v15 = vor.u32 %v7548_v1, %v6531_v0  ;;  %v3780_v54 = vpop.f32.mrf.mxu3  ;;  %v6524_v56 = vor.u32 %v7546_v17, %v6523_v14  ;;  %v7640_v57 = vld [vmem:[%s11471_s1 + $0x10f4] sm:$0xf0]  ;;  %v7027_v0 = vld [vmem:[%s11471_s1 + $0x11f0] sm:$0xf]  ;;  %v6827_v14 = vld [vmem:[%s11471_s1 + $0x1060] sm:$0xf] }
  0xf2   :  { %4019 = vmatpush.bf16.msrb.mxu2 %v6684_v4  ;;  %v7564_v4 = vld [vmem:[%s11471_s1 + $0xe94] sm:$0xf0]  ;;  %v6891_v17 = vld [vmem:[%s11471_s1 + $0x10e0] sm:$0xf]  ;;  %v6883_v54 = vld [vmem:[%s11471_s1 + $0x10d0] sm:$0xf] }
  0xf3   :  { %4032 = vmatpush.bf16.msrb.mxu3 %v6748_v55  ;;  %v7596_v55 = vld [vmem:[%s11471_s1 + $0xf94] sm:$0xf0]  ;;  %v6596_v26 = vor.u32 %v7564_v4, %v6595_v2  ;;  %v668_v2 = vunpack.c.l.b16 %v35_v47 }
  0xf4   :  { %3994 = vmatpush.bf16.msrb.mxu0 %v6548_v27  ;;  %v6660_v27 = vor.u32 %v7580_v8, %v6659_v6  ;;  %v6724_v39 = vor.u32 %v7596_v55, %v6723_v9  ;;  %v7672_v1 = vld [vmem:[%s11471_s1 + $0x11f4] sm:$0xf0]  ;;  %v6836_v6 = vor.u32 %v7624_v51, %v6835_v50  ;;  %v669_v8 = vunpack.c.h.b16 %v35_v47  ;;  %v6819_v51 = vld [vmem:[%s11471_s1 + $0x1050] sm:$0xf] }
  0xf5   :  { %4007 = vmatpush.bf16.msrb.mxu1 %v6612_v32  ;;  %v6651_v32 = vld [vmem:[%s11471_s1 + $0xf00] sm:$0xf]  ;;  %v6900_v9 = vor.u32 %v7640_v57, %v6899_v52  ;;  %v7620_v52 = vld [vmem:[%s11471_s1 + $0x1054] sm:$0xf0] }
  0xf6   :  { %4020 = vmatpush.bf16.msrb.mxu2 %v6676_v34  ;;  %v7578_v34 = vld [vmem:[%s11471_s1 + $0xf04] sm:$0xf0]  ;;  %v7636_v57 = vld [vmem:[%s11471_s1 + $0x10d4] sm:$0xf0] }
  0xf7   :  { %4033 = vmatpush.bf16.msrb.mxu3 %v6740_v43  ;;  %v7594_v43 = vld [vmem:[%s11471_s1 + $0xf84] sm:$0xf0] }
  0xf8   :  { %3995 = vmatpush.bf16.msrb.mxu0 %v6540_v59  ;;  %v7656_v59 = vld [vmem:[%s11471_s1 + $0x1174] sm:$0xf0]  ;;  %v6716_v4 = vor.u32 %v7594_v43, %v6715_v40  ;;  %v7670_v40 = vld [vmem:[%s11471_s1 + $0x11e4] sm:$0xf0]  ;;  %v9454_v43 = vpack.c.b16 %v669_v8, %v669_v8 }
  0xf9   :  { %4008 = vmatpush.bf16.msrb.mxu1 %v6604_v62  ;;  %v6588_v62 = vor.u32 %v7562_v24, %v6587_v21  ;;  %v6964_v55 = vor.u32 %v7656_v59, %v6963_v58  ;;  %v7028_v21 = vor.u32 %v7672_v1, %v7027_v0  ;;  %v9433_v24 = vpack.c.b16 %v666_v60, %v666_v60  ;;  %v6947_v58 = vld [vmem:[%s11471_s1 + $0x1150] sm:$0xf]  ;;  %v7652_v59 = vld [vmem:[%s11471_s1 + $0x1154] sm:$0xf0]  ;;  %v7634_v8 = vld [vmem:[%s11471_s1 + $0x10c4] sm:$0xf0] }
  0xfa   :  { %4021 = vmatpush.bf16.msrb.mxu2 %v6668_v63  ;;  %v6652_v63 = vor.u32 %v7578_v34, %v6651_v32  ;;  %v7654_v32 = vld [vmem:[%s11471_s1 + $0x1164] sm:$0xf0]  ;;  %v9444_v34 = vpack.c.b16 %v668_v2, %v668_v2  ;;  %v7011_v60 = vld [vmem:[%s11471_s1 + $0x11d0] sm:$0xf]  ;;  %v6884_v0 = vor.u32 %v7636_v57, %v6883_v54  ;;  %v6948_v1 = vor.u32 %v7652_v59, %v6947_v58  ;;  %v6811_v2 = vld [vmem:[%s11471_s1 + $0x1040] sm:$0xf] }
  0xfb   :  { %4034 = vmatpush.bf16.msrb.mxu3 %v6732_v3  ;;  %v667_v3 = vunpack.c.h.b16 %v34_v36  ;;  %v7648_v54 = vld [vmem:[%s11471_s1 + $0x1134] sm:$0xf0] }
  0xfc   :  { %3996 = vmatpush.bf16.msrb.mxu0 %v6532_v15  ;;  %v7622_v15 = vld [vmem:[%s11471_s1 + $0x1064] sm:$0xf0]  ;;  %v7664_v57 = vld [vmem:[%s11471_s1 + $0x11b4] sm:$0xf0] }
  0xfd   :  { %4009 = vmatpush.bf16.msrb.mxu1 %v6596_v26  ;;  %v7638_v26 = vld [vmem:[%s11471_s1 + $0x10e4] sm:$0xf0]  ;;  %v9446_v36 = vpack.c.b16 %v667_v3, %v667_v3  ;;  %v6828_v47 = vor.u32 %v7622_v15, %v6827_v14  ;;  %v7003_v15 = vld [vmem:[%s11471_s1 + $0x11c0] sm:$0xf] }
  0xfe   :  { %4022 = vmatpush.bf16.msrb.mxu2 %v6660_v27  ;;  %v6955_v27 = vld [vmem:[%s11471_s1 + $0x1160] sm:$0xf]  ;;  %v6892_v48 = vor.u32 %v7638_v26, %v6891_v17  ;;  %v7618_v3 = vld [vmem:[%s11471_s1 + $0x1044] sm:$0xf0] }
  0xff   :  { %4035 = vmatpush.bf16.msrb.mxu3 %v6724_v39  ;;  %v7019_v39 = vld [vmem:[%s11471_s1 + $0x11e0] sm:$0xf]  ;;  %v6956_v50 = vor.u32 %v7654_v32, %v6955_v27  ;;  %v7666_v17 = vld [vmem:[%s11471_s1 + $0x11c4] sm:$0xf0]  ;;  %v6812_v26 = vor.u32 %v7618_v3, %v6811_v2 }
 0x100   :  { %3997 = vmatpush.bf16.msrb.mxu0 %v6524_v56  ;;  %v7020_v56 = vor.u32 %v7670_v40, %v7019_v39  ;;  %v3791_v14 = vpop.f32.mrf.mxu0  ;;  %v6803_v40 = vld [vmem:[%s11471_s1 + $0x1030] sm:$0xf]  ;;  %v7630_v3 = vld [vmem:[%s11471_s1 + $0x10a4] sm:$0xf0] }
 0x101   :  { %4010 = vmatpush.bf16.msrb.mxu1 %v6588_v62  ;;  %v7668_v62 = vld [vmem:[%s11471_s1 + $0x11d4] sm:$0xf0]  ;;  %v3804_v27 = vpop.f32.mrf.mxu1 }
 0x102   :  { %4023 = vmatpush.bf16.msrb.mxu2 %v6652_v63  ;;  %v6820_v63 = vor.u32 %v7620_v52, %v6819_v51  ;;  %v7632_v51 = vld [vmem:[%s11471_s1 + $0x10b4] sm:$0xf0]  ;;  %v6931_v52 = vld [vmem:[%s11471_s1 + $0x1130] sm:$0xf] }
 0x103   :  { %4036 = vmatpush.bf16.msrb.mxu3 %v6716_v4  ;;  %3998 = vmatmul.bf16.vlgmr.msrb.gmra.mxu0 %v9433_v24  ;;  %v6875_v4 = vld [vmem:[%s11471_s1 + $0x10c0] sm:$0xf] }
 0x104   :  { %4042 = vmatpush.bf16.msra.mxu0 %v6836_v6  ;;  %4011 = vmatmul.bf16.vlgmr.msrb.gmra.mxu1 %v9446_v36  ;;  %v7012_v6 = vor.u32 %v7668_v62, %v7011_v60  ;;  %v6876_v32 = vor.u32 %v7634_v8, %v6875_v4  ;;  %v6932_v60 = vor.u32 %v7648_v54, %v6931_v52  ;;  %v6795_v62 = vld [vmem:[%s11471_s1 + $0x1020] sm:$0xf]  ;;  %v6979_v52 = vld [vmem:[%s11471_s1 + $0x1190] sm:$0xf]  ;;  %v7660_v54 = vld [vmem:[%s11471_s1 + $0x1194] sm:$0xf0] }
 0x105   :  { %4055 = vmatpush.bf16.msra.mxu1 %v6900_v9  ;;  %4024 = vmatmul.bf16.vlgmr.msrb.gmra.mxu2 %v9444_v34  ;;  %v6939_v9 = vld [vmem:[%s11471_s1 + $0x1140] sm:$0xf] }
 0x106   :  { %4068 = vmatpush.bf16.msra.mxu2 %v6964_v55  ;;  %4037 = vmatmul.bf16.vlgmr.msrb.gmra.mxu3 %v9454_v43  ;;  %v7650_v55 = vld [vmem:[%s11471_s1 + $0x1144] sm:$0xf0]  ;;  %v6923_v4 = vld [vmem:[%s11471_s1 + $0x1120] sm:$0xf] }
 0x107   :  { %4081 = vmatpush.bf16.msra.mxu3 %v7028_v21  ;;  %v3792_v21 = vadd.f32 %v3791_v14, %v9344_v61  ;;  %v6940_v39 = vor.u32 %v7650_v55, %v6939_v9  ;;  %v7004_v61 = vor.u32 %v7666_v17, %v7003_v15  ;;  %v6987_v55 = vld [vmem:[%s11471_s1 + $0x11a0] sm:$0xf]  ;;  %v7662_v14 = vld [vmem:[%s11471_s1 + $0x11a4] sm:$0xf0] }
 0x108   :  { %4043 = vmatpush.bf16.msra.mxu0 %v6828_v47  ;;  %v7616_v47 = vld [vmem:[%s11471_s1 + $0x1034] sm:$0xf0]  ;;  %v3817_v2 = vpop.f32.mrf.mxu2  ;;  %v3793_v15 = vpop.f32.mrf.mxu0 }
 0x109   :  { %4056 = vmatpush.bf16.msra.mxu1 %v6892_v48  ;;  %v6867_v48 = vld [vmem:[%s11471_s1 + $0x10b0] sm:$0xf]  ;;  %v6804_v58 = vor.u32 %v7616_v47, %v6803_v40  ;;  %v3830_v9 = vpop.f32.mrf.mxu3  ;;  %v7612_v40 = vld [vmem:[%s11471_s1 + $0x1014] sm:$0xf0]  ;;  %v7127_v15 = vld [vmem:[%s11471_s1 + $0xf4] sm:$0xf] }
 0x10a   :  { %4069 = vmatpush.bf16.msra.mxu2 %v6956_v50  ;;  %v3805_v50 = vadd.f32 %v3804_v27, %v3792_v21  ;;  %v6868_v59 = vor.u32 %v7632_v51, %v6867_v48  ;;  %v3806_v21 = vpop.f32.mrf.mxu1  ;;  %v6851_v47 = vld [vmem:[%s11471_s1 + $0x1090] sm:$0xf]  ;;  %v6988_v48 = vor.u32 %v7662_v14, %v6987_v55  ;;  %v7644_v51 = vld [vmem:[%s11471_s1 + $0x1114] sm:$0xf0]  ;;  %v7111_v55 = vld [vmem:[%s11471_s1 + $0x74] sm:$0xf] }
 0x10b   :  { %4082 = vmatpush.bf16.msra.mxu3 %v7020_v56  ;;  %v6995_v56 = vld [vmem:[%s11471_s1 + $0x11b0] sm:$0xf]  ;;  %v4789_v14 = vld [vmem:[%s11471_s1 + $0x78] sm:$0xf0] }
 0x10c   :  { %4044 = vmatpush.bf16.msra.mxu0 %v6820_v63  ;;  %v7614_v63 = vld [vmem:[%s11471_s1 + $0x1024] sm:$0xf0]  ;;  %v3818_v8 = vadd.f32 %v3817_v2, %v3805_v50  ;;  %v6915_v50 = vld [vmem:[%s11471_s1 + $0x1110] sm:$0xf]  ;;  %v36_v2 = vld [vmem:[%s11472_s0 + $0x80] sm:$0xff] }
 0x10d   :  { %4057 = vmatpush.bf16.msra.mxu1 %v6884_v0  ;;  %v6859_v0 = vld [vmem:[%s11471_s1 + $0x10a0] sm:$0xf]  ;;  %v6796_v17 = vor.u32 %v7614_v63, %v6795_v62  ;;  %v6916_v63 = vor.u32 %v7644_v51, %v6915_v50  ;;  %v4981_v50 = vld [vmem:[%s11471_s1 + $0x1f8] sm:$0xf0] }
 0x10e   :  { %4070 = vmatpush.bf16.msra.mxu2 %v6948_v1  ;;  %v6996_v1 = vor.u32 %v7664_v57, %v6995_v56  ;;  %v6860_v27 = vor.u32 %v7630_v3, %v6859_v0  ;;  %v6779_v56 = vld [vmem:[%s11471_s1 + $0x1000] sm:$0xf]  ;;  %v6980_v3 = vor.u32 %v7660_v54, %v6979_v52  ;;  %v671_v52 = vunpack.c.h.b16 %v36_v2 }
 0x10f   :  { %4083 = vmatpush.bf16.msra.mxu3 %v7012_v6  ;;  %v7646_v6 = vld [vmem:[%s11471_s1 + $0x1124] sm:$0xf0]  ;;  %v6907_v0 = vld [vmem:[%s11471_s1 + $0x1100] sm:$0xf] }
 0x110   :  { %4045 = vmatpush.bf16.msra.mxu0 %v6812_v26  ;;  %v9557_v26 = vadd.f32 %v3830_v9, %v3818_v8  ;;  %v37_v8 = vld [vmem:[%s11472_s0 + $0x88] sm:$0xff]  ;;  %v3819_v9 = vpop.f32.mrf.mxu2 }
 0x111   :  { %4058 = vmatpush.bf16.msra.mxu1 %v6876_v32  ;;  %v6924_v32 = vor.u32 %v7646_v6, %v6923_v4  ;;  %v6971_v4 = vld [vmem:[%s11471_s1 + $0x1180] sm:$0xf]  ;;  %v7658_v6 = vld [vmem:[%s11471_s1 + $0x1184] sm:$0xf0]  ;;  %v672_v51 = vunpack.c.l.b16 %v37_v8 }
 0x112   :  { %4071 = vmatpush.bf16.msra.mxu2 %v6940_v39  ;;  %v6787_v39 = vld [vmem:[%s11471_s1 + $0x1010] sm:$0xf]  ;;  %v6972_v54 = vor.u32 %v7658_v6, %v6971_v4  ;;  %v9659_v6 = vpack.c.b16 %v671_v52, %v671_v52 }
 0x113   :  { %4084 = vmatpush.bf16.msra.mxu3 %v7004_v61  ;;  %v7628_v61 = vld [vmem:[%s11471_s1 + $0x1094] sm:$0xf0]  ;;  %v6788_v57 = vor.u32 %v7612_v40, %v6787_v39  ;;  %v4917_v39 = vld [vmem:[%s11471_s1 + $0x178] sm:$0xf0]  ;;  %v670_v40 = vunpack.c.l.b16 %v36_v2  ;;  %v7141_v2 = vld [vmem:[%s11471_s1 + $0x164] sm:$0xf]  ;;  %v9657_v4 = vpack.c.b16 %v672_v51, %v672_v51 }
 0x114   :  { %4046 = vmatpush.bf16.msra.mxu0 %v6804_v58  ;;  %v7610_v58 = vld [vmem:[%s11471_s1 + $0x1004] sm:$0xf0]  ;;  %v6852_v62 = vor.u32 %v7628_v61, %v6851_v47  ;;  %v7159_v61 = vld [vmem:[%s11471_s1 + $0x1f4] sm:$0xf]  ;;  %v4965_v51 = vld [vmem:[%s11471_s1 + $0x1d8] sm:$0xf0] }
 0x115   :  { %4059 = vmatpush.bf16.msra.mxu1 %v6868_v59  ;;  %v6843_v59 = vld [vmem:[%s11471_s1 + $0x1080] sm:$0xf]  ;;  %v6780_v21 = vor.u32 %v7610_v58, %v6779_v56  ;;  %v4792_v56 = vor.u32 %v7111_v55, %v4789_v14  ;;  %v4973_v55 = vld [vmem:[%s11471_s1 + $0x1e8] sm:$0xf0] }
 0x116   :  { %4072 = vmatpush.bf16.msra.mxu2 %v6932_v60  ;;  %v7626_v60 = vld [vmem:[%s11471_s1 + $0x1084] sm:$0xf0] }
 0x117   :  { %4085 = vmatpush.bf16.msra.mxu3 %v6996_v1  ;;  %v7642_v1 = vld [vmem:[%s11471_s1 + $0x1104] sm:$0xf0]  ;;  %v6844_v47 = vor.u32 %v7626_v60, %v6843_v59  ;;  %v7109_v59 = vld [vmem:[%s11471_s1 + $0x64] sm:$0xf]  ;;  %v4781_v60 = vld [vmem:[%s11471_s1 + $0x68] sm:$0xf0] }
 0x118   :  { %4047 = vmatpush.bf16.msra.mxu0 %v6796_v17  ;;  %v3832_v17 = vpop.f32.mrf.mxu3 }
 0x119   :  { %4060 = vmatpush.bf16.msra.mxu1 %v6860_v27  ;;  %v4853_v27 = vld [vmem:[%s11471_s1 + $0xf8] sm:$0xf0] }
 0x11a   :  { %4073 = vmatpush.bf16.msra.mxu2 %v6924_v32  ;;  %v7143_v32 = vld [vmem:[%s11471_s1 + $0x174] sm:$0xf]  ;;  %v4856_v58 = vor.u32 %v7127_v15, %v4853_v27  ;;  %v4784_v15 = vor.u32 %v7109_v59, %v4781_v60  ;;  %v4829_v60 = vld [vmem:[%s11471_s1 + $0xc8] sm:$0xf0] }
 0x11b   :  { %4086 = vmatpush.bf16.msra.mxu3 %v6988_v48  ;;  %v6908_v48 = vor.u32 %v7642_v1, %v6907_v0  ;;  %v4920_v9 = vor.u32 %v7143_v32, %v4917_v39  ;;  %v9646_v0 = vpack.c.b16 %v670_v40, %v670_v40  ;;  %v4845_v1 = vld [vmem:[%s11471_s1 + $0xe8] sm:$0xf0]  ;;  %v7107_v27 = vld [vmem:[%s11471_s1 + $0x54] sm:$0xf]  ;;  %v4773_v32 = vld [vmem:[%s11471_s1 + $0x58] sm:$0xf0] }
 0x11c   :  { %4048 = vmatpush.bf16.msra.mxu0 %v6788_v57  ;;  %v673_v57 = vunpack.c.h.b16 %v37_v8  ;;  %v7157_v8 = vld [vmem:[%s11471_s1 + $0x1e4] sm:$0xf]  ;;  %v7123_v39 = vld [vmem:[%s11471_s1 + $0xd4] sm:$0xf]  ;;  %v4776_v52 = vor.u32 %v7107_v27, %v4773_v32  ;;  %v4757_v32 = vld [vmem:[%s11471_s1 + $0x38] sm:$0xf0] }
 0x11d   :  { %4061 = vmatpush.bf16.msra.mxu1 %v6852_v62  ;;  %v7125_v62 = vld [vmem:[%s11471_s1 + $0xe4] sm:$0xf]  ;;  %v4976_v40 = vor.u32 %v7157_v8, %v4973_v55  ;;  %v7103_v27 = vld [vmem:[%s11471_s1 + $0x34] sm:$0xf] }
 0x11e   :  { %4074 = vmatpush.bf16.msra.mxu2 %v6916_v63  ;;  %v4984_v63 = vor.u32 %v7159_v61, %v4981_v50  ;;  %v9667_v14 = vpack.c.b16 %v673_v57, %v673_v57  ;;  %v4848_v17 = vor.u32 %v7125_v62, %v4845_v1  ;;  %v4901_v61 = vld [vmem:[%s11471_s1 + $0x158] sm:$0xf0]  ;;  %v7155_v50 = vld [vmem:[%s11471_s1 + $0x1d4] sm:$0xf]  ;;  %v7105_v57 = vld [vmem:[%s11471_s1 + $0x44] sm:$0xf] }
 0x11f   :  { %4087 = vmatpush.bf16.msra.mxu3 %v6980_v3  ;;  %v4909_v3 = vld [vmem:[%s11471_s1 + $0x168] sm:$0xf0]  ;;  %v4968_v59 = vor.u32 %v7155_v50, %v4965_v51  ;;  %v7137_v62 = vld [vmem:[%s11471_s1 + $0x144] sm:$0xf]  ;;  %v7151_v50 = vld [vmem:[%s11471_s1 + $0x1b4] sm:$0xf] }
 0x120   :  { %4049 = vmatpush.bf16.msra.mxu0 %v6780_v21  ;;  %v4912_v21 = vor.u32 %v7141_v2, %v4909_v3  ;;  %v3843_v1 = vpop.f32.mrf.mxu0  ;;  %v7153_v2 = vld [vmem:[%s11471_s1 + $0x1c4] sm:$0xf]  ;;  %v4957_v3 = vld [vmem:[%s11471_s1 + $0x1c8] sm:$0xf0]  ;;  %v4949_v51 = vld [vmem:[%s11471_s1 + $0x1b8] sm:$0xf0] }
 0x121   :  { %4062 = vmatpush.bf16.msra.mxu1 %v6844_v47  ;;  %v4837_v47 = vld [vmem:[%s11471_s1 + $0xd8] sm:$0xf0]  ;;  %v3844_v8 = vadd.f32 %v3843_v1, %v9557_v26  ;;  %v4960_v26 = vor.u32 %v7153_v2, %v4957_v3  ;;  %v4877_v1 = vld [vmem:[%s11471_s1 + $0x128] sm:$0xf0] }
 0x122   :  { %4075 = vmatpush.bf16.msra.mxu2 %v6908_v48  ;;  %v7139_v48 = vld [vmem:[%s11471_s1 + $0x154] sm:$0xf] }
 0x123   :  { %4088 = vmatpush.bf16.msra.mxu3 %v6972_v54  ;;  %4050 = vmatmul.bf16.vlgmr.msra.gmra.mxu0 %v9646_v0  ;;  %v4840_v54 = vor.u32 %v7123_v39, %v4837_v47  ;;  %v7119_v39 = vld [vmem:[%s11471_s1 + $0xb4] sm:$0xf]  ;;  %v4821_v47 = vld [vmem:[%s11471_s1 + $0xb8] sm:$0xf0] }
 0x124   :  { %4094 = vmatpush.bf16.msrb.mxu0 %v4792_v56  ;;  %4063 = vmatmul.bf16.vlgmr.msra.gmra.mxu1 %v9659_v6  ;;  %v4904_v56 = vor.u32 %v7139_v48, %v4901_v61  ;;  %v7135_v48 = vld [vmem:[%s11471_s1 + $0x134] sm:$0xf]  ;;  %v4885_v61 = vld [vmem:[%s11471_s1 + $0x138] sm:$0xf0] }
 0x125   :  { %4107 = vmatpush.bf16.msrb.mxu1 %v4856_v58  ;;  %4076 = vmatmul.bf16.vlgmr.msra.gmra.mxu2 %v9657_v4  ;;  %v4765_v58 = vld [vmem:[%s11471_s1 + $0x48] sm:$0xf0] }
 0x126   :  { %4120 = vmatpush.bf16.msrb.mxu2 %v4920_v9  ;;  %4089 = vmatmul.bf16.vlgmr.msra.gmra.mxu3 %v9667_v14  ;;  %v7121_v9 = vld [vmem:[%s11471_s1 + $0xc4] sm:$0xf]  ;;  %v4768_v55 = vor.u32 %v7105_v57, %v4765_v58  ;;  %v4749_v58 = vld [vmem:[%s11471_s1 + $0x28] sm:$0xf0] }
 0x127   :  { %4133 = vmatpush.bf16.msrb.mxu3 %v4984_v63  ;;  %v4893_v63 = vld [vmem:[%s11471_s1 + $0x148] sm:$0xf0]  ;;  %v7101_v57 = vld [vmem:[%s11471_s1 + $0x24] sm:$0xf] }
 0x128   :  { %4095 = vmatpush.bf16.msrb.mxu0 %v4784_v15  ;;  %v3856_v15 = vpop.f32.mrf.mxu1 }
 0x129   :  { %4108 = vmatpush.bf16.msrb.mxu1 %v4848_v17  ;;  %v4832_v17 = vor.u32 %v7121_v9, %v4829_v60  ;;  %v7117_v9 = vld [vmem:[%s11471_s1 + $0xa4] sm:$0xf]  ;;  %v3869_v60 = vpop.f32.mrf.mxu2  ;;  %v3882_v3 = vpop.f32.mrf.mxu3 }
 0x12a   :  { %4121 = vmatpush.bf16.msrb.mxu2 %v4912_v21  ;;  %v4896_v21 = vor.u32 %v7137_v62, %v4893_v63  ;;  %v4813_v62 = vld [vmem:[%s11471_s1 + $0xa8] sm:$0xf0]  ;;  %v7133_v63 = vld [vmem:[%s11471_s1 + $0x124] sm:$0xf] }
 0x12b   :  { %4134 = vmatpush.bf16.msrb.mxu3 %v4976_v40  ;;  %v3857_v40 = vadd.f32 %v3856_v15, %v3844_v8  ;;  %v7149_v8 = vld [vmem:[%s11471_s1 + $0x1a4] sm:$0xf]  ;;  %v3845_v15 = vpop.f32.mrf.mxu0 }
 0x12c   :  { %4096 = vmatpush.bf16.msrb.mxu0 %v4776_v52  ;;  %v4760_v52 = vor.u32 %v7103_v27, %v4757_v32  ;;  %v4816_v32 = vor.u32 %v7117_v9, %v4813_v62  ;;  %v4797_v62 = vld [vmem:[%s11471_s1 + $0x88] sm:$0xf0]  ;;  %v7175_v15 = vld [vmem:[%s11471_s1 + $0x274] sm:$0xf] }
 0x12d   :  { %4109 = vmatpush.bf16.msrb.mxu1 %v4840_v54  ;;  %v4824_v54 = vor.u32 %v7119_v39, %v4821_v47  ;;  %v3870_v2 = vadd.f32 %v3869_v60, %v3857_v40  ;;  %v4880_v39 = vor.u32 %v7133_v63, %v4877_v1  ;;  %v4741_v40 = vld [vmem:[%s11471_s1 + $0x18] sm:$0xf0]  ;;  %v7115_v47 = vld [vmem:[%s11471_s1 + $0x94] sm:$0xf]  ;;  %v7113_v60 = vld [vmem:[%s11471_s1 + $0x84] sm:$0xf] }
 0x12e   :  { %4122 = vmatpush.bf16.msrb.mxu2 %v4904_v56  ;;  %v4888_v56 = vor.u32 %v7135_v48, %v4885_v61  ;;  %v4805_v61 = vld [vmem:[%s11471_s1 + $0x98] sm:$0xf0]  ;;  %v7129_v63 = vld [vmem:[%s11471_s1 + $0x104] sm:$0xf] }
 0x12f   :  { %4135 = vmatpush.bf16.msrb.mxu3 %v4968_v59  ;;  %v4952_v59 = vor.u32 %v7151_v50, %v4949_v51  ;;  %v9770_v27 = vadd.f32 %v3882_v3, %v3870_v2  ;;  %v7131_v50 = vld [vmem:[%s11471_s1 + $0x114] sm:$0xf]  ;;  %v4869_v51 = vld [vmem:[%s11471_s1 + $0x118] sm:$0xf0]  ;;  %v4808_v9 = vor.u32 %v7115_v47, %v4805_v61  ;;  %v4861_v2 = vld [vmem:[%s11471_s1 + $0x108] sm:$0xf0] }
 0x130   :  { %4097 = vmatpush.bf16.msrb.mxu0 %v4768_v55  ;;  %v4941_v55 = vld [vmem:[%s11471_s1 + $0x1a8] sm:$0xf0]  ;;  %v7145_v3 = vld [vmem:[%s11471_s1 + $0x184] sm:$0xf]  ;;  %v5173_v47 = vld [vmem:[%s11471_s1 + $0x378] sm:$0xf0]  ;;  %v4864_v61 = vor.u32 %v7129_v63, %v4861_v2 }
 0x131   :  { %4110 = vmatpush.bf16.msrb.mxu1 %v4832_v17  ;;  %v4752_v17 = vor.u32 %v7101_v57, %v4749_v58  ;;  %v4944_v48 = vor.u32 %v7149_v8, %v4941_v55  ;;  %v7097_v57 = vld [vmem:[%s11471_s1 + $0x4] sm:$0xf]  ;;  %v4733_v58 = vld [vmem:[%s11471_s1 + $0x8] sm:$0xf0]  ;;  %v3871_v55 = vpop.f32.mrf.mxu2 }
 0x132   :  { %4123 = vmatpush.bf16.msrb.mxu2 %v4896_v21  ;;  %v3858_v21 = vpop.f32.mrf.mxu1  ;;  %v4925_v8 = vld [vmem:[%s11471_s1 + $0x188] sm:$0xf0]  ;;  %v7205_v63 = vld [vmem:[%s11471_s1 + $0x364] sm:$0xf] }
 0x133   :  { %4136 = vmatpush.bf16.msrb.mxu3 %v4960_v26  ;;  %v7099_v26 = vld [vmem:[%s11471_s1 + $0x14] sm:$0xf]  ;;  %v7221_v2 = vld [vmem:[%s11471_s1 + $0x3e4] sm:$0xf] }
 0x134   :  { %4098 = vmatpush.bf16.msrb.mxu0 %v4760_v52  ;;  %v7147_v52 = vld [vmem:[%s11471_s1 + $0x194] sm:$0xf] }
 0x135   :  { %4111 = vmatpush.bf16.msrb.mxu1 %v4824_v54  ;;  %v4933_v54 = vld [vmem:[%s11471_s1 + $0x198] sm:$0xf0]  ;;  %v7191_v21 = vld [vmem:[%s11471_s1 + $0x2f4] sm:$0xf] }
 0x136   :  { %4124 = vmatpush.bf16.msrb.mxu2 %v4888_v56  ;;  %v4744_v56 = vor.u32 %v7099_v26, %v4741_v40  ;;  %v4936_v1 = vor.u32 %v7147_v52, %v4933_v54  ;;  %v5109_v26 = vld [vmem:[%s11471_s1 + $0x2f8] sm:$0xf0]  ;;  %v7207_v40 = vld [vmem:[%s11471_s1 + $0x374] sm:$0xf]  ;;  %v4928_v52 = vor.u32 %v7145_v3, %v4925_v8  ;;  %v5229_v3 = vld [vmem:[%s11471_s1 + $0x3e8] sm:$0xf0] }
 0x137   :  { %4137 = vmatpush.bf16.msrb.mxu3 %v4952_v59  ;;  %v4872_v59 = vor.u32 %v7131_v50, %v4869_v51  ;;  %v7223_v50 = vld [vmem:[%s11471_s1 + $0x3f4] sm:$0xf]  ;;  %v5237_v51 = vld [vmem:[%s11471_s1 + $0x3f8] sm:$0xf0] }
 0x138   :  { %4099 = vmatpush.bf16.msrb.mxu0 %v4752_v17  ;;  %v5045_v17 = vld [vmem:[%s11471_s1 + $0x278] sm:$0xf0] }
 0x139   :  { %4112 = vmatpush.bf16.msrb.mxu1 %v4816_v32  ;;  %v3884_v32 = vpop.f32.mrf.mxu3  ;;  %v5048_v54 = vor.u32 %v7175_v15, %v5045_v17  ;;  %v7171_v17 = vld [vmem:[%s11471_s1 + $0x254] sm:$0xf] }
 0x13a   :  { %4125 = vmatpush.bf16.msrb.mxu2 %v4880_v39  ;;  %v4736_v39 = vor.u32 %v7097_v57, %v4733_v58  ;;  %v5176_v57 = vor.u32 %v7207_v40, %v5173_v47  ;;  %v7173_v58 = vld [vmem:[%s11471_s1 + $0x264] sm:$0xf]  ;;  %v7187_v32 = vld [vmem:[%s11471_s1 + $0x2d4] sm:$0xf]  ;;  %v5157_v47 = vld [vmem:[%s11471_s1 + $0x358] sm:$0xf0] }
 0x13b   :  { %4138 = vmatpush.bf16.msrb.mxu3 %v4944_v48  ;;  %v4800_v48 = vor.u32 %v7113_v60, %v4797_v62  ;;  %v5240_v60 = vor.u32 %v7223_v50, %v5237_v51  ;;  %v5101_v62 = vld [vmem:[%s11471_s1 + $0x2e8] sm:$0xf0]  ;;  %v7203_v40 = vld [vmem:[%s11471_s1 + $0x354] sm:$0xf] }
 0x13c   :  { %4100 = vmatpush.bf16.msrb.mxu0 %v4744_v56  ;;  %v5112_v56 = vor.u32 %v7191_v21, %v5109_v26  ;;  %v5029_v21 = vld [vmem:[%s11471_s1 + $0x258] sm:$0xf0] }
 0x13d   :  { %4113 = vmatpush.bf16.msrb.mxu1 %v4808_v9  ;;  %v5037_v9 = vld [vmem:[%s11471_s1 + $0x268] sm:$0xf0]  ;;  %v5093_v26 = vld [vmem:[%s11471_s1 + $0x2d8] sm:$0xf0]  ;;  %v5032_v50 = vor.u32 %v7171_v17, %v5029_v21  ;;  %v7199_v21 = vld [vmem:[%s11471_s1 + $0x334] sm:$0xf] }
 0x13e   :  { %4126 = vmatpush.bf16.msrb.mxu2 %v4872_v59  ;;  %v7189_v59 = vld [vmem:[%s11471_s1 + $0x2e4] sm:$0xf]  ;;  %v5040_v8 = vor.u32 %v7173_v58, %v5037_v9  ;;  %v5096_v51 = vor.u32 %v7187_v32, %v5093_v26  ;;  %v5077_v17 = vld [vmem:[%s11471_s1 + $0x2b8] sm:$0xf0] }
 0x13f   :  { %4139 = vmatpush.bf16.msrb.mxu3 %v4936_v1  ;;  %v5165_v1 = vld [vmem:[%s11471_s1 + $0x368] sm:$0xf0]  ;;  %v5104_v55 = vor.u32 %v7189_v59, %v5101_v62  ;;  %v7217_v9 = vld [vmem:[%s11471_s1 + $0x3c4] sm:$0xf]  ;;  %v5141_v32 = vld [vmem:[%s11471_s1 + $0x338] sm:$0xf0] }
 0x140   :  { %4101 = vmatpush.bf16.msrb.mxu0 %v4736_v39  ;;  %v5168_v15 = vor.u32 %v7205_v63, %v5165_v1  ;;  %v5232_v39 = vor.u32 %v7221_v2, %v5229_v3  ;;  %v3895_v58 = vpop.f32.mrf.mxu0  ;;  %v5213_v59 = vld [vmem:[%s11471_s1 + $0x3c8] sm:$0xf0]  ;;  %v7167_v3 = vld [vmem:[%s11471_s1 + $0x234] sm:$0xf]  ;;  %v5205_v26 = vld [vmem:[%s11471_s1 + $0x3b8] sm:$0xf0] }
 0x141   :  { %4114 = vmatpush.bf16.msrb.mxu1 %v4800_v48  ;;  %v7219_v48 = vld [vmem:[%s11471_s1 + $0x3d4] sm:$0xf]  ;;  %v3908_v63 = vpop.f32.mrf.mxu1 }
 0x142   :  { %4127 = vmatpush.bf16.msrb.mxu2 %v4864_v61  ;;  %v5221_v61 = vld [vmem:[%s11471_s1 + $0x3d8] sm:$0xf0] }
 0x143   :  { %4140 = vmatpush.bf16.msrb.mxu3 %v4928_v52  ;;  %4102 = vmatmul.bf16.vlgmr.msrb.gmra.mxu0 %v8017_v19  ;;  %v7169_v52 = vld [vmem:[%s11471_s1 + $0x244] sm:$0xf] }
 0x144   :  { %4146 = vmatpush.bf16.msra.mxu0 %v5048_v54  ;;  %4115 = vmatmul.bf16.vlgmr.msrb.gmra.mxu1 %v8021_v22  ;;  %v5021_v54 = vld [vmem:[%s11471_s1 + $0x248] sm:$0xf0]  ;;  %v7185_v19 = vld [vmem:[%s11471_s1 + $0x2c4] sm:$0xf] }
 0x145   :  { %4159 = vmatpush.bf16.msra.mxu1 %v5112_v56  ;;  %4128 = vmatmul.bf16.vlgmr.msrb.gmra.mxu2 %v8015_v18  ;;  %v5160_v18 = vor.u32 %v7203_v40, %v5157_v47  ;;  %v5085_v22 = vld [vmem:[%s11471_s1 + $0x2c8] sm:$0xf0]  ;;  %v7201_v56 = vld [vmem:[%s11471_s1 + $0x344] sm:$0xf]  ;;  %v5024_v62 = vor.u32 %v7169_v52, %v5021_v54 }
 0x146   :  { %4172 = vmatpush.bf16.msra.mxu2 %v5176_v57  ;;  %4141 = vmatmul.bf16.vlgmr.msrb.gmra.mxu3 %v8019_v20  ;;  %v5224_v20 = vor.u32 %v7219_v48, %v5221_v61  ;;  %v5149_v57 = vld [vmem:[%s11471_s1 + $0x348] sm:$0xf0]  ;;  %v5088_v1 = vor.u32 %v7185_v19, %v5085_v22  ;;  %v5144_v48 = vor.u32 %v7199_v21, %v5141_v32  ;;  %v7165_v61 = vld [vmem:[%s11471_s1 + $0x224] sm:$0xf]  ;;  %v7211_v21 = vld [vmem:[%s11471_s1 + $0x394] sm:$0xf] }
 0x147   :  { %4185 = vmatpush.bf16.msra.mxu3 %v5240_v60  ;;  %v3896_v60 = vadd.f32 %v3895_v58, %v9770_v27  ;;  %v5152_v2 = vor.u32 %v7201_v56, %v5149_v57  ;;  %v5216_v27 = vor.u32 %v7217_v9, %v5213_v59  ;;  %v5069_v54 = vld [vmem:[%s11471_s1 + $0x2a8] sm:$0xf0]  ;;  %v7197_v19 = vld [vmem:[%s11471_s1 + $0x324] sm:$0xf]  ;;  %v5189_v32 = vld [vmem:[%s11471_s1 + $0x398] sm:$0xf0] }
 0x148   :  { %4147 = vmatpush.bf16.msra.mxu0 %v5040_v8  ;;  %v5013_v8 = vld [vmem:[%s11471_s1 + $0x238] sm:$0xf0]  ;;  %v3921_v52 = vpop.f32.mrf.mxu2  ;;  %v7213_v57 = vld [vmem:[%s11471_s1 + $0x3a4] sm:$0xf]  ;;  %v5197_v58 = vld [vmem:[%s11471_s1 + $0x3a8] sm:$0xf0]  ;;  %v3897_v9 = vpop.f32.mrf.mxu0 }
 0x149   :  { %4160 = vmatpush.bf16.msra.mxu1 %v5104_v55  ;;  %v7183_v55 = vld [vmem:[%s11471_s1 + $0x2b4] sm:$0xf]  ;;  %v5016_v40 = vor.u32 %v7167_v3, %v5013_v8  ;;  %v3934_v56 = vpop.f32.mrf.mxu3  ;;  %v4997_v3 = vld [vmem:[%s11471_s1 + $0x218] sm:$0xf0] }
 0x14a   :  { %4173 = vmatpush.bf16.msra.mxu2 %v5168_v15  ;;  %v3909_v15 = vadd.f32 %v3908_v63, %v3896_v60  ;;  %v5080_v47 = vor.u32 %v7183_v55, %v5077_v17  ;;  %v3910_v60 = vpop.f32.mrf.mxu1  ;;  %v7179_v8 = vld [vmem:[%s11471_s1 + $0x294] sm:$0xf]  ;;  %v5200_v55 = vor.u32 %v7213_v57, %v5197_v58  ;;  %v5125_v17 = vld [vmem:[%s11471_s1 + $0x318] sm:$0xf0] }
 0x14b   :  { %4186 = vmatpush.bf16.msra.mxu3 %v5232_v39  ;;  %v7215_v39 = vld [vmem:[%s11471_s1 + $0x3b4] sm:$0xf] }
 0x14c   :  { %4148 = vmatpush.bf16.msra.mxu0 %v5032_v50  ;;  %v5005_v50 = vld [vmem:[%s11471_s1 + $0x228] sm:$0xf0]  ;;  %v3922_v22 = vadd.f32 %v3921_v52, %v3909_v15  ;;  %v7195_v15 = vld [vmem:[%s11471_s1 + $0x314] sm:$0xf] }
 0x14d   :  { %4161 = vmatpush.bf16.msra.mxu1 %v5096_v51  ;;  %v7181_v51 = vld [vmem:[%s11471_s1 + $0x2a4] sm:$0xf]  ;;  %v5008_v59 = vor.u32 %v7165_v61, %v5005_v50  ;;  %v5053_v50 = vld [vmem:[%s11471_s1 + $0x288] sm:$0xf0]  ;;  %v7255_v57 = vld [vmem:[%s11471_s1 + $0x4f4] sm:$0xf] }
 0x14e   :  { %4174 = vmatpush.bf16.msra.mxu2 %v5160_v18  ;;  %v5208_v18 = vor.u32 %v7215_v39, %v5205_v26  ;;  %v5072_v63 = vor.u32 %v7181_v51, %v5069_v54  ;;  %v7161_v26 = vld [vmem:[%s11471_s1 + $0x204] sm:$0xf]  ;;  %v5117_v52 = vld [vmem:[%s11471_s1 + $0x308] sm:$0xf0]  ;;  %v7271_v60 = vld [vmem:[%s11471_s1 + $0x574] sm:$0xf] }
 0x14f   :  { %4187 = vmatpush.bf16.msra.mxu3 %v5224_v20  ;;  %v5133_v20 = vld [vmem:[%s11471_s1 + $0x328] sm:$0xf0]  ;;  %v7177_v61 = vld [vmem:[%s11471_s1 + $0x284] sm:$0xf] }
 0x150   :  { %4149 = vmatpush.bf16.msra.mxu0 %v5024_v62  ;;  %v9969_v62 = vadd.f32 %v3934_v56, %v3922_v22  ;;  %v7193_v51 = vld [vmem:[%s11471_s1 + $0x304] sm:$0xf]  ;;  %v7239_v22 = vld [vmem:[%s11471_s1 + $0x474] sm:$0xf]  ;;  %v5301_v56 = vld [vmem:[%s11471_s1 + $0x478] sm:$0xf0] }
 0x151   :  { %4162 = vmatpush.bf16.msra.mxu1 %v5088_v1  ;;  %v5136_v1 = vor.u32 %v7197_v19, %v5133_v20  ;;  %v7209_v54 = vld [vmem:[%s11471_s1 + $0x384] sm:$0xf]  ;;  %v5181_v19 = vld [vmem:[%s11471_s1 + $0x388] sm:$0xf0]  ;;  %v3923_v20 = vpop.f32.mrf.mxu2  ;;  %v3936_v58 = vpop.f32.mrf.mxu3 }
 0x152   :  { %4175 = vmatpush.bf16.msra.mxu2 %v5152_v2  ;;  %v7163_v2 = vld [vmem:[%s11471_s1 + $0x214] sm:$0xf]  ;;  %v5413_v58 = vld [vmem:[%s11471_s1 + $0x558] sm:$0xf0] }
 0x153   :  { %4188 = vmatpush.bf16.msra.mxu3 %v5216_v27  ;;  %v5061_v27 = vld [vmem:[%s11471_s1 + $0x298] sm:$0xf0]  ;;  %v5000_v39 = vor.u32 %v7163_v2, %v4997_v3  ;;  %v5120_v2 = vor.u32 %v7193_v51, %v5117_v52  ;;  %v7287_v3 = vld [vmem:[%s11471_s1 + $0x5f4] sm:$0xf] }
 0x154   :  { %4150 = vmatpush.bf16.msra.mxu0 %v5016_v40  ;;  %v4989_v40 = vld [vmem:[%s11471_s1 + $0x208] sm:$0xf0]  ;;  %v7251_v20 = vld [vmem:[%s11471_s1 + $0x4d4] sm:$0xf] }
 0x155   :  { %4163 = vmatpush.bf16.msra.mxu1 %v5080_v47  ;;  %v5064_v47 = vor.u32 %v7179_v8, %v5061_v27  ;;  %v4992_v9 = vor.u32 %v7161_v26, %v4989_v40  ;;  %v5493_v8 = vld [vmem:[%s11471_s1 + $0x5f8] sm:$0xf0]  ;;  %v5304_v27 = vor.u32 %v7239_v22, %v5301_v56  ;;  %v5357_v40 = vld [vmem:[%s11471_s1 + $0x4e8] sm:$0xf0] }
 0x156   :  { %4176 = vmatpush.bf16.msra.mxu2 %v5144_v48  ;;  %v5128_v48 = vor.u32 %v7195_v15, %v5125_v17  ;;  %v5496_v26 = vor.u32 %v7287_v3, %v5493_v8  ;;  %v5349_v56 = vld [vmem:[%s11471_s1 + $0x4d8] sm:$0xf0]  ;;  %v7265_v3 = vld [vmem:[%s11471_s1 + $0x544] sm:$0xf]  ;;  %v5405_v8 = vld [vmem:[%s11471_s1 + $0x548] sm:$0xf0] }
 0x157   :  { %4189 = vmatpush.bf16.msra.mxu3 %v5208_v18  ;;  %v5192_v18 = vor.u32 %v7211_v21, %v5189_v32  ;;  %v7237_v21 = vld [vmem:[%s11471_s1 + $0x464] sm:$0xf]  ;;  %v5293_v32 = vld [vmem:[%s11471_s1 + $0x468] sm:$0xf0] }
 0x158   :  { %4151 = vmatpush.bf16.msra.mxu0 %v5008_v59  ;;  %v5365_v59 = vld [vmem:[%s11471_s1 + $0x4f8] sm:$0xf0]  ;;  %v5296_v51 = vor.u32 %v7237_v21, %v5293_v32 }
 0x159   :  { %4164 = vmatpush.bf16.msra.mxu1 %v5072_v63  ;;  %v5429_v63 = vld [vmem:[%s11471_s1 + $0x578] sm:$0xf0]  ;;  %v5368_v15 = vor.u32 %v7255_v57, %v5365_v59  ;;  %v7267_v57 = vld [vmem:[%s11471_s1 + $0x554] sm:$0xf] }
 0x15a   :  { %4177 = vmatpush.bf16.msra.mxu2 %v5136_v1  ;;  %v5056_v1 = vor.u32 %v7177_v61, %v5053_v50  ;;  %v5432_v17 = vor.u32 %v7271_v60, %v5429_v63  ;;  %v7285_v61 = vld [vmem:[%s11471_s1 + $0x5e4] sm:$0xf]  ;;  %v5485_v50 = vld [vmem:[%s11471_s1 + $0x5e8] sm:$0xf0]  ;;  %v5352_v60 = vor.u32 %v7251_v20, %v5349_v56  ;;  %v5416_v63 = vor.u32 %v7267_v57, %v5413_v58 }
 0x15b   :  { %4190 = vmatpush.bf16.msra.mxu3 %v5200_v55  ;;  %v5184_v55 = vor.u32 %v7209_v54, %v5181_v19  ;;  %v7235_v54 = vld [vmem:[%s11471_s1 + $0x454] sm:$0xf]  ;;  %v5285_v19 = vld [vmem:[%s11471_s1 + $0x458] sm:$0xf0]  ;;  %v5488_v22 = vor.u32 %v7285_v61, %v5485_v50  ;;  %v7229_v56 = vld [vmem:[%s11471_s1 + $0x424] sm:$0xf] }
 0x15c   :  { %4152 = vmatpush.bf16.msra.mxu0 %v5000_v39  ;;  %v7253_v39 = vld [vmem:[%s11471_s1 + $0x4e4] sm:$0xf]  ;;  %v5288_v59 = vor.u32 %v7235_v54, %v5285_v19  ;;  %v5333_v50 = vld [vmem:[%s11471_s1 + $0x4b8] sm:$0xf0]  ;;  %v5261_v57 = vld [vmem:[%s11471_s1 + $0x428] sm:$0xf0] }
 0x15d   :  { %4165 = vmatpush.bf16.msra.mxu1 %v5064_v47  ;;  %v7269_v47 = vld [vmem:[%s11471_s1 + $0x564] sm:$0xf]  ;;  %v5461_v54 = vld [vmem:[%s11471_s1 + $0x5b8] sm:$0xf0] }
 0x15e   :  { %4178 = vmatpush.bf16.msra.mxu2 %v5128_v48  ;;  %v5421_v48 = vld [vmem:[%s11471_s1 + $0x568] sm:$0xf0]  ;;  %v7245_v58 = vld [vmem:[%s11471_s1 + $0x4a4] sm:$0xf] }
 0x15f   :  { %4191 = vmatpush.bf16.msra.mxu3 %v5192_v18  ;;  %v5360_v18 = vor.u32 %v7253_v39, %v5357_v40  ;;  %v5424_v52 = vor.u32 %v7269_v47, %v5421_v48  ;;  %v7231_v40 = vld [vmem:[%s11471_s1 + $0x434] sm:$0xf]  ;;  %v5269_v47 = vld [vmem:[%s11471_s1 + $0x438] sm:$0xf0] }
 0x160   :  { %4153 = vmatpush.bf16.msra.mxu0 %v4992_v9  ;;  %v7283_v9 = vld [vmem:[%s11471_s1 + $0x5d4] sm:$0xf]  ;;  %v5272_v19 = vor.u32 %v7231_v40, %v5269_v47  ;;  %v5381_v47 = vld [vmem:[%s11471_s1 + $0x518] sm:$0xf0] }
 0x161   :  { %4166 = vmatpush.bf16.msra.mxu1 %v5056_v1  ;;  %v7233_v1 = vld [vmem:[%s11471_s1 + $0x444] sm:$0xf]  ;;  %v3960_v32 = vpop.f32.mrf.mxu1  ;;  %v7247_v48 = vld [vmem:[%s11471_s1 + $0x4b4] sm:$0xf] }
 0x162   :  { %4179 = vmatpush.bf16.msra.mxu2 %v5120_v2  ;;  %v5277_v2 = vld [vmem:[%s11471_s1 + $0x448] sm:$0xf0]  ;;  %v5336_v20 = vor.u32 %v7247_v48, %v5333_v50  ;;  %v7259_v40 = vld [vmem:[%s11471_s1 + $0x514] sm:$0xf]  ;;  %v7225_v50 = vld [vmem:[%s11471_s1 + $0x404] sm:$0xf] }
 0x163   :  { %4192 = vmatpush.bf16.msra.mxu3 %v5184_v55  ;;  %4154 = vmatmul.bf16.vlgmr.msra.gmra.mxu0 %v8179_v41  ;;  %v7249_v41 = vld [vmem:[%s11471_s1 + $0x4c4] sm:$0xf]  ;;  %v3947_v55 = vpop.f32.mrf.mxu0  ;;  %v5280_v21 = vor.u32 %v7233_v1, %v5277_v2  ;;  %v7275_v48 = vld [vmem:[%s11471_s1 + $0x594] sm:$0xf] }
 0x164   :  { %4198 = vmatpush.bf16.msrb.mxu0 %v5304_v27  ;;  %4167 = vmatmul.bf16.vlgmr.msra.gmra.mxu1 %v8183_v44  ;;  %v5341_v44 = vld [vmem:[%s11471_s1 + $0x4c8] sm:$0xf0]  ;;  %v7281_v27 = vld [vmem:[%s11471_s1 + $0x5c4] sm:$0xf] }
 0x165   :  { %4211 = vmatpush.bf16.msrb.mxu1 %v5368_v15  ;;  %4180 = vmatmul.bf16.vlgmr.msra.gmra.mxu2 %v8171_v38  ;;  %v5477_v38 = vld [vmem:[%s11471_s1 + $0x5d8] sm:$0xf0]  ;;  %v5469_v15 = vld [vmem:[%s11471_s1 + $0x5c8] sm:$0xf0]  ;;  %v5344_v39 = vor.u32 %v7249_v41, %v5341_v44  ;;  %v7277_v41 = vld [vmem:[%s11471_s1 + $0x5a4] sm:$0xf] }
 0x166   :  { %4224 = vmatpush.bf16.msrb.mxu2 %v5432_v17  ;;  %4193 = vmatmul.bf16.vlgmr.msra.gmra.mxu3 %v8181_v42  ;;  %v5480_v42 = vor.u32 %v7283_v9, %v5477_v38  ;;  %v3948_v17 = vadd.f32 %v3947_v55, %v9969_v62  ;;  %v5472_v62 = vor.u32 %v7281_v27, %v5469_v15 }
 0x167   :  { %4237 = vmatpush.bf16.msrb.mxu3 %v5496_v26  ;;  %v5408_v26 = vor.u32 %v7265_v3, %v5405_v8  ;;  %v5264_v3 = vor.u32 %v7229_v56, %v5261_v57  ;;  %v5373_v56 = vld [vmem:[%s11471_s1 + $0x508] sm:$0xf0]  ;;  %v7273_v57 = vld [vmem:[%s11471_s1 + $0x584] sm:$0xf] }
 0x168   :  { %4199 = vmatpush.bf16.msrb.mxu0 %v5296_v51  ;;  %v3961_v61 = vadd.f32 %v3960_v32, %v3948_v17  ;;  %v7263_v51 = vld [vmem:[%s11471_s1 + $0x534] sm:$0xf]  ;;  %v3973_v38 = vpop.f32.mrf.mxu2 }
 0x169   :  { %4212 = vmatpush.bf16.msrb.mxu1 %v5360_v18  ;;  %v5397_v18 = vld [vmem:[%s11471_s1 + $0x538] sm:$0xf0]  ;;  %v3986_v2 = vpop.f32.mrf.mxu3  ;;  %v3962_v8 = vpop.f32.mrf.mxu1  ;;  %v7227_v17 = vld [vmem:[%s11471_s1 + $0x414] sm:$0xf] }
 0x16a   :  { %4225 = vmatpush.bf16.msrb.mxu2 %v5424_v52  ;;  %v7279_v52 = vld [vmem:[%s11471_s1 + $0x5b4] sm:$0xf]  ;;  %v3974_v1 = vadd.f32 %v3973_v38, %v3961_v61 }
 0x16b   :  { %4238 = vmatpush.bf16.msrb.mxu3 %v5488_v22  ;;  %v5400_v22 = vor.u32 %v7263_v51, %v5397_v18  ;;  %v5464_v9 = vor.u32 %v7279_v52, %v5461_v54  ;;  %v3949_v44 = vpop.f32.mrf.mxu0  ;;  %v7243_v32 = vld [vmem:[%s11471_s1 + $0x494] sm:$0xf]  ;;  %v5245_v51 = vld [vmem:[%s11471_s1 + $0x408] sm:$0xf0]  ;;  %v5384_v52 = vor.u32 %v7259_v40, %v5381_v47  ;;  %v7241_v54 = vld [vmem:[%s11471_s1 + $0x484] sm:$0xf] }
 0x16c   :  { %4200 = vmatpush.bf16.msrb.mxu0 %v5288_v59  ;;  %v5325_v59 = vld [vmem:[%s11471_s1 + $0x4a8] sm:$0xf0]  ;;  %v10168_v55 = vadd.f32 %v3986_v2, %v3974_v1  ;;  %v7303_v38 = vld [vmem:[%s11471_s1 + $0x674] sm:$0xf]  ;;  %v5248_v1 = vor.u32 %v7225_v50, %v5245_v51  ;;  %v5621_v2 = vld [vmem:[%s11471_s1 + $0x6f8] sm:$0xf0] }
 0x16d   :  { %4213 = vmatpush.bf16.msrb.mxu1 %v5352_v60  ;;  %v7261_v60 = vld [vmem:[%s11471_s1 + $0x524] sm:$0xf]  ;;  %v5328_v27 = vor.u32 %v7245_v58, %v5325_v59  ;;  %v5437_v58 = vld [vmem:[%s11471_s1 + $0x588] sm:$0xf0]  ;;  %v5557_v59 = vld [vmem:[%s11471_s1 + $0x678] sm:$0xf0] }
 0x16e   :  { %4226 = vmatpush.bf16.msrb.mxu2 %v5416_v63  ;;  %v5389_v63 = vld [vmem:[%s11471_s1 + $0x528] sm:$0xf0]  ;;  %v7351_v8 = vld [vmem:[%s11471_s1 + $0x7f4] sm:$0xf]  ;;  %v7317_v40 = vld [vmem:[%s11471_s1 + $0x6e4] sm:$0xf] }
 0x16f   :  { %4239 = vmatpush.bf16.msrb.mxu3 %v5480_v42  ;;  %v5453_v42 = vld [vmem:[%s11471_s1 + $0x5a8] sm:$0xf0]  ;;  %v5392_v15 = vor.u32 %v7261_v60, %v5389_v63  ;;  %v7319_v60 = vld [vmem:[%s11471_s1 + $0x6f4] sm:$0xf]  ;;  %v7349_v50 = vld [vmem:[%s11471_s1 + $0x7e4] sm:$0xf] }
 0x170   :  { %4201 = vmatpush.bf16.msrb.mxu0 %v5280_v21  ;;  %v5253_v21 = vld [vmem:[%s11471_s1 + $0x418] sm:$0xf0]  ;;  %v5741_v51 = vld [vmem:[%s11471_s1 + $0x7e8] sm:$0xf0] }
 0x171   :  { %4214 = vmatpush.bf16.msrb.mxu1 %v5344_v39  ;;  %v5456_v39 = vor.u32 %v7277_v41, %v5453_v42  ;;  %v5256_v61 = vor.u32 %v7227_v17, %v5253_v21  ;;  %v3988_v63 = vpop.f32.mrf.mxu3  ;;  %v7335_v41 = vld [vmem:[%s11471_s1 + $0x774] sm:$0xf]  ;;  %v5685_v42 = vld [vmem:[%s11471_s1 + $0x778] sm:$0xf0]  ;;  %v5560_v17 = vor.u32 %v7303_v38, %v5557_v59  ;;  %v5624_v21 = vor.u32 %v7319_v60, %v5621_v2  ;;  %v5597_v2 = vld [vmem:[%s11471_s1 + $0x6c8] sm:$0xf0] }
 0x172   :  { %4227 = vmatpush.bf16.msrb.mxu2 %v5408_v26  ;;  %v5317_v26 = vld [vmem:[%s11471_s1 + $0x498] sm:$0xf0] }
 0x173   :  { %4240 = vmatpush.bf16.msrb.mxu3 %v5472_v62  ;;  %v5445_v62 = vld [vmem:[%s11471_s1 + $0x598] sm:$0xf0]  ;;  %v5320_v18 = vor.u32 %v7243_v32, %v5317_v26  ;;  %v5688_v32 = vor.u32 %v7335_v41, %v5685_v42  ;;  %v5549_v26 = vld [vmem:[%s11471_s1 + $0x668] sm:$0xf0]  ;;  %v7329_v41 = vld [vmem:[%s11471_s1 + $0x744] sm:$0xf] }
 0x174   :  { %4202 = vmatpush.bf16.msrb.mxu0 %v5272_v19  ;;  %v5309_v19 = vld [vmem:[%s11471_s1 + $0x488] sm:$0xf0]  ;;  %v5733_v38 = vld [vmem:[%s11471_s1 + $0x7d8] sm:$0xf0] }
 0x175   :  { %4215 = vmatpush.bf16.msrb.mxu1 %v5336_v20  ;;  %v7257_v20 = vld [vmem:[%s11471_s1 + $0x504] sm:$0xf]  ;;  %v5312_v44 = vor.u32 %v7241_v54, %v5309_v19  ;;  %v7299_v19 = vld [vmem:[%s11471_s1 + $0x654] sm:$0xf]  ;;  %v5661_v42 = vld [vmem:[%s11471_s1 + $0x748] sm:$0xf0] }
 0x176   :  { %4228 = vmatpush.bf16.msrb.mxu2 %v5400_v22  ;;  %v5448_v22 = vor.u32 %v7275_v48, %v5445_v62  ;;  %v5613_v48 = vld [vmem:[%s11471_s1 + $0x6e8] sm:$0xf0]  ;;  %v7333_v62 = vld [vmem:[%s11471_s1 + $0x764] sm:$0xf] }
 0x177   :  { %4241 = vmatpush.bf16.msrb.mxu3 %v5464_v9  ;;  %v3975_v9 = vpop.f32.mrf.mxu2 }
 0x178   :  { %4203 = vmatpush.bf16.msrb.mxu0 %v5264_v3  ;;  %v5376_v3 = vor.u32 %v7257_v20, %v5373_v56  ;;  %v5541_v20 = vld [vmem:[%s11471_s1 + $0x658] sm:$0xf0]  ;;  %v5744_v56 = vor.u32 %v7349_v50, %v5741_v51  ;;  %v7343_v50 = vld [vmem:[%s11471_s1 + $0x7b4] sm:$0xf] }
 0x179   :  { %4216 = vmatpush.bf16.msrb.mxu1 %v5328_v27  ;;  %v5749_v27 = vld [vmem:[%s11471_s1 + $0x7f8] sm:$0xf0]  ;;  %v5544_v59 = vor.u32 %v7299_v19, %v5541_v20  ;;  %v7293_v19 = vld [vmem:[%s11471_s1 + $0x624] sm:$0xf]  ;;  %v5517_v20 = vld [vmem:[%s11471_s1 + $0x628] sm:$0xf0] }
 0x17a   :  { %4229 = vmatpush.bf16.msrb.mxu2 %v5392_v15  ;;  %v5440_v15 = vor.u32 %v7273_v57, %v5437_v58  ;;  %v5752_v47 = vor.u32 %v7351_v8, %v5749_v27  ;;  %v5605_v57 = vld [vmem:[%s11471_s1 + $0x6d8] sm:$0xf0]  ;;  %v7331_v58 = vld [vmem:[%s11471_s1 + $0x754] sm:$0xf]  ;;  %v5725_v8 = vld [vmem:[%s11471_s1 + $0x7c8] sm:$0xf0] }
 0x17b   :  { %4242 = vmatpush.bf16.msrb.mxu3 %v5456_v39  ;;  %v7301_v39 = vld [vmem:[%s11471_s1 + $0x664] sm:$0xf]  ;;  %v5669_v9 = vld [vmem:[%s11471_s1 + $0x758] sm:$0xf0] }
 0x17c   :  { %4204 = vmatpush.bf16.msrb.mxu0 %v5256_v61  ;;  %v5677_v61 = vld [vmem:[%s11471_s1 + $0x768] sm:$0xf0]  ;;  %v5672_v63 = vor.u32 %v7331_v58, %v5669_v9  ;;  %v5717_v51 = vld [vmem:[%s11471_s1 + $0x7b8] sm:$0xf0]  ;;  %v7325_v9 = vld [vmem:[%s11471_s1 + $0x724] sm:$0xf] }
 0x17d   :  { %4217 = vmatpush.bf16.msrb.mxu1 %v5320_v18  ;;  %v5552_v18 = vor.u32 %v7301_v39, %v5549_v26  ;;  %v5680_v54 = vor.u32 %v7333_v62, %v5677_v61  ;;  %v7295_v39 = vld [vmem:[%s11471_s1 + $0x634] sm:$0xf]  ;;  %v5525_v26 = vld [vmem:[%s11471_s1 + $0x638] sm:$0xf0]  ;;  %v5581_v58 = vld [vmem:[%s11471_s1 + $0x6a8] sm:$0xf0] }
 0x17e   :  { %4230 = vmatpush.bf16.msrb.mxu2 %v5384_v52  ;;  %v5616_v52 = vor.u32 %v7317_v40, %v5613_v48  ;;  %v7311_v40 = vld [vmem:[%s11471_s1 + $0x6b4] sm:$0xf]  ;;  %v5589_v48 = vld [vmem:[%s11471_s1 + $0x6b8] sm:$0xf0] }
 0x17f   :  { %4243 = vmatpush.bf16.msrb.mxu3 %v5448_v22  ;;  %v7315_v22 = vld [vmem:[%s11471_s1 + $0x6d4] sm:$0xf]  ;;  %v5653_v61 = vld [vmem:[%s11471_s1 + $0x738] sm:$0xf0] }
 0x180   :  { %4205 = vmatpush.bf16.msrb.mxu0 %v5248_v1  ;;  %v5608_v60 = vor.u32 %v7315_v22, %v5605_v57  ;;  %v7313_v1 = vld [vmem:[%s11471_s1 + $0x6c4] sm:$0xf]  ;;  %v7327_v62 = vld [vmem:[%s11471_s1 + $0x734] sm:$0xf] }
 0x181   :  { %4218 = vmatpush.bf16.msrb.mxu1 %v5312_v44  ;;  %v3999_v44 = vpop.f32.mrf.mxu0  ;;  %v7309_v22 = vld [vmem:[%s11471_s1 + $0x6a4] sm:$0xf] }
 0x182   :  { %4231 = vmatpush.bf16.msrb.mxu2 %v5376_v3  ;;  %v7345_v3 = vld [vmem:[%s11471_s1 + $0x7c4] sm:$0xf]  ;;  %v4000_v27 = vadd.f32 %v3999_v44, %v10168_v55  ;;  %v5509_v44 = vld [vmem:[%s11471_s1 + $0x618] sm:$0xf0] }
 0x183   :  { %4244 = vmatpush.bf16.msrb.mxu3 %v5440_v15  ;;  %4206 = vmatmul.bf16.vlgmr.msrb.gmra.mxu0 %v8372_v25  ;;  %v7347_v25 = vld [vmem:[%s11471_s1 + $0x7d4] sm:$0xf]  ;;  %v5728_v55 = vor.u32 %v7345_v3, %v5725_v8 }
 0x184   :  { %4250 = vmatpush.bf16.msra.mxu0 %v5560_v17  ;;  %4219 = vmatmul.bf16.vlgmr.msrb.gmra.mxu1 %v8385_v30  ;;  %v5533_v30 = vld [vmem:[%s11471_s1 + $0x648] sm:$0xf0]  ;;  %v4012_v17 = vpop.f32.mrf.mxu1  ;;  %v7307_v3 = vld [vmem:[%s11471_s1 + $0x694] sm:$0xf] }
 0x185   :  { %4263 = vmatpush.bf16.msra.mxu1 %v5624_v21  ;;  %4232 = vmatmul.bf16.vlgmr.msrb.gmra.mxu2 %v8383_v29  ;;  %v7297_v29 = vld [vmem:[%s11471_s1 + $0x644] sm:$0xf]  ;;  %v5600_v21 = vor.u32 %v7313_v1, %v5597_v2  ;;  %v5584_v2 = vor.u32 %v7309_v22, %v5581_v58  ;;  %v7383_v22 = vld [vmem:[%s11471_s1 + $0x8f4] sm:$0xf]  ;;  %v5877_v58 = vld [vmem:[%s11471_s1 + $0x8f8] sm:$0xf0] }
 0x186   :  { %4276 = vmatpush.bf16.msra.mxu2 %v5688_v32  ;;  %4245 = vmatmul.bf16.vlgmr.msrb.gmra.mxu3 %v8393_v33  ;;  %v5736_v33 = vor.u32 %v7347_v25, %v5733_v38  ;;  %v5536_v15 = vor.u32 %v7297_v29, %v5533_v30  ;;  %v5664_v32 = vor.u32 %v7329_v41, %v5661_v42  ;;  %v5645_v25 = vld [vmem:[%s11471_s1 + $0x728] sm:$0xf0]  ;;  %v7291_v42 = vld [vmem:[%s11471_s1 + $0x614] sm:$0xf] }
 0x187   :  { %4289 = vmatpush.bf16.msra.mxu3 %v5752_v47  ;;  %v4013_v47 = vadd.f32 %v4012_v17, %v4000_v27  ;;  %v5520_v30 = vor.u32 %v7293_v19, %v5517_v20  ;;  %v5648_v41 = vor.u32 %v7325_v9, %v5645_v25  ;;  %v5573_v27 = vld [vmem:[%s11471_s1 + $0x698] sm:$0xf0]  ;;  %v7367_v19 = vld [vmem:[%s11471_s1 + $0x874] sm:$0xf] }
 0x188   :  { %4251 = vmatpush.bf16.msra.mxu0 %v5552_v18  ;;  %v5528_v18 = vor.u32 %v7295_v39, %v5525_v26  ;;  %v4025_v57 = vpop.f32.mrf.mxu2  ;;  %v5637_v17 = vld [vmem:[%s11471_s1 + $0x718] sm:$0xf0]  ;;  %v5512_v39 = vor.u32 %v7291_v42, %v5509_v44  ;;  %v7289_v26 = vld [vmem:[%s11471_s1 + $0x604] sm:$0xf]  ;;  %v7399_v9 = vld [vmem:[%s11471_s1 + $0x974] sm:$0xf] }
 0x189   :  { %4264 = vmatpush.bf16.msra.mxu1 %v5616_v52  ;;  %v5592_v52 = vor.u32 %v7311_v40, %v5589_v48  ;;  %v4026_v38 = vadd.f32 %v4025_v57, %v4013_v47  ;;  %v4001_v29 = vpop.f32.mrf.mxu0  ;;  %v5501_v40 = vld [vmem:[%s11471_s1 + $0x608] sm:$0xf0]  ;;  %v7305_v48 = vld [vmem:[%s11471_s1 + $0x684] sm:$0xf]  ;;  %v5813_v20 = vld [vmem:[%s11471_s1 + $0x878] sm:$0xf0] }
 0x18a   :  { %4277 = vmatpush.bf16.msra.mxu2 %v5680_v54  ;;  %v5656_v54 = vor.u32 %v7327_v62, %v5653_v61  ;;  %v5565_v62 = vld [vmem:[%s11471_s1 + $0x688] sm:$0xf0]  ;;  %v7321_v61 = vld [vmem:[%s11471_s1 + $0x704] sm:$0xf]  ;;  %v5504_v57 = vor.u32 %v7289_v26, %v5501_v40  ;;  %v5941_v25 = vld [vmem:[%s11471_s1 + $0x978] sm:$0xf0] }
 0x18b   :  { %4290 = vmatpush.bf16.msra.mxu3 %v5744_v56  ;;  %v5720_v56 = vor.u32 %v7343_v50, %v5717_v51  ;;  %v5629_v51 = vld [vmem:[%s11471_s1 + $0x708] sm:$0xf0]  ;;  %v7381_v44 = vld [vmem:[%s11471_s1 + $0x8e4] sm:$0xf]  ;;  %v7363_v40 = vld [vmem:[%s11471_s1 + $0x854] sm:$0xf] }
 0x18c   :  { %4252 = vmatpush.bf16.msra.mxu0 %v5544_v59  ;;  %v4038_v59 = vpop.f32.mrf.mxu3  ;;  %v4014_v1 = vpop.f32.mrf.mxu1  ;;  %v5805_v42 = vld [vmem:[%s11471_s1 + $0x868] sm:$0xf0] }
 0x18d   :  { %4265 = vmatpush.bf16.msra.mxu1 %v5608_v60  ;;  %v7341_v60 = vld [vmem:[%s11471_s1 + $0x7a4] sm:$0xf]  ;;  %v5880_v1 = vor.u32 %v7383_v22, %v5877_v58 }
 0x18e   :  { %4278 = vmatpush.bf16.msra.mxu2 %v5672_v63  ;;  %v5709_v63 = vld [vmem:[%s11471_s1 + $0x7a8] sm:$0xf0]  ;;  %v7393_v22 = vld [vmem:[%s11471_s1 + $0x944] sm:$0xf] }
 0x18f   :  { %4291 = vmatpush.bf16.msra.mxu3 %v5736_v33  ;;  %v10367_v33 = vadd.f32 %v4038_v59, %v4026_v38  ;;  %v5712_v8 = vor.u32 %v7341_v60, %v5709_v63  ;;  %v5568_v38 = vor.u32 %v7305_v48, %v5565_v62  ;;  %v5632_v59 = vor.u32 %v7321_v61, %v5629_v51  ;;  %v7415_v60 = vld [vmem:[%s11471_s1 + $0x9f4] sm:$0xf]  ;;  %v6005_v63 = vld [vmem:[%s11471_s1 + $0x9f8] sm:$0xf0]  ;;  %v7409_v58 = vld [vmem:[%s11471_s1 + $0x9c4] sm:$0xf] }
 0x190   :  { %4253 = vmatpush.bf16.msra.mxu0 %v5536_v15  ;;  %v7323_v15 = vld [vmem:[%s11471_s1 + $0x714] sm:$0xf]  ;;  %v5861_v62 = vld [vmem:[%s11471_s1 + $0x8d8] sm:$0xf0] }
 0x191   :  { %4266 = vmatpush.bf16.msra.mxu1 %v5600_v21  ;;  %v7339_v21 = vld [vmem:[%s11471_s1 + $0x794] sm:$0xf]  ;;  %v5640_v47 = vor.u32 %v7323_v15, %v5637_v17  ;;  %v5933_v15 = vld [vmem:[%s11471_s1 + $0x968] sm:$0xf0]  ;;  %v7413_v17 = vld [vmem:[%s11471_s1 + $0x9e4] sm:$0xf] }
 0x192   :  { %4279 = vmatpush.bf16.msra.mxu2 %v5664_v32  ;;  %v5701_v32 = vld [vmem:[%s11471_s1 + $0x798] sm:$0xf0]  ;;  %v7395_v61 = vld [vmem:[%s11471_s1 + $0x954] sm:$0xf] }
 0x193   :  { %4292 = vmatpush.bf16.msra.mxu3 %v5728_v55  ;;  %v5576_v55 = vor.u32 %v7307_v3, %v5573_v27  ;;  %v5704_v50 = vor.u32 %v7339_v21, %v5701_v32  ;;  %v6008_v3 = vor.u32 %v7415_v60, %v6005_v63  ;;  %v7397_v27 = vld [vmem:[%s11471_s1 + $0x964] sm:$0xf]  ;;  %v5997_v21 = vld [vmem:[%s11471_s1 + $0x9e8] sm:$0xf0]  ;;  %v5989_v51 = vld [vmem:[%s11471_s1 + $0x9d8] sm:$0xf0] }
 0x194   :  { %4254 = vmatpush.bf16.msra.mxu0 %v5528_v18  ;;  %v7337_v18 = vld [vmem:[%s11471_s1 + $0x784] sm:$0xf]  ;;  %v5936_v26 = vor.u32 %v7397_v27, %v5933_v15  ;;  %v6000_v48 = vor.u32 %v7413_v17, %v5997_v21 }
 0x195   :  { %4267 = vmatpush.bf16.msra.mxu1 %v5592_v52  ;;  %v5693_v52 = vld [vmem:[%s11471_s1 + $0x788] sm:$0xf0]  ;;  %v7357_v21 = vld [vmem:[%s11471_s1 + $0x824] sm:$0xf] }
 0x196   :  { %4280 = vmatpush.bf16.msra.mxu2 %v5656_v54  ;;  %v4027_v54 = vpop.f32.mrf.mxu2  ;;  %v5696_v29 = vor.u32 %v7337_v18, %v5693_v52 }
 0x197   :  { %4293 = vmatpush.bf16.msra.mxu3 %v5720_v56  ;;  %v4040_v56 = vpop.f32.mrf.mxu3 }
 0x198   :  { %4255 = vmatpush.bf16.msra.mxu0 %v5520_v30  ;;  %v5816_v30 = vor.u32 %v7367_v19, %v5813_v20  ;;  %v7377_v19 = vld [vmem:[%s11471_s1 + $0x8c4] sm:$0xf]  ;;  %v5853_v20 = vld [vmem:[%s11471_s1 + $0x8c8] sm:$0xf0] }
 0x199   :  { %4268 = vmatpush.bf16.msra.mxu1 %v5584_v2  ;;  %v5944_v2 = vor.u32 %v7399_v9, %v5941_v25  ;;  %v5917_v56 = vld [vmem:[%s11471_s1 + $0x948] sm:$0xf0]  ;;  %v5856_v60 = vor.u32 %v7377_v19, %v5853_v20  ;;  %v7355_v19 = vld [vmem:[%s11471_s1 + $0x814] sm:$0xf] }
 0x19a   :  { %4281 = vmatpush.bf16.msra.mxu2 %v5648_v41  ;;  %v7365_v41 = vld [vmem:[%s11471_s1 + $0x864] sm:$0xf]  ;;  %v5981_v9 = vld [vmem:[%s11471_s1 + $0x9c8] sm:$0xf0]  ;;  %v5920_v63 = vor.u32 %v7393_v22, %v5917_v56  ;;  %v7371_v20 = vld [vmem:[%s11471_s1 + $0x894] sm:$0xf] }
 0x19b   :  { %4294 = vmatpush.bf16.msra.mxu3 %v5712_v8  ;;  %v5869_v8 = vld [vmem:[%s11471_s1 + $0x8e8] sm:$0xf0]  ;;  %v5808_v32 = vor.u32 %v7365_v41, %v5805_v42  ;;  %v5845_v41 = vld [vmem:[%s11471_s1 + $0x8b8] sm:$0xf0]  ;;  %v7391_v42 = vld [vmem:[%s11471_s1 + $0x934] sm:$0xf] }
 0x19c   :  { %4256 = vmatpush.bf16.msra.mxu0 %v5512_v39  ;;  %v5872_v39 = vor.u32 %v7381_v44, %v5869_v8  ;;  %v5909_v44 = vld [vmem:[%s11471_s1 + $0x938] sm:$0xf0] }
 0x19d   :  { %4269 = vmatpush.bf16.msra.mxu1 %v5576_v55  ;;  %v5797_v55 = vld [vmem:[%s11471_s1 + $0x858] sm:$0xf0]  ;;  %v5912_v17 = vor.u32 %v7391_v42, %v5909_v44  ;;  %v7401_v42 = vld [vmem:[%s11471_s1 + $0x984] sm:$0xf]  ;;  %v5949_v44 = vld [vmem:[%s11471_s1 + $0x988] sm:$0xf0] }
 0x19e   :  { %4282 = vmatpush.bf16.msra.mxu2 %v5640_v47  ;;  %v7379_v47 = vld [vmem:[%s11471_s1 + $0x8d4] sm:$0xf]  ;;  %v5800_v18 = vor.u32 %v7363_v40, %v5797_v55  ;;  %v5973_v8 = vld [vmem:[%s11471_s1 + $0x9b8] sm:$0xf0]  ;;  %v5837_v55 = vld [vmem:[%s11471_s1 + $0x8a8] sm:$0xf0] }
 0x19f   :  { %4295 = vmatpush.bf16.msra.mxu3 %v5704_v50  ;;  %v5925_v50 = vld [vmem:[%s11471_s1 + $0x958] sm:$0xf0]  ;;  %v5864_v52 = vor.u32 %v7379_v47, %v5861_v62  ;;  %v7389_v47 = vld [vmem:[%s11471_s1 + $0x924] sm:$0xf] }
 0x1a0   :  { %4257 = vmatpush.bf16.msra.mxu0 %v5504_v57  ;;  %v5928_v54 = vor.u32 %v7395_v61, %v5925_v50  ;;  %v4051_v57 = vpop.f32.mrf.mxu0  ;;  %v7405_v50 = vld [vmem:[%s11471_s1 + $0x9a4] sm:$0xf]  ;;  %v5829_v56 = vld [vmem:[%s11471_s1 + $0x898] sm:$0xf0] }
 0x1a1   :  { %4270 = vmatpush.bf16.msra.mxu1 %v5568_v38  ;;  %v4052_v25 = vadd.f32 %v4051_v57, %v10367_v33  ;;  %v5984_v33 = vor.u32 %v7409_v58, %v5981_v9  ;;  %v7387_v57 = vld [vmem:[%s11471_s1 + $0x914] sm:$0xf]  ;;  %v5893_v58 = vld [vmem:[%s11471_s1 + $0x918] sm:$0xf0] }
 0x1a2   :  { %4283 = vmatpush.bf16.msra.mxu2 %v5632_v59  ;;  %v4064_v59 = vpop.f32.mrf.mxu1  ;;  %v7403_v9 = vld [vmem:[%s11471_s1 + $0x994] sm:$0xf] }
 0x1a3   :  { %4296 = vmatpush.bf16.msra.mxu3 %v5696_v29  ;;  %4258 = vmatmul.bf16.vlgmr.msra.gmra.mxu0 %v8582_v23  ;;  %v7411_v23 = vld [vmem:[%s11471_s1 + $0x9d4] sm:$0xf] }
 0x1a4   :  { %4302 = vmatpush.bf16.msrb.mxu0 %v5816_v30  ;;  %4271 = vmatmul.bf16.vlgmr.msra.gmra.mxu1 %v8595_v31  ;;  %v5789_v31 = vld [vmem:[%s11471_s1 + $0x848] sm:$0xf0]  ;;  %v7359_v29 = vld [vmem:[%s11471_s1 + $0x834] sm:$0xf]  ;;  %v5781_v30 = vld [vmem:[%s11471_s1 + $0x838] sm:$0xf0] }
 0x1a5   :  { %4315 = vmatpush.bf16.msrb.mxu1 %v5880_v1  ;;  %4284 = vmatmul.bf16.vlgmr.msra.gmra.mxu2 %v8593_v28  ;;  %v7361_v28 = vld [vmem:[%s11471_s1 + $0x844] sm:$0xf]  ;;  %v7375_v1 = vld [vmem:[%s11471_s1 + $0x8b4] sm:$0xf]  ;;  %v5784_v27 = vor.u32 %v7359_v29, %v5781_v30  ;;  %v5896_v29 = vor.u32 %v7387_v57, %v5893_v58 }
 0x1a6   :  { %4328 = vmatpush.bf16.msrb.mxu2 %v5944_v2  ;;  %4297 = vmatmul.bf16.vlgmr.msra.gmra.mxu3 %v8603_v35  ;;  %v5992_v35 = vor.u32 %v7411_v23, %v5989_v51  ;;  %v5792_v38 = vor.u32 %v7361_v28, %v5789_v31  ;;  %v4065_v2 = vadd.f32 %v4064_v59, %v4052_v25  ;;  %v5965_v23 = vld [vmem:[%s11471_s1 + $0x9a8] sm:$0xf0]  ;;  %v5957_v25 = vld [vmem:[%s11471_s1 + $0x998] sm:$0xf0]  ;;  %v7353_v59 = vld [vmem:[%s11471_s1 + $0x804] sm:$0xf] }
 0x1a7   :  { %4341 = vmatpush.bf16.msrb.mxu3 %v6008_v3  ;;  %v7407_v3 = vld [vmem:[%s11471_s1 + $0x9b4] sm:$0xf]  ;;  %v5848_v15 = vor.u32 %v7375_v1, %v5845_v41  ;;  %v5968_v22 = vor.u32 %v7405_v50, %v5965_v23  ;;  %v7369_v30 = vld [vmem:[%s11471_s1 + $0x884] sm:$0xf]  ;;  %v5821_v1 = vld [vmem:[%s11471_s1 + $0x888] sm:$0xf0] }
 0x1a8   :  { %4303 = vmatpush.bf16.msrb.mxu0 %v5808_v32  ;;  %v5773_v32 = vld [vmem:[%s11471_s1 + $0x828] sm:$0xf0]  ;;  %v4077_v40 = vpop.f32.mrf.mxu2  ;;  %v4053_v51 = vpop.f32.mrf.mxu0 }
 0x1a9   :  { %4316 = vmatpush.bf16.msrb.mxu1 %v5872_v39  ;;  %v7373_v39 = vld [vmem:[%s11471_s1 + $0x8a4] sm:$0xf]  ;;  %v4078_v62 = vadd.f32 %v4077_v40, %v4065_v2  ;;  %v4090_v61 = vpop.f32.mrf.mxu3  ;;  %v5960_v2 = vor.u32 %v7403_v9, %v5957_v25  ;;  %v5885_v41 = vld [vmem:[%s11471_s1 + $0x908] sm:$0xf0]  ;;  %v5824_v40 = vor.u32 %v7369_v30, %v5821_v1  ;;  %v7427_v9 = vld [vmem:[%s11471_s1 + $0xa54] sm:$0xf] }
 0x1aa   :  { %4329 = vmatpush.bf16.msrb.mxu2 %v5936_v26  ;;  %v5976_v26 = vor.u32 %v7407_v3, %v5973_v8  ;;  %v5840_v28 = vor.u32 %v7373_v39, %v5837_v55  ;;  %v7431_v8 = vld [vmem:[%s11471_s1 + $0xa74] sm:$0xf]  ;;  %v7429_v51 = vld [vmem:[%s11471_s1 + $0xa64] sm:$0xf]  ;;  %v6053_v25 = vld [vmem:[%s11471_s1 + $0xa58] sm:$0xf0] }
 0x1ab   :  { %4342 = vmatpush.bf16.msrb.mxu3 %v6000_v48  ;;  %v5901_v48 = vld [vmem:[%s11471_s1 + $0x928] sm:$0xf0]  ;;  %v7463_v39 = vld [vmem:[%s11471_s1 + $0xb74] sm:$0xf]  ;;  %v6245_v30 = vld [vmem:[%s11471_s1 + $0xbd8] sm:$0xf0]  ;;  %v6056_v1 = vor.u32 %v7427_v9, %v6053_v25 }
 0x1ac   :  { %4304 = vmatpush.bf16.msrb.mxu0 %v5800_v18  ;;  %v5776_v18 = vor.u32 %v7357_v21, %v5773_v32  ;;  %v5904_v31 = vor.u32 %v7389_v47, %v5901_v48  ;;  %v6133_v32 = vld [vmem:[%s11471_s1 + $0xaf8] sm:$0xf0]  ;;  %v7479_v47 = vld [vmem:[%s11471_s1 + $0xbf4] sm:$0xf]  ;;  %v6093_v9 = vld [vmem:[%s11471_s1 + $0xaa8] sm:$0xf0] }
 0x1ad   :  { %4317 = vmatpush.bf16.msrb.mxu1 %v5864_v52  ;;  %v4066_v52 = vpop.f32.mrf.mxu1  ;;  %v6261_v48 = vld [vmem:[%s11471_s1 + $0xbf8] sm:$0xf0]  ;;  %v7453_v25 = vld [vmem:[%s11471_s1 + $0xb24] sm:$0xf] }
 0x1ae   :  { %4330 = vmatpush.bf16.msrb.mxu2 %v5928_v54  ;;  %v10566_v54 = vadd.f32 %v4090_v61, %v4078_v62  ;;  %v5952_v62 = vor.u32 %v7401_v42, %v5949_v44  ;;  %v7445_v52 = vld [vmem:[%s11471_s1 + $0xae4] sm:$0xf] }
 0x1af   :  { %4343 = vmatpush.bf16.msrb.mxu3 %v5992_v35  ;;  %v5765_v35 = vld [vmem:[%s11471_s1 + $0x818] sm:$0xf0] }
 0x1b0   :  { %4305 = vmatpush.bf16.msrb.mxu0 %v5792_v38  ;;  %v5768_v38 = vor.u32 %v7355_v19, %v5765_v35  ;;  %v4079_v3 = vpop.f32.mrf.mxu2  ;;  %v7461_v19 = vld [vmem:[%s11471_s1 + $0xb64] sm:$0xf]  ;;  %v6189_v35 = vld [vmem:[%s11471_s1 + $0xb68] sm:$0xf0] }
 0x1b1   :  { %4318 = vmatpush.bf16.msrb.mxu1 %v5856_v60  ;;  %v5757_v60 = vld [vmem:[%s11471_s1 + $0x808] sm:$0xf0]  ;;  %v6192_v58 = vor.u32 %v7461_v19, %v6189_v35 }
 0x1b2   :  { %4331 = vmatpush.bf16.msrb.mxu2 %v5920_v63  ;;  %v5832_v63 = vor.u32 %v7371_v20, %v5829_v56  ;;  %v5760_v21 = vor.u32 %v7353_v59, %v5757_v60  ;;  %v7477_v20 = vld [vmem:[%s11471_s1 + $0xbe4] sm:$0xf]  ;;  %v6117_v60 = vld [vmem:[%s11471_s1 + $0xad8] sm:$0xf0]  ;;  %v6109_v3 = vld [vmem:[%s11471_s1 + $0xac8] sm:$0xf0] }
 0x1b3   :  { %4344 = vmatpush.bf16.msrb.mxu3 %v5984_v33  ;;  %v7385_v33 = vld [vmem:[%s11471_s1 + $0x904] sm:$0xf] }
 0x1b4   :  { %4306 = vmatpush.bf16.msrb.mxu0 %v5784_v27  ;;  %v6069_v27 = vld [vmem:[%s11471_s1 + $0xa78] sm:$0xf0]  ;;  %v5888_v55 = vor.u32 %v7385_v33, %v5885_v41  ;;  %v7425_v33 = vld [vmem:[%s11471_s1 + $0xa44] sm:$0xf] }
 0x1b5   :  { %4319 = vmatpush.bf16.msrb.mxu1 %v5848_v15  ;;  %v7447_v15 = vld [vmem:[%s11471_s1 + $0xaf4] sm:$0xf]  ;;  %v6072_v61 = vor.u32 %v7431_v8, %v6069_v27  ;;  %v7441_v41 = vld [vmem:[%s11471_s1 + $0xac4] sm:$0xf]  ;;  %v6173_v27 = vld [vmem:[%s11471_s1 + $0xb48] sm:$0xf0] }
 0x1b6   :  { %4332 = vmatpush.bf16.msrb.mxu2 %v5912_v17  ;;  %v4092_v17 = vpop.f32.mrf.mxu3  ;;  %v6136_v50 = vor.u32 %v7447_v15, %v6133_v32  ;;  %v7457_v8 = vld [vmem:[%s11471_s1 + $0xb44] sm:$0xf] }
 0x1b7   :  { %4345 = vmatpush.bf16.msrb.mxu3 %v5976_v26  ;;  %v6197_v26 = vld [vmem:[%s11471_s1 + $0xb78] sm:$0xf0]  ;;  %v7473_v15 = vld [vmem:[%s11471_s1 + $0xbc4] sm:$0xf]  ;;  %v6237_v17 = vld [vmem:[%s11471_s1 + $0xbc8] sm:$0xf0] }
 0x1b8   :  { %4307 = vmatpush.bf16.msrb.mxu0 %v5776_v18  ;;  %v6200_v23 = vor.u32 %v7463_v39, %v6197_v26  ;;  %v6061_v18 = vld [vmem:[%s11471_s1 + $0xa68] sm:$0xf0]  ;;  %v6112_v39 = vor.u32 %v7441_v41, %v6109_v3  ;;  %v6176_v26 = vor.u32 %v7457_v8, %v6173_v27  ;;  %v7435_v41 = vld [vmem:[%s11471_s1 + $0xa94] sm:$0xf]  ;;  %v6149_v8 = vld [vmem:[%s11471_s1 + $0xb18] sm:$0xf0] }
 0x1b9   :  { %4320 = vmatpush.bf16.msrb.mxu1 %v5840_v28  ;;  %v6264_v28 = vor.u32 %v7479_v47, %v6261_v48  ;;  %v6064_v56 = vor.u32 %v7429_v51, %v6061_v18  ;;  %v7439_v47 = vld [vmem:[%s11471_s1 + $0xab4] sm:$0xf]  ;;  %v6165_v51 = vld [vmem:[%s11471_s1 + $0xb38] sm:$0xf0] }
 0x1ba   :  { %4333 = vmatpush.bf16.msrb.mxu2 %v5904_v31  ;;  %v6125_v31 = vld [vmem:[%s11471_s1 + $0xae8] sm:$0xf0]  ;;  %v7471_v18 = vld [vmem:[%s11471_s1 + $0xbb4] sm:$0xf] }
 0x1bb   :  { %4346 = vmatpush.bf16.msrb.mxu3 %v5968_v22  ;;  %v6253_v22 = vld [vmem:[%s11471_s1 + $0xbe8] sm:$0xf0]  ;;  %v6128_v57 = vor.u32 %v7445_v52, %v6125_v31  ;;  %v6229_v52 = vld [vmem:[%s11471_s1 + $0xbb8] sm:$0xf0]  ;;  %v7451_v3 = vld [vmem:[%s11471_s1 + $0xb14] sm:$0xf] }
 0x1bc   :  { %4308 = vmatpush.bf16.msrb.mxu0 %v5768_v38  ;;  %v7443_v38 = vld [vmem:[%s11471_s1 + $0xad4] sm:$0xf]  ;;  %v6256_v59 = vor.u32 %v7477_v20, %v6253_v22  ;;  %v7421_v20 = vld [vmem:[%s11471_s1 + $0xa24] sm:$0xf]  ;;  %v6029_v22 = vld [vmem:[%s11471_s1 + $0xa28] sm:$0xf0] }
 0x1bd   :  { %4321 = vmatpush.bf16.msrb.mxu1 %v5832_v63  ;;  %v7459_v63 = vld [vmem:[%s11471_s1 + $0xb54] sm:$0xf] }
 0x1be   :  { %4334 = vmatpush.bf16.msrb.mxu2 %v5896_v29  ;;  %v6181_v29 = vld [vmem:[%s11471_s1 + $0xb58] sm:$0xf0]  ;;  %v7467_v27 = vld [vmem:[%s11471_s1 + $0xb94] sm:$0xf] }
 0x1bf   :  { %4347 = vmatpush.bf16.msrb.mxu3 %v5960_v2  ;;  %v6045_v2 = vld [vmem:[%s11471_s1 + $0xa48] sm:$0xf0] }
 0x1c0   :  { %4309 = vmatpush.bf16.msrb.mxu0 %v5760_v21  ;;  %v6048_v21 = vor.u32 %v7425_v33, %v6045_v2  ;;  %v4103_v32 = vpop.f32.mrf.mxu0  ;;  %v6021_v2 = vld [vmem:[%s11471_s1 + $0xa18] sm:$0xf0] }
 0x1c1   :  { %4322 = vmatpush.bf16.msrb.mxu1 %v5824_v40  ;;  %v7423_v40 = vld [vmem:[%s11471_s1 + $0xa34] sm:$0xf] }
 0x1c2   :  { %4335 = vmatpush.bf16.msrb.mxu2 %v5888_v55  ;;  %v6037_v55 = vld [vmem:[%s11471_s1 + $0xa38] sm:$0xf0] }
 0x1c3   :  { %4348 = vmatpush.bf16.msrb.mxu3 %v5952_v62  ;;  %4310 = vmatmul.bf16.vlgmr.msrb.gmra.mxu0 %v8792_v37  ;;  %v7475_v37 = vld [vmem:[%s11471_s1 + $0xbd4] sm:$0xf]  ;;  %v4116_v62 = vpop.f32.mrf.mxu1  ;;  %v6040_v31 = vor.u32 %v7423_v40, %v6037_v55  ;;  %v7433_v40 = vld [vmem:[%s11471_s1 + $0xa84] sm:$0xf]  ;;  %v6077_v55 = vld [vmem:[%s11471_s1 + $0xa88] sm:$0xf0] }
 0x1c4   :  { %4354 = vmatpush.bf16.msra.mxu0 %v6072_v61  ;;  %4323 = vmatmul.bf16.vlgmr.msrb.gmra.mxu1 %v8805_v46  ;;  %v6184_v46 = vor.u32 %v7459_v63, %v6181_v29  ;;  %v6248_v44 = vor.u32 %v7475_v37, %v6245_v30  ;;  %v6240_v61 = vor.u32 %v7473_v15, %v6237_v17  ;;  %v7469_v63 = vld [vmem:[%s11471_s1 + $0xba4] sm:$0xf]  ;;  %v6221_v29 = vld [vmem:[%s11471_s1 + $0xba8] sm:$0xf0]  ;;  %v6213_v15 = vld [vmem:[%s11471_s1 + $0xb98] sm:$0xf0] }
 0x1c5   :  { %4367 = vmatpush.bf16.msra.mxu1 %v6136_v50  ;;  %4336 = vmatmul.bf16.vlgmr.msrb.gmra.mxu2 %v8803_v45  ;;  %v6120_v45 = vor.u32 %v7443_v38, %v6117_v60  ;;  %v6101_v50 = vld [vmem:[%s11471_s1 + $0xab8] sm:$0xf0]  ;;  %v6157_v38 = vld [vmem:[%s11471_s1 + $0xb28] sm:$0xf0]  ;;  %v6032_v37 = vor.u32 %v7421_v20, %v6029_v22  ;;  %v6080_v22 = vor.u32 %v7433_v40, %v6077_v55  ;;  %v7505_v55 = vld [vmem:[%s11471_s1 + $0xcc4] sm:$0xf] }
 0x1c6   :  { %4380 = vmatpush.bf16.msra.mxu2 %v6200_v23  ;;  %4349 = vmatmul.bf16.vlgmr.msrb.gmra.mxu3 %v8813_v49  ;;  %v7690_v49 = vld [vmem:[%s11473_s2] sm:$0x3]  ;;  %v7455_v23 = vld [vmem:[%s11471_s1 + $0xb34] sm:$0xf]  ;;  %v6104_v19 = vor.u32 %v7439_v47, %v6101_v50  ;;  %v7449_v47 = vld [vmem:[%s11471_s1 + $0xb04] sm:$0xf] }
 0x1c7   :  { %4393 = vmatpush.bf16.msra.mxu3 %v6264_v28  ;;  %v617_v42 = vperm.slane %v7690_v49, 1  ;;  %v6168_v35 = vor.u32 %v7455_v23, %v6165_v51  ;;  %v7465_v50 = vld [vmem:[%s11471_s1 + $0xb84] sm:$0xf]  ;;  %v6205_v23 = vld [vmem:[%s11471_s1 + $0xb88] sm:$0xf0] }
 0x1c8   :  { %4355 = vmatpush.bf16.msra.mxu0 %v6064_v56  ;;  %v7437_v56 = vld [vmem:[%s11471_s1 + $0xaa4] sm:$0xf]  ;;  %v6453_v20 = vld [vmem:[%s11471_s1 + $0xd78] sm:$0xf0] }
 0x1c9   :  { %4368 = vmatpush.bf16.msra.mxu1 %v6128_v57  ;;  %v4104_v48 = vadd.f32 %v4103_v32, %v617_v42  ;;  %v4129_v57 = vpop.f32.mrf.mxu2  ;;  %v4142_v60 = vpop.f32.mrf.mxu3  ;;  %v6096_v33 = vor.u32 %v7437_v56, %v6093_v9  ;;  %v6224_v42 = vor.u32 %v7469_v63, %v6221_v29  ;;  %v6013_v32 = vld [vmem:[%s11471_s1 + $0xa08] sm:$0xf0]  ;;  %v6208_v9 = vor.u32 %v7465_v50, %v6205_v23  ;;  %v7509_v29 = vld [vmem:[%s11471_s1 + $0xce4] sm:$0xf] }
 0x1ca   :  { %4381 = vmatpush.bf16.msra.mxu2 %v6192_v58  ;;  %v6232_v58 = vor.u32 %v7471_v18, %v6229_v52  ;;  %v7495_v18 = vld [vmem:[%s11471_s1 + $0xc74] sm:$0xf]  ;;  %v6325_v52 = vld [vmem:[%s11471_s1 + $0xc78] sm:$0xf0]  ;;  %v6317_v63 = vld [vmem:[%s11471_s1 + $0xc68] sm:$0xf0] }
 0x1cb   :  { %4394 = vmatpush.bf16.msra.mxu3 %v6256_v59  ;;  %v4117_v28 = vadd.f32 %v4116_v62, %v4104_v48  ;;  %v4118_v49 = vpop.f32.mrf.mxu1  ;;  %v6216_v62 = vor.u32 %v7467_v27, %v6213_v15  ;;  %v6373_v15 = vld [vmem:[%s11471_s1 + $0xcd8] sm:$0xf0]  ;;  %v6493_v50 = vld [vmem:[%s11471_s1 + $0xdc8] sm:$0xf0] }
 0x1cc   :  { %4356 = vmatpush.bf16.msra.mxu0 %v6056_v1  ;;  %v4105_v1 = vpop.f32.mrf.mxu0 }
 0x1cd   :  { %4369 = vmatpush.bf16.msra.mxu1 %v6120_v45  ;;  %v4130_v59 = vadd.f32 %v4129_v57, %v4117_v28  ;;  %v6160_v45 = vor.u32 %v7453_v25, %v6157_v38  ;;  %v7511_v28 = vld [vmem:[%s11471_s1 + $0xcf4] sm:$0xf]  ;;  %v6328_v25 = vor.u32 %v7495_v18, %v6325_v52  ;;  %v6381_v1 = vld [vmem:[%s11471_s1 + $0xce8] sm:$0xf0] }
 0x1ce   :  { %4382 = vmatpush.bf16.msra.mxu2 %v6184_v46  ;;  %v7419_v46 = vld [vmem:[%s11471_s1 + $0xa14] sm:$0xf]  ;;  %v6384_v49 = vor.u32 %v7509_v29, %v6381_v1  ;;  %v6285_v29 = vld [vmem:[%s11471_s1 + $0xc28] sm:$0xf0] }
 0x1cf   :  { %4395 = vmatpush.bf16.msra.mxu3 %v6248_v44  ;;  %v10767_v30 = vadd.f32 %v4142_v60, %v4130_v59  ;;  %v6085_v44 = vld [vmem:[%s11471_s1 + $0xa98] sm:$0xf0]  ;;  %v6024_v17 = vor.u32 %v7419_v46, %v6021_v2  ;;  %v7543_v57 = vld [vmem:[%s11471_s1 + $0xdf4] sm:$0xf]  ;;  %v7493_v60 = vld [vmem:[%s11471_s1 + $0xc64] sm:$0xf] }
 0x1d0   :  { %4357 = vmatpush.bf16.msra.mxu0 %v6048_v21  ;;  %v7417_v21 = vld [vmem:[%s11471_s1 + $0xa04] sm:$0xf]  ;;  %v6509_v2 = vld [vmem:[%s11471_s1 + $0xde8] sm:$0xf0] }
 0x1d1   :  { %4370 = vmatpush.bf16.msra.mxu1 %v6112_v39  ;;  %v6088_v39 = vor.u32 %v7435_v41, %v6085_v44  ;;  %v4131_v48 = vpop.f32.mrf.mxu2  ;;  %v4144_v51 = vpop.f32.mrf.mxu3  ;;  %v7541_v46 = vld [vmem:[%s11471_s1 + $0xde4] sm:$0xf]  ;;  %v6320_v41 = vor.u32 %v7493_v60, %v6317_v63  ;;  %v7491_v44 = vld [vmem:[%s11471_s1 + $0xc54] sm:$0xf] }
 0x1d2   :  { %4383 = vmatpush.bf16.msra.mxu2 %v6176_v26  ;;  %v6152_v26 = vor.u32 %v7451_v3, %v6149_v8  ;;  %v6309_v3 = vld [vmem:[%s11471_s1 + $0xc58] sm:$0xf0]  ;;  %v7507_v8 = vld [vmem:[%s11471_s1 + $0xcd4] sm:$0xf]  ;;  %v6512_v27 = vor.u32 %v7541_v46, %v6509_v2  ;;  %v7521_v48 = vld [vmem:[%s11471_s1 + $0xd44] sm:$0xf] }
 0x1d3   :  { %4396 = vmatpush.bf16.msra.mxu3 %v6240_v61  ;;  %v6141_v61 = vld [vmem:[%s11471_s1 + $0xb08] sm:$0xf0]  ;;  %v7485_v63 = vld [vmem:[%s11471_s1 + $0xc24] sm:$0xf] }
 0x1d4   :  { %4358 = vmatpush.bf16.msra.mxu0 %v6040_v31  ;;  %v6016_v31 = vor.u32 %v7417_v21, %v6013_v32  ;;  %v6144_v56 = vor.u32 %v7449_v47, %v6141_v61  ;;  %v6437_v21 = vld [vmem:[%s11471_s1 + $0xd58] sm:$0xf0]  ;;  %v6365_v47 = vld [vmem:[%s11471_s1 + $0xcc8] sm:$0xf0]  ;;  %v7537_v61 = vld [vmem:[%s11471_s1 + $0xdc4] sm:$0xf] }
 0x1d5   :  { %4371 = vmatpush.bf16.msra.mxu1 %v6104_v19  ;;  %v6389_v19 = vld [vmem:[%s11471_s1 + $0xcf8] sm:$0xf0]  ;;  %v6368_v18 = vor.u32 %v7505_v55, %v6365_v47  ;;  %v7517_v46 = vld [vmem:[%s11471_s1 + $0xd24] sm:$0xf]  ;;  %v6413_v2 = vld [vmem:[%s11471_s1 + $0xd28] sm:$0xf0] }
 0x1d6   :  { %4384 = vmatpush.bf16.msra.mxu2 %v6168_v35  ;;  %v7527_v35 = vld [vmem:[%s11471_s1 + $0xd74] sm:$0xf]  ;;  %v6392_v38 = vor.u32 %v7511_v28, %v6389_v19  ;;  %v6501_v32 = vld [vmem:[%s11471_s1 + $0xdd8] sm:$0xf0] }
 0x1d7   :  { %4397 = vmatpush.bf16.msra.mxu3 %v6232_v58  ;;  %v6517_v58 = vld [vmem:[%s11471_s1 + $0xdf8] sm:$0xf0]  ;;  %v6456_v59 = vor.u32 %v7527_v35, %v6453_v20  ;;  %v7487_v28 = vld [vmem:[%s11471_s1 + $0xc34] sm:$0xf] }
 0x1d8   :  { %4359 = vmatpush.bf16.msra.mxu0 %v6032_v37  ;;  %v6520_v37 = vor.u32 %v7543_v57, %v6517_v58  ;;  %v7503_v19 = vld [vmem:[%s11471_s1 + $0xcb4] sm:$0xf]  ;;  %v6421_v58 = vld [vmem:[%s11471_s1 + $0xd38] sm:$0xf0] }
 0x1d9   :  { %4372 = vmatpush.bf16.msra.mxu1 %v6096_v33  ;;  %v7525_v33 = vld [vmem:[%s11471_s1 + $0xd64] sm:$0xf]  ;;  %v7519_v57 = vld [vmem:[%s11471_s1 + $0xd34] sm:$0xf] }
 0x1da   :  { %4385 = vmatpush.bf16.msra.mxu2 %v6160_v45  ;;  %v6445_v45 = vld [vmem:[%s11471_s1 + $0xd68] sm:$0xf0]  ;;  %v6424_v60 = vor.u32 %v7519_v57, %v6421_v58  ;;  %v7531_v55 = vld [vmem:[%s11471_s1 + $0xd94] sm:$0xf] }
 0x1db   :  { %4398 = vmatpush.bf16.msra.mxu3 %v6224_v42  ;;  %v6448_v42 = vor.u32 %v7525_v33, %v6445_v45  ;;  %v6349_v45 = vld [vmem:[%s11471_s1 + $0xca8] sm:$0xf0]  ;;  %v7575_v57 = vld [vmem:[%s11471_s1 + $0xef4] sm:$0xf] }
 0x1dc   :  { %4360 = vmatpush.bf16.msra.mxu0 %v6024_v17  ;;  %v7523_v17 = vld [vmem:[%s11471_s1 + $0xd54] sm:$0xf] }
 0x1dd   :  { %4373 = vmatpush.bf16.msra.mxu1 %v6088_v39  ;;  %v6312_v39 = vor.u32 %v7491_v44, %v6309_v3  ;;  %v6440_v40 = vor.u32 %v7523_v17, %v6437_v21  ;;  %v6477_v44 = vld [vmem:[%s11471_s1 + $0xda8] sm:$0xf0]  ;;  %v6288_v3 = vor.u32 %v7485_v63, %v6285_v29  ;;  %v6416_v17 = vor.u32 %v7517_v46, %v6413_v2  ;;  %v7483_v21 = vld [vmem:[%s11471_s1 + $0xc14] sm:$0xf]  ;;  %v6773_v63 = vld [vmem:[%s11471_s1 + $0xff8] sm:$0xf0] }
 0x1de   :  { %4386 = vmatpush.bf16.msra.mxu2 %v6152_v26  ;;  %v6376_v26 = vor.u32 %v7507_v8, %v6373_v15  ;;  %v6573_v46 = vld [vmem:[%s11471_s1 + $0xe68] sm:$0xf0]  ;;  %v7573_v2 = vld [vmem:[%s11471_s1 + $0xee4] sm:$0xf] }
 0x1df   :  { %4399 = vmatpush.bf16.msra.mxu3 %v6216_v62  ;;  %v6429_v62 = vld [vmem:[%s11471_s1 + $0xd48] sm:$0xf0] }
 0x1e0   :  { %4361 = vmatpush.bf16.msra.mxu0 %v6016_v31  ;;  %v4155_v51 = vpop.f32.mrf.mxu0  ;;  %v6432_v52 = vor.u32 %v7521_v48, %v6429_v62  ;;  %v6293_v31 = vld [vmem:[%s11471_s1 + $0xc38] sm:$0xf0]  ;;  %v7481_v48 = vld [vmem:[%s11471_s1 + $0xc04] sm:$0xf]  ;;  %v6269_v62 = vld [vmem:[%s11471_s1 + $0xc08] sm:$0xf0] }
 0x1e1   :  { %4374 = vmatpush.bf16.msra.mxu1 %v6080_v22  ;;  %v4156_v35 = vadd.f32 %v4155_v51, %v10767_v30  ;;  %v4168_v20 = vpop.f32.mrf.mxu1  ;;  %v6496_v22 = vor.u32 %v7537_v61, %v6493_v50  ;;  %v6485_v30 = vld [vmem:[%s11471_s1 + $0xdb8] sm:$0xf0]  ;;  %v6333_v51 = vld [vmem:[%s11471_s1 + $0xc88] sm:$0xf0]  ;;  %v6272_v58 = vor.u32 %v7481_v48, %v6269_v62  ;;  %v7569_v62 = vld [vmem:[%s11471_s1 + $0xec4] sm:$0xf] }
 0x1e2   :  { %4387 = vmatpush.bf16.msra.mxu2 %v6144_v56  ;;  %v6357_v56 = vld [vmem:[%s11471_s1 + $0xcb8] sm:$0xf0] }
 0x1e3   :  { %4400 = vmatpush.bf16.msra.mxu3 %v6208_v9  ;;  %4362 = vmatmul.bf16.vlgmr.msra.gmra.mxu0 %v9007_v7  ;;  %v7539_v7 = vld [vmem:[%s11471_s1 + $0xdd4] sm:$0xf] }
 0x1e4   :  { %4406 = vmatpush.bf16.msrb.mxu0 %v6328_v25  ;;  %4375 = vmatmul.bf16.vlgmr.msra.gmra.mxu1 %v9020_v12  ;;  %v6301_v12 = vld [vmem:[%s11471_s1 + $0xc48] sm:$0xf0]  ;;  %v7535_v9 = vld [vmem:[%s11471_s1 + $0xdb4] sm:$0xf]  ;;  %v4169_v25 = vadd.f32 %v4168_v20, %v4156_v35 }
 0x1e5   :  { %4419 = vmatpush.bf16.msrb.mxu1 %v6392_v38  ;;  %4388 = vmatmul.bf16.vlgmr.msra.gmra.mxu2 %v9018_v11  ;;  %v7489_v11 = vld [vmem:[%s11471_s1 + $0xc44] sm:$0xf]  ;;  %v6296_v38 = vor.u32 %v7487_v28, %v6293_v31  ;;  %v6488_v33 = vor.u32 %v7535_v9, %v6485_v30  ;;  %v6397_v31 = vld [vmem:[%s11471_s1 + $0xd08] sm:$0xf0]  ;;  %v6645_v9 = vld [vmem:[%s11471_s1 + $0xef8] sm:$0xf0] }
 0x1e6   :  { %4432 = vmatpush.bf16.msrb.mxu2 %v6456_v59  ;;  %4401 = vmatmul.bf16.vlgmr.msra.gmra.mxu3 %v9028_v16  ;;  %v6504_v16 = vor.u32 %v7539_v7, %v6501_v32  ;;  %v6304_v23 = vor.u32 %v7489_v11, %v6301_v12  ;;  %v6360_v59 = vor.u32 %v7503_v19, %v6357_v56  ;;  %v6277_v7 = vld [vmem:[%s11471_s1 + $0xc18] sm:$0xf0]  ;;  %v7499_v32 = vld [vmem:[%s11471_s1 + $0xc94] sm:$0xf]  ;;  %v7529_v19 = vld [vmem:[%s11471_s1 + $0xd84] sm:$0xf] }
 0x1e7   :  { %4445 = vmatpush.bf16.msrb.mxu3 %v6520_v37  ;;  %v7501_v37 = vld [vmem:[%s11471_s1 + $0xca4] sm:$0xf]  ;;  %v7515_v11 = vld [vmem:[%s11471_s1 + $0xd14] sm:$0xf]  ;;  %v6405_v12 = vld [vmem:[%s11471_s1 + $0xd18] sm:$0xf0]  ;;  %v6280_v47 = vor.u32 %v7483_v21, %v6277_v7 }
 0x1e8   :  { %4407 = vmatpush.bf16.msrb.mxu0 %v6320_v41  ;;  %v4181_v1 = vpop.f32.mrf.mxu2  ;;  %v6352_v15 = vor.u32 %v7501_v37, %v6349_v45  ;;  %v6408_v50 = vor.u32 %v7515_v11, %v6405_v12  ;;  %v6461_v35 = vld [vmem:[%s11471_s1 + $0xd88] sm:$0xf0]  ;;  %v6581_v56 = vld [vmem:[%s11471_s1 + $0xe78] sm:$0xf0]  ;;  %v7591_v30 = vld [vmem:[%s11471_s1 + $0xf74] sm:$0xf] }
 0x1e9   :  { %4420 = vmatpush.bf16.msrb.mxu1 %v6384_v49  ;;  %v4182_v41 = vadd.f32 %v4181_v1, %v4169_v25  ;;  %v4194_v49 = vpop.f32.mrf.mxu3  ;;  %v6709_v25 = vld [vmem:[%s11471_s1 + $0xf78] sm:$0xf0]  ;;  %v6464_v29 = vor.u32 %v7529_v19, %v6461_v35  ;;  %v6648_v1 = vor.u32 %v7575_v57, %v6645_v9  ;;  %v7557_v45 = vld [vmem:[%s11471_s1 + $0xe64] sm:$0xf]  ;;  %v7555_v7 = vld [vmem:[%s11471_s1 + $0xe54] sm:$0xf] }
 0x1ea   :  { %4433 = vmatpush.bf16.msrb.mxu2 %v6448_v42  ;;  %v7533_v42 = vld [vmem:[%s11471_s1 + $0xda4] sm:$0xf]  ;;  %v7587_v11 = vld [vmem:[%s11471_s1 + $0xf54] sm:$0xf]  ;;  %v6693_v12 = vld [vmem:[%s11471_s1 + $0xf58] sm:$0xf0] }
 0x1eb   :  { %4446 = vmatpush.bf16.msrb.mxu3 %v6512_v27  ;;  %v10966_v8 = vadd.f32 %v4194_v49, %v4182_v41  ;;  %v4157_v27 = vpop.f32.mrf.mxu0  ;;  %v6637_v49 = vld [vmem:[%s11471_s1 + $0xee8] sm:$0xf0]  ;;  %v6696_v48 = vor.u32 %v7587_v11, %v6693_v12  ;;  %v7567_v57 = vld [vmem:[%s11471_s1 + $0xeb4] sm:$0xf]  ;;  %v6613_v9 = vld [vmem:[%s11471_s1 + $0xeb8] sm:$0xf0] }
 0x1ec   :  { %4408 = vmatpush.bf16.msrb.mxu0 %v6312_v39  ;;  %v4170_v39 = vpop.f32.mrf.mxu1  ;;  %v6765_v27 = vld [vmem:[%s11471_s1 + $0xfe8] sm:$0xf0]  ;;  %v7563_v11 = vld [vmem:[%s11471_s1 + $0xe94] sm:$0xf] }
 0x1ed   :  { %4421 = vmatpush.bf16.msrb.mxu1 %v6376_v26  ;;  %v6480_v26 = vor.u32 %v7533_v42, %v6477_v44  ;;  %v7589_v42 = vld [vmem:[%s11471_s1 + $0xf64] sm:$0xf]  ;;  %v6701_v44 = vld [vmem:[%s11471_s1 + $0xf68] sm:$0xf0]  ;;  %v7571_v39 = vld [vmem:[%s11471_s1 + $0xed4] sm:$0xf] }
 0x1ee   :  { %4434 = vmatpush.bf16.msrb.mxu2 %v6440_v40  ;;  %v6341_v40 = vld [vmem:[%s11471_s1 + $0xc98] sm:$0xf0]  ;;  %v6704_v21 = vor.u32 %v7589_v42, %v6701_v44 }
 0x1ef   :  { %4447 = vmatpush.bf16.msrb.mxu3 %v6504_v16  ;;  %v6469_v16 = vld [vmem:[%s11471_s1 + $0xd98] sm:$0xf0]  ;;  %v6344_v61 = vor.u32 %v7499_v32, %v6341_v40 }
 0x1f0   :  { %4409 = vmatpush.bf16.msrb.mxu0 %v6304_v23  ;;  %v7497_v23 = vld [vmem:[%s11471_s1 + $0xc84] sm:$0xf]  ;;  %v6472_v28 = vor.u32 %v7531_v55, %v6469_v16  ;;  %v6565_v32 = vld [vmem:[%s11471_s1 + $0xe58] sm:$0xf0] }
 0x1f1   :  { %4422 = vmatpush.bf16.msrb.mxu1 %v6368_v18  ;;  %v7513_v18 = vld [vmem:[%s11471_s1 + $0xd04] sm:$0xf]  ;;  %v4196_v20 = vpop.f32.mrf.mxu3  ;;  %v6629_v40 = vld [vmem:[%s11471_s1 + $0xed8] sm:$0xf0]  ;;  %v6568_v16 = vor.u32 %v7555_v7, %v6565_v32 }
 0x1f2   :  { %4435 = vmatpush.bf16.msrb.mxu2 %v6432_v52  ;;  %v4183_v52 = vpop.f32.mrf.mxu2  ;;  %v6757_v55 = vld [vmem:[%s11471_s1 + $0xfd8] sm:$0xf0] }
 0x1f3   :  { %4448 = vmatpush.bf16.msrb.mxu3 %v6496_v22  ;;  %v7559_v22 = vld [vmem:[%s11471_s1 + $0xe74] sm:$0xf]  ;;  %v6749_v52 = vld [vmem:[%s11471_s1 + $0xfc8] sm:$0xf0] }
 0x1f4   :  { %4410 = vmatpush.bf16.msrb.mxu0 %v6296_v38  ;;  %v6336_v38 = vor.u32 %v7497_v23, %v6333_v51  ;;  %v6584_v37 = vor.u32 %v7559_v22, %v6581_v56  ;;  %v6685_v23 = vld [vmem:[%s11471_s1 + $0xf48] sm:$0xf0]  ;;  %v7551_v22 = vld [vmem:[%s11471_s1 + $0xe34] sm:$0xf]  ;;  %v6549_v56 = vld [vmem:[%s11471_s1 + $0xe38] sm:$0xf0] }
 0x1f5   :  { %4423 = vmatpush.bf16.msrb.mxu1 %v6360_v59  ;;  %v6400_v59 = vor.u32 %v7513_v18, %v6397_v31  ;;  %v7601_v18 = vld [vmem:[%s11471_s1 + $0xfc4] sm:$0xf] }
 0x1f6   :  { %4436 = vmatpush.bf16.msrb.mxu2 %v6424_v60  ;;  %v7607_v60 = vld [vmem:[%s11471_s1 + $0xff4] sm:$0xf] }
 0x1f7   :  { %4449 = vmatpush.bf16.msrb.mxu3 %v6488_v33  ;;  %v6712_v33 = vor.u32 %v7591_v30, %v6709_v25  ;;  %v6776_v41 = vor.u32 %v7607_v60, %v6773_v63  ;;  %v7583_v30 = vld [vmem:[%s11471_s1 + $0xf34] sm:$0xf]  ;;  %v6677_v25 = vld [vmem:[%s11471_s1 + $0xf38] sm:$0xf0]  ;;  %v6552_v60 = vor.u32 %v7551_v22, %v6549_v56  ;;  %v6616_v63 = vor.u32 %v7567_v57, %v6613_v9 }
 0x1f8   :  { %4411 = vmatpush.bf16.msrb.mxu0 %v6288_v3  ;;  %v7605_v3 = vld [vmem:[%s11471_s1 + $0xfe4] sm:$0xf]  ;;  %v7639_v22 = vld [vmem:[%s11471_s1 + $0x10f4] sm:$0xf]  ;;  %v6965_v9 = vld [vmem:[%s11471_s1 + $0x1178] sm:$0xf0] }
 0x1f9   :  { %4424 = vmatpush.bf16.msrb.mxu1 %v6352_v15  ;;  %v6576_v15 = vor.u32 %v7557_v45, %v6573_v46 }
 0x1fa   :  { %4437 = vmatpush.bf16.msrb.mxu2 %v6416_v17  ;;  %v6640_v17 = vor.u32 %v7573_v2, %v6637_v49  ;;  %v6605_v2 = vld [vmem:[%s11471_s1 + $0xea8] sm:$0xf0] }
 0x1fb   :  { %4450 = vmatpush.bf16.msrb.mxu3 %v6480_v26  ;;  %v6768_v26 = vor.u32 %v7605_v3, %v6765_v27  ;;  %v6669_v49 = vld [vmem:[%s11471_s1 + $0xf28] sm:$0xf0]  ;;  %v7597_v3 = vld [vmem:[%s11471_s1 + $0xfa4] sm:$0xf] }
 0x1fc   :  { %4412 = vmatpush.bf16.msrb.mxu0 %v6280_v47  ;;  %v6632_v47 = vor.u32 %v7571_v39, %v6629_v40  ;;  %v6733_v27 = vld [vmem:[%s11471_s1 + $0xfa8] sm:$0xf0]  ;;  %v6533_v40 = vld [vmem:[%s11471_s1 + $0xe18] sm:$0xf0] }
 0x1fd   :  { %4425 = vmatpush.bf16.msrb.mxu1 %v6344_v61  ;;  %v6621_v61 = vld [vmem:[%s11471_s1 + $0xec8] sm:$0xf0]  ;;  %v6736_v12 = vor.u32 %v7597_v3, %v6733_v27 }
 0x1fe   :  { %4438 = vmatpush.bf16.msrb.mxu2 %v6408_v50  ;;  %v7585_v50 = vld [vmem:[%s11471_s1 + $0xf44] sm:$0xf]  ;;  %v6624_v35 = vor.u32 %v7569_v62, %v6621_v61  ;;  %v6525_v62 = vld [vmem:[%s11471_s1 + $0xe08] sm:$0xf0] }
 0x1ff   :  { %4451 = vmatpush.bf16.msrb.mxu3 %v6472_v28  ;;  %v6688_v20 = vor.u32 %v7585_v50, %v6685_v23  ;;  %v7561_v50 = vld [vmem:[%s11471_s1 + $0xe84] sm:$0xf]  ;;  %v6589_v23 = vld [vmem:[%s11471_s1 + $0xe88] sm:$0xf0] }
 0x200   :  { %4413 = vmatpush.bf16.msrb.mxu0 %v6272_v58  ;;  %v4207_v51 = vpop.f32.mrf.mxu0 }
 0x201   :  { %4426 = vmatpush.bf16.msrb.mxu1 %v6336_v38  ;;  %v4208_v28 = vadd.f32 %v4207_v51, %v10966_v8  ;;  %v4220_v19 = vpop.f32.mrf.mxu1  ;;  %v6752_v8 = vor.u32 %v7601_v18, %v6749_v52  ;;  %v7599_v38 = vld [vmem:[%s11471_s1 + $0xfb4] sm:$0xf]  ;;  %v7577_v51 = vld [vmem:[%s11471_s1 + $0xf04] sm:$0xf]  ;;  %v6653_v52 = vld [vmem:[%s11471_s1 + $0xf08] sm:$0xf0] }
 0x202   :  { %4439 = vmatpush.bf16.msrb.mxu2 %v6400_v59  ;;  %v6741_v59 = vld [vmem:[%s11471_s1 + $0xfb8] sm:$0xf0] }
 0x203   :  { %4452 = vmatpush.bf16.msrb.mxu3 %v6464_v29  ;;  %4414 = vmatmul.bf16.vlgmr.msrb.gmra.mxu0 %v9220_v5  ;;  %v7603_v5 = vld [vmem:[%s11471_s1 + $0xfd4] sm:$0xf]  ;;  %v4221_v58 = vadd.f32 %v4220_v19, %v4208_v28  ;;  %v6680_v29 = vor.u32 %v7583_v30, %v6677_v25  ;;  %v6744_v45 = vor.u32 %v7599_v38, %v6741_v59  ;;  %v7593_v28 = vld [vmem:[%s11471_s1 + $0xf84] sm:$0xf]  ;;  %v7029_v59 = vld [vmem:[%s11471_s1 + $0x11f8] sm:$0xf0] }
 0x204   :  { %4458 = vmatpush.bf16.msra.mxu0 %v6584_v37  ;;  %4427 = vmatmul.bf16.vlgmr.msrb.gmra.mxu1 %v9233_v13  ;;  %v6557_v13 = vld [vmem:[%s11471_s1 + $0xe48] sm:$0xf0]  ;;  %v7549_v37 = vld [vmem:[%s11471_s1 + $0xe24] sm:$0xf]  ;;  %v6592_v30 = vor.u32 %v7561_v50, %v6589_v23  ;;  %v6656_v25 = vor.u32 %v7577_v51, %v6653_v52  ;;  %v7671_v38 = vld [vmem:[%s11471_s1 + $0x11f4] sm:$0xf] }
 0x205   :  { %4471 = vmatpush.bf16.msra.mxu1 %v6648_v1  ;;  %4440 = vmatmul.bf16.vlgmr.msrb.gmra.mxu2 %v9231_v10  ;;  %v7553_v10 = vld [vmem:[%s11471_s1 + $0xe44] sm:$0xf]  ;;  %v6541_v1 = vld [vmem:[%s11471_s1 + $0xe28] sm:$0xf0] }
 0x206   :  { %4484 = vmatpush.bf16.msra.mxu2 %v6712_v33  ;;  %4453 = vmatmul.bf16.vlgmr.msrb.gmra.mxu3 %v9241_v53  ;;  %v6760_v53 = vor.u32 %v7603_v5, %v6757_v55  ;;  %v6560_v31 = vor.u32 %v7553_v10, %v6557_v13  ;;  %v7565_v33 = vld [vmem:[%s11471_s1 + $0xea4] sm:$0xf]  ;;  %v6597_v5 = vld [vmem:[%s11471_s1 + $0xe98] sm:$0xf0]  ;;  %v7579_v55 = vld [vmem:[%s11471_s1 + $0xf14] sm:$0xf] }
 0x207   :  { %4497 = vmatpush.bf16.msra.mxu3 %v6776_v41  ;;  %v7581_v41 = vld [vmem:[%s11471_s1 + $0xf24] sm:$0xf]  ;;  %v6608_v32 = vor.u32 %v7565_v33, %v6605_v2  ;;  %v6829_v33 = vld [vmem:[%s11471_s1 + $0x1068] sm:$0xf0] }
 0x208   :  { %4459 = vmatpush.bf16.msra.mxu0 %v6576_v15  ;;  %v4233_v46 = vpop.f32.mrf.mxu2  ;;  %v4209_v15 = vpop.f32.mrf.mxu0  ;;  %v6672_v39 = vor.u32 %v7581_v41, %v6669_v49  ;;  %v7545_v13 = vld [vmem:[%s11471_s1 + $0xe04] sm:$0xf]  ;;  %v6893_v2 = vld [vmem:[%s11471_s1 + $0x10e8] sm:$0xf0] }
 0x209   :  { %4472 = vmatpush.bf16.msra.mxu1 %v6640_v17  ;;  %v4234_v42 = vadd.f32 %v4233_v46, %v4221_v58  ;;  %v4246_v44 = vpop.f32.mrf.mxu3  ;;  %v6544_v17 = vor.u32 %v7549_v37, %v6541_v1  ;;  %v6528_v57 = vor.u32 %v7545_v13, %v6525_v62  ;;  %v7655_v58 = vld [vmem:[%s11471_s1 + $0x1174] sm:$0xf]  ;;  %v7621_v1 = vld [vmem:[%s11471_s1 + $0x1064] sm:$0xf]  ;;  %v7032_v46 = vor.u32 %v7671_v38, %v7029_v59  ;;  %v6957_v49 = vld [vmem:[%s11471_s1 + $0x1168] sm:$0xf0] }
 0x20a   :  { %4485 = vmatpush.bf16.msra.mxu2 %v6704_v21  ;;  %v4222_v21 = vpop.f32.mrf.mxu1  ;;  %v6968_v37 = vor.u32 %v7655_v58, %v6965_v9  ;;  %v7653_v41 = vld [vmem:[%s11471_s1 + $0x1164] sm:$0xf]  ;;  %v6832_v3 = vor.u32 %v7621_v1, %v6829_v33  ;;  %v6941_v13 = vld [vmem:[%s11471_s1 + $0x1148] sm:$0xf0] }
 0x20b   :  { %4498 = vmatpush.bf16.msra.mxu3 %v6768_v26  ;;  %v11165_v7 = vadd.f32 %v4246_v44, %v4234_v42  ;;  %v7547_v26 = vld [vmem:[%s11471_s1 + $0xe14] sm:$0xf]  ;;  %v7669_v42 = vld [vmem:[%s11471_s1 + $0x11e4] sm:$0xf]  ;;  %v7021_v44 = vld [vmem:[%s11471_s1 + $0x11e8] sm:$0xf0]  ;;  %v6960_v15 = vor.u32 %v7653_v41, %v6957_v49 }
 0x20c   :  { %4460 = vmatpush.bf16.msra.mxu0 %v6568_v16  ;;  %v6661_v16 = vld [vmem:[%s11471_s1 + $0xf18] sm:$0xf0]  ;;  %v6536_v10 = vor.u32 %v7547_v26, %v6533_v40  ;;  %v7651_v40 = vld [vmem:[%s11471_s1 + $0x1154] sm:$0xf]  ;;  %v6797_v38 = vld [vmem:[%s11471_s1 + $0x1028] sm:$0xf0] }
 0x20d   :  { %4473 = vmatpush.bf16.msra.mxu1 %v6632_v47  ;;  %v7595_v47 = vld [vmem:[%s11471_s1 + $0xf94] sm:$0xf]  ;;  %v6664_v61 = vor.u32 %v7579_v55, %v6661_v16  ;;  %v6821_v21 = vld [vmem:[%s11471_s1 + $0x1058] sm:$0xf0]  ;;  %v7629_v59 = vld [vmem:[%s11471_s1 + $0x10a4] sm:$0xf] }
 0x20e   :  { %4486 = vmatpush.bf16.msra.mxu2 %v6696_v48  ;;  %v6725_v48 = vld [vmem:[%s11471_s1 + $0xf98] sm:$0xf0]  ;;  %v6925_v1 = vld [vmem:[%s11471_s1 + $0x1128] sm:$0xf0] }
 0x20f   :  { %4499 = vmatpush.bf16.msra.mxu3 %v6760_v53  ;;  %v6600_v53 = vor.u32 %v7563_v11, %v6597_v5  ;;  %v6728_v18 = vor.u32 %v7595_v47, %v6725_v48  ;;  %v6885_v26 = vld [vmem:[%s11471_s1 + $0x10d8] sm:$0xf0]  ;;  %v7633_v47 = vld [vmem:[%s11471_s1 + $0x10c4] sm:$0xf]  ;;  %v6877_v48 = vld [vmem:[%s11471_s1 + $0x10c8] sm:$0xf0] }
 0x210   :  { %4461 = vmatpush.bf16.msra.mxu0 %v6560_v31  ;;  %v6717_v31 = vld [vmem:[%s11471_s1 + $0xf88] sm:$0xf0]  ;;  %v4235_v19 = vpop.f32.mrf.mxu2  ;;  %v6949_v11 = vld [vmem:[%s11471_s1 + $0x1158] sm:$0xf0] }
 0x211   :  { %4474 = vmatpush.bf16.msra.mxu1 %v6624_v35  ;;  %v7623_v35 = vld [vmem:[%s11471_s1 + $0x1074] sm:$0xf]  ;;  %v4248_v56 = vpop.f32.mrf.mxu3  ;;  %v6952_v16 = vor.u32 %v7651_v40, %v6949_v11  ;;  %v6917_v40 = vld [vmem:[%s11471_s1 + $0x1118] sm:$0xf0] }
 0x212   :  { %4487 = vmatpush.bf16.msra.mxu2 %v6688_v20  ;;  %v6837_v20 = vld [vmem:[%s11471_s1 + $0x1078] sm:$0xf0]  ;;  %v7631_v19 = vld [vmem:[%s11471_s1 + $0x10b4] sm:$0xf] }
 0x213   :  { %4500 = vmatpush.bf16.msra.mxu3 %v6752_v8  ;;  %v6901_v8 = vld [vmem:[%s11471_s1 + $0x10f8] sm:$0xf0]  ;;  %v7659_v11 = vld [vmem:[%s11471_s1 + $0x1194] sm:$0xf] }
 0x214   :  { %4462 = vmatpush.bf16.msra.mxu0 %v6552_v60  ;;  %v6720_v60 = vor.u32 %v7593_v28, %v6717_v31  ;;  %v7615_v28 = vld [vmem:[%s11471_s1 + $0x1034] sm:$0xf]  ;;  %v6805_v31 = vld [vmem:[%s11471_s1 + $0x1038] sm:$0xf0] }
 0x215   :  { %4475 = vmatpush.bf16.msra.mxu1 %v6616_v63  ;;  %v6840_v63 = vor.u32 %v7623_v35, %v6837_v20  ;;  %v6869_v20 = vld [vmem:[%s11471_s1 + $0x10b8] sm:$0xf0]  ;;  %v6808_v58 = vor.u32 %v7615_v28, %v6805_v31  ;;  %v7679_v28 = vld [vmem:[%s11474_s3 + $0x30] sm:$0xff]  ;;  %v7678_v31 = vld [vmem:[%s11474_s3 + $0x28] sm:$0xff] }
 0x216   :  { %4488 = vmatpush.bf16.msra.mxu2 %v6680_v29  ;;  %v6904_v29 = vor.u32 %v7639_v22, %v6901_v8  ;;  %v7647_v22 = vld [vmem:[%s11471_s1 + $0x1134] sm:$0xf]  ;;  %v6933_v56 = vld [vmem:[%s11471_s1 + $0x1138] sm:$0xf0]  ;;  %v6872_v9 = vor.u32 %v7631_v19, %v6869_v20 }
 0x217   :  { %4501 = vmatpush.bf16.msra.mxu3 %v6744_v45  ;;  %v7637_v45 = vld [vmem:[%s11471_s1 + $0x10e4] sm:$0xf]  ;;  %v6997_v8 = vld [vmem:[%s11471_s1 + $0x11b8] sm:$0xf0] }
 0x218   :  { %4463 = vmatpush.bf16.msra.mxu0 %v6544_v17  ;;  %v6896_v27 = vor.u32 %v7637_v45, %v6893_v2  ;;  %v7619_v17 = vld [vmem:[%s11471_s1 + $0x1054] sm:$0xf]  ;;  %v6989_v2 = vld [vmem:[%s11471_s1 + $0x11a8] sm:$0xf0] }
 0x219   :  { %4476 = vmatpush.bf16.msra.mxu1 %v6608_v32  ;;  %v7635_v32 = vld [vmem:[%s11471_s1 + $0x10d4] sm:$0xf]  ;;  %v6824_v5 = vor.u32 %v7619_v17, %v6821_v21  ;;  %v6789_v17 = vld [vmem:[%s11471_s1 + $0x1018] sm:$0xf0] }
 0x21a   :  { %4489 = vmatpush.bf16.msra.mxu2 %v6672_v39  ;;  %v7024_v39 = vor.u32 %v7669_v42, %v7021_v44  ;;  %v6888_v55 = vor.u32 %v7635_v32, %v6885_v26  ;;  %v7627_v21 = vld [vmem:[%s11471_s1 + $0x1094] sm:$0xf] }
 0x21b   :  { %4502 = vmatpush.bf16.msra.mxu3 %v6736_v12  ;;  %v7013_v12 = vld [vmem:[%s11471_s1 + $0x11d8] sm:$0xf0]  ;;  %v7643_v26 = vld [vmem:[%s11471_s1 + $0x1114] sm:$0xf] }
 0x21c   :  { %4464 = vmatpush.bf16.msra.mxu0 %v6536_v10  ;;  %v7649_v10 = vld [vmem:[%s11471_s1 + $0x1144] sm:$0xf] }
 0x21d   :  { %4477 = vmatpush.bf16.msra.mxu1 %v6600_v53  ;;  %v7665_v53 = vld [vmem:[%s11471_s1 + $0x11c4] sm:$0xf]  ;;  %v6944_v52 = vor.u32 %v7649_v10, %v6941_v13  ;;  %v6909_v10 = vld [vmem:[%s11471_s1 + $0x1108] sm:$0xf0] }
 0x21e   :  { %4490 = vmatpush.bf16.msra.mxu2 %v6664_v61  ;;  %v7005_v61 = vld [vmem:[%s11471_s1 + $0x11c8] sm:$0xf0] }
 0x21f   :  { %4503 = vmatpush.bf16.msra.mxu3 %v6728_v18  ;;  %v6880_v18 = vor.u32 %v7633_v47, %v6877_v48  ;;  %v7641_v48 = vld [vmem:[%s11471_s1 + $0x1104] sm:$0xf] }
 0x220   :  { %4465 = vmatpush.bf16.msra.mxu0 %v6528_v57  ;;  %v4259_v62 = vpop.f32.mrf.mxu0  ;;  %v7663_v57 = vld [vmem:[%s11471_s1 + $0x11b4] sm:$0xf] }
 0x221   :  { %4478 = vmatpush.bf16.msra.mxu1 %v6592_v30  ;;  %v4260_v50 = vadd.f32 %v4259_v62, %v11165_v7  ;;  %v4272_v51 = vpop.f32.mrf.mxu1  ;;  %v7008_v7 = vor.u32 %v7665_v53, %v7005_v61  ;;  %v6936_v30 = vor.u32 %v7647_v22, %v6933_v56  ;;  %v7657_v62 = vld [vmem:[%s11471_s1 + $0x1184] sm:$0xf]  ;;  %v6973_v53 = vld [vmem:[%s11471_s1 + $0x1188] sm:$0xf0] }
 0x222   :  { %4491 = vmatpush.bf16.msra.mxu2 %v6656_v25  ;;  %v7613_v25 = vld [vmem:[%s11471_s1 + $0x1024] sm:$0xf] }
 0x223   :  { %4504 = vmatpush.bf16.msra.mxu3 %v6720_v60  ;;  %4466 = vmatmul.bf16.vlgmr.msra.gmra.mxu0 %v9433_v24  ;;  %v7667_v24 = vld [vmem:[%s11471_s1 + $0x11d4] sm:$0xf]  ;;  %v4273_v35 = vadd.f32 %v4272_v51, %v4260_v50  ;;  %v7000_v60 = vor.u32 %v7663_v57, %v6997_v8  ;;  %v6800_v49 = vor.u32 %v7613_v25, %v6797_v38  ;;  %v7673_v38 = vld [vmem:[%s11474_s3] sm:$0xff] }
 0x224   :  { %4510 = vmatpush.bf16.msrb.mxu0 %v6840_v63  ;;  %4479 = vmatmul.bf16.vlgmr.msra.gmra.mxu1 %v9446_v36  ;;  %v6813_v36 = vld [vmem:[%s11471_s1 + $0x1048] sm:$0xf0]  ;;  %v6912_v51 = vor.u32 %v7641_v48, %v6909_v10  ;;  %v7675_v57 = vld [vmem:[%s11474_s3 + $0x10] sm:$0xff] }
 0x225   :  { %4523 = vmatpush.bf16.msrb.mxu1 %v6904_v29  ;;  %4492 = vmatmul.bf16.vlgmr.msra.gmra.mxu2 %v9444_v34  ;;  %v7617_v34 = vld [vmem:[%s11471_s1 + $0x1044] sm:$0xf]  ;;  %v6861_v29 = vld [vmem:[%s11471_s1 + $0x10a8] sm:$0xf0] }
 0x226   :  { %4536 = vmatpush.bf16.msrb.mxu2 %v6968_v37  ;;  %4505 = vmatmul.bf16.vlgmr.msra.gmra.mxu3 %v9454_v43  ;;  %v7016_v43 = vor.u32 %v7667_v24, %v7013_v12  ;;  %v6816_v23 = vor.u32 %v7617_v34, %v6813_v36  ;;  %v7645_v37 = vld [vmem:[%s11471_s1 + $0x1124] sm:$0xf]  ;;  %v6981_v24 = vld [vmem:[%s11471_s1 + $0x1198] sm:$0xf0]  ;;  %v6781_v34 = vld [vmem:[%s11471_s1 + $0x1008] sm:$0xf0] }
 0x227   :  { %4549 = vmatpush.bf16.msrb.mxu3 %v7032_v46  ;;  %v7661_v46 = vld [vmem:[%s11471_s1 + $0x11a4] sm:$0xf]  ;;  %v6984_v47 = vor.u32 %v7659_v11, %v6981_v24 }
 0x228   :  { %4511 = vmatpush.bf16.msrb.mxu0 %v6832_v3  ;;  %v4285_v63 = vpop.f32.mrf.mxu2  ;;  %v4261_v41 = vpop.f32.mrf.mxu0  ;;  %v6864_v3 = vor.u32 %v7629_v59, %v6861_v29  ;;  %v6992_v32 = vor.u32 %v7661_v46, %v6989_v2  ;;  %v7625_v36 = vld [vmem:[%s11471_s1 + $0x1084] sm:$0xf]  ;;  %v4562_v59 = vmax.f32 %v10566_v54, 0.0 }
 0x229   :  { %4524 = vmatpush.bf16.msrb.mxu1 %v6896_v27  ;;  %v4286_v33 = vadd.f32 %v4285_v63, %v4273_v35  ;;  %v4298_v45 = vpop.f32.mrf.mxu3  ;;  %v4274_v42 = vpop.f32.mrf.mxu1  ;;  %v6928_v27 = vor.u32 %v7645_v37, %v6925_v1  ;;  %v7677_v35 = vld [vmem:[%s11474_s3 + $0x20] sm:$0xff] }
 0x22a   :  { %4537 = vmatpush.bf16.msrb.mxu2 %v6960_v15  ;;  %v7611_v15 = vld [vmem:[%s11471_s1 + $0x1014] sm:$0xf]  ;;  %v7685_v24 = vld [vmem:[%s11474_s3 + $0x60] sm:$0xff] }
 0x22b   :  { %4550 = vmatpush.bf16.msrb.mxu3 %v7024_v39  ;;  %v4299_v44 = vadd.f32 %v4298_v45, %v4286_v33  ;;  %v6853_v39 = vld [vmem:[%s11471_s1 + $0x1098] sm:$0xf0]  ;;  %v6792_v12 = vor.u32 %v7611_v15, %v6789_v17 }
 0x22c   :  { %4512 = vmatpush.bf16.msrb.mxu0 %v6824_v5  ;;  %v6856_v5 = vor.u32 %v7627_v21, %v6853_v39  ;;  %v7688_v21 = vld [vmem:[%s11474_s3 + $0x78] sm:$0xff]  ;;  %v7687_v39 = vld [vmem:[%s11474_s3 + $0x70] sm:$0xff] }
 0x22d   :  { %4525 = vmatpush.bf16.msrb.mxu1 %v6888_v55  ;;  %v6920_v55 = vor.u32 %v7643_v26, %v6917_v40  ;;  %v7686_v26 = vld [vmem:[%s11474_s3 + $0x68] sm:$0xff] }
 0x22e   :  { %4538 = vmatpush.bf16.msrb.mxu2 %v6952_v16  ;;  %v7609_v16 = vld [vmem:[%s11471_s1 + $0x1004] sm:$0xf] }
 0x22f   :  { %4551 = vmatpush.bf16.msrb.mxu3 %v7016_v43  ;;  %v6845_v43 = vld [vmem:[%s11471_s1 + $0x1088] sm:$0xf0]  ;;  %v6784_v50 = vor.u32 %v7609_v16, %v6781_v34 }
 0x230   :  { %4513 = vmatpush.bf16.msrb.mxu0 %v6816_v23  ;;  %v4287_v13 = vpop.f32.mrf.mxu2  ;;  %v6848_v23 = vor.u32 %v7625_v36, %v6845_v43  ;;  %v7682_v34 = vld [vmem:[%s11474_s3 + $0x48] sm:$0xff] }
 0x231   :  { %4526 = vmatpush.bf16.msrb.mxu1 %v6880_v18  ;;  %v4300_v61 = vpop.f32.mrf.mxu3  ;;  %v6976_v18 = vor.u32 %v7657_v62, %v6973_v53  ;;  %v7681_v13 = vld [vmem:[%s11474_s3 + $0x40] sm:$0xff] }
 0x232   :  { %4539 = vmatpush.bf16.msrb.mxu2 %v6944_v52  ;;  %v7680_v52 = vld [vmem:[%s11474_s3 + $0x38] sm:$0xff] }
 0x233   :  { %4552 = vmatpush.bf16.msrb.mxu3 %v7008_v7 }
 0x234   :  { %4514 = vmatpush.bf16.msrb.mxu0 %v6808_v58 }
 0x235   :  { %4527 = vmatpush.bf16.msrb.mxu1 %v6872_v9  ;;  %v7674_v9 = vld [vmem:[%s11474_s3 + $0x8] sm:$0xff] }
 0x236   :  { %4540 = vmatpush.bf16.msrb.mxu2 %v6936_v30 }
 0x237   :  { %4553 = vmatpush.bf16.msrb.mxu3 %v7000_v60  ;;  %v4564_v60 = vpack.c.bf16 %v4562_v59, %v4562_v59 }
 0x238   :  { %4515 = vmatpush.bf16.msrb.mxu0 %v6800_v49 }
 0x239   :  { %4528 = vmatpush.bf16.msrb.mxu1 %v6864_v3 }
 0x23a   :  { %4541 = vmatpush.bf16.msrb.mxu2 %v6928_v27 }
 0x23b   :  { %4554 = vmatpush.bf16.msrb.mxu3 %v6992_v32 }
 0x23c   :  { %4516 = vmatpush.bf16.msrb.mxu0 %v6792_v12  ;;  %v7684_v12 = vld [vmem:[%s11474_s3 + $0x58] sm:$0xff] }
 0x23d   :  { %4529 = vmatpush.bf16.msrb.mxu1 %v6856_v5 }
 0x23e   :  { %4542 = vmatpush.bf16.msrb.mxu2 %v6920_v55  ;;  %v7683_v55 = vld [vmem:[%s11474_s3 + $0x50] sm:$0xff] }
 0x23f   :  { %4555 = vmatpush.bf16.msrb.mxu3 %v6984_v47 }
 0x240   :  { %4517 = vmatpush.bf16.msrb.mxu0 %v6784_v50  ;;  %v4311_v19 = vpop.f32.mrf.mxu0 }
 0x241   :  { %4530 = vmatpush.bf16.msrb.mxu1 %v6848_v23  ;;  %v4312_v7 = vadd.f32 %v4311_v19, %v4299_v44  ;;  %v4324_v20 = vpop.f32.mrf.mxu1 }
 0x242   :  { %4543 = vmatpush.bf16.msrb.mxu2 %v6912_v51 }
 0x243   :  { %4556 = vmatpush.bf16.msrb.mxu3 %v6976_v18  ;;  %4518 = vmatmul.bf16.vlgmr.msrb.gmra.mxu0 %v9646_v0  ;;  %v4325_v0 = vadd.f32 %v4324_v20, %v4312_v7 }
 0x244   :  { %4698 = vmatpush.bf16.msra.mxu0 %v7680_v52  ;;  %4531 = vmatmul.bf16.vlgmr.msrb.gmra.mxu1 %v9659_v6 }
 0x245   :  { %4544 = vmatmul.bf16.vlgmr.msrb.gmra.mxu2 %v9657_v4  ;;  %v7676_v4 = vld [vmem:[%s11474_s3 + $0x18] sm:$0xff]  ;;  %4711 = vmatpush.bf16.msra.mxu1 %v7688_v21 }
 0x246   :  { %4557 = vmatmul.bf16.vlgmr.msrb.gmra.mxu3 %v9667_v14 }
 0x248   :  { %4699 = vmatpush.bf16.msra.mxu0 %v7679_v28  ;;  %v4337_v6 = vpop.f32.mrf.mxu2  ;;  %v4313_v56 = vpop.f32.mrf.mxu0 }
 0x249   :  { %v4338_v14 = vadd.f32 %v4337_v6, %v4325_v0  ;;  %v4350_v22 = vpop.f32.mrf.mxu3  ;;  %v4326_v8 = vpop.f32.mrf.mxu1  ;;  %4712 = vmatpush.bf16.msra.mxu1 %v7687_v39 }
 0x24b   :  { %v4351_v58 = vadd.f32 %v4350_v22, %v4338_v14 }
 0x24c   :  { %4700 = vmatpush.bf16.msra.mxu0 %v7678_v31 }
 0x24d   :  { %4713 = vmatpush.bf16.msra.mxu1 %v7686_v26 }
 0x250   :  { %4701 = vmatpush.bf16.msra.mxu0 %v7677_v35  ;;  %v4339_v30 = vpop.f32.mrf.mxu2 }
 0x251   :  { %v4352_v25 = vpop.f32.mrf.mxu3  ;;  %4714 = vmatpush.bf16.msra.mxu1 %v7685_v24 }
 0x252   :  { %v7689_v25 = vld [vmem:[%s11475_s4] ss:$0 sm:$0xff] }
 0x254   :  { %4702 = vmatpush.bf16.msra.mxu0 %v7676_v4 }
 0x255   :  { %4715 = vmatpush.bf16.msra.mxu1 %v7684_v12 }
 0x258   :  { %4703 = vmatpush.bf16.msra.mxu0 %v7675_v57 }
 0x259   :  { %4716 = vmatpush.bf16.msra.mxu1 %v7683_v55 }
 0x25c   :  { %4704 = vmatpush.bf16.msra.mxu0 %v7674_v9 }
 0x25d   :  { %4717 = vmatpush.bf16.msra.mxu1 %v7682_v34 }
 0x260   :  { %4705 = vmatpush.bf16.msra.mxu0 %v7673_v38  ;;  %v4363_v63 = vpop.f32.mrf.mxu0 }
 0x261   :  { %v4364_v29 = vadd.f32 %v4363_v63, %v4351_v58  ;;  %v4376_v37 = vpop.f32.mrf.mxu1  ;;  %4718 = vmatpush.bf16.msra.mxu1 %v7681_v13 }
 0x263   :  { %4706 = vmatmul.bf16.vlgmr.msra.gmra.mxu0 %v4564_v60  ;;  %v4377_v1 = vadd.f32 %v4376_v37, %v4364_v29 }
 0x268   :  { %v4389_v33 = vpop.f32.mrf.mxu2  ;;  %v4365_v2 = vpop.f32.mrf.mxu0 }
 0x269   :  { %v4390_v45 = vadd.f32 %v4389_v33, %v4377_v1  ;;  %v4402_v46 = vpop.f32.mrf.mxu3  ;;  %v4378_v41 = vpop.f32.mrf.mxu1 }
 0x26b   :  { %v4403_v49 = vadd.f32 %v4402_v46, %v4390_v45 }
 0x270   :  { %v4391_v42 = vpop.f32.mrf.mxu2 }
 0x271   :  { %v4404_v44 = vpop.f32.mrf.mxu3 }
 0x280   :  { %v4415_v3 = vpop.f32.mrf.mxu0 }
 0x281   :  { %v4428_v27 = vpop.f32.mrf.mxu1  ;;  %v4416_v36 = vadd.f32 %v4415_v3, %v4403_v49 }
 0x283   :  { %v4429_v62 = vadd.f32 %v4428_v27, %v4416_v36 }
 0x288   :  { %v4441_v15 = vpop.f32.mrf.mxu2  ;;  %v4417_v54 = vpop.f32.mrf.mxu0 }
 0x289   :  { %v4454_v17 = vpop.f32.mrf.mxu3  ;;  %v4430_v32 = vpop.f32.mrf.mxu1  ;;  %v4442_v53 = vadd.f32 %v4441_v15, %v4429_v62 }
 0x28b   :  { %v4455_v23 = vadd.f32 %v4454_v17, %v4442_v53 }
 0x290   :  { %v4443_v40 = vpop.f32.mrf.mxu2 }
 0x291   :  { %v4456_v11 = vpop.f32.mrf.mxu3 }
 0x2a0   :  { %v4467_v5 = vpop.f32.mrf.mxu0 }
 0x2a1   :  { %v4480_v16 = vpop.f32.mrf.mxu1  ;;  %v4468_v51 = vadd.f32 %v4467_v5, %v4455_v23 }
 0x2a3   :  { %v4481_v18 = vadd.f32 %v4480_v16, %v4468_v51 }
 0x2a8   :  { %v4493_v47 = vpop.f32.mrf.mxu2  ;;  %v4469_v48 = vpop.f32.mrf.mxu0 }
 0x2a9   :  { %v4506_v43 = vpop.f32.mrf.mxu3  ;;  %v4482_v10 = vpop.f32.mrf.mxu1  ;;  %v4494_v52 = vadd.f32 %v4493_v47, %v4481_v18 }
 0x2ab   :  { %v4507_v28 = vadd.f32 %v4506_v43, %v4494_v52 }
 0x2b0   :  { %v4495_v61 = vpop.f32.mrf.mxu2 }
 0x2b1   :  { %v4508_v50 = vpop.f32.mrf.mxu3 }
 0x2c0   :  { %v4519_v31 = vpop.f32.mrf.mxu0 }
 0x2c1   :  { %v4532_v19 = vpop.f32.mrf.mxu1  ;;  %v4520_v7 = vadd.f32 %v4519_v31, %v4507_v28 }
 0x2c3   :  { %v4533_v35 = vadd.f32 %v4532_v19, %v4520_v7 }
 0x2c8   :  { %v4545_v20 = vpop.f32.mrf.mxu2  ;;  %v4521_v6 = vpop.f32.mrf.mxu0 }
 0x2c9   :  { %v4546_v0 = vadd.f32 %v4545_v20, %v4533_v35  ;;  %v4558_v4 = vpop.f32.mrf.mxu3  ;;  %v4534_v14 = vpop.f32.mrf.mxu1 }
 0x2cb   :  { %v4559_v22 = vadd.f32 %v4558_v4, %v4546_v0 }
 0x2cd   :  { %v4563_v56 = vmax.f32 %v4559_v22, 0.0 }
 0x2cf   :  { %v4565_v57 = vpack.c.bf16 %v4563_v56, %v4563_v56 }
 0x2d0   :  { %v4547_v8 = vpop.f32.mrf.mxu2 }
 0x2d1   :  { %v4560_v58 = vpop.f32.mrf.mxu3  ;;  %4719 = vmatmul.bf16.vlgmr.msra.gmra.mxu1 %v4565_v57 }
 0x2e0   :  { %v4707_v9 = vpop.f32.mrf.mxu0 }
 0x2e1   :  { %v4708_v38 = vadd.f32 %v7689_v25, %v4707_v9 }
 0x2e8   :  { %v4709_v30 = vpop.f32.mrf.mxu0 }
 0x34e   :  { %v4720_v59 = vpop.f32.mrf.mxu1 }
 0x34f   :  { %v4721_v60 = vadd.f32 %v4720_v59, %v4708_v38 }
 0x351   :  { %4724 = vst [vmem:[%s11476_s5] sm:$0xff] %v4721_v60 }
 0x356   :  { %v4722_v63 = vpop.f32.mrf.mxu1 }

</bundles_post_ra>
